<compile_context>
chip_gen: v7x
topology: tpu7x:2x2x1
jax: 0.10.0
libtpu: 0.0.40
codegen_flags: <defaults>
</compile_context>

<pallas_src>
import functools

import jax
import jax.numpy as jnp
from jax import lax
from jax.experimental import pallas as pl
from jax.experimental.pallas import tpu as pltpu


def _round_up(x, m):
    return (x + m - 1) // m * m


def _conv_stats_kernel(x_ref, w_ref, b_ref, mask_ref, y_ref, *, cin, wp):
    # x_ref:    (Cin, P_in)    zero-padded, spatially-flattened input (1 image)
    # w_ref:    (Cout, 49*Cin) packed multi-scale weight, col = (kh*7+kw)*Cin + ci
    # b_ref:    (Cout, 1)      packed bias
    # mask_ref: (1, L)         1.0 on valid output lanes (q = h*Wp + w, h<H, w<W)
    # y_ref:    (Cout, L)      conv + bias in padded-stride layout; per-image BN
    #                          partial stats packed into lanes L-2 (sum), L-1 (sumsq)
    cout, l_out = y_ref.shape
    x = x_ref[...]
    w = w_ref[...]

    acc = jnp.zeros((cout, l_out), jnp.float32)
    t = 0
    for kh in range(7):                       # 49 static taps, traced once
        for kw in range(7):
            shift = kh * wp + kw
            w_t = w[:, t * cin:(t + 1) * cin]          # (Cout, Cin)
            x_t = x[:, shift:shift + l_out]            # (Cin, L) lane-shifted view
            acc = acc + jnp.dot(w_t, x_t,
                                preferred_element_type=jnp.float32,
                                precision=lax.Precision.HIGHEST)
            t += 1
    acc = acc + b_ref[...]

    # Per-image BN partial stats over valid output positions only.
    mask = mask_ref[...]                                        # (1, L)
    ssum = jnp.sum(acc * mask, axis=1, keepdims=True)           # (Cout, 1)
    ssq = jnp.sum(acc * acc * mask, axis=1, keepdims=True)      # (Cout, 1)

    # Pack stats into the two spare trailing lanes (never part of the valid
    # output region since Wp >= W + 2) -> one unmasked full-width store.
    lane = lax.broadcasted_iota(jnp.int32, (1, l_out), 1)
    packed = jnp.where(lane == l_out - 2, ssum,
                       jnp.where(lane == l_out - 1, ssq, acc))
    y_ref[...] = packed


def _bn_relu_kernel(y_ref, scale_ref, shift_ref, o_ref):
    # Pure folded-affine + ReLU: y*scale + shift, clamp at 0.  Lane-dense.
    o_ref[...] = jnp.maximum(y_ref[...] * scale_ref[...] + shift_ref[...], 0.0)


def multiscale_conv(x_nchw, w7, bias, gamma, beta, eps=1e-5):
    """x_nchw: (N, Cin, H, W) f32.  Returns (N, Cout, H, W) f32."""
    N, Cin, H, W = x_nchw.shape
    Cout = w7.shape[-1]
    Hp, Wp = H + 6, W + 6

    # Padded-stride output layout: q = h*Wp + w, lane-dense width L (>= H*Wp).
    L = _round_up(H * Wp, 128)
    s_max = 6 * Wp + 6                       # largest in-kernel lane shift
    P_in = _round_up(s_max + L, 128)         # every x[:, s:s+L] stays in bounds

    # --- wrapper layout plumbing only: pad + flatten (no im2col expansion) ---
    x = x_nchw.astype(jnp.float32)
    xpad = jnp.pad(x, ((0, 0), (0, 0), (3, 3), (3, 3)))           # (N, Cin, Hp, Wp)
    xflat = xpad.reshape(N, Cin, Hp * Wp)
    xflat = jnp.pad(xflat, ((0, 0), (0, 0), (0, P_in - Hp * Wp)))  # (N, Cin, P_in)

    # Packed weight (7,7,Cin,Cout) HWIO -> (Cout, 49*Cin); col order matches taps.
    wmat = jnp.transpose(w7.reshape(49 * Cin, Cout)).astype(jnp.float32)
    b_c = bias.reshape(Cout, 1).astype(jnp.float32)

    # Valid-lane mask for BN statistics (q = h*Wp + w with h < H, w < W).
    q = jnp.arange(L)
    mask = (((q < H * Wp) & ((q % Wp) < W)).astype(jnp.float32)).reshape(1, L)

    # ---- Pass 1: in-kernel patch construction + conv + bias + packed stats ----
    y = pl.pallas_call(
        functools.partial(_conv_stats_kernel, cin=Cin, wp=Wp),
        grid=(N,),
        out_shape=jax.ShapeDtypeStruct((N, Cout, L), jnp.float32),
        in_specs=[pl.BlockSpec((None, Cin, P_in), lambda n: (n, 0, 0)),
                  pl.BlockSpec((Cout, 49 * Cin), lambda n: (0, 0)),
                  pl.BlockSpec((Cout, 1), lambda n: (0, 0)),
                  pl.BlockSpec((1, L), lambda n: (0, 0))],
        out_specs=pl.BlockSpec((None, Cout, L), lambda n: (n, 0, 0)),
        compiler_params=pltpu.CompilerParams(
            dimension_semantics=("parallel",)),
    )(xflat, wmat, b_c, mask)

    # ---- BN fold hoisted out of the grid (O(N*Cout) wrapper jnp) ----
    ssum = jnp.sum(y[:, :, L - 2], axis=0)        # (Cout,)
    ssq = jnp.sum(y[:, :, L - 1], axis=0)         # (Cout,)
    count = float(N * H * W)
    mean = ssum / count
    var = jnp.maximum(ssq / count - mean * mean, 0.0)   # biased var (BN train mode)
    scale_v = gamma.astype(jnp.float32) * lax.rsqrt(var + eps)
    shift_v = beta.astype(jnp.float32) - mean * scale_v
    scale_c = scale_v.reshape(Cout, 1)
    shift_c = shift_v.reshape(Cout, 1)

    # ---- Pass 2: folded affine + ReLU, reusing y's HBM buffer ----
    out_p = pl.pallas_call(
        _bn_relu_kernel,
        grid=(N,),
        out_shape=jax.ShapeDtypeStruct((N, Cout, L), jnp.float32),
        in_specs=[pl.BlockSpec((None, Cout, L), lambda n: (n, 0, 0)),
                  pl.BlockSpec((Cout, 1), lambda n: (0, 0)),
                  pl.BlockSpec((Cout, 1), lambda n: (0, 0))],
        out_specs=pl.BlockSpec((None, Cout, L), lambda n: (n, 0, 0)),
        input_output_aliases={0: 0},
        compiler_params=pltpu.CompilerParams(
            dimension_semantics=("parallel",)),
    )(y, scale_c, shift_c)

    # Padded-stride layout -> NCHW: drop the padded columns (layout plumbing).
    out = out_p[:, :, :H * Wp].reshape(N, Cout, H, Wp)[:, :, :, :W]
    return out


def make_params(key, in_channels, out_channels):
    """Deterministic synthetic params mirroring the PyTorch module's shapes."""
    c4 = out_channels // 4
    keys = jax.random.split(key, 8)
    # Packed 7x7 weight in HWIO layout: (7, 7, Cin, Cout).
    w7 = jnp.zeros((7, 7, in_channels, out_channels), jnp.float32)
    biases = []
    for i, k in enumerate((1, 3, 5, 7)):
        fan_in = in_channels * k * k
        bound = 1.0 / (fan_in ** 0.5)
        wk = jax.random.uniform(keys[2 * i], (k, k, in_channels, c4),
                                minval=-bound, maxval=bound, dtype=jnp.float32)
        bk = jax.random.uniform(keys[2 * i + 1], (c4,),
                                minval=-bound, maxval=bound, dtype=jnp.float32)
        off = (7 - k) // 2
        w7 = w7.at[off:off + k, off:off + k, :, i * c4:(i + 1) * c4].set(wk)
        biases.append(bk)
    bias = jnp.concatenate(biases)
    gamma = jnp.ones((out_channels,), jnp.float32)   # BN affine weight default
    beta = jnp.zeros((out_channels,), jnp.float32)   # BN affine bias default
    return w7, bias, gamma, beta


def _reference(x_nchw, w7, bias, gamma, beta, eps=1e-5):
    """Pure-JAX reference (lax conv + BN(train) + ReLU) for verification."""
    x_nhwc = jnp.transpose(x_nchw, (0, 2, 3, 1))
    y = jax.lax.conv_general_dilated(
        x_nhwc, w7, window_strides=(1, 1), padding=((3, 3), (3, 3)),
        dimension_numbers=("NHWC", "HWIO", "NHWC"))
    y = y + bias
    mean = jnp.mean(y, axis=(0, 1, 2), keepdims=True)
    var = jnp.mean((y - mean) ** 2, axis=(0, 1, 2), keepdims=True)
    y = (y - mean) * jax.lax.rsqrt(var + eps) * gamma + beta
    y = jnp.maximum(y, 0.0)
    return jnp.transpose(y, (0, 3, 1, 2))


if __name__ == "__main__":
    key = jax.random.PRNGKey(0)
    kx, kp = jax.random.split(key)

    N, Cin, H, W = 2, 4, 16, 16
    Cout = 8                      # out_channels (each branch gets Cout // 4 = 2)

    x = jax.random.normal(kx, (N, Cin, H, W), dtype=jnp.float32)
    w7, bias, gamma, beta = make_params(kp, Cin, Cout)

    out = jax.block_until_ready(jax.jit(multiscale_conv)(x, w7, bias, gamma, beta))

    ref = jax.block_until_ready(_reference(x, w7, bias, gamma, beta))
    assert out.shape == (N, Cout, H, W)
    assert jnp.allclose(out, ref, rtol=1e-4, atol=1e-4), \
        f"max abs err {jnp.max(jnp.abs(out - ref))}"

    print("KERNEL_OK")
</pallas_src>

<mosaic_0001>
module attributes {stable_mosaic.version = 11 : i64} {
  func.func @_bn_relu_kernel(%arg0: i32, %arg1: memref<1x8x384xf32, #tpu.memory_space<vmem>>, %arg2: memref<8x1xf32, #tpu.memory_space<vmem>>, %arg3: memref<8x1xf32, #tpu.memory_space<vmem>>, %arg4: memref<1x8x384xf32, #tpu.memory_space<vmem>>) attributes {dimension_semantics = [#tpu.dimension_semantics<parallel>], iteration_bounds = array<i64: 2>, scalar_prefetch = 0 : i64, scratch_operands = 0 : i64, tpu.core_type = #tpu.core_type<tc>, window_params = [{transform_indices = @transform_0, window_bounds = array<i64: 1, 8, 384>}, {pipeline_mode = #tpu.pipeline_mode<synchronous>, transform_indices = @transform_1, window_bounds = array<i64: 8, 1>}, {pipeline_mode = #tpu.pipeline_mode<synchronous>, transform_indices = @transform_2, window_bounds = array<i64: 8, 1>}, {transform_indices = @transform_3, window_bounds = array<i64: 1, 8, 384>}]} {
    %c0 = arith.constant 0 : index
    %c0_0 = arith.constant 0 : index
    %c0_1 = arith.constant 0 : index
    %0 = vector.load %arg1[%c0, %c0_0, %c0_1] : memref<1x8x384xf32, #tpu.memory_space<vmem>>, vector<1x8x384xf32>
    %1 = vector.shape_cast %0 : vector<1x8x384xf32> to vector<8x384xf32>
    %c0_2 = arith.constant 0 : index
    %c0_3 = arith.constant 0 : index
    %2 = vector.load %arg2[%c0_2, %c0_3] : memref<8x1xf32, #tpu.memory_space<vmem>>, vector<8x1xf32>
    %3 = vector.broadcast %2 : vector<8x1xf32> to vector<8x384xf32>
    %4 = arith.mulf %1, %3 : vector<8x384xf32>
    %c0_4 = arith.constant 0 : index
    %c0_5 = arith.constant 0 : index
    %5 = vector.load %arg3[%c0_4, %c0_5] : memref<8x1xf32, #tpu.memory_space<vmem>>, vector<8x1xf32>
    %6 = vector.broadcast %5 : vector<8x1xf32> to vector<8x384xf32>
    %7 = arith.addf %4, %6 : vector<8x384xf32>
    %cst = arith.constant 0.000000e+00 : f32
    %8 = vector.broadcast %cst : f32 to vector<8x384xf32>
    %9 = arith.maximumf %7, %8 : vector<8x384xf32>
    %c0_6 = arith.constant 0 : index
    %c0_7 = arith.constant 0 : index
    %c0_8 = arith.constant 0 : index
    %10 = vector.load %arg4[%c0_6, %c0_7, %c0_8] : memref<1x8x384xf32, #tpu.memory_space<vmem>>, vector<1x8x384xf32>
    %11 = vector.shape_cast %10 : vector<1x8x384xf32> to vector<8x384xf32>
    %12 = vector.shape_cast %9 : vector<8x384xf32> to vector<1x8x384xf32>
    tpu.vector_store %arg4[%c0_6, %c0_7, %c0_8], %12 {strides = array<i32>} : memref<1x8x384xf32, #tpu.memory_space<vmem>>, vector<1x8x384xf32>,
    return
  }
  func.func @transform_0(%arg0: i32) -> (i32, i32, i32) {
    %c0_i32 = arith.constant 0 : i32
    %c0_i32_0 = arith.constant 0 : i32
    %c0_i32_1 = arith.constant 0 : i32
    return %arg0, %c0_i32, %c0_i32_0 : i32, i32, i32
  }
  func.func @transform_1(%arg0: i32) -> (i32, i32) {
    %c0_i32 = arith.constant 0 : i32
    %c0_i32_0 = arith.constant 0 : i32
    %c0_i32_1 = arith.constant 0 : i32
    return %c0_i32, %c0_i32_0 : i32, i32
  }
  func.func @transform_2(%arg0: i32) -> (i32, i32) {
    %c0_i32 = arith.constant 0 : i32
    %c0_i32_0 = arith.constant 0 : i32
    %c0_i32_1 = arith.constant 0 : i32
    return %c0_i32, %c0_i32_0 : i32, i32
  }
  func.func @transform_3(%arg0: i32) -> (i32, i32, i32) {
    %c0_i32 = arith.constant 0 : i32
    %c0_i32_0 = arith.constant 0 : i32
    %c0_i32_1 = arith.constant 0 : i32
    return %arg0, %c0_i32, %c0_i32_0 : i32, i32, i32
  }
}

module attributes {stable_mosaic.version = 11 : i64} {
  func.func @_conv_stats_kernel(%arg0: i32, %arg1: memref<1x4x640xf32, #tpu.memory_space<vmem>>, %arg2: memref<8x196xf32, #tpu.memory_space<vmem>>, %arg3: memref<8x1xf32, #tpu.memory_space<vmem>>, %arg4: memref<1x384xf32, #tpu.memory_space<vmem>>, %arg5: memref<1x8x384xf32, #tpu.memory_space<vmem>>) attributes {dimension_semantics = [#tpu.dimension_semantics<parallel>], iteration_bounds = array<i64: 2>, scalar_prefetch = 0 : i64, scratch_operands = 0 : i64, tpu.core_type = #tpu.core_type<tc>, window_params = [{transform_indices = @transform_0, window_bounds = array<i64: 1, 4, 640>}, {pipeline_mode = #tpu.pipeline_mode<synchronous>, transform_indices = @transform_1, window_bounds = array<i64: 8, 196>}, {pipeline_mode = #tpu.pipeline_mode<synchronous>, transform_indices = @transform_2, window_bounds = array<i64: 8, 1>}, {pipeline_mode = #tpu.pipeline_mode<synchronous>, transform_indices = @transform_3, window_bounds = array<i64: 1, 384>}, {transform_indices = @transform_4, window_bounds = array<i64: 1, 8, 384>}]} {
    %c0 = arith.constant 0 : index
    %c0_0 = arith.constant 0 : index
    %c0_1 = arith.constant 0 : index
    %0 = vector.load %arg1[%c0, %c0_0, %c0_1] : memref<1x4x640xf32, #tpu.memory_space<vmem>>, vector<1x4x640xf32>
    %1 = vector.shape_cast %0 : vector<1x4x640xf32> to vector<4x640xf32>
    %c0_2 = arith.constant 0 : index
    %c0_3 = arith.constant 0 : index
    %2 = vector.load %arg2[%c0_2, %c0_3] : memref<8x196xf32, #tpu.memory_space<vmem>>, vector<8x196xf32>
    %cst = arith.constant 0.000000e+00 : f32
    %3 = vector.broadcast %cst : f32 to vector<8x384xf32>
    %4 = vector.extract_strided_slice %2 {offsets = [0, 0], sizes = [8, 4], strides = [1, 1]} : vector<8x196xf32> to vector<8x4xf32>
    %5 = vector.extract_strided_slice %1 {offsets = [0, 0], sizes = [4, 384], strides = [1, 1]} : vector<4x640xf32> to vector<4x384xf32>
    %cst_4 = arith.constant dense<0.000000e+00> : vector<8x384xf32>
    %6 = tpu.matmul %4, %5, %cst_4 {dimension_numbers = #tpu.dot_dimension_numbers<[1], [0], [0], [1], [0, 0, 1, 1], [], []>, precision = #tpu.contract_precision<fp32>} : vector<8x4xf32>, vector<4x384xf32>, vector<8x384xf32> -> vector<8x384xf32>
    %7 = arith.addf %3, %6 : vector<8x384xf32>
    %8 = vector.extract_strided_slice %2 {offsets = [0, 4], sizes = [8, 4], strides = [1, 1]} : vector<8x196xf32> to vector<8x4xf32>
    %9 = vector.extract_strided_slice %1 {offsets = [0, 1], sizes = [4, 384], strides = [1, 1]} : vector<4x640xf32> to vector<4x384xf32>
    %cst_5 = arith.constant dense<0.000000e+00> : vector<8x384xf32>
    %10 = tpu.matmul %8, %9, %cst_5 {dimension_numbers = #tpu.dot_dimension_numbers<[1], [0], [0], [1], [0, 0, 1, 1], [], []>, precision = #tpu.contract_precision<fp32>} : vector<8x4xf32>, vector<4x384xf32>, vector<8x384xf32> -> vector<8x384xf32>
    %11 = arith.addf %7, %10 : vector<8x384xf32>
    %12 = vector.extract_strided_slice %2 {offsets = [0, 8], sizes = [8, 4], strides = [1, 1]} : vector<8x196xf32> to vector<8x4xf32>
    %13 = vector.extract_strided_slice %1 {offsets = [0, 2], sizes = [4, 384], strides = [1, 1]} : vector<4x640xf32> to vector<4x384xf32>
    %cst_6 = arith.constant dense<0.000000e+00> : vector<8x384xf32>
    %14 = tpu.matmul %12, %13, %cst_6 {dimension_numbers = #tpu.dot_dimension_numbers<[1], [0], [0], [1], [0, 0, 1, 1], [], []>, precision = #tpu.contract_precision<fp32>} : vector<8x4xf32>, vector<4x384xf32>, vector<8x384xf32> -> vector<8x384xf32>
    %15 = arith.addf %11, %14 : vector<8x384xf32>
    %16 = vector.extract_strided_slice %2 {offsets = [0, 12], sizes = [8, 4], strides = [1, 1]} : vector<8x196xf32> to vector<8x4xf32>
    %17 = vector.extract_strided_slice %1 {offsets = [0, 3], sizes = [4, 384], strides = [1, 1]} : vector<4x640xf32> to vector<4x384xf32>
    %cst_7 = arith.constant dense<0.000000e+00> : vector<8x384xf32>
    %18 = tpu.matmul %16, %17, %cst_7 {dimension_numbers = #tpu.dot_dimension_numbers<[1], [0], [0], [1], [0, 0, 1, 1], [], []>, precision = #tpu.contract_precision<fp32>} : vector<8x4xf32>, vector<4x384xf32>, vector<8x384xf32> -> vector<8x384xf32>
    %19 = arith.addf %15, %18 : vector<8x384xf32>
    %20 = vector.extract_strided_slice %2 {offsets = [0, 16], sizes = [8, 4], strides = [1, 1]} : vector<8x196xf32> to vector<8x4xf32>
    %21 = vector.extract_strided_slice %1 {offsets = [0, 4], sizes = [4, 384], strides = [1, 1]} : vector<4x640xf32> to vector<4x384xf32>
    %cst_8 = arith.constant dense<0.000000e+00> : vector<8x384xf32>
    %22 = tpu.matmul %20, %21, %cst_8 {dimension_numbers = #tpu.dot_dimension_numbers<[1], [0], [0], [1], [0, 0, 1, 1], [], []>, precision = #tpu.contract_precision<fp32>} : vector<8x4xf32>, vector<4x384xf32>, vector<8x384xf32> -> vector<8x384xf32>
    %23 = arith.addf %19, %22 : vector<8x384xf32>
    %24 = vector.extract_strided_slice %2 {offsets = [0, 20], sizes = [8, 4], strides = [1, 1]} : vector<8x196xf32> to vector<8x4xf32>
    %25 = vector.extract_strided_slice %1 {offsets = [0, 5], sizes = [4, 384], strides = [1, 1]} : vector<4x640xf32> to vector<4x384xf32>
    %cst_9 = arith.constant dense<0.000000e+00> : vector<8x384xf32>
    %26 = tpu.matmul %24, %25, %cst_9 {dimension_numbers = #tpu.dot_dimension_numbers<[1], [0], [0], [1], [0, 0, 1, 1], [], []>, precision = #tpu.contract_precision<fp32>} : vector<8x4xf32>, vector<4x384xf32>, vector<8x384xf32> -> vector<8x384xf32>
    %27 = arith.addf %23, %26 : vector<8x384xf32>
    %28 = vector.extract_strided_slice %2 {offsets = [0, 24], sizes = [8, 4], strides = [1, 1]} : vector<8x196xf32> to vector<8x4xf32>
    %29 = vector.extract_strided_slice %1 {offsets = [0, 6], sizes = [4, 384], strides = [1, 1]} : vector<4x640xf32> to vector<4x384xf32>
    %cst_10 = arith.constant dense<0.000000e+00> : vector<8x384xf32>
    %30 = tpu.matmul %28, %29, %cst_10 {dimension_numbers = #tpu.dot_dimension_numbers<[1], [0], [0], [1], [0, 0, 1, 1], [], []>, precision = #tpu.contract_precision<fp32>} : vector<8x4xf32>, vector<4x384xf32>, vector<8x384xf32> -> vector<8x384xf32>
    %31 = arith.addf %27, %30 : vector<8x384xf32>
    %32 = vector.extract_strided_slice %2 {offsets = [0, 28], sizes = [8, 4], strides = [1, 1]} : vector<8x196xf32> to vector<8x4xf32>
    %33 = vector.extract_strided_slice %1 {offsets = [0, 22], sizes = [4, 384], strides = [1, 1]} : vector<4x640xf32> to vector<4x384xf32>
    %cst_11 = arith.constant dense<0.000000e+00> : vector<8x384xf32>
    %34 = tpu.matmul %32, %33, %cst_11 {dimension_numbers = #tpu.dot_dimension_numbers<[1], [0], [0], [1], [0, 0, 1, 1], [], []>, precision = #tpu.contract_precision<fp32>} : vector<8x4xf32>, vector<4x384xf32>, vector<8x384xf32> -> vector<8x384xf32>
    %35 = arith.addf %31, %34 : vector<8x384xf32>
    %36 = vector.extract_strided_slice %2 {offsets = [0, 32], sizes = [8, 4], strides = [1, 1]} : vector<8x196xf32> to vector<8x4xf32>
    %37 = vector.extract_strided_slice %1 {offsets = [0, 23], sizes = [4, 384], strides = [1, 1]} : vector<4x640xf32> to vector<4x384xf32>
    %cst_12 = arith.constant dense<0.000000e+00> : vector<8x384xf32>
    %38 = tpu.matmul %36, %37, %cst_12 {dimension_numbers = #tpu.dot_dimension_numbers<[1], [0], [0], [1], [0, 0, 1, 1], [], []>, precision = #tpu.contract_precision<fp32>} : vector<8x4xf32>, vector<4x384xf32>, vector<8x384xf32> -> vector<8x384xf32>
    %39 = arith.addf %35, %38 : vector<8x384xf32>
    %40 = vector.extract_strided_slice %2 {offsets = [0, 36], sizes = [8, 4], strides = [1, 1]} : vector<8x196xf32> to vector<8x4xf32>
    %41 = vector.extract_strided_slice %1 {offsets = [0, 24], sizes = [4, 384], strides = [1, 1]} : vector<4x640xf32> to vector<4x384xf32>
    %cst_13 = arith.constant dense<0.000000e+00> : vector<8x384xf32>
    %42 = tpu.matmul %40, %41, %cst_13 {dimension_numbers = #tpu.dot_dimension_numbers<[1], [0], [0], [1], [0, 0, 1, 1], [], []>, precision = #tpu.contract_precision<fp32>} : vector<8x4xf32>, vector<4x384xf32>, vector<8x384xf32> -> vector<8x384xf32>
    %43 = arith.addf %39, %42 : vector<8x384xf32>
    %44 = vector.extract_strided_slice %2 {offsets = [0, 40], sizes = [8, 4], strides = [1, 1]} : vector<8x196xf32> to vector<8x4xf32>
    %45 = vector.extract_strided_slice %1 {offsets = [0, 25], sizes = [4, 384], strides = [1, 1]} : vector<4x640xf32> to vector<4x384xf32>
    %cst_14 = arith.constant dense<0.000000e+00> : vector<8x384xf32>
    %46 = tpu.matmul %44, %45, %cst_14 {dimension_numbers = #tpu.dot_dimension_numbers<[1], [0], [0], [1], [0, 0, 1, 1], [], []>, precision = #tpu.contract_precision<fp32>} : vector<8x4xf32>, vector<4x384xf32>, vector<8x384xf32> -> vector<8x384xf32>
    %47 = arith.addf %43, %46 : vector<8x384xf32>
    %48 = vector.extract_strided_slice %2 {offsets = [0, 44], sizes = [8, 4], strides = [1, 1]} : vector<8x196xf32> to vector<8x4xf32>
    %49 = vector.extract_strided_slice %1 {offsets = [0, 26], sizes = [4, 384], strides = [1, 1]} : vector<4x640xf32> to vector<4x384xf32>
    %cst_15 = arith.constant dense<0.000000e+00> : vector<8x384xf32>
    %50 = tpu.matmul %48, %49, %cst_15 {dimension_numbers = #tpu.dot_dimension_numbers<[1], [0], [0], [1], [0, 0, 1, 1], [], []>, precision = #tpu.contract_precision<fp32>} : vector<8x4xf32>, vector<4x384xf32>, vector<8x384xf32> -> vector<8x384xf32>
    %51 = arith.addf %47, %50 : vector<8x384xf32>
    %52 = vector.extract_strided_slice %2 {offsets = [0, 48], sizes = [8, 4], strides = [1, 1]} : vector<8x196xf32> to vector<8x4xf32>
    %53 = vector.extract_strided_slice %1 {offsets = [0, 27], sizes = [4, 384], strides = [1, 1]} : vector<4x640xf32> to vector<4x384xf32>
    %cst_16 = arith.constant dense<0.000000e+00> : vector<8x384xf32>
    %54 = tpu.matmul %52, %53, %cst_16 {dimension_numbers = #tpu.dot_dimension_numbers<[1], [0], [0], [1], [0, 0, 1, 1], [], []>, precision = #tpu.contract_precision<fp32>} : vector<8x4xf32>, vector<4x384xf32>, vector<8x384xf32> -> vector<8x384xf32>
    %55 = arith.addf %51, %54 : vector<8x384xf32>
    %56 = vector.extract_strided_slice %2 {offsets = [0, 52], sizes = [8, 4], strides = [1, 1]} : vector<8x196xf32> to vector<8x4xf32>
    %57 = vector.extract_strided_slice %1 {offsets = [0, 28], sizes = [4, 384], strides = [1, 1]} : vector<4x640xf32> to vector<4x384xf32>
    %cst_17 = arith.constant dense<0.000000e+00> : vector<8x384xf32>
    %58 = tpu.matmul %56, %57, %cst_17 {dimension_numbers = #tpu.dot_dimension_numbers<[1], [0], [0], [1], [0, 0, 1, 1], [], []>, precision = #tpu.contract_precision<fp32>} : vector<8x4xf32>, vector<4x384xf32>, vector<8x384xf32> -> vector<8x384xf32>
    %59 = arith.addf %55, %58 : vector<8x384xf32>
    %60 = vector.extract_strided_slice %2 {offsets = [0, 56], sizes = [8, 4], strides = [1, 1]} : vector<8x196xf32> to vector<8x4xf32>
    %61 = vector.extract_strided_slice %1 {offsets = [0, 44], sizes = [4, 384], strides = [1, 1]} : vector<4x640xf32> to vector<4x384xf32>
    %cst_18 = arith.constant dense<0.000000e+00> : vector<8x384xf32>
    %62 = tpu.matmul %60, %61, %cst_18 {dimension_numbers = #tpu.dot_dimension_numbers<[1], [0], [0], [1], [0, 0, 1, 1], [], []>, precision = #tpu.contract_precision<fp32>} : vector<8x4xf32>, vector<4x384xf32>, vector<8x384xf32> -> vector<8x384xf32>
    %63 = arith.addf %59, %62 : vector<8x384xf32>
    %64 = vector.extract_strided_slice %2 {offsets = [0, 60], sizes = [8, 4], strides = [1, 1]} : vector<8x196xf32> to vector<8x4xf32>
    %65 = vector.extract_strided_slice %1 {offsets = [0, 45], sizes = [4, 384], strides = [1, 1]} : vector<4x640xf32> to vector<4x384xf32>
    %cst_19 = arith.constant dense<0.000000e+00> : vector<8x384xf32>
    %66 = tpu.matmul %64, %65, %cst_19 {dimension_numbers = #tpu.dot_dimension_numbers<[1], [0], [0], [1], [0, 0, 1, 1], [], []>, precision = #tpu.contract_precision<fp32>} : vector<8x4xf32>, vector<4x384xf32>, vector<8x384xf32> -> vector<8x384xf32>
    %67 = arith.addf %63, %66 : vector<8x384xf32>
    %68 = vector.extract_strided_slice %2 {offsets = [0, 64], sizes = [8, 4], strides = [1, 1]} : vector<8x196xf32> to vector<8x4xf32>
    %69 = vector.extract_strided_slice %1 {offsets = [0, 46], sizes = [4, 384], strides = [1, 1]} : vector<4x640xf32> to vector<4x384xf32>
    %cst_20 = arith.constant dense<0.000000e+00> : vector<8x384xf32>
    %70 = tpu.matmul %68, %69, %cst_20 {dimension_numbers = #tpu.dot_dimension_numbers<[1], [0], [0], [1], [0, 0, 1, 1], [], []>, precision = #tpu.contract_precision<fp32>} : vector<8x4xf32>, vector<4x384xf32>, vector<8x384xf32> -> vector<8x384xf32>
    %71 = arith.addf %67, %70 : vector<8x384xf32>
    %72 = vector.extract_strided_slice %2 {offsets = [0, 68], sizes = [8, 4], strides = [1, 1]} : vector<8x196xf32> to vector<8x4xf32>
    %73 = vector.extract_strided_slice %1 {offsets = [0, 47], sizes = [4, 384], strides = [1, 1]} : vector<4x640xf32> to vector<4x384xf32>
    %cst_21 = arith.constant dense<0.000000e+00> : vector<8x384xf32>
    %74 = tpu.matmul %72, %73, %cst_21 {dimension_numbers = #tpu.dot_dimension_numbers<[1], [0], [0], [1], [0, 0, 1, 1], [], []>, precision = #tpu.contract_precision<fp32>} : vector<8x4xf32>, vector<4x384xf32>, vector<8x384xf32> -> vector<8x384xf32>
    %75 = arith.addf %71, %74 : vector<8x384xf32>
    %76 = vector.extract_strided_slice %2 {offsets = [0, 72], sizes = [8, 4], strides = [1, 1]} : vector<8x196xf32> to vector<8x4xf32>
    %77 = vector.extract_strided_slice %1 {offsets = [0, 48], sizes = [4, 384], strides = [1, 1]} : vector<4x640xf32> to vector<4x384xf32>
    %cst_22 = arith.constant dense<0.000000e+00> : vector<8x384xf32>
    %78 = tpu.matmul %76, %77, %cst_22 {dimension_numbers = #tpu.dot_dimension_numbers<[1], [0], [0], [1], [0, 0, 1, 1], [], []>, precision = #tpu.contract_precision<fp32>} : vector<8x4xf32>, vector<4x384xf32>, vector<8x384xf32> -> vector<8x384xf32>
    %79 = arith.addf %75, %78 : vector<8x384xf32>
    %80 = vector.extract_strided_slice %2 {offsets = [0, 76], sizes = [8, 4], strides = [1, 1]} : vector<8x196xf32> to vector<8x4xf32>
    %81 = vector.extract_strided_slice %1 {offsets = [0, 49], sizes = [4, 384], strides = [1, 1]} : vector<4x640xf32> to vector<4x384xf32>
    %cst_23 = arith.constant dense<0.000000e+00> : vector<8x384xf32>
    %82 = tpu.matmul %80, %81, %cst_23 {dimension_numbers = #tpu.dot_dimension_numbers<[1], [0], [0], [1], [0, 0, 1, 1], [], []>, precision = #tpu.contract_precision<fp32>} : vector<8x4xf32>, vector<4x384xf32>, vector<8x384xf32> -> vector<8x384xf32>
    %83 = arith.addf %79, %82 : vector<8x384xf32>
    %84 = vector.extract_strided_slice %2 {offsets = [0, 80], sizes = [8, 4], strides = [1, 1]} : vector<8x196xf32> to vector<8x4xf32>
    %85 = vector.extract_strided_slice %1 {offsets = [0, 50], sizes = [4, 384], strides = [1, 1]} : vector<4x640xf32> to vector<4x384xf32>
    %cst_24 = arith.constant dense<0.000000e+00> : vector<8x384xf32>
    %86 = tpu.matmul %84, %85, %cst_24 {dimension_numbers = #tpu.dot_dimension_numbers<[1], [0], [0], [1], [0, 0, 1, 1], [], []>, precision = #tpu.contract_precision<fp32>} : vector<8x4xf32>, vector<4x384xf32>, vector<8x384xf32> -> vector<8x384xf32>
    %87 = arith.addf %83, %86 : vector<8x384xf32>
    %88 = vector.extract_strided_slice %2 {offsets = [0, 84], sizes = [8, 4], strides = [1, 1]} : vector<8x196xf32> to vector<8x4xf32>
    %89 = vector.extract_strided_slice %1 {offsets = [0, 66], sizes = [4, 384], strides = [1, 1]} : vector<4x640xf32> to vector<4x384xf32>
    %cst_25 = arith.constant dense<0.000000e+00> : vector<8x384xf32>
    %90 = tpu.matmul %88, %89, %cst_25 {dimension_numbers = #tpu.dot_dimension_numbers<[1], [0], [0], [1], [0, 0, 1, 1], [], []>, precision = #tpu.contract_precision<fp32>} : vector<8x4xf32>, vector<4x384xf32>, vector<8x384xf32> -> vector<8x384xf32>
    %91 = arith.addf %87, %90 : vector<8x384xf32>
    %92 = vector.extract_strided_slice %2 {offsets = [0, 88], sizes = [8, 4], strides = [1, 1]} : vector<8x196xf32> to vector<8x4xf32>
    %93 = vector.extract_strided_slice %1 {offsets = [0, 67], sizes = [4, 384], strides = [1, 1]} : vector<4x640xf32> to vector<4x384xf32>
    %cst_26 = arith.constant dense<0.000000e+00> : vector<8x384xf32>
    %94 = tpu.matmul %92, %93, %cst_26 {dimension_numbers = #tpu.dot_dimension_numbers<[1], [0], [0], [1], [0, 0, 1, 1], [], []>, precision = #tpu.contract_precision<fp32>} : vector<8x4xf32>, vector<4x384xf32>, vector<8x384xf32> -> vector<8x384xf32>
    %95 = arith.addf %91, %94 : vector<8x384xf32>
    %96 = vector.extract_strided_slice %2 {offsets = [0, 92], sizes = [8, 4], strides = [1, 1]} : vector<8x196xf32> to vector<8x4xf32>
    %97 = vector.extract_strided_slice %1 {offsets = [0, 68], sizes = [4, 384], strides = [1, 1]} : vector<4x640xf32> to vector<4x384xf32>
    %cst_27 = arith.constant dense<0.000000e+00> : vector<8x384xf32>
    %98 = tpu.matmul %96, %97, %cst_27 {dimension_numbers = #tpu.dot_dimension_numbers<[1], [0], [0], [1], [0, 0, 1, 1], [], []>, precision = #tpu.contract_precision<fp32>} : vector<8x4xf32>, vector<4x384xf32>, vector<8x384xf32> -> vector<8x384xf32>
    %99 = arith.addf %95, %98 : vector<8x384xf32>
    %100 = vector.extract_strided_slice %2 {offsets = [0, 96], sizes = [8, 4], strides = [1, 1]} : vector<8x196xf32> to vector<8x4xf32>
    %101 = vector.extract_strided_slice %1 {offsets = [0, 69], sizes = [4, 384], strides = [1, 1]} : vector<4x640xf32> to vector<4x384xf32>
    %cst_28 = arith.constant dense<0.000000e+00> : vector<8x384xf32>
    %102 = tpu.matmul %100, %101, %cst_28 {dimension_numbers = #tpu.dot_dimension_numbers<[1], [0], [0], [1], [0, 0, 1, 1], [], []>, precision = #tpu.contract_precision<fp32>} : vector<8x4xf32>, vector<4x384xf32>, vector<8x384xf32> -> vector<8x384xf32>
    %103 = arith.addf %99, %102 : vector<8x384xf32>
    %104 = vector.extract_strided_slice %2 {offsets = [0, 100], sizes = [8, 4], strides = [1, 1]} : vector<8x196xf32> to vector<8x4xf32>
    %105 = vector.extract_strided_slice %1 {offsets = [0, 70], sizes = [4, 384], strides = [1, 1]} : vector<4x640xf32> to vector<4x384xf32>
    %cst_29 = arith.constant dense<0.000000e+00> : vector<8x384xf32>
    %106 = tpu.matmul %104, %105, %cst_29 {dimension_numbers = #tpu.dot_dimension_numbers<[1], [0], [0], [1], [0, 0, 1, 1], [], []>, precision = #tpu.contract_precision<fp32>} : vector<8x4xf32>, vector<4x384xf32>, vector<8x384xf32> -> vector<8x384xf32>
    %107 = arith.addf %103, %106 : vector<8x384xf32>
    %108 = vector.extract_strided_slice %2 {offsets = [0, 104], sizes = [8, 4], strides = [1, 1]} : vector<8x196xf32> to vector<8x4xf32>
    %109 = vector.extract_strided_slice %1 {offsets = [0, 71], sizes = [4, 384], strides = [1, 1]} : vector<4x640xf32> to vector<4x384xf32>
    %cst_30 = arith.constant dense<0.000000e+00> : vector<8x384xf32>
    %110 = tpu.matmul %108, %109, %cst_30 {dimension_numbers = #tpu.dot_dimension_numbers<[1], [0], [0], [1], [0, 0, 1, 1], [], []>, precision = #tpu.contract_precision<fp32>} : vector<8x4xf32>, vector<4x384xf32>, vector<8x384xf32> -> vector<8x384xf32>
    %111 = arith.addf %107, %110 : vector<8x384xf32>
    %112 = vector.extract_strided_slice %2 {offsets = [0, 108], sizes = [8, 4], strides = [1, 1]} : vector<8x196xf32> to vector<8x4xf32>
    %113 = vector.extract_strided_slice %1 {offsets = [0, 72], sizes = [4, 384], strides = [1, 1]} : vector<4x640xf32> to vector<4x384xf32>
    %cst_31 = arith.constant dense<0.000000e+00> : vector<8x384xf32>
    %114 = tpu.matmul %112, %113, %cst_31 {dimension_numbers = #tpu.dot_dimension_numbers<[1], [0], [0], [1], [0, 0, 1, 1], [], []>, precision = #tpu.contract_precision<fp32>} : vector<8x4xf32>, vector<4x384xf32>, vector<8x384xf32> -> vector<8x384xf32>
    %115 = arith.addf %111, %114 : vector<8x384xf32>
    %116 = vector.extract_strided_slice %2 {offsets = [0, 112], sizes = [8, 4], strides = [1, 1]} : vector<8x196xf32> to vector<8x4xf32>
    %117 = vector.extract_strided_slice %1 {offsets = [0, 88], sizes = [4, 384], strides = [1, 1]} : vector<4x640xf32> to vector<4x384xf32>
    %cst_32 = arith.constant dense<0.000000e+00> : vector<8x384xf32>
    %118 = tpu.matmul %116, %117, %cst_32 {dimension_numbers = #tpu.dot_dimension_numbers<[1], [0], [0], [1], [0, 0, 1, 1], [], []>, precision = #tpu.contract_precision<fp32>} : vector<8x4xf32>, vector<4x384xf32>, vector<8x384xf32> -> vector<8x384xf32>
    %119 = arith.addf %115, %118 : vector<8x384xf32>
    %120 = vector.extract_strided_slice %2 {offsets = [0, 116], sizes = [8, 4], strides = [1, 1]} : vector<8x196xf32> to vector<8x4xf32>
    %121 = vector.extract_strided_slice %1 {offsets = [0, 89], sizes = [4, 384], strides = [1, 1]} : vector<4x640xf32> to vector<4x384xf32>
    %cst_33 = arith.constant dense<0.000000e+00> : vector<8x384xf32>
    %122 = tpu.matmul %120, %121, %cst_33 {dimension_numbers = #tpu.dot_dimension_numbers<[1], [0], [0], [1], [0, 0, 1, 1], [], []>, precision = #tpu.contract_precision<fp32>} : vector<8x4xf32>, vector<4x384xf32>, vector<8x384xf32> -> vector<8x384xf32>
    %123 = arith.addf %119, %122 : vector<8x384xf32>
    %124 = vector.extract_strided_slice %2 {offsets = [0, 120], sizes = [8, 4], strides = [1, 1]} : vector<8x196xf32> to vector<8x4xf32>
    %125 = vector.extract_strided_slice %1 {offsets = [0, 90], sizes = [4, 384], strides = [1, 1]} : vector<4x640xf32> to vector<4x384xf32>
    %cst_34 = arith.constant dense<0.000000e+00> : vector<8x384xf32>
    %126 = tpu.matmul %124, %125, %cst_34 {dimension_numbers = #tpu.dot_dimension_numbers<[1], [0], [0], [1], [0, 0, 1, 1], [], []>, precision = #tpu.contract_precision<fp32>} : vector<8x4xf32>, vector<4x384xf32>, vector<8x384xf32> -> vector<8x384xf32>
    %127 = arith.addf %123, %126 : vector<8x384xf32>
    %128 = vector.extract_strided_slice %2 {offsets = [0, 124], sizes = [8, 4], strides = [1, 1]} : vector<8x196xf32> to vector<8x4xf32>
    %129 = vector.extract_strided_slice %1 {offsets = [0, 91], sizes = [4, 384], strides = [1, 1]} : vector<4x640xf32> to vector<4x384xf32>
    %cst_35 = arith.constant dense<0.000000e+00> : vector<8x384xf32>
    %130 = tpu.matmul %128, %129, %cst_35 {dimension_numbers = #tpu.dot_dimension_numbers<[1], [0], [0], [1], [0, 0, 1, 1], [], []>, precision = #tpu.contract_precision<fp32>} : vector<8x4xf32>, vector<4x384xf32>, vector<8x384xf32> -> vector<8x384xf32>
    %131 = arith.addf %127, %130 : vector<8x384xf32>
    %132 = vector.extract_strided_slice %2 {offsets = [0, 128], sizes = [8, 4], strides = [1, 1]} : vector<8x196xf32> to vector<8x4xf32>
    %133 = vector.extract_strided_slice %1 {offsets = [0, 92], sizes = [4, 384], strides = [1, 1]} : vector<4x640xf32> to vector<4x384xf32>
    %cst_36 = arith.constant dense<0.000000e+00> : vector<8x384xf32>
    %134 = tpu.matmul %132, %133, %cst_36 {dimension_numbers = #tpu.dot_dimension_numbers<[1], [0], [0], [1], [0, 0, 1, 1], [], []>, precision = #tpu.contract_precision<fp32>} : vector<8x4xf32>, vector<4x384xf32>, vector<8x384xf32> -> vector<8x384xf32>
    %135 = arith.addf %131, %134 : vector<8x384xf32>
    %136 = vector.extract_strided_slice %2 {offsets = [0, 132], sizes = [8, 4], strides = [1, 1]} : vector<8x196xf32> to vector<8x4xf32>
    %137 = vector.extract_strided_slice %1 {offsets = [0, 93], sizes = [4, 384], strides = [1, 1]} : vector<4x640xf32> to vector<4x384xf32>
    %cst_37 = arith.constant dense<0.000000e+00> : vector<8x384xf32>
    %138 = tpu.matmul %136, %137, %cst_37 {dimension_numbers = #tpu.dot_dimension_numbers<[1], [0], [0], [1], [0, 0, 1, 1], [], []>, precision = #tpu.contract_precision<fp32>} : vector<8x4xf32>, vector<4x384xf32>, vector<8x384xf32> -> vector<8x384xf32>
    %139 = arith.addf %135, %138 : vector<8x384xf32>
    %140 = vector.extract_strided_slice %2 {offsets = [0, 136], sizes = [8, 4], strides = [1, 1]} : vector<8x196xf32> to vector<8x4xf32>
    %141 = vector.extract_strided_slice %1 {offsets = [0, 94], sizes = [4, 384], strides = [1, 1]} : vector<4x640xf32> to vector<4x384xf32>
    %cst_38 = arith.constant dense<0.000000e+00> : vector<8x384xf32>
    %142 = tpu.matmul %140, %141, %cst_38 {dimension_numbers = #tpu.dot_dimension_numbers<[1], [0], [0], [1], [0, 0, 1, 1], [], []>, precision = #tpu.contract_precision<fp32>} : vector<8x4xf32>, vector<4x384xf32>, vector<8x384xf32> -> vector<8x384xf32>
    %143 = arith.addf %139, %142 : vector<8x384xf32>
    %144 = vector.extract_strided_slice %2 {offsets = [0, 140], sizes = [8, 4], strides = [1, 1]} : vector<8x196xf32> to vector<8x4xf32>
    %145 = vector.extract_strided_slice %1 {offsets = [0, 110], sizes = [4, 384], strides = [1, 1]} : vector<4x640xf32> to vector<4x384xf32>
    %cst_39 = arith.constant dense<0.000000e+00> : vector<8x384xf32>
    %146 = tpu.matmul %144, %145, %cst_39 {dimension_numbers = #tpu.dot_dimension_numbers<[1], [0], [0], [1], [0, 0, 1, 1], [], []>, precision = #tpu.contract_precision<fp32>} : vector<8x4xf32>, vector<4x384xf32>, vector<8x384xf32> -> vector<8x384xf32>
    %147 = arith.addf %143, %146 : vector<8x384xf32>
    %148 = vector.extract_strided_slice %2 {offsets = [0, 144], sizes = [8, 4], strides = [1, 1]} : vector<8x196xf32> to vector<8x4xf32>
    %149 = vector.extract_strided_slice %1 {offsets = [0, 111], sizes = [4, 384], strides = [1, 1]} : vector<4x640xf32> to vector<4x384xf32>
    %cst_40 = arith.constant dense<0.000000e+00> : vector<8x384xf32>
    %150 = tpu.matmul %148, %149, %cst_40 {dimension_numbers = #tpu.dot_dimension_numbers<[1], [0], [0], [1], [0, 0, 1, 1], [], []>, precision = #tpu.contract_precision<fp32>} : vector<8x4xf32>, vector<4x384xf32>, vector<8x384xf32> -> vector<8x384xf32>
    %151 = arith.addf %147, %150 : vector<8x384xf32>
    %152 = vector.extract_strided_slice %2 {offsets = [0, 148], sizes = [8, 4], strides = [1, 1]} : vector<8x196xf32> to vector<8x4xf32>
    %153 = vector.extract_strided_slice %1 {offsets = [0, 112], sizes = [4, 384], strides = [1, 1]} : vector<4x640xf32> to vector<4x384xf32>
    %cst_41 = arith.constant dense<0.000000e+00> : vector<8x384xf32>
    %154 = tpu.matmul %152, %153, %cst_41 {dimension_numbers = #tpu.dot_dimension_numbers<[1], [0], [0], [1], [0, 0, 1, 1], [], []>, precision = #tpu.contract_precision<fp32>} : vector<8x4xf32>, vector<4x384xf32>, vector<8x384xf32> -> vector<8x384xf32>
    %155 = arith.addf %151, %154 : vector<8x384xf32>
    %156 = vector.extract_strided_slice %2 {offsets = [0, 152], sizes = [8, 4], strides = [1, 1]} : vector<8x196xf32> to vector<8x4xf32>
    %157 = vector.extract_strided_slice %1 {offsets = [0, 113], sizes = [4, 384], strides = [1, 1]} : vector<4x640xf32> to vector<4x384xf32>
    %cst_42 = arith.constant dense<0.000000e+00> : vector<8x384xf32>
    %158 = tpu.matmul %156, %157, %cst_42 {dimension_numbers = #tpu.dot_dimension_numbers<[1], [0], [0], [1], [0, 0, 1, 1], [], []>, precision = #tpu.contract_precision<fp32>} : vector<8x4xf32>, vector<4x384xf32>, vector<8x384xf32> -> vector<8x384xf32>
    %159 = arith.addf %155, %158 : vector<8x384xf32>
    %160 = vector.extract_strided_slice %2 {offsets = [0, 156], sizes = [8, 4], strides = [1, 1]} : vector<8x196xf32> to vector<8x4xf32>
    %161 = vector.extract_strided_slice %1 {offsets = [0, 114], sizes = [4, 384], strides = [1, 1]} : vector<4x640xf32> to vector<4x384xf32>
    %cst_43 = arith.constant dense<0.000000e+00> : vector<8x384xf32>
    %162 = tpu.matmul %160, %161, %cst_43 {dimension_numbers = #tpu.dot_dimension_numbers<[1], [0], [0], [1], [0, 0, 1, 1], [], []>, precision = #tpu.contract_precision<fp32>} : vector<8x4xf32>, vector<4x384xf32>, vector<8x384xf32> -> vector<8x384xf32>
    %163 = arith.addf %159, %162 : vector<8x384xf32>
    %164 = vector.extract_strided_slice %2 {offsets = [0, 160], sizes = [8, 4], strides = [1, 1]} : vector<8x196xf32> to vector<8x4xf32>
    %165 = vector.extract_strided_slice %1 {offsets = [0, 115], sizes = [4, 384], strides = [1, 1]} : vector<4x640xf32> to vector<4x384xf32>
    %cst_44 = arith.constant dense<0.000000e+00> : vector<8x384xf32>
    %166 = tpu.matmul %164, %165, %cst_44 {dimension_numbers = #tpu.dot_dimension_numbers<[1], [0], [0], [1], [0, 0, 1, 1], [], []>, precision = #tpu.contract_precision<fp32>} : vector<8x4xf32>, vector<4x384xf32>, vector<8x384xf32> -> vector<8x384xf32>
    %167 = arith.addf %163, %166 : vector<8x384xf32>
    %168 = vector.extract_strided_slice %2 {offsets = [0, 164], sizes = [8, 4], strides = [1, 1]} : vector<8x196xf32> to vector<8x4xf32>
    %169 = vector.extract_strided_slice %1 {offsets = [0, 116], sizes = [4, 384], strides = [1, 1]} : vector<4x640xf32> to vector<4x384xf32>
    %cst_45 = arith.constant dense<0.000000e+00> : vector<8x384xf32>
    %170 = tpu.matmul %168, %169, %cst_45 {dimension_numbers = #tpu.dot_dimension_numbers<[1], [0], [0], [1], [0, 0, 1, 1], [], []>, precision = #tpu.contract_precision<fp32>} : vector<8x4xf32>, vector<4x384xf32>, vector<8x384xf32> -> vector<8x384xf32>
    %171 = arith.addf %167, %170 : vector<8x384xf32>
    %172 = vector.extract_strided_slice %2 {offsets = [0, 168], sizes = [8, 4], strides = [1, 1]} : vector<8x196xf32> to vector<8x4xf32>
    %173 = vector.extract_strided_slice %1 {offsets = [0, 132], sizes = [4, 384], strides = [1, 1]} : vector<4x640xf32> to vector<4x384xf32>
    %cst_46 = arith.constant dense<0.000000e+00> : vector<8x384xf32>
    %174 = tpu.matmul %172, %173, %cst_46 {dimension_numbers = #tpu.dot_dimension_numbers<[1], [0], [0], [1], [0, 0, 1, 1], [], []>, precision = #tpu.contract_precision<fp32>} : vector<8x4xf32>, vector<4x384xf32>, vector<8x384xf32> -> vector<8x384xf32>
    %175 = arith.addf %171, %174 : vector<8x384xf32>
    %176 = vector.extract_strided_slice %2 {offsets = [0, 172], sizes = [8, 4], strides = [1, 1]} : vector<8x196xf32> to vector<8x4xf32>
    %177 = vector.extract_strided_slice %1 {offsets = [0, 133], sizes = [4, 384], strides = [1, 1]} : vector<4x640xf32> to vector<4x384xf32>
    %cst_47 = arith.constant dense<0.000000e+00> : vector<8x384xf32>
    %178 = tpu.matmul %176, %177, %cst_47 {dimension_numbers = #tpu.dot_dimension_numbers<[1], [0], [0], [1], [0, 0, 1, 1], [], []>, precision = #tpu.contract_precision<fp32>} : vector<8x4xf32>, vector<4x384xf32>, vector<8x384xf32> -> vector<8x384xf32>
    %179 = arith.addf %175, %178 : vector<8x384xf32>
    %180 = vector.extract_strided_slice %2 {offsets = [0, 176], sizes = [8, 4], strides = [1, 1]} : vector<8x196xf32> to vector<8x4xf32>
    %181 = vector.extract_strided_slice %1 {offsets = [0, 134], sizes = [4, 384], strides = [1, 1]} : vector<4x640xf32> to vector<4x384xf32>
    %cst_48 = arith.constant dense<0.000000e+00> : vector<8x384xf32>
    %182 = tpu.matmul %180, %181, %cst_48 {dimension_numbers = #tpu.dot_dimension_numbers<[1], [0], [0], [1], [0, 0, 1, 1], [], []>, precision = #tpu.contract_precision<fp32>} : vector<8x4xf32>, vector<4x384xf32>, vector<8x384xf32> -> vector<8x384xf32>
    %183 = arith.addf %179, %182 : vector<8x384xf32>
    %184 = vector.extract_strided_slice %2 {offsets = [0, 180], sizes = [8, 4], strides = [1, 1]} : vector<8x196xf32> to vector<8x4xf32>
    %185 = vector.extract_strided_slice %1 {offsets = [0, 135], sizes = [4, 384], strides = [1, 1]} : vector<4x640xf32> to vector<4x384xf32>
    %cst_49 = arith.constant dense<0.000000e+00> : vector<8x384xf32>
    %186 = tpu.matmul %184, %185, %cst_49 {dimension_numbers = #tpu.dot_dimension_numbers<[1], [0], [0], [1], [0, 0, 1, 1], [], []>, precision = #tpu.contract_precision<fp32>} : vector<8x4xf32>, vector<4x384xf32>, vector<8x384xf32> -> vector<8x384xf32>
    %187 = arith.addf %183, %186 : vector<8x384xf32>
    %188 = vector.extract_strided_slice %2 {offsets = [0, 184], sizes = [8, 4], strides = [1, 1]} : vector<8x196xf32> to vector<8x4xf32>
    %189 = vector.extract_strided_slice %1 {offsets = [0, 136], sizes = [4, 384], strides = [1, 1]} : vector<4x640xf32> to vector<4x384xf32>
    %cst_50 = arith.constant dense<0.000000e+00> : vector<8x384xf32>
    %190 = tpu.matmul %188, %189, %cst_50 {dimension_numbers = #tpu.dot_dimension_numbers<[1], [0], [0], [1], [0, 0, 1, 1], [], []>, precision = #tpu.contract_precision<fp32>} : vector<8x4xf32>, vector<4x384xf32>, vector<8x384xf32> -> vector<8x384xf32>
    %191 = arith.addf %187, %190 : vector<8x384xf32>
    %192 = vector.extract_strided_slice %2 {offsets = [0, 188], sizes = [8, 4], strides = [1, 1]} : vector<8x196xf32> to vector<8x4xf32>
    %193 = vector.extract_strided_slice %1 {offsets = [0, 137], sizes = [4, 384], strides = [1, 1]} : vector<4x640xf32> to vector<4x384xf32>
    %cst_51 = arith.constant dense<0.000000e+00> : vector<8x384xf32>
    %194 = tpu.matmul %192, %193, %cst_51 {dimension_numbers = #tpu.dot_dimension_numbers<[1], [0], [0], [1], [0, 0, 1, 1], [], []>, precision = #tpu.contract_precision<fp32>} : vector<8x4xf32>, vector<4x384xf32>, vector<8x384xf32> -> vector<8x384xf32>
    %195 = arith.addf %191, %194 : vector<8x384xf32>
    %196 = vector.extract_strided_slice %2 {offsets = [0, 192], sizes = [8, 4], strides = [1, 1]} : vector<8x196xf32> to vector<8x4xf32>
    %197 = vector.extract_strided_slice %1 {offsets = [0, 138], sizes = [4, 384], strides = [1, 1]} : vector<4x640xf32> to vector<4x384xf32>
    %cst_52 = arith.constant dense<0.000000e+00> : vector<8x384xf32>
    %198 = tpu.matmul %196, %197, %cst_52 {dimension_numbers = #tpu.dot_dimension_numbers<[1], [0], [0], [1], [0, 0, 1, 1], [], []>, precision = #tpu.contract_precision<fp32>} : vector<8x4xf32>, vector<4x384xf32>, vector<8x384xf32> -> vector<8x384xf32>
    %199 = arith.addf %195, %198 : vector<8x384xf32>
    %c0_53 = arith.constant 0 : index
    %c0_54 = arith.constant 0 : index
    %200 = vector.load %arg3[%c0_53, %c0_54] : memref<8x1xf32, #tpu.memory_space<vmem>>, vector<8x1xf32>
    %201 = vector.broadcast %200 : vector<8x1xf32> to vector<8x384xf32>
    %202 = arith.addf %199, %201 : vector<8x384xf32>
    %c0_55 = arith.constant 0 : index
    %c0_56 = arith.constant 0 : index
    %203 = vector.load %arg4[%c0_55, %c0_56] : memref<1x384xf32, #tpu.memory_space<vmem>>, vector<1x384xf32>
    %204 = vector.broadcast %203 : vector<1x384xf32> to vector<8x384xf32>
    %205 = arith.mulf %202, %204 : vector<8x384xf32>
    %cst_57 = arith.constant dense<0.000000e+00> : vector<8xf32>
    %206 = vector.multi_reduction <add>, %205, %cst_57 [1] : vector<8x384xf32> to vector<8xf32>
    %207 = vector.shape_cast %206 : vector<8xf32> to vector<8x1xf32>
    %208 = arith.mulf %202, %202 : vector<8x384xf32>
    %209 = vector.broadcast %203 : vector<1x384xf32> to vector<8x384xf32>
    %210 = arith.mulf %208, %209 : vector<8x384xf32>
    %cst_58 = arith.constant dense<0.000000e+00> : vector<8xf32>
    %211 = vector.multi_reduction <add>, %210, %cst_58 [1] : vector<8x384xf32> to vector<8xf32>
    %212 = vector.shape_cast %211 : vector<8xf32> to vector<8x1xf32>
    %213 = tpu.iota {dimensions = array<i32: 1>} : vector<1x384xi32>
    %c382_i32 = arith.constant 382 : i32
    %214 = vector.broadcast %c382_i32 : i32 to vector<1x384xi32>
    %215 = arith.cmpi eq, %213, %214 : vector<1x384xi32>
    %c383_i32 = arith.constant 383 : i32
    %216 = vector.broadcast %c383_i32 : i32 to vector<1x384xi32>
    %217 = arith.cmpi eq, %213, %216 : vector<1x384xi32>
    %218 = vector.shape_cast %217 : vector<1x384xi1> to vector<1x384xi1>
    %219 = vector.broadcast %218 : vector<1x384xi1> to vector<8x384xi1>
    %220 = vector.shape_cast %212 : vector<8x1xf32> to vector<8x1xf32>
    %221 = vector.broadcast %220 : vector<8x1xf32> to vector<8x384xf32>
    %222 = arith.select %219, %221, %202 : vector<8x384xi1>, vector<8x384xf32>
    %223 = vector.shape_cast %215 : vector<1x384xi1> to vector<1x384xi1>
    %224 = vector.broadcast %223 : vector<1x384xi1> to vector<8x384xi1>
    %225 = vector.shape_cast %207 : vector<8x1xf32> to vector<8x1xf32>
    %226 = vector.broadcast %225 : vector<8x1xf32> to vector<8x384xf32>
    %227 = arith.select %224, %226, %222 : vector<8x384xi1>, vector<8x384xf32>
    %c0_59 = arith.constant 0 : index
    %c0_60 = arith.constant 0 : index
    %c0_61 = arith.constant 0 : index
    %228 = vector.load %arg5[%c0_59, %c0_60, %c0_61] : memref<1x8x384xf32, #tpu.memory_space<vmem>>, vector<1x8x384xf32>
    %229 = vector.shape_cast %228 : vector<1x8x384xf32> to vector<8x384xf32>
    %230 = vector.shape_cast %227 : vector<8x384xf32> to vector<1x8x384xf32>
    tpu.vector_store %arg5[%c0_59, %c0_60, %c0_61], %230 {strides = array<i32>} : memref<1x8x384xf32, #tpu.memory_space<vmem>>, vector<1x8x384xf32>,
    return
  }
  func.func @transform_0(%arg0: i32) -> (i32, i32, i32) {
    %c0_i32 = arith.constant 0 : i32
    %c0_i32_0 = arith.constant 0 : i32
    %c0_i32_1 = arith.constant 0 : i32
    return %arg0, %c0_i32, %c0_i32_0 : i32, i32, i32
  }
  func.func @transform_1(%arg0: i32) -> (i32, i32) {
    %c0_i32 = arith.constant 0 : i32
    %c0_i32_0 = arith.constant 0 : i32
    %c0_i32_1 = arith.constant 0 : i32
    return %c0_i32, %c0_i32_0 : i32, i32
  }
  func.func @transform_2(%arg0: i32) -> (i32, i32) {
    %c0_i32 = arith.constant 0 : i32
    %c0_i32_0 = arith.constant 0 : i32
    %c0_i32_1 = arith.constant 0 : i32
    return %c0_i32, %c0_i32_0 : i32, i32
  }
  func.func @transform_3(%arg0: i32) -> (i32, i32) {
    %c0_i32 = arith.constant 0 : i32
    %c0_i32_0 = arith.constant 0 : i32
    %c0_i32_1 = arith.constant 0 : i32
    return %c0_i32, %c0_i32_0 : i32, i32
  }
  func.func @transform_4(%arg0: i32) -> (i32, i32, i32) {
    %c0_i32 = arith.constant 0 : i32
    %c0_i32_0 = arith.constant 0 : i32
    %c0_i32_1 = arith.constant 0 : i32
    return %arg0, %c0_i32, %c0_i32_0 : i32, i32, i32
  }
}

</mosaic_0001>

<bundles_post_ra>
// kernel: multiscale_conv.3
= control target key start
LH: loop header
LB: loop body
LE: loop exit
PB: predicated region body
PF: predicated region fallthrough
CT: control target
= control target key end

     0   :  { %s302_s12 = smov 0   ;;  %s325_s0 = inlined_call_operand.vmem [shape: f32[2,8,384], index: 0, kind: input, shape index: {}, may-alias: {0,3}]   ;;  %s326_s1 = inlined_call_operand.vmem [shape: f32[8,1], index: 1, kind: input, shape index: {}]   ;;  %s327_s2 = inlined_call_operand.vmem [shape: f32[8,1], index: 2, kind: input, shape index: {}]   ;;  %s328_s3 = inlined_call_operand.vmem [shape: f32[2,8,384], index: 3, kind: output, shape index: {}, may-alias: {0,3}]  }
   0x1 LB: > { %s253_s13 = sadd.s32 4294967295, %s279_s12   ;;  %p257_p0 = scmp.ge.s32.totalorder %s279_s12, 1  ;;  %s279_s12 = sphi %s302_s12, %s13_s12  }
   0x2   : > { %p137_p1 = scmp.lt.s32.totalorder %s279_s12, 3 }
   0x4   : > { %p138_p2 = pnand %p257_p0, %p137_p1 }
   0x5   : > { %v174_v0 = vld [vmem:[%s326_s1] sm:$0xff] (!%p138_p2)  ;;  %v281_v1 = vmov (!%p138_p2), 0   ;;  %p161_p3 = scmp.lt.s32.totalorder (!%p138_p2), %s253_s13, 1 }
   0x6   : > { %141 = sbr.rel (%p138_p2) target bundleno = 145 (0x91), region = 32  ;;  %272 = vset.pattern.permute.xlu0 (!%p138_p2), %v281_v1  ;;  %v183_v2 = vld [vmem:[%s327_s2] sm:$0xff] (!%p138_p2) }
   0x7   : > { %177 = vperm.xlu0 (!%p138_p2), %272, %v174_v0  }
   0xb   : > { %186 = vperm.xlu0 (!%p138_p2), %272, %v183_v2  }
   0xd   : > { %s330_s13 = smov (!%p161_p3, %s253_s13), 1 }
   0xe   : > { %s262_s18 = smul.u32 24, %s330_s13 }
  0x10   : > { %s165_s21 = scalar_lea.vmem %s325_s0, %s262_s18  ;;  %s170_s24 = scalar_lea.vmem %s328_s3, %s262_s18 }
  0x11   : > { %v171_v4 = vld [vmem:[%s165_s21] sm:$0xff]  ;;  %v172_v5 = vld [vmem:[%s165_s21 + $0x8] sm:$0xff]  ;;  %v173_v6 = vld [vmem:[%s165_s21 + $0x10] sm:$0xff] }
  0x86   : > { %v178_v3 = vpop.permute.xlu0 %177 }
  0x87   : > { %v180_v7 = vmul.f32 %v178_v3, %v171_v4  ;;  %v181_v8 = vmul.f32 %v178_v3, %v172_v5  ;;  %v182_v9 = vmul.f32 %v178_v3, %v173_v6 }
  0x8a   : > { %v187_v10 = vpop.permute.xlu0 %186 }
  0x8b   : > { %v189_v11 = vadd.f32 %v187_v10, %v180_v7  ;;  %v190_v12 = vadd.f32 %v187_v10, %v181_v8  ;;  %v191_v13 = vadd.f32 %v187_v10, %v182_v9 }
  0x8d   : > { %v192_v14 = vmax.f32 %v189_v11, 0.0  ;;  %v193_v15 = vmax.f32 %v190_v12, 0.0  ;;  %v194_v16 = vmax.f32 %v191_v13, 0.0 }
  0x8f   : > { %195 = vst [vmem:[%s170_s24] sm:$0xff] %v192_v14  ;;  %196 = vst [vmem:[%s170_s24 + $0x8] sm:$0xff] %v193_v15 }
  0x90   : > { %197 = vst [vmem:[%s170_s24 + $0x10] sm:$0xff] %v194_v16 }
  0x91 PF: > { %s13_s12 = sadd.s32 1, %s279_s12  }
  0x92   : > { %p10_p4 = scmp.ge.s32.totalorder %s13_s12, 4  }
  0x94   :  { %12 = sbr.rel (!%p10_p4) target bundleno = 1 (0x1), region = 62 }

// kernel: multiscale_conv.2
= control target key start
LH: loop header
LB: loop body
LE: loop exit
PB: predicated region body
PF: predicated region fallthrough
CT: control target
= control target key end

     0   :  { %s48988_s15 = smov 0   ;;  %s54647_s0 = inlined_call_operand.vmem [shape: f32[2,4,640], index: 0, kind: input, shape index: {}]   ;;  %s54648_s1 = inlined_call_operand.vmem [shape: f32[8,196], index: 1, kind: input, shape index: {}]   ;;  %s54649_s2 = inlined_call_operand.vmem [shape: f32[8,1], index: 2, kind: input, shape index: {}]   ;;  %s54650_s3 = inlined_call_operand.vmem [shape: f32[1,384], index: 3, kind: input, shape index: {}]   ;;  %s54651_s4 = inlined_call_operand.vmem [shape: f32[2,8,384], index: 4, kind: output, shape index: {}]  }
   0x1 LB: > { %s46144_s16 = sadd.s32 4294967295, %s48894_s15   ;;  %p46148_p0 = scmp.ge.s32.totalorder %s48894_s15, 1  ;;  %s48894_s15 = sphi %s48988_s15, %s14_s15  }
   0x2   : > { %p162_p1 = scmp.lt.s32.totalorder %s48894_s15, 3 }
   0x4   : > { %p163_p2 = pnand %p46148_p0, %p162_p1 }
   0x6   : > { %166 = sbr.rel (%p163_p2) target bundleno = 2856 (0xb28), region = 36 }
   0xd   : > { %v48999_v0 = vld [vmem:[%s54648_s1] sm:$0xff]  ;;  %p188_p3 = scmp.lt.s32.totalorder %s46144_s16, 1  ;;  %s48896_s19 = smov 124   ;;  %v54672_v1 = vmov 0.0   ;;  %vm222_vm0 = vcmask 31744   ;;  %vm218_vm1 = vcmask 1039360  }
   0xe   : > { %204 = vrot.lane.b32.xlu0 %v48999_v0, %s48896_s19  ;;  %298 = vmatprep.mubr.f32.mxu0 %v54672_v1  ;;  %s48898_s24 = smov 127   ;;  %s54662_s25 = smov 120   ;;  %vm225_vm2 = vcmask 1043456   ;;  %v1143_v46 = vsel %vm222_vm0, %v48999_v0, 0  ;;  %vm48938_vm3 = vmmov 0   ;;  %vm2072_vm4 = vcmask 1031168  }
   0xf   : > { %s55495_s16 = smov (!%p188_p3, %s46144_s16), 1  ;;  %46741 = vmatprep.subr.mxu1 %v54672_v1  ;;  %s48900_s26 = smov 126   ;;  %v49259_v51 = vand.u32 4294901760, %v1143_v46  ;;  %46743 = vmatprep.mubr.msk.f32.mxu1 %vm48938_vm3, %v54672_v1  ;;  %vm3008_vm5 = vcmask 1022976   ;;  %vm54782_vm6 = vcmask 1014784   ;;  %vm54775_vm7 = vcmask 1006592  }
  0x10   : > { %s48797_s20 = smul.u32 20, %s55495_s16  ;;  %s54661_s27 = smov 116   ;;  %vm54772_vm8 = vcmask 998400   ;;  %vm6752_vm9 = vcmask 867328   ;;  %vm7688_vm10 = vcmask 859136   ;;  %vm8624_vm11 = vcmask 850944  }
  0x11   : > { %s48902_s28 = smov 125   ;;  %s54660_s29 = smov 112   ;;  %v49274_v56 = vsub.f32 %v1143_v46, %v49259_v51  ;;  %vm9560_vm12 = vcmask 842752   ;;  %vm10496_vm13 = vcmask 834560   ;;  %vm11432_vm14 = vcmask 826368  }
  0x12   : > { %s49011_s23 = scalar_lea.vmem %s54647_s0, %s48797_s20  ;;  %s54659_s30 = smov 108   ;;  %vm30150_vm15 = vcmask 293888  }
  0x13   : > { %v49014_v2 = vld [vmem:[%s49011_s23 + $0x8] sm:$0xff]  ;;  %v49017_v3 = vld [vmem:[%s49011_s23] sm:$0xff]  ;;  %s54751_s5 = smov 123   ;;  %s48906_s6 = smov 104   ;;  %v49293_v61 = vand.u32 4294901760, %v49274_v56 }
  0x14   : > { %214 = vrot.lane.b32.xlu1 %v49014_v2, %s48898_s24  ;;  %v49023_v4 = vcombine.high %v49017_v3, %v49017_v3  ;;  %s54750_s7 = smov 122   ;;  %s48908_s8 = smov 100   ;;  %v1145_v48 = vsel %vm225_vm2, %v49017_v3, 0 }
  0x15   : > { %s48909_s9 = smov 106   ;;  %s54658_s10 = smov 96   ;;  %v49261_v52 = vand.u32 4294901760, %v1145_v48 }
  0x16   : > { %212 = vrot.lane.b32.xlu0 %v49023_v4, %s48898_s24  ;;  %s48911_s11 = smov 105   ;;  %s54656_s12 = smov 92   ;;  %v1147_v41 = vsel %vm225_vm2, %v49023_v4, 0 }
  0x17   : > { %s54652_s13 = smov 88   ;;  %s48914_s14 = smov 103   ;;  %v49236_v44 = vand.u32 4294901760, %v1147_v41  ;;  %v49279_v57 = vsub.f32 %v1145_v48, %v49261_v52 }
  0x18   : > { %210 = vrot.lane.b32.xlu1 %v49017_v3, %s48898_s24  ;;  %s48915_s17 = smov 84   ;;  %s48916_s18 = smov 102  }
  0x19   : > { %s48917_s20 = smov 80   ;;  %s48918_s21 = smov 101   ;;  %v49253_v49 = vsub.f32 %v1147_v41, %v49236_v44  ;;  %v1237_v62 = vand.u32 4294901760, %v49279_v57 }
  0x1a   : > { %2062 = vrot.lane.b32.xlu0 %v48999_v0, %s54662_s25  ;;  %s54653_s22 = smov 76   ;;  %s54664_s25 = smov 78  }
  0x1b   : > { %v1231_v54 = vand.u32 4294901760, %v49253_v49 }
  0x1c   : > { %2066 = vrot.lane.b32.xlu1 %v49023_v4, %s48900_s26 }
  0x1d   : > { %v1232_v59 = vsub.f32 %v49253_v49, %v1231_v54 }
  0x1e   : > { %2068 = vrot.lane.b32.xlu0 %v49014_v2, %s48900_s26 }
  0x20   : > { %2064 = vrot.lane.b32.xlu1 %v49017_v3, %s48900_s26 }
  0x22   : > { %2998 = vrot.lane.b32.xlu0 %v48999_v0, %s54661_s27  ;;  %s54666_s27 = smov 79  }
  0x24   : > { %3002 = vrot.lane.b32.xlu1 %v49023_v4, %s48902_s28 }
  0x26   : > { %3004 = vrot.lane.b32.xlu0 %v49014_v2, %s48902_s28 }
  0x28   : > { %3000 = vrot.lane.b32.xlu1 %v49017_v3, %s48902_s28 }
  0x2a   : > { %3934 = vrot.lane.b32.xlu0 %v48999_v0, %s54660_s29  ;;  %s48928_s29 = smov 52  }
  0x2c   : > { %3938 = vrot.lane.b32.xlu1 %v49023_v4, %s48896_s19 }
  0x2e   : > { %3940 = vrot.lane.b32.xlu0 %v49014_v2, %s48896_s19 }
  0x30   : > { %3936 = vrot.lane.b32.xlu1 %v49017_v3, %s48896_s19 }
  0x32   : > { %4870 = vrot.lane.b32.xlu0 %v48999_v0, %s54659_s30  ;;  %s48927_s30 = smov 56  }
  0x34   : > { %4874 = vrot.lane.b32.xlu1 %v49023_v4, %s54751_s5 }
  0x36   : > { %4876 = vrot.lane.b32.xlu0 %v49014_v2, %s54751_s5 }
  0x38   : > { %4872 = vrot.lane.b32.xlu1 %v49017_v3, %s54751_s5 }
  0x3a   : > { %5806 = vrot.lane.b32.xlu0 %v48999_v0, %s48906_s6 }
  0x3c   : > { %5810 = vrot.lane.b32.xlu1 %v49023_v4, %s54750_s7 }
  0x3e   : > { %5812 = vrot.lane.b32.xlu0 %v49014_v2, %s54750_s7 }
  0x40   : > { %5808 = vrot.lane.b32.xlu1 %v49017_v3, %s54750_s7 }
  0x42   : > { %6742 = vrot.lane.b32.xlu0 %v48999_v0, %s48908_s8 }
  0x44   : > { %6746 = vrot.lane.b32.xlu1 %v49023_v4, %s48909_s9 }
  0x46   : > { %6748 = vrot.lane.b32.xlu0 %v49014_v2, %s48909_s9 }
  0x48   : > { %6744 = vrot.lane.b32.xlu1 %v49017_v3, %s48909_s9 }
  0x4a   : > { %7678 = vrot.lane.b32.xlu0 %v48999_v0, %s54658_s10  ;;  %s48926_s10 = smov 81  }
  0x4c   : > { %7682 = vrot.lane.b32.xlu1 %v49023_v4, %s48911_s11 }
  0x4e   : > { %7684 = vrot.lane.b32.xlu0 %v49014_v2, %s48911_s11 }
  0x50   : > { %7680 = vrot.lane.b32.xlu1 %v49017_v3, %s48911_s11 }
  0x52   : > { %8614 = vrot.lane.b32.xlu0 %v48999_v0, %s54656_s12  ;;  %s48924_s12 = smov 82  }
  0x54   : > { %8618 = vrot.lane.b32.xlu1 %v49023_v4, %s48906_s6 }
  0x56   : > { %8620 = vrot.lane.b32.xlu0 %v49014_v2, %s48906_s6 }
  0x58   : > { %8616 = vrot.lane.b32.xlu1 %v49017_v3, %s48906_s6 }
  0x5a   : > { %9550 = vrot.lane.b32.xlu0 %v48999_v0, %s54652_s13  ;;  %s54654_s13 = smov 72  }
  0x5c   : > { %9554 = vrot.lane.b32.xlu1 %v49023_v4, %s48914_s14 }
  0x5e   : > { %9556 = vrot.lane.b32.xlu0 %v49014_v2, %s48914_s14 }
  0x60   : > { %9552 = vrot.lane.b32.xlu1 %v49017_v3, %s48914_s14 }
  0x62   : > { %10486 = vrot.lane.b32.xlu0 %v48999_v0, %s48915_s17 }
  0x64   : > { %10490 = vrot.lane.b32.xlu1 %v49023_v4, %s48916_s18 }
  0x66   : > { %10492 = vrot.lane.b32.xlu0 %v49014_v2, %s48916_s18 }
  0x68   : > { %10488 = vrot.lane.b32.xlu1 %v49017_v3, %s48916_s18 }
  0x6a   : > { %11422 = vrot.lane.b32.xlu0 %v48999_v0, %s48917_s20 }
  0x6c   : > { %11426 = vrot.lane.b32.xlu1 %v49023_v4, %s48918_s21 }
  0x6e   : > { %11428 = vrot.lane.b32.xlu0 %v49014_v2, %s48918_s21 }
  0x70   : > { %11424 = vrot.lane.b32.xlu1 %v49017_v3, %s48918_s21 }
  0x72   : > { %12358 = vrot.lane.b32.xlu0 %v48999_v0, %s54653_s22  ;;  %s54655_s22 = smov 68  }
  0x74   : > { %12362 = vrot.lane.b32.xlu1 %v49023_v4, %s48908_s8 }
  0x76   : > { %12364 = vrot.lane.b32.xlu0 %v49014_v2, %s48908_s8 }
  0x78   : > { %12360 = vrot.lane.b32.xlu1 %v49017_v3, %s48908_s8 }
  0x7a   : > { %13294 = vrot.lane.b32.xlu0 %v48999_v0, %s54654_s13  ;;  %s48922_s13 = smov 83  }
  0x7c   : > { %13298 = vrot.lane.b32.xlu1 %v49023_v4, %s48915_s17 }
  0x7e   : > { %13300 = vrot.lane.b32.xlu0 %v49014_v2, %s48915_s17 }
  0x80   : > { %v205_v5 = vpop.permute.xlu0 %204  ;;  %13296 = vrot.lane.b32.xlu1 %v49017_v3, %s48915_s17 }
  0x81   : > { %v223_v6 = vsel %vm222_vm0, %v205_v5, 0  ;;  %v1233_v5 = vand.u32 4294901760, %v1232_v59 }
  0x82   : > { %v49134_v7 = vand.u32 4294901760, %v223_v6  ;;  %14230 = vrot.lane.b32.xlu0 %v48999_v0, %s54655_s22  ;;  %s54657_s22 = smov 64  }
  0x84   : > { %v49139_v8 = vsub.f32 %v223_v6, %v49134_v7  ;;  %14234 = vrot.lane.b32.xlu1 %v49023_v4, %s48922_s13 }
  0x86   : > { %v49143_v9 = vpop.permute.xlu1 %214  ;;  %14236 = vrot.lane.b32.xlu0 %v49014_v2, %s48922_s13  ;;  %v49148_v10 = vand.u32 4294901760, %v49139_v8 }
  0x88   : > { %14232 = vrot.lane.b32.xlu1 %v49017_v3, %s48922_s13  ;;  %v213_v11 = vpop.permute.xlu0 %212  ;;  %v302_v15 = vsub.f32 %v49139_v8, %v49148_v10 }
  0x89   : > { %v220_v12 = vsel %vm218_vm1, %v213_v11, %v49143_v9 }
  0x8a   : > { %v228_v13 = vsel %vm225_vm2, %v220_v12, 0  ;;  %v211_v14 = vpop.permute.xlu1 %210  ;;  %15166 = vrot.lane.b32.xlu0 %v48999_v0, %s54657_s22  ;;  %v49175_v23 = vand.u32 4294901760, %v302_v15  ;;  %s54668_s22 = smov 60   ;;  %v1238_v12 = vsub.f32 %v49279_v57, %v1237_v62 }
  0x8b   : > { %v49159_v16 = vand.u32 4294901760, %v228_v13  ;;  %v219_v17 = vsel %vm218_vm1, %v211_v14, %v213_v11  ;;  %v1221_v11 = vsub.f32 %v49274_v56, %v49293_v61 }
  0x8c   : > { %v226_v18 = vsel %vm225_vm2, %v219_v17, 0  ;;  %15170 = vrot.lane.b32.xlu1 %v49023_v4, %s48924_s12  ;;  %v49165_v19 = vpop.permute.xlu0 %2062 }
  0x8d   : > { %v311_v20 = vsub.f32 %v228_v13, %v49159_v16  ;;  %v49168_v21 = vand.u32 4294901760, %v226_v18  ;;  %233 = vmatprep.subr.mxu0 %v49159_v16  ;;  %v49320_v15 = vand.u32 4294901760, %v1221_v11 }
  0x8e   : > { %v49171_v22 = vpop.permute.xlu1 %2066  ;;  %15172 = vrot.lane.b32.xlu0 %v49014_v2, %s48924_s12 }
  0x8f   : > { %v317_v24 = vsub.f32 %v226_v18, %v49168_v21  ;;  %235 = vmatpush1.msra.mxu0 %v49168_v21  ;;  %v312_v25 = vand.u32 4294901760, %v311_v20 }
  0x90   : > { %15168 = vrot.lane.b32.xlu1 %v49017_v3, %s48924_s12  ;;  %304 = vmatmul.mubr.f32.vlgmr.msra.gmra.mrb[0].mxu0 %v49175_v23  ;;  %v49182_v26 = vpop.permute.xlu0 %2068 }
  0x91   : > { %v318_v27 = vand.u32 4294901760, %v317_v24  ;;  %v313_v28 = vsub.f32 %v311_v20, %v312_v25  ;;  %384 = vmatprep.mubr.f32.mxu0 %v54672_v1 }
  0x92   : > { %v49185_v29 = vpop.permute.xlu1 %2064  ;;  %16102 = vrot.lane.b32.xlu0 %v48999_v0, %s54668_s22 }
  0x93   : > { %v314_v30 = vand.u32 4294901760, %v313_v28  ;;  %v319_v31 = vsub.f32 %v317_v24, %v318_v27 }
  0x94   : > { %16106 = vrot.lane.b32.xlu1 %v49023_v4, %s48926_s10  ;;  %v49191_v32 = vpop.permute.xlu0 %2998 }
  0x95   : > { %315 = vmatprep.subr.mxu0 %v314_v30  ;;  %v320_v33 = vand.u32 4294901760, %v319_v31  ;;  %v49368_v31 = vcombine.high %v49014_v2, %v49014_v2 }
  0x96   : > { %v49193_v34 = vpop.permute.xlu1 %3002  ;;  %16108 = vrot.lane.b32.xlu0 %v49014_v2, %s48926_s10 }
  0x97   : > { %321 = vmatpush1.msra.mxu0 %v320_v33  ;;  %v2074_v33 = vsel %vm2072_vm4, %v49171_v22, %v49182_v26 }
  0x98   : > { %16104 = vrot.lane.b32.xlu1 %v49017_v3, %s48926_s10  ;;  %386 = vmatmul.mubr.f32.vlgmr.msra.gmra.mrb[0].mxu0 %v49134_v7  ;;  %v49200_v35 = vpop.permute.xlu0 %3004  ;;  %v2080_v48 = vsel %vm225_vm2, %v2074_v33, 0 }
  0x99   : > { %394 = vmatprep.subr.mxu0 %v311_v20  ;;  %460 = vmatprep.mubr.f32.mxu0 %v54672_v1 }
  0x9a   : > { %397 = vmatpush1.msra.mxu0 %v317_v24  ;;  %v49203_v36 = vpop.permute.xlu1 %3000  ;;  %17038 = vrot.lane.b32.xlu0 %v48999_v0, %s48927_s30 }
  0x9b   : > { %470 = vmatprep.subr.mxu0 %v49159_v16 }
  0x9c   : > { %17042 = vrot.lane.b32.xlu1 %v49023_v4, %s48917_s20  ;;  %v49210_v37 = vpop.permute.xlu0 %3934 }
  0x9e   : > { %v49212_v38 = vpop.permute.xlu1 %3938  ;;  %17044 = vrot.lane.b32.xlu0 %v49014_v2, %s48917_s20 }
  0xa0   : > { %17040 = vrot.lane.b32.xlu1 %v49017_v3, %s48917_s20  ;;  %463 = vmatmul.mubr.f32.vlgmr.msra.gmra.mrb[0].mxu0 %v49139_v8  ;;  %v49219_v39 = vpop.permute.xlu0 %3940 }
  0xa1   : > { %472 = vmatpush1.msra.mxu0 %v49168_v21  ;;  %535 = vmatprep.mubr.f32.mxu0 %v54672_v1 }
  0xa2   : > { %548 = vmatprep.subr.mxu0 %v312_v25  ;;  %v49223_v40 = vpop.permute.xlu1 %3936  ;;  %17974 = vrot.lane.b32.xlu0 %v48999_v0, %s48928_s29  ;;  %s48930_s29 = smov 48  }
  0xa4   : > { %17978 = vrot.lane.b32.xlu1 %v49023_v4, %s54666_s27  ;;  %v49230_v42 = vpop.permute.xlu0 %4870 }
  0xa6   : > { %v49232_v43 = vpop.permute.xlu1 %4874  ;;  %17980 = vrot.lane.b32.xlu0 %v49014_v2, %s54666_s27 }
  0xa8   : > { %17976 = vrot.lane.b32.xlu1 %v49017_v3, %s54666_s27  ;;  %539 = vmatmul.mubr.f32.vlgmr.msra.gmra.mrb[0].mxu0 %v49148_v10  ;;  %v49241_v45 = vpop.permute.xlu0 %4876  ;;  %s48936_s27 = smov 36  }
  0xa9   : > { %552 = vmatpush1.msra.mxu0 %v318_v27  ;;  %615 = vmatprep.mubr.f32.mxu0 %v54672_v1 }
  0xaa   : > { %624 = vmatprep.subr.mxu0 %v49159_v16  ;;  %v49247_v47 = vpop.permute.xlu1 %4872  ;;  %18910 = vrot.lane.b32.xlu0 %v48999_v0, %s48930_s29  ;;  %s48932_s29 = smov 44   ;;  %v1239_v16 = vand.u32 4294901760, %v1238_v12 }
  0xac   : > { %18914 = vrot.lane.b32.xlu1 %v49023_v4, %s54664_s25  ;;  %v49257_v50 = vpop.permute.xlu0 %5806 }
  0xae   : > { %v49263_v53 = vpop.permute.xlu1 %5810  ;;  %18916 = vrot.lane.b32.xlu0 %v49014_v2, %s54664_s25 }
  0xb0   : > { %18912 = vrot.lane.b32.xlu1 %v49017_v3, %s54664_s25  ;;  %617 = vmatmul.mubr.f32.vlgmr.msra.gmra.mrb[0].mxu0 %v49134_v7  ;;  %v49271_v55 = vpop.permute.xlu0 %5812  ;;  %s54665_s25 = smov 62  }
  0xb1   : > { %626 = vmatpush1.msra.mxu0 %v49168_v21  ;;  %689 = vmatprep.mubr.f32.mxu0 %v54672_v1 }
  0xb2   : > { %v49281_v58 = vpop.permute.xlu1 %5808  ;;  %19846 = vrot.lane.b32.xlu0 %v48999_v0, %s48932_s29  ;;  %1152 = vmatprep.subr.mxu0 %v49236_v44  ;;  %s48934_s29 = smov 40  }
  0xb4   : > { %19850 = vrot.lane.b32.xlu1 %v49023_v4, %s54665_s25  ;;  %v49290_v60 = vpop.permute.xlu0 %6742 }
  0xb6   : > { %v49296_v63 = vpop.permute.xlu1 %6746  ;;  %19852 = vrot.lane.b32.xlu0 %v49014_v2, %s54665_s25 }
  0xb8   : > { %19848 = vrot.lane.b32.xlu1 %v49017_v3, %s54665_s25  ;;  %691 = vmatmul.mubr.f32.vlgmr.msra.gmra.mrb[0].mxu0 %v49134_v7  ;;  %v49303_v6 = vpop.permute.xlu0 %6748  ;;  %s54667_s25 = smov 61  }
  0xb9   : > { %1154 = vmatpush1.msra.mxu0 %v49261_v52  ;;  %1217 = vmatprep.mubr.f32.mxu0 %v54672_v1 }
  0xba   : > { %v49312_v13 = vpop.permute.xlu1 %6744  ;;  %20782 = vrot.lane.b32.xlu0 %v48999_v0, %s48934_s29  ;;  %1234 = vmatprep.subr.mxu0 %v1233_v5  ;;  %v49390_v5 = vand.u32 4294901760, %v2080_v48 }
  0xbc   : > { %20786 = vrot.lane.b32.xlu1 %v49023_v4, %s54667_s25  ;;  %v49318_v14 = vpop.permute.xlu0 %7678  ;;  %v49408_v12 = vsub.f32 %v2080_v48, %v49390_v5 }
  0xbe   : > { %v49322_v17 = vpop.permute.xlu1 %7682  ;;  %20788 = vrot.lane.b32.xlu0 %v49014_v2, %s54667_s25 }
  0xc0   : > { %20784 = vrot.lane.b32.xlu1 %v49017_v3, %s54667_s25  ;;  %v49328_v18 = vpop.permute.xlu0 %7684  ;;  %1223 = vmatmul.mubr.f32.vlgmr.msra.gmra.mrb[0].mxu0 %v49320_v15  ;;  %s48937_s25 = smov 32  }
  0xc1   : > { %1240 = vmatpush1.msra.mxu0 %v1239_v16  ;;  %1303 = vmatprep.mubr.f32.mxu0 %v54672_v1 }
  0xc2   : > { %v49332_v20 = vpop.permute.xlu1 %7680  ;;  %21718 = vrot.lane.b32.xlu0 %v48999_v0, %s48936_s27  ;;  %1313 = vmatprep.subr.mxu0 %v49253_v49  ;;  %v2073_v49 = vsel %vm2072_vm4, %v49185_v29, %v49171_v22  ;;  %v2076_v22 = vsel %vm222_vm0, %v49165_v19, 0 }
  0xc3   : > { %v2078_v16 = vsel %vm225_vm2, %v2073_v49, 0  ;;  %v54674_v49 = vand.u32 4294901760, %v49408_v12 }
  0xc4   : > { %21722 = vrot.lane.b32.xlu1 %v49023_v4, %s54668_s22  ;;  %v49339_v21 = vpop.permute.xlu0 %8614 }
  0xc6   : > { %v49341_v24 = vpop.permute.xlu1 %8618  ;;  %21724 = vrot.lane.b32.xlu0 %v49014_v2, %s54668_s22 }
  0xc8   : > { %21720 = vrot.lane.b32.xlu1 %v49017_v3, %s54668_s22  ;;  %v49347_v25 = vpop.permute.xlu0 %8620  ;;  %1305 = vmatmul.mubr.f32.vlgmr.msra.gmra.mrb[0].mxu0 %v49259_v51  ;;  %s54669_s22 = smov 59  }
  0xc9   : > { %1316 = vmatpush1.msra.mxu0 %v49279_v57  ;;  %1379 = vmatprep.mubr.f32.mxu0 %v54672_v1  ;;  %v49422_v57 = vand.u32 4294901760, %v2078_v16 }
  0xca   : > { %v49352_v27 = vpop.permute.xlu1 %8616  ;;  %22654 = vrot.lane.b32.xlu0 %v48999_v0, %s48937_s25  ;;  %1389 = vmatprep.subr.mxu0 %v49236_v44  ;;  %s48940_s25 = smov 28  }
  0xcb   : > { %54927 = vst [vmem:[#allocation2_spill] sm:$0xff] %v49352_v27 }
  0xcc   : > { %22658 = vrot.lane.b32.xlu1 %v49023_v4, %s54669_s22  ;;  %v49360_v28 = vpop.permute.xlu0 %9550 }
  0xcd   : > { %54928 = vst [vmem:[#allocation3_spill] sm:$0xff] %v49360_v28 }
  0xce   : > { %v49362_v30 = vpop.permute.xlu1 %9554  ;;  %22660 = vrot.lane.b32.xlu0 %v49014_v2, %s54669_s22 }
  0xcf   : > { %54929 = vst [vmem:[#allocation4_spill] sm:$0xff] %v49362_v30 }
  0xd0   : > { %22656 = vrot.lane.b32.xlu1 %v49017_v3, %s54669_s22  ;;  %v49375_v41 = vpop.permute.xlu0 %9556  ;;  %1382 = vmatmul.mubr.f32.vlgmr.msra.gmra.mrb[0].mxu0 %v49274_v56  ;;  %s48941_s22 = smov 58  }
  0xd1   : > { %1391 = vmatpush1.msra.mxu0 %v49261_v52  ;;  %1454 = vmatprep.mubr.f32.mxu0 %v54672_v1 }
  0xd2   : > { %v49380_v46 = vpop.permute.xlu1 %9552  ;;  %216 = vrot.lane.b32.xlu0 %v49368_v31, %s48898_s24  ;;  %1467 = vmatprep.subr.mxu0 %v1231_v54  ;;  %s48942_s24 = smov 24  }
  0xd3   : > { %54930 = vst [vmem:[#allocation5_spill] sm:$0xff] %v49380_v46 }
  0xd4   : > { %23590 = vrot.lane.b32.xlu1 %v48999_v0, %s48940_s25  ;;  %v49388_v59 = vpop.permute.xlu0 %10486  ;;  %s48947_s25 = smov 39  }
  0xd5   : > { %54931 = vst [vmem:[#allocation6_spill] sm:$0xff] %v49388_v59 }
  0xd6   : > { %v49392_v11 = vpop.permute.xlu1 %10490  ;;  %23594 = vrot.lane.b32.xlu0 %v49023_v4, %s48941_s22 }
  0xd7   : > { %54932 = vst [vmem:[#allocation7_spill] sm:$0xff] %v49392_v11  ;;  %v2165_v11 = vsub.f32 %v49408_v12, %v54674_v49 }
  0xd8   : > { %23596 = vrot.lane.b32.xlu1 %v49014_v2, %s48941_s22  ;;  %v49401_v54 = vpop.permute.xlu0 %10492  ;;  %1458 = vmatmul.mubr.f32.vlgmr.msra.gmra.mrb[0].mxu0 %v49293_v61 }
  0xd9   : > { %54933 = vst [vmem:[#allocation8_spill] sm:$0xff] %v49401_v54  ;;  %1471 = vmatpush1.msra.mxu0 %v1237_v62  ;;  %1534 = vmatprep.mubr.f32.mxu0 %v54672_v1  ;;  %v49424_v62 = vand.u32 4294901760, %v2076_v22 }
  0xda   : > { %v49411_v33 = vpop.permute.xlu1 %10488  ;;  %23592 = vrot.lane.b32.xlu0 %v49017_v3, %s48941_s22  ;;  %1543 = vmatprep.subr.mxu0 %v49236_v44  ;;  %v49436_v44 = vsub.f32 %v2078_v16, %v49422_v57 }
  0xdb   : > { %54934 = vst [vmem:[#allocation9_spill] sm:$0xff] %v49411_v33 }
  0xdc   : > { %2070 = vrot.lane.b32.xlu1 %v49368_v31, %s48900_s26  ;;  %v49420_v29 = vpop.permute.xlu0 %11422  ;;  %s48943_s26 = smov 57   ;;  %v2170_v16 = vand.u32 4294901760, %v49436_v44 }
  0xdd   : > { %54935 = vst [vmem:[#allocation10_spill] sm:$0xff] %v49420_v29 }
  0xde   : > { %v49426_v48 = vpop.permute.xlu1 %11426  ;;  %3006 = vrot.lane.b32.xlu0 %v49368_v31, %s48902_s28  ;;  %v2171_v29 = vsub.f32 %v49436_v44, %v2170_v16  ;;  %s48944_s28 = smov 20  }
  0xdf   : > { %54936 = vst [vmem:[#allocation11_spill] sm:$0xff] %v49426_v48  ;;  %v49441_v48 = vsub.f32 %v2076_v22, %v49424_v62 }
  0xe0   : > { %24526 = vrot.lane.b32.xlu1 %v48999_v0, %s48942_s24  ;;  %v49432_v19 = vpop.permute.xlu0 %11428  ;;  %1536 = vmatmul.mubr.f32.vlgmr.msra.gmra.mrb[0].mxu0 %v49259_v51  ;;  %s48948_s24 = smov 8  }
  0xe1   : > { %54937 = vst [vmem:[#allocation12_spill] sm:$0xff] %v49432_v19  ;;  %1545 = vmatpush1.msra.mxu0 %v49261_v52  ;;  %1608 = vmatprep.mubr.f32.mxu0 %v54672_v1  ;;  %v49457_v22 = vand.u32 4294901760, %v49441_v48 }
  0xe2   : > { %v49443_v33 = vpop.permute.xlu1 %11424  ;;  %2085 = vmatprep.subr.mxu0 %v49390_v5  ;;  %24530 = vrot.lane.b32.xlu0 %v49023_v4, %s48943_s26 }
  0xe3   : > { %54938 = vst [vmem:[#allocation13_spill] sm:$0xff] %v49443_v33  ;;  %v2166_v33 = vand.u32 4294901760, %v2165_v11  ;;  %v2154_v11 = vsub.f32 %v49441_v48, %v49457_v22 }
  0xe4   : > { %24532 = vrot.lane.b32.xlu1 %v49014_v2, %s48943_s26  ;;  %v49453_v52 = vpop.permute.xlu0 %12358 }
  0xe5   : > { %54939 = vst [vmem:[#allocation14_spill] sm:$0xff] %v49453_v52  ;;  %v54942_v52 = vmov 0.0   ;;  %v49482_v30 = vand.u32 4294901760, %v2154_v11 }
  0xe6   : > { %v49459_v1 = vpop.permute.xlu1 %12362  ;;  %24528 = vrot.lane.b32.xlu0 %v49017_v3, %s48943_s26 }
  0xe7   : > { %54940 = vst [vmem:[#allocation15_spill] sm:$0xff] %v49459_v1 }
  0xe8   : > { %3942 = vrot.lane.b32.xlu1 %v49368_v31, %s48896_s19  ;;  %v49465_v49 = vpop.permute.xlu0 %12364  ;;  %1610 = vmatmul.mubr.f32.vlgmr.msra.gmra.mrb[0].mxu0 %v49259_v51 }
  0xe9   : > { %54941 = vst [vmem:[#allocation16_spill] sm:$0xff] %v49465_v49  ;;  %2087 = vmatpush1.msra.mxu0 %v49422_v57  ;;  %2150 = vmatprep.mubr.f32.mxu0 %v54942_v52  ;;  %v2172_v49 = vand.u32 4294901760, %v2171_v29 }
  0xea   : > { %v49471_v46 = vpop.permute.xlu1 %12360  ;;  %2167 = vmatprep.subr.mxu0 %v2166_v33  ;;  %4878 = vrot.lane.b32.xlu0 %v49368_v31, %s54751_s5  ;;  %s55089_s5 = smov 108  }
  0xeb   : > { %54943 = vst [vmem:[#allocation17_spill] sm:$0xff] %v49471_v46 }
  0xec   : > { %v49477_v1 = vpop.permute.xlu0 %13294  ;;  %25462 = vrot.lane.b32.xlu1 %v48999_v0, %s48944_s28  ;;  %s48949_s28 = smov 38  }
  0xed   : > { %54944 = vst [vmem:[#allocation18_spill] sm:$0xff] %v49477_v1 }
  0xee   : > { %v49480_v19 = vpop.permute.xlu1 %13298  ;;  %25466 = vrot.lane.b32.xlu0 %v49023_v4, %s48927_s30 }
  0xef   : > { %54945 = vst [vmem:[#allocation19_spill] sm:$0xff] %v49480_v19 }
  0xf0   : > { %v49486_v33 = vpop.permute.xlu0 %13300  ;;  %2156 = vmatmul.mubr.f32.vlgmr.msra.gmra.mrb[0].mxu0 %v49482_v30  ;;  %25468 = vrot.lane.b32.xlu1 %v49014_v2, %s48927_s30 }
  0xf1   : > { %54946 = vst [vmem:[#allocation20_spill] sm:$0xff] %v49486_v33  ;;  %2173 = vmatpush1.msra.mxu0 %v2172_v49  ;;  %2236 = vmatprep.mubr.f32.mxu0 %v54942_v52  ;;  %v3009_v33 = vsel %vm3008_vm5, %v49203_v36, %v49193_v34 }
  0xf2   : > { %2246 = vmatprep.subr.mxu0 %v49408_v12  ;;  %v49493_v29 = vpop.permute.xlu1 %13296  ;;  %25464 = vrot.lane.b32.xlu0 %v49017_v3, %s48927_s30 }
  0xf3   : > { %54947 = vst [vmem:[#allocation21_spill] sm:$0xff] %v49493_v29 }
  0xf4   : > { %v49497_v11 = vpop.permute.xlu0 %14230  ;;  %5814 = vrot.lane.b32.xlu1 %v49368_v31, %s54750_s7  ;;  %s48958_s7 = smov 13  }
  0xf5   : > { %54948 = vst [vmem:[#allocation22_spill] sm:$0xff] %v49497_v11 }
  0xf6   : > { %v49501_v19 = vpop.permute.xlu1 %14234  ;;  %6750 = vrot.lane.b32.xlu0 %v49368_v31, %s48909_s9  ;;  %s48945_s9 = smov 16  }
  0xf7   : > { %54949 = vst [vmem:[#allocation23_spill] sm:$0xff] %v49501_v19 }
  0xf8   : > { %v49505_v49 = vpop.permute.xlu0 %14236  ;;  %2238 = vmatmul.mubr.f32.vlgmr.msra.gmra.mrb[0].mxu0 %v49424_v62  ;;  %26398 = vrot.lane.b32.xlu1 %v48999_v0, %s48945_s9 }
  0xf9   : > { %54950 = vst [vmem:[#allocation24_spill] sm:$0xff] %v49505_v49  ;;  %2249 = vmatpush1.msra.mxu0 %v49436_v44  ;;  %2312 = vmatprep.mubr.f32.mxu0 %v54942_v52  ;;  %v3010_v44 = vsel %vm3008_vm5, %v49193_v34, %v49200_v35  ;;  %v3012_v34 = vsel %vm222_vm0, %v49191_v32, 0 }
  0xfa   : > { %2322 = vmatprep.subr.mxu0 %v49390_v5  ;;  %v49511_v29 = vpop.permute.xlu1 %14232  ;;  %26402 = vrot.lane.b32.xlu0 %v49023_v4, %s48934_s29 }
  0xfb   : > { %54951 = vst [vmem:[#allocation25_spill] sm:$0xff] %v49511_v29  ;;  %v54955_v29 = vand.u32 4294901760, %v49408_v12 }
  0xfc   : > { %v49515_v46 = vpop.permute.xlu0 %15166  ;;  %26404 = vrot.lane.b32.xlu1 %v49014_v2, %s48934_s29 }
  0xfd   : > { %54952 = vst [vmem:[#allocation26_spill] sm:$0xff] %v49515_v46 }
  0xfe   : > { %v49517_v19 = vpop.permute.xlu1 %15170  ;;  %26400 = vrot.lane.b32.xlu0 %v49017_v3, %s48934_s29 }
  0xff   : > { %54953 = vst [vmem:[#allocation27_spill] sm:$0xff] %v49517_v19  ;;  %v3016_v19 = vsel %vm225_vm2, %v3010_v44, 0 }
 0x100   : > { %v49524_v11 = vpop.permute.xlu0 %15172  ;;  %2315 = vmatmul.mubr.f32.vlgmr.msra.gmra.mrb[0].mxu0 %v49441_v48  ;;  %v49538_v1 = vand.u32 4294901760, %v3016_v19  ;;  %7686 = vrot.lane.b32.xlu1 %v49368_v31, %s48911_s11  ;;  %s48946_s11 = smov 12  }
 0x101   : > { %54954 = vst [vmem:[#allocation28_spill] sm:$0xff] %v49524_v11  ;;  %2324 = vmatpush1.msra.mxu0 %v49422_v57  ;;  %2387 = vmatprep.mubr.f32.mxu0 %v54942_v52 }
 0x102   : > { %2400 = vmatprep.subr.mxu0 %v54955_v29  ;;  %v49531_v46 = vpop.permute.xlu1 %15168  ;;  %8622 = vrot.lane.b32.xlu0 %v49368_v31, %s48906_s6  ;;  %v3099_v12 = vsub.f32 %v3016_v19, %v49538_v1  ;;  %v3014_v29 = vsel %vm225_vm2, %v3009_v33, 0 }
 0x103   : > { %54956 = vst [vmem:[#allocation29_spill] sm:$0xff] %v49531_v46 }
 0x104   : > { %v49536_v49 = vpop.permute.xlu0 %16102  ;;  %v3100_v33 = vand.u32 4294901760, %v3099_v12  ;;  %27334 = vrot.lane.b32.xlu1 %v48999_v0, %s48946_s11 }
 0x105   : > { %54957 = vst [vmem:[#allocation30_spill] sm:$0xff] %v49536_v49 }
 0x106   : > { %v49540_v11 = vpop.permute.xlu1 %16106  ;;  %27338 = vrot.lane.b32.xlu0 %v49023_v4, %s48947_s25 }
 0x107   : > { %54958 = vst [vmem:[#allocation31_spill] sm:$0xff] %v49540_v11  ;;  %v49562_v11 = vand.u32 4294901760, %v3012_v34 }
 0x108   : > { %v49545_v59 = vpop.permute.xlu0 %16108  ;;  %2391 = vmatmul.mubr.f32.vlgmr.msra.gmra.mrb[0].mxu0 %v49457_v22  ;;  %27340 = vrot.lane.b32.xlu1 %v49014_v2, %s48947_s25 }
 0x109   : > { %54959 = vst [vmem:[#allocation32_spill] sm:$0xff] %v49545_v59  ;;  %2404 = vmatpush1.msra.mxu0 %v2170_v16  ;;  %2467 = vmatprep.mubr.f32.mxu0 %v54942_v52  ;;  %v49560_v16 = vand.u32 4294901760, %v3014_v29  ;;  %v49575_v32 = vsub.f32 %v3012_v34, %v49562_v11 }
 0x10a   : > { %2476 = vmatprep.subr.mxu0 %v49390_v5  ;;  %v49552_v44 = vpop.permute.xlu1 %16104  ;;  %27336 = vrot.lane.b32.xlu0 %v49017_v3, %s48947_s25 }
 0x10b   : > { %54960 = vst [vmem:[#allocation33_spill] sm:$0xff] %v49552_v44  ;;  %v3105_v44 = vsub.f32 %v3014_v29, %v49560_v16  ;;  %v49585_v29 = vand.u32 4294901760, %v49575_v32 }
 0x10c   : > { %v49558_v36 = vpop.permute.xlu0 %17038  ;;  %9558 = vrot.lane.b32.xlu1 %v49368_v31, %s48914_s14  ;;  %s48951_s14 = smov 37  }
 0x10d   : > { %54961 = vst [vmem:[#allocation34_spill] sm:$0xff] %v49558_v36 }
 0x10e   : > { %v49564_v19 = vpop.permute.xlu1 %17042  ;;  %10494 = vrot.lane.b32.xlu0 %v49368_v31, %s48916_s18  ;;  %s55032_s18 = smov 79  }
 0x10f   : > { %54962 = vst [vmem:[#allocation35_spill] sm:$0xff] %v49564_v19  ;;  %v3101_v19 = vsub.f32 %v3099_v12, %v3100_v33 }
 0x110   : > { %v49568_v5 = vpop.permute.xlu0 %17044  ;;  %2469 = vmatmul.mubr.f32.vlgmr.msra.gmra.mrb[0].mxu0 %v49424_v62 }
 0x111   : > { %54963 = vst [vmem:[#allocation36_spill] sm:$0xff] %v49568_v5  ;;  %2478 = vmatpush1.msra.mxu0 %v49422_v57  ;;  %2541 = vmatprep.mubr.f32.mxu0 %v54942_v52  ;;  %v3106_v5 = vand.u32 4294901760, %v3105_v44  ;;  %v3102_v49 = vand.u32 4294901760, %v3101_v19 }
 0x112   : > { %v49577_v46 = vpop.permute.xlu1 %17040  ;;  %3021 = vmatprep.subr.mxu0 %v49538_v1  ;;  %28274 = vrot.lane.b32.xlu0 %v49023_v4, %s48949_s28 }
 0x113   : > { %54964 = vst [vmem:[#allocation37_spill] sm:$0xff] %v49577_v46  ;;  %v3107_v34 = vsub.f32 %v3105_v44, %v3106_v5 }
 0x114   : > { %v49582_v36 = vpop.permute.xlu0 %17974 }
 0x115   : > { %54965 = vst [vmem:[#allocation38_spill] sm:$0xff] %v49582_v36  ;;  %v3090_v36 = vsub.f32 %v49575_v32, %v49585_v29  ;;  %v3108_v28 = vand.u32 4294901760, %v3107_v34  ;;  %v3946_v34 = vsel %vm54782_vm6, %v49212_v38, %v49219_v39 }
 0x116   : > { %v49587_v57 = vpop.permute.xlu1 %17978 }
 0x117   : > { %54966 = vst [vmem:[#allocation39_spill] sm:$0xff] %v49587_v57  ;;  %v49602_v19 = vand.u32 4294901760, %v3090_v36 }
 0x118   : > { %v49589_v59 = vpop.permute.xlu0 %17980  ;;  %2543 = vmatmul.mubr.f32.vlgmr.msra.gmra.mrb[0].mxu0 %v49424_v62 }
 0x119   : > { %54967 = vst [vmem:[#allocation40_spill] sm:$0xff] %v49589_v59  ;;  %3023 = vmatpush1.msra.mxu0 %v49560_v16  ;;  %3086 = vmatprep.mubr.f32.mxu0 %v54942_v52 }
 0x11a   : > { %v49594_v46 = vpop.permute.xlu1 %17976  ;;  %3103 = vmatprep.subr.mxu0 %v3102_v49 }
 0x11b   : > { %54968 = vst [vmem:[#allocation41_spill] sm:$0xff] %v49594_v46 }
 0x11c   : > { %v49598_v54 = vpop.permute.xlu0 %18910 }
 0x11d   : > { %54969 = vst [vmem:[#allocation42_spill] sm:$0xff] %v49598_v54 }
 0x11e   : > { %v49600_v57 = vpop.permute.xlu1 %18914 }
 0x11f   : > { %54970 = vst [vmem:[#allocation43_spill] sm:$0xff] %v49600_v57  ;;  %v3945_v57 = vsel %vm54782_vm6, %v49223_v40, %v49212_v38 }
 0x120   : > { %v49604_v59 = vpop.permute.xlu0 %18916  ;;  %3092 = vmatmul.mubr.f32.vlgmr.msra.gmra.mrb[0].mxu0 %v49602_v19 }
 0x121   : > { %3109 = vmatpush1.msra.mxu0 %v3108_v28  ;;  %3172 = vmatprep.mubr.f32.mxu0 %v54942_v52 }
 0x122   : > { %3182 = vmatprep.subr.mxu0 %v3099_v12  ;;  %v49608_v46 = vpop.permute.xlu1 %18912 }
 0x123   : > { %54971 = vst [vmem:[#allocation44_spill] sm:$0xff] %v49608_v46 }
 0x124   : > { %v49610_v49 = vpop.permute.xlu0 %19846 }
 0x125   : > { %54972 = vst [vmem:[#allocation45_spill] sm:$0xff] %v49610_v49  ;;  %v1149_v49 = vsel %vm225_vm2, %v49014_v2, 0 }
 0x126   : > { %v49612_v27 = vpop.permute.xlu1 %19850 }
 0x127   : > { %54973 = vst [vmem:[#allocation46_spill] sm:$0xff] %v49612_v27 }
 0x128   : > { %v49614_v54 = vpop.permute.xlu0 %19852  ;;  %3174 = vmatmul.mubr.f32.vlgmr.msra.gmra.mrb[0].mxu0 %v49562_v11 }
 0x129   : > { %54974 = vst [vmem:[#allocation47_spill] sm:$0xff] %v49614_v54  ;;  %3185 = vmatpush1.msra.mxu0 %v3105_v44  ;;  %3248 = vmatprep.mubr.f32.mxu0 %v54942_v52  ;;  %v3952_v44 = vsel %vm225_vm2, %v3946_v34, 0 }
 0x12a   : > { %3258 = vmatprep.subr.mxu0 %v49538_v1  ;;  %v49621_v28 = vpop.permute.xlu1 %19848 }
 0x12b   : > { %54976 = vst [vmem:[#allocation49_spill] sm:$0xff] %v49621_v28  ;;  %v49636_v28 = vand.u32 4294901760, %v3952_v44 }
 0x12c   : > { %v49619_v36 = vpop.permute.xlu0 %20782 }
 0x12d   : > { %54975 = vst [vmem:[#allocation48_spill] sm:$0xff] %v49619_v36  ;;  %54980 = vst [vmem:[#allocation53_spill] sm:$0xff] %v49636_v28 }
 0x12e   : > { %v49632_v27 = vpop.permute.xlu1 %20786 }
 0x12f   : > { %54978 = vst [vmem:[#allocation51_spill] sm:$0xff] %v49632_v27  ;;  %v3948_v27 = vsel %vm222_vm0, %v49210_v37, 0 }
 0x130   : > { %v49623_v12 = vpop.permute.xlu0 %20788  ;;  %3251 = vmatmul.mubr.f32.vlgmr.msra.gmra.mrb[0].mxu0 %v49575_v32 }
 0x131   : > { %54977 = vst [vmem:[#allocation50_spill] sm:$0xff] %v49623_v12  ;;  %3260 = vmatpush1.msra.mxu0 %v49560_v16  ;;  %3323 = vmatprep.mubr.f32.mxu0 %v54942_v52 }
 0x132   : > { %3336 = vmatprep.subr.mxu0 %v3100_v33  ;;  %v3950_v33 = vsel %vm225_vm2, %v3945_v57, 0  ;;  %v49646_v34 = vpop.permute.xlu1 %20784 }
 0x133   : > { %54982 = vst [vmem:[#allocation55_spill] sm:$0xff] %v49646_v34  ;;  %v49658_v40 = vand.u32 4294901760, %v3950_v33 }
 0x134   : > { %v49634_v46 = vpop.permute.xlu0 %21718 }
 0x135   : > { %54979 = vst [vmem:[#allocation52_spill] sm:$0xff] %v49634_v46  ;;  %v49652_v46 = vsub.f32 %v3952_v44, %v49636_v28  ;;  %v49675_v0 = vsub.f32 %v3950_v33, %v49658_v40 }
 0x136   : > { %v49669_v37 = vpop.permute.xlu1 %21722 }
 0x137   : > { %54983 = vst [vmem:[#allocation56_spill] sm:$0xff] %v49652_v46  ;;  %54986 = vst [vmem:[#allocation59_spill] sm:$0xff] %v49669_v37  ;;  %v54699_v34 = vand.u32 4294901760, %v49675_v0 }
 0x138   : > { %v49641_v36 = vpop.permute.xlu0 %21724  ;;  %3327 = vmatmul.mubr.f32.vlgmr.msra.gmra.mrb[0].mxu0 %v49585_v29 }
 0x139   : > { %54981 = vst [vmem:[#allocation54_spill] sm:$0xff] %v49641_v36  ;;  %3340 = vmatpush1.msra.mxu0 %v3106_v5  ;;  %3403 = vmatprep.mubr.f32.mxu0 %v54942_v52  ;;  %v49662_v5 = vand.u32 4294901760, %v3948_v27 }
 0x13a   : > { %3412 = vmatprep.subr.mxu0 %v49538_v1  ;;  %v49665_v1 = vand.u32 4294901760, %v49652_v46 }
 0x13b   : > { %v49680_v44 = vsub.f32 %v3948_v27, %v49662_v5 }
 0x13c   : > { %v49656_v38 = vpop.permute.xlu0 %22654  ;;  %54985 = vst [vmem:[#allocation58_spill] sm:$0xff] %v49665_v1  ;;  %v4037_v37 = vsub.f32 %v49652_v46, %v49665_v1 }
 0x13d   : > { %54984 = vst [vmem:[#allocation57_spill] sm:$0xff] %v49656_v38  ;;  %v49693_v27 = vand.u32 4294901760, %v49680_v44  ;;  %v49695_v38 = vpop.permute.xlu1 %21720 }
 0x13e   : > { %54988 = vst [vmem:[#allocation61_spill] sm:$0xff] %v49695_v38  ;;  %v49700_v36 = vand.u32 4294901760, %v4037_v37 }
 0x140   : > { %v49671_v57 = vpop.permute.xlu0 %22660  ;;  %3405 = vmatmul.mubr.f32.vlgmr.msra.gmra.mrb[0].mxu0 %v49562_v11  ;;  %54989 = vst [vmem:[#allocation62_spill] sm:$0xff] %v49700_v36 }
 0x141   : > { %54987 = vst [vmem:[#allocation60_spill] sm:$0xff] %v49671_v57  ;;  %3414 = vmatpush1.msra.mxu0 %v49560_v16  ;;  %3477 = vmatprep.mubr.f32.mxu0 %v54942_v52  ;;  %v49713_v37 = vpop.permute.xlu1 %22658 }
 0x142   : > { %3957 = vmatprep.subr.mxu0 %v49636_v28  ;;  %54990 = vst [vmem:[#allocation63_spill] sm:$0xff] %v49713_v37 }
 0x144   : > { %v217_v33 = vpop.permute.xlu0 %216 }
 0x145   : > { %v221_v16 = vsel %vm218_vm1, %v49143_v9, %v217_v33  ;;  %v4043_v9 = vsub.f32 %v49675_v0, %v54699_v34  ;;  %v4026_v33 = vsub.f32 %v49680_v44, %v49693_v27  ;;  %vm12368_vm1 = vcmask 818176  }
 0x146   : > { %v230_v57 = vsel %vm225_vm2, %v221_v16, 0 }
 0x147   : > { %v698_v3 = vand.u32 4294901760, %v230_v57  ;;  %v49717_v34 = vand.u32 4294901760, %v4026_v33 }
 0x148   : > { %3479 = vmatmul.mubr.f32.vlgmr.msra.gmra.mrb[0].mxu0 %v49562_v11 }
 0x149   : > { %v775_v12 = vsub.f32 %v230_v57, %v698_v3  ;;  %46742 = vmatpush3.msra.mxu1 %v698_v3  ;;  %3959 = vmatpush1.msra.mxu0 %v49658_v40  ;;  %v4044_v57 = vand.u32 4294901760, %v4043_v9  ;;  %v49729_v9 = vand.u32 4294901760, %v1149_v49 }
 0x14a   : > { %46744 = vmatmul.mubr.f32.vlgmr.msra.gmra.mrb[0].mxu1 %v49175_v23  ;;  %4022 = vmatprep.mubr.f32.mxu0 %v54942_v52 }
 0x14b   : > { %v776_v16 = vand.u32 4294901760, %v775_v12  ;;  %4039 = vmatprep.subr.mxu0 %v49700_v36  ;;  %46746 = vmatprep.subr.mxu1 %v54942_v52  ;;  %v49722_v36 = vpop.permute.xlu1 %22656  ;;  %v49737_v2 = vsub.f32 %v1149_v49, %v49729_v9 }
 0x14c   : > { %46748 = vmatprep.mubr.msk.f32.mxu1 %vm48938_vm3, %v54942_v52  ;;  %54991 = vst [vmem:[#allocation64_spill] sm:$0xff] %v49722_v36  ;;  %v55092_v36 = vld [vmem:[#allocation11_spill] sm:$0xff] }
 0x14d   : > { %v777_v38 = vsub.f32 %v775_v12, %v776_v16 }
 0x14f   : > { %v778_v23 = vand.u32 4294901760, %v777_v38  ;;  %v49739_v38 = vpop.permute.xlu1 %23590 }
 0x150   : > { %4028 = vmatmul.mubr.f32.vlgmr.msra.gmra.mrb[0].mxu0 %v49717_v34 }
 0x151   : > { %4045 = vmatpush1.msra.mxu0 %v4044_v57  ;;  %46747 = vmatpush3.msra.mxu1 %v778_v23  ;;  %v4881_v23 = vsel %vm54775_vm7, %v49247_v47, %v49232_v43  ;;  %v4884_v47 = vsel %vm222_vm0, %v49230_v42, 0 }
 0x152   : > { %4118 = vmatprep.subr.mxu0 %v49652_v46  ;;  %46749 = vmatmul.mubr.f32.vlgmr.msra.gmra.mrb[2].mxu1 %v49134_v7  ;;  %v49813_v42 = vand.u32 4294901760, %v4884_v47 }
 0x153   : > { %46751 = vmatprep.subr.mxu1 %v54942_v52  ;;  %46753 = vmatprep.mubr.msk.f32.mxu1 %vm48938_vm3, %v54942_v52  ;;  %v49751_v49 = vpop.permute.xlu1 %23596 }
 0x154   : > { %46752 = vmatpush3.msra.mxu1 %v775_v12  ;;  %4108 = vmatprep.mubr.f32.mxu0 %v54942_v52  ;;  %v4882_v12 = vsel %vm54775_vm7, %v49232_v43, %v49241_v45  ;;  %v4886_v43 = vsel %vm225_vm2, %v4881_v23, 0 }
 0x155   : > { %46756 = vmatprep.subr.mxu1 %v54942_v52 }
 0x156   : > { %46754 = vmatmul.mubr.f32.vlgmr.msra.gmra.mrb[4].mxu1 %v49139_v8  ;;  %v1695_v8 = vand.u32 4294901760, %v49737_v2 }
 0x157   : > { %46757 = vmatpush3.msra.mxu1 %v698_v3  ;;  %46758 = vmatprep.mubr.msk.f32.mxu1 %vm48938_vm3, %v54942_v52 }
 0x158   : > { %4110 = vmatmul.mubr.f32.vlgmr.msra.gmra.mrb[0].mxu0 %v49662_v5  ;;  %46761 = vmatprep.subr.mxu1 %v54942_v52 }
 0x159   : > { %4121 = vmatpush1.msra.mxu0 %v49675_v0  ;;  %4184 = vmatprep.mubr.f32.mxu0 %v54942_v52 }
 0x15a   : > { %4194 = vmatprep.subr.mxu0 %v49636_v28  ;;  %46759 = vmatmul.mubr.f32.vlgmr.msra.gmra.mrb[6].mxu1 %v49148_v10  ;;  %v1696_v10 = vsub.f32 %v49737_v2, %v1695_v8 }
 0x15b   : > { %46762 = vmatpush3.msra.mxu1 %v776_v16  ;;  %46763 = vmatprep.mubr.msk.f32.mxu1 %vm48938_vm3, %v54942_v52  ;;  %v2071_v16 = vpop.permute.xlu1 %2070 }
 0x15c   : > { %46766 = vmatprep.subr.mxu1 %v54942_v52  ;;  %v1697_v33 = vand.u32 4294901760, %v1696_v10  ;;  %v54993_v10 = vand.u32 4294901760, %v49675_v0  ;;  %v49804_v0 = vld [vmem:[%s54648_s1] sm:$0xff] }
 0x15d   : > { %28270 = vrot.lane.b32.xlu1 %v49804_v0, %s48948_s24  ;;  %s55033_s24 = smov 120  }
 0x15e   : > { %46764 = vmatmul.mubr.f32.vlgmr.msra.gmra.mrb[8].mxu1 %v49134_v7 }
 0x15f   : > { %46767 = vmatpush3.msra.mxu1 %v698_v3  ;;  %46768 = vmatprep.mubr.msk.f32.mxu1 %vm48938_vm3, %v54942_v52  ;;  %v4888_v3 = vsel %vm225_vm2, %v4882_v12, 0  ;;  %v49807_v12 = vand.u32 4294901760, %v4886_v43 }
 0x160   : > { %4187 = vmatmul.mubr.f32.vlgmr.msra.gmra.mrb[0].mxu0 %v49680_v44  ;;  %46771 = vmatprep.subr.mxu1 %v54942_v52  ;;  %v49773_v57 = vand.u32 4294901760, %v4888_v3 }
 0x161   : > { %4196 = vmatpush1.msra.mxu0 %v49658_v40  ;;  %4259 = vmatprep.mubr.f32.mxu0 %v54942_v52  ;;  %v49827_v23 = vsub.f32 %v4886_v43, %v49807_v12 }
 0x162   : > { %4272 = vmatprep.subr.mxu0 %v49665_v1  ;;  %46769 = vmatmul.mubr.f32.vlgmr.msra.gmra.mrb[10].mxu1 %v49134_v7  ;;  %54992 = vst [vmem:[#allocation65_spill] sm:$0xff] %v49773_v57  ;;  %v2075_v7 = vsel %vm2072_vm4, %v49182_v26, %v2071_v16  ;;  %v49822_v16 = vpop.permute.xlu0 %23594  ;;  %vm13304_vm4 = vcmask 687104  }
 0x163   : > { %46772 = vmatpush3.msra.mxu1 %v49729_v9  ;;  %46773 = vmatprep.mubr.msk.f32.mxu1 %vm48938_vm3, %v54942_v52  ;;  %v2082_v26 = vsel %vm225_vm2, %v2075_v7, 0  ;;  %54996 = vst [vmem:[#allocation68_spill] sm:$0xff] %v49822_v16  ;;  %v49835_v7 = vsub.f32 %v4884_v47, %v49813_v42  ;;  %v54999_v1 = vand.u32 4294901760, %v49827_v23 }
 0x164   : > { %46776 = vmatprep.subr.mxu1 %v54942_v52 }
 0x166   : > { %46774 = vmatmul.mubr.f32.vlgmr.msra.gmra.mrb[12].mxu1 %v49320_v15  ;;  %v49789_v15 = vsub.f32 %v4888_v3, %v49773_v57  ;;  %v49809_v3 = vand.u32 4294901760, %v2082_v26 }
 0x167   : > { %46777 = vmatpush3.msra.mxu1 %v1697_v33  ;;  %46778 = vmatprep.mubr.msk.f32.mxu1 %vm48938_vm3, %v54942_v52 }
 0x168   : > { %4263 = vmatmul.mubr.f32.vlgmr.msra.gmra.mrb[0].mxu0 %v49693_v27  ;;  %46781 = vmatprep.subr.mxu1 %v54942_v52  ;;  %54994 = vst [vmem:[#allocation66_spill] sm:$0xff] %v49789_v15  ;;  %v49817_v33 = vand.u32 4294901760, %v49789_v15 }
 0x169   : > { %4276 = vmatpush1.msra.mxu0 %v54993_v10  ;;  %4339 = vmatprep.mubr.f32.mxu0 %v54942_v52 }
 0x16a   : > { %4348 = vmatprep.subr.mxu0 %v49636_v28  ;;  %46779 = vmatmul.mubr.f32.vlgmr.msra.gmra.mrb[14].mxu1 %v49259_v51  ;;  %54995 = vst [vmem:[#allocation67_spill] sm:$0xff] %v49817_v33  ;;  %v4973_v10 = vsub.f32 %v49789_v15, %v49817_v33 }
 0x16b   : > { %46782 = vmatpush3.msra.mxu1 %v49737_v2  ;;  %46783 = vmatprep.mubr.msk.f32.mxu1 %vm48938_vm3, %v54942_v52  ;;  %v49859_v2 = vand.u32 4294901760, %v49835_v7 }
 0x16c   : > { %46786 = vmatprep.subr.mxu1 %v54942_v52  ;;  %v49864_v47 = vand.u32 4294901760, %v4973_v10  ;;  %v4979_v10 = vsub.f32 %v49827_v23, %v54999_v1 }
 0x16e   : > { %46784 = vmatmul.mubr.f32.vlgmr.msra.gmra.mrb[16].mxu1 %v49274_v56  ;;  %v49830_v56 = vsub.f32 %v2082_v26, %v49809_v3  ;;  %v49854_v26 = vld [vmem:[%s49011_s23] sm:$0xff]  ;;  %54998 = vst [vmem:[#allocation70_spill] sm:$0xff] %v49864_v47  ;;  %v4980_v1 = vand.u32 4294901760, %v4979_v10 }
 0x16f   : > { %46787 = vmatpush3.msra.mxu1 %v49729_v9  ;;  %46788 = vmatprep.mubr.msk.f32.mxu1 %vm48938_vm3, %v54942_v52 }
 0x170   : > { %4341 = vmatmul.mubr.f32.vlgmr.msra.gmra.mrb[0].mxu0 %v49662_v5  ;;  %46791 = vmatprep.subr.mxu1 %v54942_v52  ;;  %v2628_v43 = vand.u32 4294901760, %v49830_v56 }
 0x171   : > { %4350 = vmatpush1.msra.mxu0 %v49658_v40  ;;  %4413 = vmatprep.mubr.f32.mxu0 %v54942_v52  ;;  %v49847_v40 = vld [vmem:[%s49011_s23 + $0x8] sm:$0xff] }
 0x172   : > { %46789 = vmatmul.mubr.f32.vlgmr.msra.gmra.mrb[18].mxu1 %v49293_v61  ;;  %4893 = vmatprep.subr.mxu0 %v49773_v57  ;;  %v2629_v61 = vsub.f32 %v49830_v56, %v2628_v43 }
 0x173   : > { %46792 = vmatpush3.msra.mxu1 %v1695_v8  ;;  %46793 = vmatprep.mubr.msk.f32.mxu1 %vm48938_vm3, %v54942_v52  ;;  %v49861_v8 = vpop.permute.xlu0 %23592 }
 0x174   : > { %46796 = vmatprep.subr.mxu1 %v54942_v52  ;;  %28276 = vrot.lane.b32.xlu1 %v49847_v40, %s48949_s28  ;;  %54997 = vst [vmem:[#allocation69_spill] sm:$0xff] %v49861_v8  ;;  %v2630_v28 = vand.u32 4294901760, %v2629_v61 }
 0x175   : > { %28272 = vrot.lane.b32.xlu0 %v49854_v26, %s48949_s28 }
 0x176   : > { %46794 = vmatmul.mubr.f32.vlgmr.msra.gmra.mrb[20].mxu1 %v49259_v51 }
 0x177   : > { %46797 = vmatpush3.msra.mxu1 %v49729_v9  ;;  %46798 = vmatprep.mubr.msk.f32.mxu1 %vm48938_vm3, %v54942_v52  ;;  %v4962_v9 = vsub.f32 %v49835_v7, %v49859_v2  ;;  %v3007_v46 = vpop.permute.xlu0 %3006 }
 0x178   : > { %4415 = vmatmul.mubr.f32.vlgmr.msra.gmra.mrb[0].mxu0 %v49662_v5  ;;  %46801 = vmatprep.subr.mxu1 %v54942_v52 }
 0x179   : > { %4895 = vmatpush1.msra.mxu0 %v49807_v12  ;;  %4958 = vmatprep.mubr.f32.mxu0 %v54942_v52 }
 0x17a   : > { %46799 = vmatmul.mubr.f32.vlgmr.msra.gmra.mrb[22].mxu1 %v49259_v51  ;;  %4975 = vmatprep.subr.mxu0 %v49864_v47  ;;  %v49890_v51 = vand.u32 4294901760, %v4962_v9  ;;  %v3011_v47 = vsel %vm3008_vm5, %v49200_v35, %v3007_v46  ;;  %vm31087_vm5 = vcmask 285696  }
 0x17b   : > { %46802 = vmatpush3.msra.mxu1 %v49809_v3  ;;  %46803 = vmatprep.mubr.msk.f32.mxu1 %vm48938_vm3, %v54942_v52  ;;  %v3018_v61 = vsel %vm225_vm2, %v3011_v47, 0 }
 0x17c   : > { %46806 = vmatprep.subr.mxu1 %v54942_v52  ;;  %11430 = vrot.lane.b32.xlu1 %v49368_v31, %s48918_s21  ;;  %v49906_v35 = vand.u32 4294901760, %v3018_v61  ;;  %s48950_s21 = smov 4  }
 0x17d   : > { %12366 = vrot.lane.b32.xlu0 %v49368_v31, %s48908_s8 }
 0x17e   : > { %46804 = vmatmul.mubr.f32.vlgmr.msra.gmra.mrb[24].mxu1 %v49482_v30  ;;  %v49912_v30 = vpop.permute.xlu1 %24526  ;;  %v49917_v46 = vsub.f32 %v3018_v61, %v49906_v35 }
 0x17f   : > { %46807 = vmatpush3.msra.mxu1 %v2630_v28  ;;  %46808 = vmatprep.mubr.msk.f32.mxu1 %vm48938_vm3, %v54942_v52 }
 0x180   : > { %4964 = vmatmul.mubr.f32.vlgmr.msra.gmra.mrb[0].mxu0 %v49890_v51  ;;  %46811 = vmatprep.subr.mxu1 %v54942_v52 }
 0x181   : > { %4981 = vmatpush1.msra.mxu0 %v4980_v1  ;;  %5044 = vmatprep.mubr.f32.mxu0 %v54942_v52  ;;  %v55002_v1 = vand.u32 4294901760, %v49827_v23 }
 0x182   : > { %5054 = vmatprep.subr.mxu0 %v49789_v15  ;;  %46809 = vmatmul.mubr.f32.vlgmr.msra.gmra.mrb[26].mxu1 %v49424_v62  ;;  %v49927_v28 = vpop.permute.xlu1 %24532 }
 0x183   : > { %46812 = vmatpush3.msra.mxu1 %v49830_v56  ;;  %46813 = vmatprep.mubr.msk.f32.mxu1 %vm48938_vm3, %v54942_v52 }
 0x184   : > { %46816 = vmatprep.subr.mxu1 %v54942_v52  ;;  %29206 = vrot.lane.b32.xlu1 %v49804_v0, %s48950_s21  ;;  %v49995_v0 = vpop.permute.xlu0 %24530  ;;  %s48953_s21 = smov 34  }
 0x185   : > { %29210 = vrot.lane.b32.xlu0 %v49023_v4, %s48951_s14  ;;  %55006 = vst [vmem:[#allocation76_spill] sm:$0xff] %v49995_v0 }
 0x186   : > { %46814 = vmatmul.mubr.f32.vlgmr.msra.gmra.mrb[28].mxu1 %v49441_v48  ;;  %v3564_v48 = vand.u32 4294901760, %v49917_v46 }
 0x187   : > { %46817 = vmatpush3.msra.mxu1 %v49809_v3  ;;  %46818 = vmatprep.mubr.msk.f32.mxu1 %vm48938_vm3, %v54942_v52 }
 0x188   : > { %5046 = vmatmul.mubr.f32.vlgmr.msra.gmra.mrb[0].mxu0 %v49813_v42  ;;  %46821 = vmatprep.subr.mxu1 %v54942_v52  ;;  %v3565_v56 = vsub.f32 %v49917_v46, %v3564_v48 }
 0x189   : > { %5057 = vmatpush1.msra.mxu0 %v49827_v23  ;;  %5120 = vmatprep.mubr.f32.mxu0 %v54942_v52 }
 0x18a   : > { %5130 = vmatprep.subr.mxu0 %v49773_v57  ;;  %46819 = vmatmul.mubr.f32.vlgmr.msra.gmra.mrb[30].mxu1 %v49457_v22  ;;  %v5818_v22 = vsel %vm54772_vm8, %v49263_v53, %v49271_v55  ;;  %v3566_v47 = vand.u32 4294901760, %v3565_v56 }
 0x18b   : > { %46822 = vmatpush3.msra.mxu1 %v2628_v43  ;;  %46823 = vmatprep.mubr.msk.f32.mxu1 %vm48938_vm3, %v54942_v52  ;;  %v49947_v43 = vpop.permute.xlu1 %3942 }
 0x18c   : > { %46826 = vmatprep.subr.mxu1 %v54942_v52  ;;  %55000 = vst [vmem:[#allocation71_spill] sm:$0xff] %v49947_v43  ;;  %v3947_v9 = vsel %vm54782_vm6, %v49219_v39, %v49947_v43  ;;  %29212 = vrot.lane.b32.xlu1 %v49847_v40, %s48951_s14  ;;  %vm20792_vm6 = vcmask 498688  }
 0x18d   : > { %v3954_v39 = vsel %vm225_vm2, %v3947_v9, 0  ;;  %29208 = vrot.lane.b32.xlu0 %v49854_v26, %s48951_s14 }
 0x18e   : > { %46824 = vmatmul.mubr.f32.vlgmr.msra.gmra.mrb[32].mxu1 %v49424_v62  ;;  %v49982_v61 = vand.u32 4294901760, %v3954_v39 }
 0x18f   : > { %46827 = vmatpush3.msra.mxu1 %v49809_v3  ;;  %46828 = vmatprep.mubr.msk.f32.mxu1 %vm48938_vm3, %v54942_v52  ;;  %v5824_v3 = vsel %vm225_vm2, %v5818_v22, 0 }
 0x190   : > { %5123 = vmatmul.mubr.f32.vlgmr.msra.gmra.mrb[0].mxu0 %v49835_v7  ;;  %46831 = vmatprep.subr.mxu1 %v54942_v52  ;;  %v49950_v10 = vand.u32 4294901760, %v5824_v3  ;;  %55004 = vst [vmem:[#allocation74_spill] sm:$0xff] %v49982_v61 }
 0x191   : > { %5132 = vmatpush1.msra.mxu0 %v49807_v12  ;;  %5195 = vmatprep.mubr.f32.mxu0 %v54942_v52 }
 0x192   : > { %5208 = vmatprep.subr.mxu0 %v49817_v33  ;;  %46829 = vmatmul.mubr.f32.vlgmr.msra.gmra.mrb[34].mxu1 %v49424_v62  ;;  %55001 = vst [vmem:[#allocation72_spill] sm:$0xff] %v49950_v10  ;;  %v5817_v62 = vsel %vm54772_vm8, %v49281_v58, %v49263_v53  ;;  %v5820_v58 = vsel %vm222_vm0, %v49257_v50, 0 }
 0x193   : > { %46832 = vmatpush3.msra.mxu1 %v49906_v35  ;;  %46833 = vmatprep.mubr.msk.f32.mxu1 %vm48938_vm3, %v54942_v52  ;;  %v5822_v53 = vsel %vm225_vm2, %v5817_v62, 0  ;;  %v49984_v22 = vand.u32 4294901760, %v5820_v58 }
 0x194   : > { %46836 = vmatprep.subr.mxu1 %v54942_v52  ;;  %v49980_v23 = vand.u32 4294901760, %v5822_v53  ;;  %13302 = vrot.lane.b32.xlu1 %v49368_v31, %s48915_s17 }
 0x195   : > { %v50008_v56 = vsub.f32 %v5820_v58, %v49984_v22  ;;  %14238 = vrot.lane.b32.xlu0 %v49368_v31, %s48922_s13  ;;  %s48952_s13 = smov 35  }
 0x196   : > { %46834 = vmatmul.mubr.f32.vlgmr.msra.gmra.mrb[36].mxu1 %v49602_v19  ;;  %v49967_v19 = vsub.f32 %v5824_v3, %v49950_v10 }
 0x197   : > { %46837 = vmatpush3.msra.mxu1 %v3566_v47  ;;  %46838 = vmatprep.mubr.msk.f32.mxu1 %vm48938_vm3, %v54942_v52 }
 0x198   : > { %5199 = vmatmul.mubr.f32.vlgmr.msra.gmra.mrb[0].mxu0 %v49859_v2  ;;  %46841 = vmatprep.subr.mxu1 %v54942_v52  ;;  %55003 = vst [vmem:[#allocation73_spill] sm:$0xff] %v49967_v19  ;;  %v49988_v50 = vand.u32 4294901760, %v49967_v19 }
 0x199   : > { %5212 = vmatpush1.msra.mxu0 %v55002_v1  ;;  %5275 = vmatprep.mubr.f32.mxu0 %v54942_v52 }
 0x19a   : > { %5284 = vmatprep.subr.mxu0 %v49773_v57  ;;  %46839 = vmatmul.mubr.f32.vlgmr.msra.gmra.mrb[38].mxu1 %v49562_v11  ;;  %55005 = vst [vmem:[#allocation75_spill] sm:$0xff] %v49988_v50  ;;  %v5909_v3 = vsub.f32 %v49967_v19, %v49988_v50 }
 0x19b   : > { %46842 = vmatpush3.msra.mxu1 %v49917_v46  ;;  %46843 = vmatprep.mubr.msk.f32.mxu1 %vm48938_vm3, %v54942_v52  ;;  %v50003_v46 = vsub.f32 %v3954_v39, %v49982_v61 }
 0x19c   : > { %46846 = vmatprep.subr.mxu1 %v54942_v52  ;;  %v50031_v62 = vand.u32 4294901760, %v5909_v3  ;;  %30146 = vrot.lane.b32.xlu0 %v49847_v40, %s48936_s27 }
 0x19d   : > { %55007 = vst [vmem:[#allocation77_spill] sm:$0xff] %v50003_v46  ;;  %v50021_v47 = vand.u32 4294901760, %v50003_v46  ;;  %30144 = vrot.lane.b32.xlu1 %v49023_v4, %s48936_s27 }
 0x19e   : > { %46844 = vmatmul.mubr.f32.vlgmr.msra.gmra.mrb[40].mxu1 %v49575_v32  ;;  %v50000_v32 = vsub.f32 %v5822_v53, %v49980_v23  ;;  %55010 = vst [vmem:[#allocation80_spill] sm:$0xff] %v50031_v62 }
 0x19f   : > { %46847 = vmatpush3.msra.mxu1 %v49906_v35  ;;  %46848 = vmatprep.mubr.msk.f32.mxu1 %vm48938_vm3, %v54942_v52  ;;  %55008 = vst [vmem:[#allocation78_spill] sm:$0xff] %v50021_v47  ;;  %v4501_v9 = vsub.f32 %v50003_v46, %v50021_v47 }
 0x1a0   : > { %5277 = vmatmul.mubr.f32.vlgmr.msra.gmra.mrb[0].mxu0 %v49813_v42  ;;  %46851 = vmatprep.subr.mxu1 %v54942_v52 }
 0x1a1   : > { %5286 = vmatpush1.msra.mxu0 %v49807_v12  ;;  %5349 = vmatprep.mubr.f32.mxu0 %v54942_v52  ;;  %v54706_v12 = vand.u32 4294901760, %v50000_v32  ;;  %v50057_v39 = vand.u32 4294901760, %v4501_v9  ;;  %v50090_v9 = vpop.permute.xlu1 %25462 }
 0x1a2   : > { %46849 = vmatmul.mubr.f32.vlgmr.msra.gmra.mrb[42].mxu1 %v49585_v29  ;;  %5829 = vmatprep.subr.mxu0 %v49950_v10  ;;  %v50026_v29 = vand.u32 4294901760, %v50008_v56 }
 0x1a3   : > { %46852 = vmatpush3.msra.mxu1 %v3564_v48  ;;  %46853 = vmatprep.mubr.msk.f32.mxu1 %vm48938_vm3, %v54942_v52  ;;  %v50028_v48 = vpop.permute.xlu0 %24528  ;;  %v5915_v1 = vsub.f32 %v50000_v32, %v54706_v12  ;;  %55012 = vst [vmem:[#allocation82_spill] sm:$0xff] %v50057_v39 }
 0x1a4   : > { %46856 = vmatprep.subr.mxu1 %v54942_v52  ;;  %55009 = vst [vmem:[#allocation79_spill] sm:$0xff] %v50028_v48  ;;  %15174 = vrot.lane.b32.xlu0 %v49368_v31, %s48924_s12  ;;  %s55050_s12 = smov 62  }
 0x1a5   : > { %30142 = vrot.lane.b32.xlu1 %v49854_v26, %s48936_s27 }
 0x1a6   : > { %46854 = vmatmul.mubr.f32.vlgmr.msra.gmra.mrb[44].mxu1 %v49562_v11 }
 0x1a7   : > { %46857 = vmatpush3.msra.mxu1 %v49906_v35  ;;  %46858 = vmatprep.mubr.msk.f32.mxu1 %vm48938_vm3, %v54942_v52  ;;  %v5898_v35 = vsub.f32 %v50008_v56, %v50026_v29  ;;  %v50052_v53 = vpop.permute.xlu0 %4878 }
 0x1a8   : > { %5351 = vmatmul.mubr.f32.vlgmr.msra.gmra.mrb[0].mxu0 %v49813_v42  ;;  %46861 = vmatprep.subr.mxu1 %v54942_v52  ;;  %55011 = vst [vmem:[#allocation81_spill] sm:$0xff] %v50052_v53  ;;  %v4883_v3 = vsel %vm54775_vm7, %v49241_v45, %v50052_v53  ;;  %v55077_v53 = vld [vmem:[#allocation9_spill] sm:$0xff]  ;;  %vm54786_vm7 = vcmask 138240  }
 0x1a9   : > { %5831 = vmatpush1.msra.mxu0 %v49980_v23  ;;  %5894 = vmatprep.mubr.f32.mxu0 %v54942_v52  ;;  %v50062_v58 = vand.u32 4294901760, %v5898_v35  ;;  %v50112_v35 = vpop.permute.xlu1 %25468 }
 0x1aa   : > { %46859 = vmatmul.mubr.f32.vlgmr.msra.gmra.mrb[46].mxu1 %v49562_v11  ;;  %5911 = vmatprep.subr.mxu0 %v50031_v62  ;;  %v5916_v11 = vand.u32 4294901760, %v5915_v1  ;;  %55016 = vst [vmem:[#allocation86_spill] sm:$0xff] %v50112_v35 }
 0x1ab   : > { %46862 = vmatpush3.msra.mxu1 %v49982_v61  ;;  %46863 = vmatprep.mubr.msk.f32.mxu1 %vm48938_vm3, %v54942_v52 }
 0x1ac   : > { %46866 = vmatprep.subr.mxu1 %v54942_v52  ;;  %16110 = vrot.lane.b32.xlu1 %v49368_v31, %s48926_s10  ;;  %s55046_s10 = smov 78  }
 0x1ae   : > { %46864 = vmatmul.mubr.f32.vlgmr.msra.gmra.mrb[48].mxu1 %v49717_v34  ;;  %v4890_v34 = vsel %vm225_vm2, %v4883_v3, 0 }
 0x1af   : > { %46867 = vmatpush3.msra.mxu1 %v50057_v39  ;;  %46868 = vmatprep.mubr.msk.f32.mxu1 %vm48938_vm3, %v54942_v52  ;;  %v50082_v45 = vand.u32 4294901760, %v4890_v34 }
 0x1b0   : > { %5900 = vmatmul.mubr.f32.vlgmr.msra.gmra.mrb[0].mxu0 %v50062_v58  ;;  %46871 = vmatprep.subr.mxu1 %v54942_v52 }
 0x1b1   : > { %5917 = vmatpush1.msra.mxu0 %v5916_v11  ;;  %5980 = vmatprep.mubr.f32.mxu0 %v54942_v52  ;;  %55013 = vst [vmem:[#allocation83_spill] sm:$0xff] %v50082_v45  ;;  %v50095_v1 = vsub.f32 %v4890_v34, %v50082_v45  ;;  %v50133_v34 = vpop.permute.xlu1 %5814 }
 0x1b2   : > { %5990 = vmatprep.subr.mxu0 %v49967_v19  ;;  %46869 = vmatmul.mubr.f32.vlgmr.msra.gmra.mrb[50].mxu1 %v49662_v5  ;;  %55017 = vst [vmem:[#allocation87_spill] sm:$0xff] %v50133_v34 }
 0x1b3   : > { %46872 = vmatpush3.msra.mxu1 %v50003_v46  ;;  %46873 = vmatprep.mubr.msk.f32.mxu1 %vm48938_vm3, %v54942_v52  ;;  %55014 = vst [vmem:[#allocation84_spill] sm:$0xff] %v50095_v1 }
 0x1b4   : > { %46876 = vmatprep.subr.mxu1 %v54942_v52  ;;  %31081 = vrot.lane.b32.xlu1 %v49023_v4, %s48952_s13 }
 0x1b6   : > { %46874 = vmatmul.mubr.f32.vlgmr.msra.gmra.mrb[52].mxu1 %v49680_v44  ;;  %v50108_v44 = vand.u32 4294901760, %v50095_v1 }
 0x1b7   : > { %46877 = vmatpush3.msra.mxu1 %v49982_v61  ;;  %46878 = vmatprep.mubr.msk.f32.mxu1 %vm48938_vm3, %v54942_v52 }
 0x1b8   : > { %5982 = vmatmul.mubr.f32.vlgmr.msra.gmra.mrb[0].mxu0 %v49984_v22  ;;  %46881 = vmatprep.subr.mxu1 %v54942_v52  ;;  %55015 = vst [vmem:[#allocation85_spill] sm:$0xff] %v50108_v44  ;;  %v5437_v11 = vsub.f32 %v50095_v1, %v50108_v44 }
 0x1b9   : > { %5993 = vmatpush1.msra.mxu0 %v50000_v32  ;;  %6056 = vmatprep.mubr.f32.mxu0 %v54942_v52 }
 0x1ba   : > { %6066 = vmatprep.subr.mxu0 %v49950_v10  ;;  %46879 = vmatmul.mubr.f32.vlgmr.msra.gmra.mrb[54].mxu1 %v49693_v27  ;;  %v6754_v27 = vsel %vm6752_vm9, %v49296_v63, %v49303_v6  ;;  %v50138_v12 = vand.u32 4294901760, %v5437_v11  ;;  %v55019_v11 = vand.u32 4294901760, %v50000_v32 }
 0x1bb   : > { %46882 = vmatpush3.msra.mxu1 %v50021_v47  ;;  %46883 = vmatprep.mubr.msk.f32.mxu1 %vm48938_vm3, %v54942_v52  ;;  %v6760_v3 = vsel %vm225_vm2, %v6754_v27, 0  ;;  %v5819_v27 = vsel %vm54772_vm8, %v49271_v55, %v50133_v34  ;;  %v55048_v47 = vld [vmem:[#allocation6_spill] sm:$0xff]  ;;  %vm18920_vm8 = vcmask 637952  }
 0x1bc   : > { %46886 = vmatprep.subr.mxu1 %v54942_v52  ;;  %55018 = vst [vmem:[#allocation88_spill] sm:$0xff] %v50138_v12  ;;  %v50140_v19 = vand.u32 4294901760, %v6760_v3  ;;  %v5826_v55 = vsel %vm225_vm2, %v5819_v27, 0  ;;  %31079 = vrot.lane.b32.xlu1 %v49854_v26, %s48952_s13  ;;  %v10500_v46 = vsel %vm222_vm0, %v55048_v47, 0 }
 0x1be   : > { %46884 = vmatmul.mubr.f32.vlgmr.msra.gmra.mrb[56].mxu1 %v49662_v5 }
 0x1bf   : > { %46887 = vmatpush3.msra.mxu1 %v49982_v61  ;;  %46888 = vmatprep.mubr.msk.f32.mxu1 %vm48938_vm3, %v54942_v52 }
 0x1c0   : > { %6059 = vmatmul.mubr.f32.vlgmr.msra.gmra.mrb[0].mxu0 %v50008_v56  ;;  %46891 = vmatprep.subr.mxu1 %v54942_v52 }
 0x1c1   : > { %6068 = vmatpush1.msra.mxu0 %v49980_v23  ;;  %6131 = vmatprep.mubr.f32.mxu0 %v54942_v52 }
 0x1c2   : > { %6144 = vmatprep.subr.mxu0 %v49988_v50  ;;  %46889 = vmatmul.mubr.f32.vlgmr.msra.gmra.mrb[58].mxu1 %v49662_v5  ;;  %v6753_v5 = vsel %vm6752_vm9, %v49312_v13, %v49296_v63  ;;  %v50158_v63 = vsub.f32 %v6760_v3, %v50140_v19  ;;  %v50172_v3 = vand.u32 4294901760, %v5826_v55 }
 0x1c3   : > { %46892 = vmatpush3.msra.mxu1 %v50082_v45  ;;  %46893 = vmatprep.mubr.msk.f32.mxu1 %vm48938_vm3, %v54942_v52  ;;  %v6758_v13 = vsel %vm225_vm2, %v6753_v5, 0 }
 0x1c4   : > { %46896 = vmatprep.subr.mxu1 %v54942_v52  ;;  %v50170_v32 = vand.u32 4294901760, %v6758_v13  ;;  %55020 = vst [vmem:[#allocation89_spill] sm:$0xff] %v50172_v3  ;;  %v54710_v27 = vand.u32 4294901760, %v50158_v63  ;;  %v50189_v50 = vsub.f32 %v5826_v55, %v50172_v3  ;;  %17982 = vrot.lane.b32.xlu1 %v49368_v31, %s55032_s18  ;;  %s55051_s18 = smov 116  }
 0x1c6   : > { %46894 = vmatmul.mubr.f32.vlgmr.msra.gmra.mrb[60].mxu1 %v49890_v51  ;;  %v6756_v51 = vsel %vm222_vm0, %v49290_v60, 0  ;;  %v50181_v60 = vpop.permute.xlu0 %25466  ;;  %55022 = vst [vmem:[#allocation91_spill] sm:$0xff] %v50189_v50  ;;  %v6845_v62 = vsub.f32 %v50158_v63, %v54710_v27 }
 0x1c7   : > { %46897 = vmatpush3.msra.mxu1 %v50138_v12  ;;  %46898 = vmatprep.mubr.msk.f32.mxu1 %vm48938_vm3, %v54942_v52  ;;  %v50174_v5 = vand.u32 4294901760, %v6756_v51  ;;  %55021 = vst [vmem:[#allocation90_spill] sm:$0xff] %v50181_v60 }
 0x1c8   : > { %6135 = vmatmul.mubr.f32.vlgmr.msra.gmra.mrb[0].mxu0 %v50026_v29  ;;  %46901 = vmatprep.subr.mxu1 %v54942_v52 }
 0x1c9   : > { %6148 = vmatpush1.msra.mxu0 %v55019_v11  ;;  %6211 = vmatprep.mubr.f32.mxu0 %v54942_v52  ;;  %v50186_v11 = vsub.f32 %v6758_v13, %v50170_v32  ;;  %v50207_v13 = vand.u32 4294901760, %v50189_v50 }
 0x1ca   : > { %6220 = vmatprep.subr.mxu0 %v49950_v10  ;;  %46899 = vmatmul.mubr.f32.vlgmr.msra.gmra.mrb[62].mxu1 %v49813_v42  ;;  %v50212_v55 = vpop.permute.xlu0 %25464 }
 0x1cb   : > { %46902 = vmatpush3.msra.mxu1 %v50095_v1  ;;  %46903 = vmatprep.mubr.msk.f32.mxu1 %vm48938_vm3, %v54942_v52  ;;  %55023 = vst [vmem:[#allocation92_spill] sm:$0xff] %v50207_v13  ;;  %55024 = vst [vmem:[#allocation93_spill] sm:$0xff] %v50212_v55  ;;  %v6373_v27 = vsub.f32 %v50189_v50, %v50207_v13  ;;  %v55058_v55 = vld [vmem:[#allocation5_spill] sm:$0xff] }
 0x1cc   : > { %46906 = vmatprep.subr.mxu1 %v54942_v52  ;;  %32017 = vrot.lane.b32.xlu1 %v49023_v4, %s48953_s21 }
 0x1ce   : > { %46904 = vmatmul.mubr.f32.vlgmr.msra.gmra.mrb[64].mxu1 %v49835_v7  ;;  %v50194_v7 = vsub.f32 %v6756_v51, %v50174_v5  ;;  %v6846_v51 = vand.u32 4294901760, %v6845_v62  ;;  %v6751_v33 = vpop.permute.xlu0 %6750 }
 0x1cf   : > { %46907 = vmatpush3.msra.mxu1 %v50082_v45  ;;  %46908 = vmatprep.mubr.msk.f32.mxu1 %vm48938_vm3, %v54942_v52 }
 0x1d0   : > { %6213 = vmatmul.mubr.f32.vlgmr.msra.gmra.mrb[0].mxu0 %v49984_v22  ;;  %46911 = vmatprep.subr.mxu1 %v54942_v52 }
 0x1d1   : > { %6222 = vmatpush1.msra.mxu0 %v49980_v23  ;;  %6285 = vmatprep.mubr.f32.mxu0 %v54942_v52  ;;  %v54716_v23 = vand.u32 4294901760, %v50186_v11 }
 0x1d2   : > { %46909 = vmatmul.mubr.f32.vlgmr.msra.gmra.mrb[66].mxu1 %v49859_v2  ;;  %6765 = vmatprep.subr.mxu0 %v50140_v19  ;;  %v50210_v2 = vand.u32 4294901760, %v50194_v7 }
 0x1d3   : > { %46912 = vmatpush3.msra.mxu1 %v50108_v44  ;;  %46913 = vmatprep.mubr.msk.f32.mxu1 %vm48938_vm3, %v54942_v52  ;;  %v6851_v62 = vsub.f32 %v50186_v11, %v54716_v23  ;;  %v50234_v44 = vand.u32 4294901760, %v6373_v27 }
 0x1d4   : > { %46916 = vmatprep.subr.mxu1 %v54942_v52  ;;  %v6834_v10 = vsub.f32 %v50194_v7, %v50210_v2 }
 0x1d5   : > { %55025 = vst [vmem:[#allocation94_spill] sm:$0xff] %v50234_v44  ;;  %v6852_v15 = vand.u32 4294901760, %v6851_v62 }
 0x1d6   : > { %46914 = vmatmul.mubr.f32.vlgmr.msra.gmra.mrb[68].mxu1 %v49813_v42  ;;  %v6835_v23 = vand.u32 4294901760, %v6834_v10 }
 0x1d7   : > { %46917 = vmatpush3.msra.mxu1 %v50082_v45  ;;  %46918 = vmatprep.mubr.msk.f32.mxu1 %vm48938_vm3, %v54942_v52 }
 0x1d8   : > { %6287 = vmatmul.mubr.f32.vlgmr.msra.gmra.mrb[0].mxu0 %v49984_v22  ;;  %46921 = vmatprep.subr.mxu1 %v54942_v52 }
 0x1d9   : > { %6767 = vmatpush1.msra.mxu0 %v50170_v32  ;;  %6830 = vmatprep.mubr.f32.mxu0 %v54942_v52 }
 0x1da   : > { %46919 = vmatmul.mubr.f32.vlgmr.msra.gmra.mrb[70].mxu1 %v49813_v42  ;;  %6847 = vmatprep.subr.mxu0 %v6846_v51  ;;  %v6755_v42 = vsel %vm6752_vm9, %v49303_v6, %v6751_v33  ;;  %v55028_v51 = vand.u32 4294901760, %v50158_v63  ;;  %vm14240_vm9 = vcmask 678912  }
 0x1db   : > { %46922 = vmatpush3.msra.mxu1 %v50172_v3  ;;  %46923 = vmatprep.mubr.msk.f32.mxu1 %vm48938_vm3, %v54942_v52  ;;  %v6762_v27 = vsel %vm225_vm2, %v6755_v42, 0 }
 0x1dc   : > { %46926 = vmatprep.subr.mxu1 %v54942_v52  ;;  %v50251_v6 = vand.u32 4294901760, %v6762_v27 }
 0x1de   : > { %46924 = vmatmul.mubr.f32.vlgmr.msra.gmra.mrb[72].mxu1 %v50062_v58  ;;  %v50262_v33 = vsub.f32 %v6762_v27, %v50251_v6 }
 0x1df   : > { %46927 = vmatpush3.msra.mxu1 %v50234_v44  ;;  %46928 = vmatprep.mubr.msk.f32.mxu1 %vm48938_vm3, %v54942_v52 }
 0x1e0   : > { %6836 = vmatmul.mubr.f32.vlgmr.msra.gmra.mrb[0].mxu0 %v6835_v23  ;;  %46931 = vmatprep.subr.mxu1 %v54942_v52 }
 0x1e1   : > { %6853 = vmatpush1.msra.mxu0 %v6852_v15  ;;  %6916 = vmatprep.mubr.f32.mxu0 %v54942_v52  ;;  %v50254_v15 = vpop.permute.xlu1 %26398 }
 0x1e2   : > { %6926 = vmatprep.subr.mxu0 %v50158_v63  ;;  %46929 = vmatmul.mubr.f32.vlgmr.msra.gmra.mrb[74].mxu1 %v49984_v22  ;;  %55026 = vst [vmem:[#allocation95_spill] sm:$0xff] %v50254_v15 }
 0x1e3   : > { %46932 = vmatpush3.msra.mxu1 %v50189_v50  ;;  %46933 = vmatprep.mubr.msk.f32.mxu1 %vm48938_vm3, %v54942_v52 }
 0x1e4   : > { %46936 = vmatprep.subr.mxu1 %v54942_v52 }
 0x1e5   : > { %v50272_v10 = vpop.permute.xlu1 %26404 }
 0x1e6   : > { %46934 = vmatmul.mubr.f32.vlgmr.msra.gmra.mrb[76].mxu1 %v50008_v56  ;;  %55027 = vst [vmem:[#allocation96_spill] sm:$0xff] %v50272_v10  ;;  %v7308_v56 = vand.u32 4294901760, %v50262_v33  ;;  %v55111_v10 = vld [vmem:[#allocation34_spill] sm:$0xff] }
 0x1e7   : > { %46937 = vmatpush3.msra.mxu1 %v50172_v3  ;;  %46938 = vmatprep.mubr.msk.f32.mxu1 %vm48938_vm3, %v54942_v52 }
 0x1e8   : > { %6918 = vmatmul.mubr.f32.vlgmr.msra.gmra.mrb[0].mxu0 %v50174_v5  ;;  %46941 = vmatprep.subr.mxu1 %v54942_v52  ;;  %v7309_v58 = vsub.f32 %v50262_v33, %v7308_v56 }
 0x1e9   : > { %6929 = vmatpush1.msra.mxu0 %v50186_v11  ;;  %6992 = vmatprep.mubr.f32.mxu0 %v54942_v52  ;;  %v7687_v62 = vpop.permute.xlu1 %7686 }
 0x1ea   : > { %7002 = vmatprep.subr.mxu0 %v50140_v19  ;;  %46939 = vmatmul.mubr.f32.vlgmr.msra.gmra.mrb[78].mxu1 %v50026_v29  ;;  %v7690_v29 = vsel %vm7688_vm10, %v49322_v17, %v49328_v18  ;;  %v7310_v27 = vand.u32 4294901760, %v7309_v58  ;;  %v50337_v58 = vpop.permute.xlu0 %26402 }
 0x1eb   : > { %46942 = vmatpush3.msra.mxu1 %v50207_v13  ;;  %46943 = vmatprep.mubr.msk.f32.mxu1 %vm48938_vm3, %v54942_v52  ;;  %v7696_v42 = vsel %vm225_vm2, %v7690_v29, 0  ;;  %v7691_v13 = vsel %vm7688_vm10, %v49328_v18, %v7687_v62  ;;  %v7692_v18 = vsel %vm222_vm0, %v49318_v14, 0  ;;  %v55029_v29 = vand.u32 4294901760, %v50186_v11  ;;  %55030 = vst [vmem:[#allocation97_spill] sm:$0xff] %v50337_v58 }
 0x1ec   : > { %46946 = vmatprep.subr.mxu1 %v54942_v52  ;;  %v50297_v50 = vand.u32 4294901760, %v7696_v42  ;;  %v7698_v63 = vsel %vm225_vm2, %v7691_v13, 0  ;;  %v50328_v11 = vand.u32 4294901760, %v7692_v18 }
 0x1ed   : > { %v50326_v14 = vand.u32 4294901760, %v7698_v63 }
 0x1ee   : > { %46944 = vmatmul.mubr.f32.vlgmr.msra.gmra.mrb[80].mxu1 %v49984_v22 }
 0x1ef   : > { %46947 = vmatpush3.msra.mxu1 %v50172_v3  ;;  %46948 = vmatprep.mubr.msk.f32.mxu1 %vm48938_vm3, %v54942_v52  ;;  %v55037_v3 = vld [vmem:[#allocation3_spill] sm:$0xff] }
 0x1f0   : > { %6995 = vmatmul.mubr.f32.vlgmr.msra.gmra.mrb[0].mxu0 %v50194_v7  ;;  %46951 = vmatprep.subr.mxu1 %v54942_v52  ;;  %v9564_v1 = vsel %vm222_vm0, %v55037_v3, 0 }
 0x1f1   : > { %7004 = vmatpush1.msra.mxu0 %v50170_v32  ;;  %7067 = vmatprep.mubr.f32.mxu0 %v54942_v52 }
 0x1f2   : > { %7080 = vmatprep.subr.mxu0 %v55028_v51  ;;  %46949 = vmatmul.mubr.f32.vlgmr.msra.gmra.mrb[82].mxu1 %v49984_v22  ;;  %v7689_v22 = vsel %vm7688_vm10, %v49332_v20, %v49322_v17  ;;  %v50313_v17 = vsub.f32 %v7696_v42, %v50297_v50  ;;  %v50346_v51 = vsub.f32 %v7692_v18, %v50328_v11  ;;  %vm15176_vm10 = vcmask 670720  }
 0x1f3   : > { %46952 = vmatpush3.msra.mxu1 %v50251_v6  ;;  %46953 = vmatprep.mubr.msk.f32.mxu1 %vm48938_vm3, %v54942_v52  ;;  %v7694_v20 = vsel %vm225_vm2, %v7689_v22, 0 }
 0x1f4   : > { %46956 = vmatprep.subr.mxu1 %v54942_v52  ;;  %v7780_v13 = vand.u32 4294901760, %v50313_v17 }
 0x1f6   : > { %46954 = vmatmul.mubr.f32.vlgmr.msra.gmra.mrb[84].mxu1 %v6835_v23  ;;  %v50321_v23 = vld [vmem:[%s54648_s1 + $0x8] sm:$0xff]  ;;  %v7781_v62 = vsub.f32 %v50313_v17, %v7780_v13 }
 0x1f7   : > { %46957 = vmatpush3.msra.mxu1 %v7310_v27  ;;  %46958 = vmatprep.mubr.msk.f32.mxu1 %vm48938_vm3, %v54942_v52  ;;  %v50364_v27 = vand.u32 4294901760, %v50346_v51 }
 0x1f8   : > { %7071 = vmatmul.mubr.f32.vlgmr.msra.gmra.mrb[0].mxu0 %v50210_v2  ;;  %46961 = vmatprep.subr.mxu1 %v54942_v52 }
 0x1f9   : > { %7084 = vmatpush1.msra.mxu0 %v55029_v29  ;;  %7147 = vmatprep.mubr.f32.mxu0 %v54942_v52 }
 0x1fa   : > { %7156 = vmatprep.subr.mxu0 %v50140_v19  ;;  %46959 = vmatmul.mubr.f32.vlgmr.msra.gmra.mrb[86].mxu1 %v50174_v5  ;;  %v50333_v19 = vand.u32 4294901760, %v7694_v20 }
 0x1fb   : > { %46962 = vmatpush3.msra.mxu1 %v50262_v33  ;;  %46963 = vmatprep.mubr.msk.f32.mxu1 %vm48938_vm3, %v54942_v52  ;;  %v50343_v33 = vsub.f32 %v7698_v63, %v50326_v14  ;;  %v7770_v63 = vsub.f32 %v50346_v51, %v50364_v27 }
 0x1fc   : > { %46966 = vmatprep.subr.mxu1 %v54942_v52  ;;  %31077 = vrot.lane.b32.xlu0 %v50321_v23, %s48896_s19 }
 0x1fd   : > { %v8244_v42 = vand.u32 4294901760, %v50343_v33 }
 0x1fe   : > { %46964 = vmatmul.mubr.f32.vlgmr.msra.gmra.mrb[88].mxu1 %v50194_v7  ;;  %v50351_v7 = vsub.f32 %v7694_v20, %v50333_v19  ;;  %v7771_v20 = vand.u32 4294901760, %v7770_v63 }
 0x1ff   : > { %46967 = vmatpush3.msra.mxu1 %v50251_v6  ;;  %46968 = vmatprep.mubr.msk.f32.mxu1 %vm48938_vm3, %v54942_v52  ;;  %v8245_v22 = vsub.f32 %v50343_v33, %v8244_v42 }
 0x200   : > { %7149 = vmatmul.mubr.f32.vlgmr.msra.gmra.mrb[0].mxu0 %v50174_v5  ;;  %46971 = vmatprep.subr.mxu1 %v54942_v52 }
 0x201   : > { %7158 = vmatpush1.msra.mxu0 %v50170_v32  ;;  %7221 = vmatprep.mubr.f32.mxu0 %v54942_v52  ;;  %v50367_v32 = vpop.permute.xlu0 %26400  ;;  %v8246_v29 = vand.u32 4294901760, %v8245_v22 }
 0x202   : > { %46969 = vmatmul.mubr.f32.vlgmr.msra.gmra.mrb[90].mxu1 %v50210_v2  ;;  %7701 = vmatprep.subr.mxu0 %v50297_v50  ;;  %55031 = vst [vmem:[#allocation98_spill] sm:$0xff] %v50367_v32  ;;  %v54719_v2 = vand.u32 4294901760, %v50351_v7 }
 0x203   : > { %46972 = vmatpush3.msra.mxu1 %v7308_v56  ;;  %46973 = vmatprep.mubr.msk.f32.mxu1 %vm48938_vm3, %v54942_v52  ;;  %v7782_v56 = vand.u32 4294901760, %v7781_v62 }
 0x204   : > { %46976 = vmatprep.subr.mxu1 %v54942_v52  ;;  %31083 = vrot.lane.b32.xlu0 %v49847_v40, %s48952_s13 }
 0x205   : > { %v8623_v18 = vpop.permute.xlu0 %8622 }
 0x206   : > { %46974 = vmatmul.mubr.f32.vlgmr.msra.gmra.mrb[92].mxu1 %v50174_v5 }
 0x207   : > { %46977 = vmatpush3.msra.mxu1 %v50251_v6  ;;  %46978 = vmatprep.mubr.msk.f32.mxu1 %vm48938_vm3, %v54942_v52  ;;  %v7787_v6 = vsub.f32 %v50351_v7, %v54719_v2  ;;  %v8627_v2 = vsel %vm8624_vm11, %v49347_v25, %v8623_v18 }
 0x208   : > { %7223 = vmatmul.mubr.f32.vlgmr.msra.gmra.mrb[0].mxu0 %v50174_v5  ;;  %46981 = vmatprep.subr.mxu1 %v54942_v52 }
 0x209   : > { %7703 = vmatpush1.msra.mxu0 %v50333_v19  ;;  %7766 = vmatprep.mubr.f32.mxu0 %v54942_v52  ;;  %v7788_v62 = vand.u32 4294901760, %v7787_v6 }
 0x20a   : > { %46979 = vmatmul.mubr.f32.vlgmr.msra.gmra.mrb[94].mxu1 %v50174_v5  ;;  %7783 = vmatprep.subr.mxu0 %v7782_v56  ;;  %v8628_v5 = vsel %vm222_vm0, %v49339_v21, 0  ;;  %v8634_v56 = vsel %vm225_vm2, %v8627_v2, 0  ;;  %v50426_v2 = vpop.permute.xlu1 %27334 }
 0x20b   : > { %46982 = vmatpush3.msra.mxu1 %v50326_v14  ;;  %46983 = vmatprep.mubr.msk.f32.mxu1 %vm48938_vm3, %v54942_v52  ;;  %v50408_v22 = vand.u32 4294901760, %v8628_v5  ;;  %v50415_v21 = vand.u32 4294901760, %v8634_v56  ;;  %55034 = vst [vmem:[#allocation99_spill] sm:$0xff] %v50426_v2 }
 0x20c   : > { %46986 = vmatprep.subr.mxu1 %v54942_v52  ;;  %17046 = vrot.lane.b32.xlu0 %v49368_v31, %s48917_s20 }
 0x20d   : > { %v50423_v26 = vsub.f32 %v8628_v5, %v50408_v22  ;;  %v50432_v63 = vsub.f32 %v8634_v56, %v50415_v21 }
 0x20e   : > { %46984 = vmatmul.mubr.f32.vlgmr.msra.gmra.mrb[96].mxu1 %v7771_v20 }
 0x20f   : > { %46987 = vmatpush3.msra.mxu1 %v8246_v29  ;;  %46988 = vmatprep.mubr.msk.f32.mxu1 %vm48938_vm3, %v54942_v52  ;;  %v50439_v6 = vand.u32 4294901760, %v50423_v26  ;;  %v54720_v18 = vand.u32 4294901760, %v50432_v63  ;;  %v50449_v29 = vpop.permute.xlu1 %27340 }
 0x210   : > { %7772 = vmatmul.mubr.f32.vlgmr.msra.gmra.mrb[0].mxu0 %v7771_v20  ;;  %46991 = vmatprep.subr.mxu1 %v54942_v52  ;;  %55035 = vst [vmem:[#allocation100_spill] sm:$0xff] %v50449_v29  ;;  %v55110_v29 = vld [vmem:[#allocation17_spill] sm:$0xff] }
 0x211   : > { %7789 = vmatpush1.msra.mxu0 %v7788_v62  ;;  %7852 = vmatprep.mubr.f32.mxu0 %v54942_v52  ;;  %v8706_v5 = vsub.f32 %v50423_v26, %v50439_v6 }
 0x212   : > { %7862 = vmatprep.subr.mxu0 %v50313_v17  ;;  %46989 = vmatmul.mubr.f32.vlgmr.msra.gmra.mrb[98].mxu1 %v50328_v11 }
 0x213   : > { %46992 = vmatpush3.msra.mxu1 %v50343_v33  ;;  %46993 = vmatprep.mubr.msk.f32.mxu1 %vm48938_vm3, %v54942_v52  ;;  %v9181_v33 = vsub.f32 %v50432_v63, %v54720_v18  ;;  %v9559_v56 = vpop.permute.xlu1 %9558 }
 0x214   : > { %46996 = vmatprep.subr.mxu1 %v54942_v52  ;;  %32013 = vrot.lane.b32.xlu0 %v50321_v23, %s55033_s24  ;;  %v9563_v17 = vsel %vm9560_vm12, %v49375_v41, %v9559_v56 }
 0x216   : > { %46994 = vmatmul.mubr.f32.vlgmr.msra.gmra.mrb[100].mxu1 %v50346_v51 }
 0x217   : > { %46997 = vmatpush3.msra.mxu1 %v50326_v14  ;;  %46998 = vmatprep.mubr.msk.f32.mxu1 %vm48938_vm3, %v54942_v52 }
 0x218   : > { %7854 = vmatmul.mubr.f32.vlgmr.msra.gmra.mrb[0].mxu0 %v50328_v11  ;;  %47001 = vmatprep.subr.mxu1 %v54942_v52 }
 0x219   : > { %7865 = vmatpush1.msra.mxu0 %v50351_v7  ;;  %7928 = vmatprep.mubr.f32.mxu0 %v54942_v52 }
 0x21a   : > { %7938 = vmatprep.subr.mxu0 %v50297_v50  ;;  %46999 = vmatmul.mubr.f32.vlgmr.msra.gmra.mrb[102].mxu1 %v50364_v27 }
 0x21b   : > { %47002 = vmatpush3.msra.mxu1 %v8244_v42  ;;  %47003 = vmatprep.mubr.msk.f32.mxu1 %vm48938_vm3, %v54942_v52  ;;  %v8626_v42 = vsel %vm8624_vm11, %v49341_v24, %v49347_v25  ;;  %v9182_v25 = vand.u32 4294901760, %v9181_v33  ;;  %v55038_v33 = vand.u32 4294901760, %v50351_v7 }
 0x21c   : > { %47006 = vmatprep.subr.mxu1 %v54942_v52  ;;  %32019 = vrot.lane.b32.xlu0 %v49847_v40, %s48953_s21 }
 0x21d   : > { %v769_v20 = vpop.f32.mrb[0].mxu1 }
 0x21e   : > { %v46745_v62 = vpop.f32.mrb[1].mxu1  ;;  %47004 = vmatmul.mubr.f32.vlgmr.msra.gmra.mrb[104].mxu1 %v50328_v11 }
 0x21f   : > { %47007 = vmatpush3.msra.mxu1 %v50326_v14  ;;  %47008 = vmatprep.mubr.msk.f32.mxu1 %vm48938_vm3, %v54942_v52  ;;  %v50470_v14 = vand.u32 4294901760, %v8706_v5  ;;  %v8632_v62 = vsel %vm225_vm2, %v8626_v42, 0  ;;  %v55036_v42 = vld [vmem:[#allocation2_spill] sm:$0xff] }
 0x220   : > { %7931 = vmatmul.mubr.f32.vlgmr.msra.gmra.mrb[0].mxu0 %v50346_v51  ;;  %47011 = vmatprep.subr.mxu1 %v54942_v52  ;;  %v8625_v44 = vsel %vm8624_vm11, %v55036_v42, %v49341_v24  ;;  %v50516_v42 = vpop.permute.xlu0 %27338  ;;  %vm32023_vm11 = vcmask 277504  }
 0x221   : > { %7940 = vmatpush1.msra.mxu0 %v50333_v19  ;;  %8003 = vmatprep.mubr.f32.mxu0 %v54942_v52  ;;  %v8630_v3 = vsel %vm225_vm2, %v8625_v44, 0  ;;  %55039 = vst [vmem:[#allocation2_spill] sm:$0xff] %v50516_v42 }
 0x222   : > { %8016 = vmatprep.subr.mxu0 %v7780_v13  ;;  %47009 = vmatmul.mubr.f32.vlgmr.msra.gmra.mrb[106].mxu1 %v50328_v11  ;;  %v50479_v13 = vand.u32 4294901760, %v8632_v62 }
 0x223   : > { %47012 = vmatpush3.msra.mxu1 %v50415_v21  ;;  %47013 = vmatprep.mubr.msk.f32.mxu1 %vm48938_vm3, %v54942_v52 }
 0x224   : > { %47016 = vmatprep.subr.mxu1 %v54942_v52  ;;  %v50496_v24 = vsub.f32 %v8632_v62, %v50479_v13  ;;  %v50509_v62 = vand.u32 4294901760, %v8630_v3  ;;  %18918 = vrot.lane.b32.xlu0 %v49368_v31, %s55046_s10  ;;  %s48954_s10 = smov 18  }
 0x225   : > { %v845_v51 = vpop.f32.mrb[2].mxu1 }
 0x226   : > { %v846_v18 = vadd.f32 %v845_v51, %v769_v20  ;;  %v46750_v5 = vpop.f32.mrb[3].mxu1  ;;  %47014 = vmatmul.mubr.f32.vlgmr.msra.gmra.mrb[108].mxu1 %v50470_v14  ;;  %v9570_v20 = vsel %vm225_vm2, %v9563_v17, 0 }
 0x227   : > { %47017 = vmatpush3.msra.mxu1 %v9182_v25  ;;  %47018 = vmatprep.mubr.msk.f32.mxu1 %vm48938_vm3, %v54942_v52  ;;  %v50499_v25 = vand.u32 4294901760, %v9564_v1  ;;  %v50506_v7 = vand.u32 4294901760, %v9570_v20  ;;  %v54725_v5 = vand.u32 4294901760, %v50496_v24 }
 0x228   : > { %8007 = vmatmul.mubr.f32.vlgmr.msra.gmra.mrb[0].mxu0 %v50364_v27  ;;  %47021 = vmatprep.subr.mxu1 %v54942_v52 }
 0x229   : > { %8020 = vmatpush1.msra.mxu0 %v55038_v33  ;;  %v919_v56 = vpop.f32.mrb[4].mxu1  ;;  %8083 = vmatprep.mubr.f32.mxu0 %v54942_v52  ;;  %v50512_v17 = vsub.f32 %v9564_v1, %v50499_v25  ;;  %v50522_v33 = vsub.f32 %v9570_v20, %v50506_v7  ;;  %v50527_v1 = vsub.f32 %v8630_v3, %v50509_v62  ;;  %v50539_v3 = vpop.permute.xlu1 %28270 }
 0x22a   : > { %v920_v51 = vadd.f32 %v919_v56, %v846_v18  ;;  %8092 = vmatprep.subr.mxu0 %v50297_v50  ;;  %v46755_v27 = vpop.f32.mrb[5].mxu1  ;;  %47019 = vmatmul.mubr.f32.vlgmr.msra.gmra.mrb[110].mxu1 %v50408_v22  ;;  %v8717_v20 = vsub.f32 %v50496_v24, %v54725_v5  ;;  %55040 = vst [vmem:[#allocation3_spill] sm:$0xff] %v50539_v3  ;;  %v55097_v3 = vld [vmem:[#allocation26_spill] sm:$0xff] }
 0x22b   : > { %47022 = vmatpush3.msra.mxu1 %v50432_v63  ;;  %47023 = vmatprep.mubr.msk.f32.mxu1 %vm48938_vm3, %v54942_v52  ;;  %v55043_v40 = vand.u32 4294901760, %v50522_v33  ;;  %v55053_v39 = vand.u32 4294901760, %v50522_v33 }
 0x22c   : > { %47026 = vmatprep.subr.mxu1 %v54942_v52  ;;  %32949 = vrot.lane.b32.xlu0 %v50321_v23, %s55051_s18  ;;  %s55070_s18 = smov 60  }
 0x22d   : > { %v993_v44 = vpop.f32.mrb[6].mxu1 }
 0x22e   : > { %v994_v18 = vadd.f32 %v993_v44, %v920_v51  ;;  %v46760_v50 = vpop.f32.mrb[7].mxu1  ;;  %47024 = vmatmul.mubr.f32.vlgmr.msra.gmra.mrb[112].mxu1 %v50423_v26  ;;  %v50532_v51 = vand.u32 4294901760, %v50512_v17 }
 0x22f   : > { %47027 = vmatpush3.msra.mxu1 %v50415_v21  ;;  %47028 = vmatprep.mubr.msk.f32.mxu1 %vm48938_vm3, %v54942_v52  ;;  %v55041_v50 = vand.u32 4294901760, %v50432_v63 }
 0x230   : > { %8085 = vmatmul.mubr.f32.vlgmr.msra.gmra.mrb[0].mxu0 %v50328_v11  ;;  %47031 = vmatprep.subr.mxu1 %v54942_v52 }
 0x231   : > { %8094 = vmatpush1.msra.mxu0 %v50333_v19  ;;  %v1067_v56 = vpop.f32.mrb[8].mxu1  ;;  %8157 = vmatprep.mubr.f32.mxu0 %v54942_v52  ;;  %v8718_v19 = vand.u32 4294901760, %v8717_v20 }
 0x232   : > { %v1068_v27 = vadd.f32 %v1067_v56, %v994_v18  ;;  %v46765_v44 = vpop.f32.mrb[9].mxu1  ;;  %47029 = vmatmul.mubr.f32.vlgmr.msra.gmra.mrb[114].mxu1 %v50439_v6  ;;  %8637 = vmatprep.subr.mxu0 %v50479_v13  ;;  %v50547_v18 = vpop.permute.xlu0 %27336  ;;  %v10117_v56 = vsub.f32 %v50522_v33, %v55043_v40 }
 0x233   : > { %47032 = vmatpush3.msra.mxu1 %v55041_v50  ;;  %47033 = vmatprep.mubr.msk.f32.mxu1 %vm48938_vm3, %v54942_v52  ;;  %55042 = vst [vmem:[#allocation101_spill] sm:$0xff] %v50547_v18  ;;  %v9642_v50 = vsub.f32 %v50512_v17, %v50532_v51 }
 0x234   : > { %47036 = vmatprep.subr.mxu1 %v54942_v52  ;;  %v10118_v57 = vand.u32 4294901760, %v10117_v56 }
 0x235   : > { %v1139_v44 = vpop.f32.mrb[10].mxu1 }
 0x236   : > { %v1140_v5 = vadd.f32 %v1139_v44, %v1068_v27  ;;  %v46770_v63 = vpop.f32.mrb[11].mxu1  ;;  %47034 = vmatmul.mubr.f32.vlgmr.msra.gmra.mrb[116].mxu1 %v50408_v22  ;;  %v50565_v27 = vpop.permute.xlu1 %28276 }
 0x237   : > { %47037 = vmatpush3.msra.mxu1 %v50415_v21  ;;  %47038 = vmatprep.mubr.msk.f32.mxu1 %vm48938_vm3, %v54942_v52  ;;  %55044 = vst [vmem:[#allocation102_spill] sm:$0xff] %v50565_v27  ;;  %v55045_v21 = vand.u32 4294901760, %v50527_v1  ;;  %v10495_v12 = vpop.permute.xlu0 %10494  ;;  %v15180_v27 = vsel %vm222_vm0, %v55097_v3, 0 }
 0x238   : > { %8159 = vmatmul.mubr.f32.vlgmr.msra.gmra.mrb[0].mxu0 %v50328_v11  ;;  %47041 = vmatprep.subr.mxu1 %v54942_v52  ;;  %v50573_v11 = vand.u32 4294901760, %v9642_v50  ;;  %v50584_v50 = vld [vmem:[%s49011_s23] sm:$0xff] }
 0x239   : > { %v1688_v44 = vpop.f32.mrb[12].mxu1  ;;  %8639 = vmatpush1.msra.mxu0 %v50509_v62  ;;  %8702 = vmatprep.mubr.f32.mxu0 %v54942_v52  ;;  %v8723_v20 = vsub.f32 %v50527_v1, %v55045_v21 }
 0x23a   : > { %v1689_v63 = vadd.f32 %v1688_v44, %v1140_v5  ;;  %47039 = vmatmul.mubr.f32.vlgmr.msra.gmra.mrb[118].mxu1 %v50408_v22  ;;  %v46775_v40 = vpop.f32.mrb[13].mxu1  ;;  %8719 = vmatprep.subr.mxu0 %v8718_v19  ;;  %v55047_v44 = vld [vmem:[#allocation8_spill] sm:$0xff]  ;;  %v50589_v56 = vpop.permute.xlu1 %11430 }
 0x23b   : > { %47042 = vmatpush3.msra.mxu1 %v50506_v7  ;;  %47043 = vmatprep.mubr.msk.f32.mxu1 %vm48938_vm3, %v54942_v52  ;;  %v8724_v5 = vand.u32 4294901760, %v8723_v20  ;;  %v10499_v40 = vsel %vm10496_vm13, %v55047_v44, %v10495_v12 }
 0x23c   : > { %47046 = vmatprep.subr.mxu1 %v54942_v52  ;;  %32015 = vrot.lane.b32.xlu1 %v50584_v50, %s48953_s21  ;;  %v10506_v12 = vsel %vm225_vm2, %v10499_v40, 0 }
 0x23d   : > { %v1764_v21 = vpop.f32.mrb[14].mxu1 }
 0x23e   : > { %v1765_v19 = vadd.f32 %v1764_v21, %v1689_v63  ;;  %47044 = vmatmul.mubr.f32.vlgmr.msra.gmra.mrb[120].mxu1 %v50573_v11  ;;  %v46780_v45 = vpop.f32.mrb[15].mxu1  ;;  %v50603_v47 = vpop.permute.xlu1 %29206 }
 0x23f   : > { %47047 = vmatpush3.msra.mxu1 %v10118_v57  ;;  %47048 = vmatprep.mubr.msk.f32.mxu1 %vm48938_vm3, %v54942_v52  ;;  %v50599_v45 = vand.u32 4294901760, %v10500_v46  ;;  %55049 = vst [vmem:[#allocation8_spill] sm:$0xff] %v50603_v47  ;;  %v55096_v47 = vld [vmem:[#allocation13_spill] sm:$0xff] }
 0x240   : > { %8708 = vmatmul.mubr.f32.vlgmr.msra.gmra.mrb[0].mxu0 %v50470_v14  ;;  %47051 = vmatprep.subr.mxu1 %v54942_v52  ;;  %v50608_v14 = vand.u32 4294901760, %v10506_v12 }
 0x241   : > { %8725 = vmatpush1.msra.mxu0 %v8724_v5  ;;  %v1838_v20 = vpop.f32.mrb[16].mxu1  ;;  %8788 = vmatprep.mubr.f32.mxu0 %v54942_v52  ;;  %v50616_v5 = vsub.f32 %v10500_v46, %v50599_v45 }
 0x242   : > { %v1839_v63 = vadd.f32 %v1838_v20, %v1765_v19  ;;  %8798 = vmatprep.subr.mxu0 %v50496_v24  ;;  %47049 = vmatmul.mubr.f32.vlgmr.msra.gmra.mrb[122].mxu1 %v50499_v25  ;;  %v46785_v57 = vpop.f32.mrb[17].mxu1  ;;  %v50623_v20 = vsub.f32 %v10506_v12, %v50608_v14 }
 0x243   : > { %47052 = vmatpush3.msra.mxu1 %v50522_v33  ;;  %47053 = vmatprep.mubr.msk.f32.mxu1 %vm48938_vm3, %v54942_v52  ;;  %v50627_v57 = vpop.permute.xlu1 %29212 }
 0x244   : > { %47056 = vmatprep.subr.mxu1 %v54942_v52  ;;  %19854 = vrot.lane.b32.xlu1 %v49368_v31, %s55050_s12  ;;  %55052 = vst [vmem:[#allocation6_spill] sm:$0xff] %v50627_v57  ;;  %s55067_s12 = smov 61   ;;  %v11433_v57 = vsel %vm11432_vm14, %v55096_v47, %v55092_v36 }
 0x245   : > { %v1912_v21 = vpop.f32.mrb[18].mxu1  ;;  %v11438_v47 = vsel %vm225_vm2, %v11433_v57, 0 }
 0x246   : > { %v1913_v40 = vadd.f32 %v1912_v21, %v1839_v63  ;;  %47054 = vmatmul.mubr.f32.vlgmr.msra.gmra.mrb[124].mxu1 %v50512_v17  ;;  %v46790_v19 = vpop.f32.mrb[19].mxu1  ;;  %v50632_v63 = vand.u32 4294901760, %v50616_v5  ;;  %v51116_v57 = vand.u32 4294901760, %v11438_v47 }
 0x247   : > { %47057 = vmatpush3.msra.mxu1 %v50506_v7  ;;  %47058 = vmatprep.mubr.msk.f32.mxu1 %vm48938_vm3, %v54942_v52  ;;  %v54736_v19 = vand.u32 4294901760, %v50623_v20 }
 0x248   : > { %8790 = vmatmul.mubr.f32.vlgmr.msra.gmra.mrb[0].mxu0 %v50408_v22  ;;  %47061 = vmatprep.subr.mxu1 %v54942_v52 }
 0x249   : > { %8801 = vmatpush1.msra.mxu0 %v50527_v1  ;;  %v1986_v46 = vpop.f32.mrb[20].mxu1  ;;  %8864 = vmatprep.mubr.f32.mxu0 %v54942_v52 }
 0x24a   : > { %v1987_v21 = vadd.f32 %v1986_v46, %v1913_v40  ;;  %8874 = vmatprep.subr.mxu0 %v50479_v13  ;;  %47059 = vmatmul.mubr.f32.vlgmr.msra.gmra.mrb[126].mxu1 %v50532_v51  ;;  %v46795_v12 = vpop.f32.mrb[21].mxu1  ;;  %v10578_v46 = vsub.f32 %v50616_v5, %v50632_v63 }
 0x24b   : > { %47062 = vmatpush3.msra.mxu1 %v55053_v39  ;;  %47063 = vmatprep.mubr.msk.f32.mxu1 %vm48938_vm3, %v54942_v52  ;;  %v50647_v12 = vpop.permute.xlu1 %13302  ;;  %v11053_v39 = vsub.f32 %v50623_v20, %v54736_v19 }
 0x24c   : > { %47066 = vmatprep.subr.mxu1 %v54942_v52  ;;  %v50665_v19 = vand.u32 4294901760, %v10578_v46  ;;  %32953 = vrot.lane.b32.xlu1 %v49023_v4, %s48954_s10 }
 0x24d   : > { %v2058_v61 = vpop.f32.mrb[22].mxu1 }
 0x24e   : > { %v50642_v18 = vadd.f32 %v2058_v61, %v1987_v21  ;;  %47064 = vmatmul.mubr.f32.vlgmr.msra.gmra.mrb[128].mxu1 %v50499_v25  ;;  %v46800_v40 = vpop.f32.mrb[23].mxu1  ;;  %v55054_v61 = vld [vmem:[#allocation4_spill] sm:$0xff] }
 0x24f   : > { %47067 = vmatpush3.msra.mxu1 %v50506_v7  ;;  %47068 = vmatprep.mubr.msk.f32.mxu1 %vm48938_vm3, %v54942_v52  ;;  %v9562_v33 = vsel %vm9560_vm12, %v55054_v61, %v49375_v41  ;;  %v55055_v7 = vand.u32 4294901760, %v50496_v24  ;;  %v50667_v42 = vpop.permute.xlu1 %30144  ;;  %v55057_v24 = vld [vmem:[#allocation12_spill] sm:$0xff]  ;;  %v9561_v60 = vsel %vm9560_vm12, %v55058_v55, %v55054_v61  ;;  %vm16112_vm12 = vcmask 662528  }
 0x250   : > { %8867 = vmatmul.mubr.f32.vlgmr.msra.gmra.mrb[0].mxu0 %v50423_v26  ;;  %47071 = vmatprep.subr.mxu1 %v54942_v52  ;;  %55056 = vst [vmem:[#allocation4_spill] sm:$0xff] %v50667_v42  ;;  %v9568_v41 = vsel %vm225_vm2, %v9562_v33, 0  ;;  %v11054_v26 = vand.u32 4294901760, %v11053_v39  ;;  %v55059_v39 = vld [vmem:[#allocation10_spill] sm:$0xff] }
 0x251   : > { %8876 = vmatpush1.msra.mxu0 %v50509_v62  ;;  %v2621_v21 = vpop.f32.mrb[24].mxu1  ;;  %8939 = vmatprep.mubr.f32.mxu0 %v54942_v52  ;;  %v11436_v48 = vsel %vm222_vm0, %v55059_v39, 0 }
 0x252   : > { %8952 = vmatprep.subr.mxu0 %v55055_v7  ;;  %v46805_v40 = vpop.f32.mrb[25].mxu1  ;;  %47069 = vmatmul.mubr.f32.vlgmr.msra.gmra.mrb[130].mxu1 %v50499_v25  ;;  %v11435_v7 = vsel %vm11432_vm14, %v55057_v24, %v50589_v56 }
 0x253   : > { %47072 = vmatpush3.msra.mxu1 %v50608_v14  ;;  %47073 = vmatprep.mubr.msk.f32.mxu1 %vm48938_vm3, %v54942_v52  ;;  %v50677_v40 = vand.u32 4294901760, %v9568_v41  ;;  %v30143_v33 = vpop.permute.xlu1 %30142 }
 0x254   : > { %47076 = vmatprep.subr.mxu1 %v54942_v52  ;;  %v50689_v56 = vsel %vm30150_vm15, %v30143_v33, %v50667_v42  ;;  %32951 = vrot.lane.b32.xlu1 %v50584_v50, %s48954_s10 }
 0x255   : > { %v2697_v32 = vpop.f32.mrb[26].mxu1  ;;  %55060 = vst [vmem:[#allocation12_spill] sm:$0xff] %v50689_v56  ;;  %v50698_v61 = vsub.f32 %v9568_v41, %v50677_v40 }
 0x256   : > { %v2698_v46 = vadd.f32 %v2697_v32, %v2621_v21  ;;  %v46810_v58 = vpop.f32.mrb[27].mxu1  ;;  %47074 = vmatmul.mubr.f32.vlgmr.msra.gmra.mrb[132].mxu1 %v50665_v19  ;;  %v55061_v32 = vand.u32 4294901760, %v50527_v1  ;;  %v9566_v21 = vsel %vm225_vm2, %v9561_v60, 0 }
 0x257   : > { %47077 = vmatpush3.msra.mxu1 %v11054_v26  ;;  %47078 = vmatprep.mubr.msk.f32.mxu1 %vm48938_vm3, %v54942_v52  ;;  %v11442_v58 = vsel %vm225_vm2, %v11435_v7, 0  ;;  %v50701_v26 = vand.u32 4294901760, %v11436_v48  ;;  %v50711_v41 = vand.u32 4294901760, %v9566_v21  ;;  %v54740_v39 = vand.u32 4294901760, %v50698_v61 }
 0x258   : > { %8943 = vmatmul.mubr.f32.vlgmr.msra.gmra.mrb[0].mxu0 %v50439_v6  ;;  %47081 = vmatprep.subr.mxu1 %v54942_v52  ;;  %v50708_v1 = vand.u32 4294901760, %v11442_v58 }
 0x259   : > { %8956 = vmatpush1.msra.mxu0 %v55061_v32  ;;  %v2771_v55 = vpop.f32.mrb[28].mxu1  ;;  %9019 = vmatprep.mubr.f32.mxu0 %v54942_v52  ;;  %v50714_v7 = vsub.f32 %v11436_v48, %v50701_v26  ;;  %v50718_v32 = vpop.permute.xlu0 %28274  ;;  %v50729_v48 = vsub.f32 %v9566_v21, %v50711_v41 }
 0x25a   : > { %v2772_v33 = vadd.f32 %v2771_v55, %v2698_v46  ;;  %9028 = vmatprep.subr.mxu0 %v50479_v13  ;;  %v46815_v6 = vpop.f32.mrb[29].mxu1  ;;  %47079 = vmatmul.mubr.f32.vlgmr.msra.gmra.mrb[134].mxu1 %v50599_v45  ;;  %55062 = vst [vmem:[#allocation5_spill] sm:$0xff] %v50718_v32  ;;  %v50724_v55 = vsub.f32 %v11442_v58, %v50708_v1  ;;  %v55069_v32 = vld [vmem:[#allocation14_spill] sm:$0xff] }
 0x25b   : > { %47082 = vmatpush3.msra.mxu1 %v50623_v20  ;;  %47083 = vmatprep.mubr.msk.f32.mxu1 %vm48938_vm3, %v54942_v52  ;;  %v50734_v6 = vand.u32 4294901760, %v50714_v7  ;;  %v9653_v58 = vsub.f32 %v50698_v61, %v54740_v39 }
 0x25c   : > { %47086 = vmatprep.subr.mxu1 %v54942_v52  ;;  %v55065_v42 = vand.u32 4294901760, %v50724_v55  ;;  %21726 = vrot.lane.b32.xlu1 %v49368_v31, %s55070_s18  ;;  %s48955_s18 = smov 17  }
 0x25d   : > { %v2845_v60 = vpop.f32.mrb[30].mxu1  ;;  %v11514_v21 = vsub.f32 %v50714_v7, %v50734_v6  ;;  %v9654_v56 = vand.u32 4294901760, %v9653_v58 }
 0x25e   : > { %v2846_v46 = vadd.f32 %v2845_v60, %v2772_v33  ;;  %v46820_v13 = vpop.f32.mrb[31].mxu1  ;;  %47084 = vmatmul.mubr.f32.vlgmr.msra.gmra.mrb[136].mxu1 %v50616_v5 }
 0x25f   : > { %47087 = vmatpush3.msra.mxu1 %v50608_v14  ;;  %47088 = vmatprep.mubr.msk.f32.mxu1 %vm48938_vm3, %v54942_v52 }
 0x260   : > { %9021 = vmatmul.mubr.f32.vlgmr.msra.gmra.mrb[0].mxu0 %v50408_v22  ;;  %47091 = vmatprep.subr.mxu1 %v54942_v52 }
 0x261   : > { %9030 = vmatpush1.msra.mxu0 %v50509_v62  ;;  %v2919_v33 = vpop.f32.mrb[32].mxu1  ;;  %9093 = vmatprep.mubr.f32.mxu0 %v54942_v52  ;;  %v55063_v62 = vand.u32 4294901760, %v50623_v20 }
 0x262   : > { %v2920_v60 = vadd.f32 %v2919_v33, %v2846_v46  ;;  %v46825_v13 = vpop.f32.mrb[33].mxu1  ;;  %47089 = vmatmul.mubr.f32.vlgmr.msra.gmra.mrb[138].mxu1 %v50632_v63  ;;  %9573 = vmatprep.subr.mxu0 %v50677_v40  ;;  %v50747_v46 = vpop.permute.xlu0 %28272  ;;  %v50750_v33 = vld [vmem:[%s49011_s23 + $0x8] sm:$0xff] }
 0x263   : > { %47092 = vmatpush3.msra.mxu1 %v55063_v62  ;;  %47093 = vmatprep.mubr.msk.f32.mxu1 %vm48938_vm3, %v54942_v52  ;;  %55064 = vst [vmem:[#allocation10_spill] sm:$0xff] %v50747_v46  ;;  %v11989_v13 = vsub.f32 %v50724_v55, %v55065_v42  ;;  %v50777_v42 = vand.u32 4294901760, %v11514_v21 }
 0x264   : > { %47096 = vmatprep.subr.mxu1 %v54942_v52  ;;  %32955 = vrot.lane.b32.xlu0 %v50750_v33, %s48954_s10 }
 0x265   : > { %v2991_v39 = vpop.f32.mrb[34].mxu1  ;;  %33889 = vrot.lane.b32.xlu1 %v49023_v4, %s48955_s18 }
 0x266   : > { %v2992_v20 = vadd.f32 %v2991_v39, %v2920_v60  ;;  %v46830_v62 = vpop.f32.mrb[35].mxu1  ;;  %47094 = vmatmul.mubr.f32.vlgmr.msra.gmra.mrb[140].mxu1 %v50599_v45 }
 0x267   : > { %47097 = vmatpush3.msra.mxu1 %v50608_v14  ;;  %47098 = vmatprep.mubr.msk.f32.mxu1 %vm48938_vm3, %v54942_v52  ;;  %v55066_v14 = vand.u32 4294901760, %v50729_v48 }
 0x268   : > { %v50767_v46 = vadd.f32 %v2992_v20, %v50642_v18  ;;  %9095 = vmatmul.mubr.f32.vlgmr.msra.gmra.mrb[0].mxu0 %v50408_v22  ;;  %47101 = vmatprep.subr.mxu1 %v54942_v52  ;;  %v12367_v18 = vpop.permute.xlu0 %12366  ;;  %v11990_v22 = vand.u32 4294901760, %v11989_v13  ;;  %v12372_v13 = vsel %vm222_vm0, %v55069_v32, 0 }
 0x269   : > { %v3557_v39 = vpop.f32.mrb[36].mxu1  ;;  %9575 = vmatpush1.msra.mxu0 %v50711_v41  ;;  %9638 = vmatprep.mubr.f32.mxu0 %v54942_v52  ;;  %v9659_v60 = vsub.f32 %v50729_v48, %v55066_v14  ;;  %v55068_v14 = vld [vmem:[#allocation16_spill] sm:$0xff] }
 0x26a   : > { %v46835_v58 = vpop.f32.mrb[37].mxu1  ;;  %47099 = vmatmul.mubr.f32.vlgmr.msra.gmra.mrb[142].mxu1 %v50599_v45  ;;  %9655 = vmatprep.subr.mxu0 %v9654_v56 }
 0x26b   : > { %47102 = vmatpush3.msra.mxu1 %v50708_v1  ;;  %47103 = vmatprep.mubr.msk.f32.mxu1 %vm48938_vm3, %v54942_v52  ;;  %v9660_v62 = vand.u32 4294901760, %v9659_v60  ;;  %v12371_v58 = vsel %vm12368_vm1, %v55068_v14, %v12367_v18 }
 0x26c   : > { %47106 = vmatprep.subr.mxu1 %v54942_v52  ;;  %20790 = vrot.lane.b32.xlu0 %v49368_v31, %s55067_s12  ;;  %v12378_v60 = vsel %vm225_vm2, %v12371_v58, 0  ;;  %s55071_s12 = smov 112  }
 0x26d   : > { %v3633_v20 = vpop.f32.mrb[38].mxu1  ;;  %33887 = vrot.lane.b32.xlu1 %v50584_v50, %s48955_s18 }
 0x26e   : > { %v3634_v56 = vadd.f32 %v3633_v20, %v3557_v39  ;;  %v46840_v21 = vpop.f32.mrb[39].mxu1  ;;  %47104 = vmatmul.mubr.f32.vlgmr.msra.gmra.mrb[144].mxu1 %v50777_v42  ;;  %v50798_v39 = vand.u32 4294901760, %v12372_v13 }
 0x26f   : > { %47107 = vmatpush3.msra.mxu1 %v11990_v22  ;;  %47108 = vmatprep.mubr.msk.f32.mxu1 %vm48938_vm3, %v54942_v52 }
 0x270   : > { %9644 = vmatmul.mubr.f32.vlgmr.msra.gmra.mrb[0].mxu0 %v50573_v11  ;;  %47111 = vmatprep.subr.mxu1 %v54942_v52  ;;  %v50805_v11 = vand.u32 4294901760, %v12378_v60 }
 0x271   : > { %9661 = vmatpush1.msra.mxu0 %v9660_v62  ;;  %v3707_v18 = vpop.f32.mrb[40].mxu1  ;;  %9724 = vmatprep.mubr.f32.mxu0 %v54942_v52  ;;  %v50813_v62 = vsub.f32 %v12372_v13, %v50798_v39 }
 0x272   : > { %v3708_v20 = vadd.f32 %v3707_v18, %v3634_v56  ;;  %9734 = vmatprep.subr.mxu0 %v50698_v61  ;;  %v46845_v32 = vpop.f32.mrb[41].mxu1  ;;  %47109 = vmatmul.mubr.f32.vlgmr.msra.gmra.mrb[146].mxu1 %v50701_v26  ;;  %v50820_v21 = vsub.f32 %v12378_v60, %v50805_v11 }
 0x273   : > { %47112 = vmatpush3.msra.mxu1 %v50724_v55  ;;  %47113 = vmatprep.mubr.msk.f32.mxu1 %vm48938_vm3, %v54942_v52  ;;  %v50827_v13 = vand.u32 4294901760, %v50813_v62  ;;  %v55072_v32 = vand.u32 4294901760, %v50724_v55 }
 0x274   : > { %47116 = vmatprep.subr.mxu1 %v54942_v52  ;;  %33885 = vrot.lane.b32.xlu0 %v50321_v23, %s55071_s12  ;;  %v54744_v60 = vand.u32 4294901760, %v50820_v21  ;;  %s55086_s12 = smov 59  }
 0x275   : > { %v3781_v22 = vpop.f32.mrb[42].mxu1  ;;  %23598 = vrot.lane.b32.xlu1 %v49368_v31, %s48941_s22  ;;  %s55158_s22 = smov 92  }
 0x276   : > { %v3782_v58 = vadd.f32 %v3781_v22, %v3708_v20  ;;  %v46850_v56 = vpop.f32.mrb[43].mxu1  ;;  %47114 = vmatmul.mubr.f32.vlgmr.msra.gmra.mrb[148].mxu1 %v50714_v7  ;;  %v12925_v55 = vsub.f32 %v50820_v21, %v54744_v60 }
 0x277   : > { %47117 = vmatpush3.msra.mxu1 %v50708_v1  ;;  %47118 = vmatprep.mubr.msk.f32.mxu1 %vm48938_vm3, %v54942_v52 }
 0x278   : > { %9726 = vmatmul.mubr.f32.vlgmr.msra.gmra.mrb[0].mxu0 %v50499_v25  ;;  %47121 = vmatprep.subr.mxu1 %v54942_v52 }
 0x279   : > { %9737 = vmatpush1.msra.mxu0 %v50729_v48  ;;  %v3855_v23 = vpop.f32.mrb[44].mxu1  ;;  %9800 = vmatprep.mubr.f32.mxu0 %v54942_v52 }
 0x27a   : > { %v3856_v18 = vadd.f32 %v3855_v23, %v3782_v58  ;;  %9810 = vmatprep.subr.mxu0 %v50677_v40  ;;  %v46855_v20 = vpop.f32.mrb[45].mxu1  ;;  %47119 = vmatmul.mubr.f32.vlgmr.msra.gmra.mrb[150].mxu1 %v50734_v6  ;;  %v12450_v58 = vsub.f32 %v50813_v62, %v50827_v13  ;;  %v50840_v23 = vpop.permute.xlu1 %16110 }
 0x27b   : > { %47122 = vmatpush3.msra.mxu1 %v55072_v32  ;;  %47123 = vmatprep.mubr.msk.f32.mxu1 %vm48938_vm3, %v54942_v52  ;;  %v55073_v20 = vld [vmem:[#allocation7_spill] sm:$0xff]  ;;  %v55074_v32 = vand.u32 4294901760, %v50698_v61  ;;  %v55076_v61 = vld [vmem:[#allocation20_spill] sm:$0xff] }
 0x27c   : > { %47126 = vmatprep.subr.mxu1 %v54942_v52  ;;  %v10497_v8 = vsel %vm10496_vm13, %v55077_v53, %v55073_v20  ;;  %33891 = vrot.lane.b32.xlu0 %v50750_v33, %s48955_s18 }
 0x27d   : > { %v3927_v22 = vpop.f32.mrb[46].mxu1  ;;  %34825 = vrot.lane.b32.xlu1 %v49023_v4, %s48945_s9 }
 0x27e   : > { %v3928_v56 = vadd.f32 %v3927_v22, %v3856_v18  ;;  %v46860_v34 = vpop.f32.mrb[47].mxu1  ;;  %47124 = vmatmul.mubr.f32.vlgmr.msra.gmra.mrb[152].mxu1 %v50701_v26 }
 0x27f   : > { %47127 = vmatpush3.msra.mxu1 %v50708_v1  ;;  %47128 = vmatprep.mubr.msk.f32.mxu1 %vm48938_vm3, %v54942_v52  ;;  %v10498_v34 = vsel %vm10496_vm13, %v55073_v20, %v55047_v44  ;;  %v50861_v44 = vand.u32 4294901760, %v12450_v58  ;;  %vm17048_vm13 = vcmask 654336  }
 0x280   : > { %v50852_v18 = vadd.f32 %v3928_v56, %v50767_v46  ;;  %9803 = vmatmul.mubr.f32.vlgmr.msra.gmra.mrb[0].mxu0 %v50512_v17  ;;  %47131 = vmatprep.subr.mxu1 %v54942_v52  ;;  %v50863_v46 = vpop.permute.xlu1 %31081  ;;  %v10504_v17 = vsel %vm225_vm2, %v10498_v34, 0  ;;  %v12926_v56 = vand.u32 4294901760, %v12925_v55  ;;  %v55078_v55 = vld [vmem:[#allocation18_spill] sm:$0xff] }
 0x281   : > { %9812 = vmatpush1.msra.mxu0 %v50711_v41  ;;  %v4493_v1 = vpop.f32.mrb[48].mxu1  ;;  %9875 = vmatprep.mubr.f32.mxu0 %v54942_v52  ;;  %55075 = vst [vmem:[#allocation16_spill] sm:$0xff] %v50863_v46  ;;  %v13308_v43 = vsel %vm222_vm0, %v55078_v55, 0 }
 0x282   : > { %9888 = vmatprep.subr.mxu0 %v55074_v32  ;;  %v46865_v22 = vpop.f32.mrb[49].mxu1  ;;  %47129 = vmatmul.mubr.f32.vlgmr.msra.gmra.mrb[154].mxu1 %v50701_v26  ;;  %v13307_v32 = vsel %vm13304_vm4, %v55076_v61, %v50647_v12 }
 0x283   : > { %47132 = vmatpush3.msra.mxu1 %v50805_v11  ;;  %47133 = vmatprep.mubr.msk.f32.mxu1 %vm48938_vm3, %v54942_v52  ;;  %v50873_v22 = vand.u32 4294901760, %v10504_v17 }
 0x284   : > { %47136 = vmatprep.subr.mxu1 %v54942_v52  ;;  %v31080_v34 = vpop.permute.xlu1 %31079  ;;  %22662 = vrot.lane.b32.xlu0 %v49368_v31, %s55086_s12 }
 0x285   : > { %v4569_v60 = vpop.f32.mrb[50].mxu1  ;;  %v50885_v12 = vsel %vm31087_vm5, %v31080_v34, %v50863_v46  ;;  %v50894_v20 = vsub.f32 %v10504_v17, %v50873_v22  ;;  %34823 = vrot.lane.b32.xlu1 %v50584_v50, %s48945_s9 }
 0x286   : > { %v4570_v58 = vadd.f32 %v4569_v60, %v4493_v1  ;;  %v46870_v0 = vpop.f32.mrb[51].mxu1  ;;  %47134 = vmatmul.mubr.f32.vlgmr.msra.gmra.mrb[156].mxu1 %v50861_v44  ;;  %55079 = vst [vmem:[#allocation14_spill] sm:$0xff] %v50885_v12  ;;  %v55080_v60 = vand.u32 4294901760, %v50729_v48  ;;  %v10502_v1 = vsel %vm225_vm2, %v10497_v8, 0 }
 0x287   : > { %47137 = vmatpush3.msra.mxu1 %v12926_v56  ;;  %47138 = vmatprep.mubr.msk.f32.mxu1 %vm48938_vm3, %v54942_v52  ;;  %v13314_v0 = vsel %vm225_vm2, %v13307_v32, 0  ;;  %v50897_v56 = vand.u32 4294901760, %v13308_v43  ;;  %v50907_v17 = vand.u32 4294901760, %v10502_v1  ;;  %v54748_v55 = vand.u32 4294901760, %v50894_v20 }
 0x288   : > { %9879 = vmatmul.mubr.f32.vlgmr.msra.gmra.mrb[0].mxu0 %v50532_v51  ;;  %47141 = vmatprep.subr.mxu1 %v54942_v52  ;;  %v50904_v48 = vand.u32 4294901760, %v13314_v0 }
 0x289   : > { %9892 = vmatpush1.msra.mxu0 %v55080_v60  ;;  %v4643_v53 = vpop.f32.mrb[52].mxu1  ;;  %9955 = vmatprep.mubr.f32.mxu0 %v54942_v52  ;;  %v50910_v32 = vsub.f32 %v13308_v43, %v50897_v56  ;;  %v50914_v60 = vpop.permute.xlu0 %29210  ;;  %v50925_v43 = vsub.f32 %v10502_v1, %v50907_v17 }
 0x28a   : > { %v4644_v34 = vadd.f32 %v4643_v53, %v4570_v58  ;;  %9964 = vmatprep.subr.mxu0 %v50677_v40  ;;  %v46875_v51 = vpop.f32.mrb[53].mxu1  ;;  %47139 = vmatmul.mubr.f32.vlgmr.msra.gmra.mrb[158].mxu1 %v50798_v39  ;;  %55081 = vst [vmem:[#allocation7_spill] sm:$0xff] %v50914_v60  ;;  %v50920_v53 = vsub.f32 %v13314_v0, %v50904_v48 }
 0x28b   : > { %47142 = vmatpush3.msra.mxu1 %v50820_v21  ;;  %47143 = vmatprep.mubr.msk.f32.mxu1 %vm48938_vm3, %v54942_v52  ;;  %v50930_v51 = vand.u32 4294901760, %v50910_v32  ;;  %v10589_v0 = vsub.f32 %v50894_v20, %v54748_v55 }
 0x28c   : > { %47146 = vmatprep.subr.mxu1 %v54942_v52  ;;  %v55084_v12 = vand.u32 4294901760, %v50920_v53  ;;  %25470 = vrot.lane.b32.xlu1 %v49368_v31, %s48927_s30  ;;  %s48956_s30 = smov 15  }
 0x28d   : > { %v4717_v8 = vpop.f32.mrb[54].mxu1  ;;  %v10590_v1 = vand.u32 4294901760, %v10589_v0 }
 0x28e   : > { %v4718_v58 = vadd.f32 %v4717_v8, %v4644_v34  ;;  %v46880_v40 = vpop.f32.mrb[55].mxu1  ;;  %47144 = vmatmul.mubr.f32.vlgmr.msra.gmra.mrb[160].mxu1 %v50813_v62 }
 0x28f   : > { %47147 = vmatpush3.msra.mxu1 %v50805_v11  ;;  %47148 = vmatprep.mubr.msk.f32.mxu1 %vm48938_vm3, %v54942_v52 }
 0x290   : > { %9957 = vmatmul.mubr.f32.vlgmr.msra.gmra.mrb[0].mxu0 %v50499_v25  ;;  %47151 = vmatprep.subr.mxu1 %v54942_v52 }
 0x291   : > { %9966 = vmatpush1.msra.mxu0 %v50711_v41  ;;  %v4791_v34 = vpop.f32.mrb[56].mxu1  ;;  %10029 = vmatprep.mubr.f32.mxu0 %v54942_v52  ;;  %v55082_v41 = vand.u32 4294901760, %v50820_v21 }
 0x292   : > { %v4792_v8 = vadd.f32 %v4791_v34, %v4718_v58  ;;  %v46885_v40 = vpop.f32.mrb[57].mxu1  ;;  %47149 = vmatmul.mubr.f32.vlgmr.msra.gmra.mrb[162].mxu1 %v50827_v13  ;;  %10509 = vmatprep.subr.mxu0 %v50873_v22  ;;  %v50943_v58 = vpop.permute.xlu0 %29208  ;;  %v13861_v34 = vsub.f32 %v50920_v53, %v55084_v12 }
 0x293   : > { %47152 = vmatpush3.msra.mxu1 %v55082_v41  ;;  %47153 = vmatprep.mubr.msk.f32.mxu1 %vm48938_vm3, %v54942_v52  ;;  %55083 = vst [vmem:[#allocation20_spill] sm:$0xff] %v50943_v58  ;;  %v13386_v41 = vsub.f32 %v50910_v32, %v50930_v51  ;;  %v55088_v58 = vld [vmem:[#allocation22_spill] sm:$0xff] }
 0x294   : > { %47156 = vmatprep.subr.mxu1 %v54942_v52  ;;  %35761 = vrot.lane.b32.xlu1 %v49023_v4, %s48956_s30 }
 0x295   : > { %v4863_v40 = vpop.f32.mrb[58].mxu1  ;;  %v50970_v12 = vand.u32 4294901760, %v13386_v41 }
 0x296   : > { %v4864_v55 = vadd.f32 %v4863_v40, %v4792_v8  ;;  %v46890_v21 = vpop.f32.mrb[59].mxu1  ;;  %47154 = vmatmul.mubr.f32.vlgmr.msra.gmra.mrb[164].mxu1 %v50798_v39 }
 0x297   : > { %47157 = vmatpush3.msra.mxu1 %v50805_v11  ;;  %47158 = vmatprep.mubr.msk.f32.mxu1 %vm48938_vm3, %v54942_v52  ;;  %v55085_v11 = vand.u32 4294901760, %v50925_v43 }
 0x298   : > { %v50960_v46 = vadd.f32 %v4864_v55, %v50852_v18  ;;  %10031 = vmatmul.mubr.f32.vlgmr.msra.gmra.mrb[0].mxu0 %v50499_v25  ;;  %47161 = vmatprep.subr.mxu1 %v54942_v52  ;;  %v14239_v18 = vpop.permute.xlu0 %14238  ;;  %v13862_v25 = vand.u32 4294901760, %v13861_v34  ;;  %v14244_v34 = vsel %vm222_vm0, %v55088_v58, 0 }
 0x299   : > { %v5429_v8 = vpop.f32.mrb[60].mxu1  ;;  %10511 = vmatpush1.msra.mxu0 %v50907_v17  ;;  %10574 = vmatprep.mubr.f32.mxu0 %v54942_v52  ;;  %v10595_v0 = vsub.f32 %v50925_v43, %v55085_v11  ;;  %v55087_v11 = vld [vmem:[#allocation24_spill] sm:$0xff] }
 0x29a   : > { %v46895_v40 = vpop.f32.mrb[61].mxu1  ;;  %47159 = vmatmul.mubr.f32.vlgmr.msra.gmra.mrb[166].mxu1 %v50798_v39  ;;  %10591 = vmatprep.subr.mxu0 %v10590_v1 }
 0x29b   : > { %47162 = vmatpush3.msra.mxu1 %v50904_v48  ;;  %47163 = vmatprep.mubr.msk.f32.mxu1 %vm48938_vm3, %v54942_v52  ;;  %v10596_v21 = vand.u32 4294901760, %v10595_v0  ;;  %v14243_v40 = vsel %vm14240_vm9, %v55087_v11, %v14239_v18 }
 0x29c   : > { %47166 = vmatprep.subr.mxu1 %v54942_v52  ;;  %v14250_v0 = vsel %vm225_vm2, %v14243_v40, 0  ;;  %v51034_v60 = vpop.permute.xlu0 %30146 }
 0x29d   : > { %v5505_v55 = vpop.f32.mrb[62].mxu1  ;;  %55091 = vst [vmem:[#allocation9_spill] sm:$0xff] %v51034_v60 }
 0x29e   : > { %v5506_v1 = vadd.f32 %v5505_v55, %v5429_v8  ;;  %v46900_v41 = vpop.f32.mrb[63].mxu1  ;;  %47164 = vmatmul.mubr.f32.vlgmr.msra.gmra.mrb[168].mxu1 %v50970_v12  ;;  %v50991_v8 = vand.u32 4294901760, %v14244_v34 }
 0x29f   : > { %47167 = vmatpush3.msra.mxu1 %v13862_v25  ;;  %47168 = vmatprep.mubr.msk.f32.mxu1 %vm48938_vm3, %v54942_v52 }
 0x2a0   : > { %10580 = vmatmul.mubr.f32.vlgmr.msra.gmra.mrb[0].mxu0 %v50665_v19  ;;  %47171 = vmatprep.subr.mxu1 %v54942_v52  ;;  %v50998_v19 = vand.u32 4294901760, %v14250_v0  ;;  %v51011_v40 = vsub.f32 %v14244_v34, %v50991_v8 }
 0x2a1   : > { %10597 = vmatpush1.msra.mxu0 %v10596_v21  ;;  %v5579_v18 = vpop.f32.mrb[64].mxu1  ;;  %10660 = vmatprep.mubr.f32.mxu0 %v54942_v52  ;;  %v51006_v21 = vld [vmem:[%s54648_s1 + $0x8] sm:$0xff] }
 0x2a2   : > { %v5580_v55 = vadd.f32 %v5579_v18, %v5506_v1  ;;  %10670 = vmatprep.subr.mxu0 %v50894_v20  ;;  %v46905_v58 = vpop.f32.mrb[65].mxu1  ;;  %47169 = vmatmul.mubr.f32.vlgmr.msra.gmra.mrb[170].mxu1 %v50897_v56  ;;  %v51018_v18 = vsub.f32 %v14250_v0, %v50998_v19 }
 0x2a3   : > { %47172 = vmatpush3.msra.mxu1 %v50920_v53  ;;  %47173 = vmatprep.mubr.msk.f32.mxu1 %vm48938_vm3, %v54942_v52 }
 0x2a4   : > { %47176 = vmatprep.subr.mxu1 %v54942_v52  ;;  %34821 = vrot.lane.b32.xlu0 %v51006_v21, %s55089_s5  ;;  %v54754_v0 = vand.u32 4294901760, %v51018_v18  ;;  %s48957_s5 = smov 14  }
 0x2a5   : > { %v5653_v25 = vpop.f32.mrb[66].mxu1 }
 0x2a6   : > { %v5654_v1 = vadd.f32 %v5653_v25, %v5580_v55  ;;  %v46910_v41 = vpop.f32.mrb[67].mxu1  ;;  %47174 = vmatmul.mubr.f32.vlgmr.msra.gmra.mrb[172].mxu1 %v50910_v32  ;;  %v51025_v55 = vand.u32 4294901760, %v51011_v40  ;;  %v14797_v16 = vsub.f32 %v51018_v18, %v54754_v0  ;;  %v55093_v0 = vand.u32 4294901760, %v50894_v20  ;;  %v55095_v20 = vld [vmem:[#allocation28_spill] sm:$0xff] }
 0x2a7   : > { %47177 = vmatpush3.msra.mxu1 %v50904_v48  ;;  %47178 = vmatprep.mubr.msk.f32.mxu1 %vm48938_vm3, %v54942_v52  ;;  %v55090_v41 = vand.u32 4294901760, %v50920_v53 }
 0x2a8   : > { %10662 = vmatmul.mubr.f32.vlgmr.msra.gmra.mrb[0].mxu0 %v50599_v45  ;;  %47181 = vmatprep.subr.mxu1 %v54942_v52  ;;  %v14322_v53 = vsub.f32 %v51011_v40, %v51025_v55 }
 0x2a9   : > { %10673 = vmatpush1.msra.mxu0 %v50925_v43  ;;  %v5727_v34 = vpop.f32.mrb[68].mxu1  ;;  %10736 = vmatprep.mubr.f32.mxu0 %v54942_v52 }
 0x2aa   : > { %v5728_v58 = vadd.f32 %v5727_v34, %v5654_v1  ;;  %10746 = vmatprep.subr.mxu0 %v50873_v22  ;;  %v46915_v25 = vpop.f32.mrb[69].mxu1  ;;  %47179 = vmatmul.mubr.f32.vlgmr.msra.gmra.mrb[174].mxu1 %v50930_v51 }
 0x2ab   : > { %47182 = vmatpush3.msra.mxu1 %v55090_v41  ;;  %47183 = vmatprep.mubr.msk.f32.mxu1 %vm48938_vm3, %v54942_v52  ;;  %v51044_v41 = vpop.permute.xlu1 %17982 }
 0x2ac   : > { %47186 = vmatprep.subr.mxu1 %v54942_v52  ;;  %34827 = vrot.lane.b32.xlu0 %v50750_v33, %s48945_s9 }
 0x2ad   : > { %v5799_v1 = vpop.f32.mrb[70].mxu1 }
 0x2ae   : > { %v5800_v34 = vadd.f32 %v5799_v1, %v5728_v58  ;;  %v46920_v25 = vpop.f32.mrb[71].mxu1  ;;  %47184 = vmatmul.mubr.f32.vlgmr.msra.gmra.mrb[176].mxu1 %v50897_v56  ;;  %v11434_v58 = vsel %vm11432_vm14, %v55092_v36, %v55057_v24  ;;  %v51065_v24 = vand.u32 4294901760, %v14322_v53  ;;  %vm32959_vm14 = vcmask 146432  }
 0x2af   : > { %47187 = vmatpush3.msra.mxu1 %v50904_v48  ;;  %47188 = vmatprep.mubr.msk.f32.mxu1 %vm48938_vm3, %v54942_v52  ;;  %v15175_v25 = vpop.permute.xlu0 %15174 }
 0x2b0   : > { %v51056_v1 = vadd.f32 %v5800_v34, %v50960_v46  ;;  %10739 = vmatmul.mubr.f32.vlgmr.msra.gmra.mrb[0].mxu0 %v50616_v5  ;;  %47191 = vmatprep.subr.mxu1 %v54942_v52  ;;  %v51067_v46 = vpop.permute.xlu1 %32017  ;;  %v11440_v5 = vsel %vm225_vm2, %v11434_v58, 0  ;;  %v14798_v34 = vand.u32 4294901760, %v14797_v16 }
 0x2b1   : > { %10748 = vmatpush1.msra.mxu0 %v50907_v17  ;;  %v6365_v48 = vpop.f32.mrb[72].mxu1  ;;  %10811 = vmatprep.mubr.f32.mxu0 %v54942_v52  ;;  %55094 = vst [vmem:[#allocation18_spill] sm:$0xff] %v51067_v46  ;;  %v51080_v53 = vand.u32 4294901760, %v11440_v5 }
 0x2b2   : > { %10824 = vmatprep.subr.mxu0 %v55093_v0  ;;  %v46925_v37 = vpop.f32.mrb[73].mxu1  ;;  %47189 = vmatmul.mubr.f32.vlgmr.msra.gmra.mrb[178].mxu1 %v50897_v56  ;;  %v15179_v0 = vsel %vm15176_vm10, %v55095_v20, %v15175_v25  ;;  %v51104_v25 = vand.u32 4294901760, %v15180_v27 }
 0x2b3   : > { %47192 = vmatpush3.msra.mxu1 %v50998_v19  ;;  %47193 = vmatprep.mubr.msk.f32.mxu1 %vm48938_vm3, %v54942_v52  ;;  %v51101_v3 = vsub.f32 %v11440_v5, %v51080_v53 }
 0x2b4   : > { %47196 = vmatprep.subr.mxu1 %v54942_v52  ;;  %24534 = vrot.lane.b32.xlu0 %v49368_v31, %s48943_s26  ;;  %v32016_v16 = vpop.permute.xlu1 %32015 }
 0x2b5   : > { %v6441_v37 = vpop.f32.mrb[74].mxu1  ;;  %v51092_v50 = vsel %vm32023_vm11, %v32016_v16, %v51067_v46 }
 0x2b6   : > { %v6442_v58 = vadd.f32 %v6441_v37, %v6365_v48  ;;  %v46930_v60 = vpop.f32.mrb[75].mxu1  ;;  %47194 = vmatmul.mubr.f32.vlgmr.msra.gmra.mrb[180].mxu1 %v51065_v24  ;;  %55098 = vst [vmem:[#allocation24_spill] sm:$0xff] %v51092_v50  ;;  %v55099_v48 = vand.u32 4294901760, %v50925_v43 }
 0x2b7   : > { %47197 = vmatpush3.msra.mxu1 %v14798_v34  ;;  %47198 = vmatprep.mubr.msk.f32.mxu1 %vm48938_vm3, %v54942_v52  ;;  %v15186_v60 = vsel %vm225_vm2, %v15179_v0, 0 }
 0x2b8   : > { %10815 = vmatmul.mubr.f32.vlgmr.msra.gmra.mrb[0].mxu0 %v50632_v63  ;;  %47201 = vmatprep.subr.mxu1 %v54942_v52  ;;  %v51111_v43 = vand.u32 4294901760, %v15186_v60 }
 0x2b9   : > { %10828 = vmatpush1.msra.mxu0 %v55099_v48  ;;  %v6515_v36 = vpop.f32.mrb[76].mxu1  ;;  %10891 = vmatprep.mubr.f32.mxu0 %v54942_v52 }
 0x2ba   : > { %v6516_v34 = vadd.f32 %v6515_v36, %v6442_v58  ;;  %10900 = vmatprep.subr.mxu0 %v50873_v22  ;;  %v46935_v63 = vpop.f32.mrb[77].mxu1  ;;  %47199 = vmatmul.mubr.f32.vlgmr.msra.gmra.mrb[182].mxu1 %v50991_v8  ;;  %v51121_v22 = vsub.f32 %v15180_v27, %v51104_v25  ;;  %v54759_v58 = vand.u32 4294901760, %v51101_v3  ;;  %v51129_v16 = vsub.f32 %v15186_v60, %v51111_v43 }
 0x2bb   : > { %47202 = vmatpush3.msra.mxu1 %v51018_v18  ;;  %47203 = vmatprep.mubr.msk.f32.mxu1 %vm48938_vm3, %v54942_v52  ;;  %v51134_v27 = vsub.f32 %v11438_v47, %v51116_v57 }
 0x2bc   : > { %47206 = vmatprep.subr.mxu1 %v54942_v52  ;;  %35757 = vrot.lane.b32.xlu0 %v51006_v21, %s48906_s6  ;;  %v51139_v36 = vand.u32 4294901760, %v51121_v22  ;;  %v11525_v60 = vsub.f32 %v51101_v3, %v54759_v58  ;;  %v54761_v47 = vand.u32 4294901760, %v51129_v16  ;;  %s55137_s6 = smov 96  }
 0x2bd   : > { %v6589_v5 = vpop.f32.mrb[78].mxu1 }
 0x2be   : > { %v6590_v37 = vadd.f32 %v6589_v5, %v6516_v34  ;;  %v46940_v0 = vpop.f32.mrb[79].mxu1  ;;  %47204 = vmatmul.mubr.f32.vlgmr.msra.gmra.mrb[184].mxu1 %v51011_v40  ;;  %v54760_v5 = vand.u32 4294901760, %v51134_v27  ;;  %v11526_v58 = vand.u32 4294901760, %v11525_v60 }
 0x2bf   : > { %47207 = vmatpush3.msra.mxu1 %v50998_v19  ;;  %47208 = vmatprep.mubr.msk.f32.mxu1 %vm48938_vm3, %v54942_v52 }
 0x2c0   : > { %10893 = vmatmul.mubr.f32.vlgmr.msra.gmra.mrb[0].mxu0 %v50599_v45  ;;  %47211 = vmatprep.subr.mxu1 %v54942_v52 }
 0x2c1   : > { %10902 = vmatpush1.msra.mxu0 %v50907_v17  ;;  %v6663_v48 = vpop.f32.mrb[80].mxu1  ;;  %10965 = vmatprep.mubr.f32.mxu0 %v54942_v52  ;;  %v55100_v17 = vand.u32 4294901760, %v51018_v18  ;;  %v15733_v18 = vsub.f32 %v51129_v16, %v54761_v47 }
 0x2c2   : > { %v6664_v34 = vadd.f32 %v6663_v48, %v6590_v37  ;;  %v46945_v63 = vpop.f32.mrb[81].mxu1  ;;  %47209 = vmatmul.mubr.f32.vlgmr.msra.gmra.mrb[186].mxu1 %v51025_v55  ;;  %11445 = vmatprep.subr.mxu0 %v51080_v53 }
 0x2c3   : > { %47212 = vmatpush3.msra.mxu1 %v55100_v17  ;;  %47213 = vmatprep.mubr.msk.f32.mxu1 %vm48938_vm3, %v54942_v52  ;;  %v15258_v63 = vsub.f32 %v51121_v22, %v51139_v36 }
 0x2c4   : > { %47216 = vmatprep.subr.mxu1 %v54942_v52  ;;  %35763 = vrot.lane.b32.xlu0 %v50750_v33, %s48956_s30 }
 0x2c5   : > { %v6735_v37 = vpop.f32.mrb[82].mxu1 }
 0x2c6   : > { %v6736_v0 = vadd.f32 %v6735_v37, %v6664_v34  ;;  %v46950_v48 = vpop.f32.mrb[83].mxu1  ;;  %47214 = vmatmul.mubr.f32.vlgmr.msra.gmra.mrb[188].mxu1 %v50991_v8  ;;  %v51173_v37 = vand.u32 4294901760, %v15258_v63  ;;  %v55102_v63 = vld [vmem:[#allocation30_spill] sm:$0xff] }
 0x2c7   : > { %47217 = vmatpush3.msra.mxu1 %v50998_v19  ;;  %47218 = vmatprep.mubr.msk.f32.mxu1 %vm48938_vm3, %v54942_v52  ;;  %v11531_v19 = vsub.f32 %v51134_v27, %v54760_v5  ;;  %v55101_v48 = vld [vmem:[#allocation32_spill] sm:$0xff] }
 0x2c8   : > { %v51163_v17 = vadd.f32 %v6736_v0, %v51056_v1  ;;  %10967 = vmatmul.mubr.f32.vlgmr.msra.gmra.mrb[0].mxu0 %v50599_v45  ;;  %47221 = vmatprep.subr.mxu1 %v54942_v52  ;;  %v15734_v45 = vand.u32 4294901760, %v15733_v18  ;;  %v16115_v5 = vsel %vm16112_vm12, %v55101_v48, %v50840_v23 }
 0x2c9   : > { %v7301_v34 = vpop.f32.mrb[84].mxu1  ;;  %11447 = vmatpush1.msra.mxu0 %v51116_v57  ;;  %11510 = vmatprep.mubr.f32.mxu0 %v54942_v52  ;;  %v11532_v0 = vand.u32 4294901760, %v11531_v19  ;;  %v16122_v18 = vsel %vm225_vm2, %v16115_v5, 0 }
 0x2ca   : > { %v46955_v60 = vpop.f32.mrb[85].mxu1  ;;  %47219 = vmatmul.mubr.f32.vlgmr.msra.gmra.mrb[190].mxu1 %v50991_v8  ;;  %11527 = vmatprep.subr.mxu0 %v11526_v58  ;;  %v16116_v58 = vsel %vm222_vm0, %v55102_v63, 0 }
 0x2cb   : > { %47222 = vmatpush3.msra.mxu1 %v51111_v43  ;;  %47223 = vmatprep.mubr.msk.f32.mxu1 %vm48938_vm3, %v54942_v52  ;;  %v51191_v23 = vand.u32 4294901760, %v16116_v58 }
 0x2cc   : > { %47226 = vmatprep.subr.mxu1 %v54942_v52  ;;  %26406 = vrot.lane.b32.xlu0 %v49368_v31, %s48934_s29  ;;  %s55169_s29 = smov 88  }
 0x2cd   : > { %v7377_v1 = vpop.f32.mrb[86].mxu1 }
 0x2ce   : > { %v7378_v60 = vadd.f32 %v7377_v1, %v7301_v34  ;;  %v46960_v47 = vpop.f32.mrb[87].mxu1  ;;  %47224 = vmatmul.mubr.f32.vlgmr.msra.gmra.mrb[192].mxu1 %v51173_v37  ;;  %v51204_v1 = vsub.f32 %v16116_v58, %v51191_v23 }
 0x2cf   : > { %47227 = vmatpush3.msra.mxu1 %v15734_v45  ;;  %47228 = vmatprep.mubr.msk.f32.mxu1 %vm48938_vm3, %v54942_v52  ;;  %v51201_v45 = vpop.permute.xlu0 %31077 }
 0x2d0   : > { %11516 = vmatmul.mubr.f32.vlgmr.msra.gmra.mrb[0].mxu0 %v50777_v42  ;;  %47231 = vmatprep.subr.mxu1 %v54942_v52  ;;  %v51198_v42 = vand.u32 4294901760, %v16122_v18  ;;  %55103 = vst [vmem:[#allocation22_spill] sm:$0xff] %v51201_v45 }
 0x2d1   : > { %11533 = vmatpush1.msra.mxu0 %v11532_v0  ;;  %v7451_v19 = vpop.f32.mrb[88].mxu1  ;;  %11596 = vmatprep.mubr.f32.mxu0 %v54942_v52 }
 0x2d2   : > { %v7452_v47 = vadd.f32 %v7451_v19, %v7378_v60  ;;  %11606 = vmatprep.subr.mxu0 %v51101_v3  ;;  %v46965_v34 = vpop.f32.mrb[89].mxu1  ;;  %47229 = vmatmul.mubr.f32.vlgmr.msra.gmra.mrb[194].mxu1 %v51104_v25  ;;  %v51211_v63 = vsub.f32 %v16122_v18, %v51198_v42  ;;  %v51218_v19 = vand.u32 4294901760, %v51204_v1 }
 0x2d3   : > { %47232 = vmatpush3.msra.mxu1 %v51129_v16  ;;  %47233 = vmatprep.mubr.msk.f32.mxu1 %vm48938_vm3, %v54942_v52 }
 0x2d4   : > { %47236 = vmatprep.subr.mxu1 %v54942_v52  ;;  %v54763_v18 = vand.u32 4294901760, %v51211_v63  ;;  %36693 = vrot.lane.b32.xlu0 %v51006_v21, %s48908_s8 }
 0x2d5   : > { %v7525_v5 = vpop.f32.mrb[90].mxu1 }
 0x2d6   : > { %v7526_v0 = vadd.f32 %v7525_v5, %v7452_v47  ;;  %v46970_v60 = vpop.f32.mrb[91].mxu1  ;;  %47234 = vmatmul.mubr.f32.vlgmr.msra.gmra.mrb[196].mxu1 %v51121_v22  ;;  %v55104_v5 = vand.u32 4294901760, %v51129_v16  ;;  %v16669_v16 = vsub.f32 %v51211_v63, %v54763_v18  ;;  %v55107_v18 = vand.u32 4294901760, %v51101_v3  ;;  %v55109_v3 = vld [vmem:[#allocation36_spill] sm:$0xff] }
 0x2d7   : > { %47237 = vmatpush3.msra.mxu1 %v51111_v43  ;;  %47238 = vmatprep.mubr.msk.f32.mxu1 %vm48938_vm3, %v54942_v52  ;;  %v51227_v60 = vpop.permute.xlu0 %31083 }
 0x2d8   : > { %11598 = vmatmul.mubr.f32.vlgmr.msra.gmra.mrb[0].mxu0 %v50701_v26  ;;  %47241 = vmatprep.subr.mxu1 %v54942_v52  ;;  %55105 = vst [vmem:[#allocation11_spill] sm:$0xff] %v51227_v60 }
 0x2d9   : > { %11609 = vmatpush1.msra.mxu0 %v51134_v27  ;;  %v7599_v58 = vpop.f32.mrb[92].mxu1  ;;  %11672 = vmatprep.mubr.f32.mxu0 %v54942_v52 }
 0x2da   : > { %v7600_v47 = vadd.f32 %v7599_v58, %v7526_v0  ;;  %11682 = vmatprep.subr.mxu0 %v51080_v53  ;;  %v46975_v34 = vpop.f32.mrb[93].mxu1  ;;  %47239 = vmatmul.mubr.f32.vlgmr.msra.gmra.mrb[198].mxu1 %v51139_v36  ;;  %v16194_v58 = vsub.f32 %v51204_v1, %v51218_v19 }
 0x2db   : > { %47242 = vmatpush3.msra.mxu1 %v55104_v5  ;;  %47243 = vmatprep.mubr.msk.f32.mxu1 %vm48938_vm3, %v54942_v52  ;;  %v51233_v34 = vpop.permute.xlu1 %19854  ;;  %v55106_v5 = vld [vmem:[#allocation15_spill] sm:$0xff] }
 0x2dc   : > { %47246 = vmatprep.subr.mxu1 %v54942_v52  ;;  %v12369_v15 = vsel %vm12368_vm1, %v55110_v29, %v55106_v5 }
 0x2dd   : > { %v7671_v50 = vpop.f32.mrb[94].mxu1 }
 0x2de   : > { %v7672_v46 = vadd.f32 %v7671_v50, %v7600_v47  ;;  %v46980_v0 = vpop.f32.mrb[95].mxu1  ;;  %47244 = vmatmul.mubr.f32.vlgmr.msra.gmra.mrb[200].mxu1 %v51104_v25  ;;  %v12370_v50 = vsel %vm12368_vm1, %v55106_v5, %v55068_v14  ;;  %v51254_v14 = vand.u32 4294901760, %v16194_v58  ;;  %v12374_v5 = vsel %vm225_vm2, %v12369_v15, 0 }
 0x2df   : > { %47247 = vmatpush3.msra.mxu1 %v51111_v43  ;;  %47248 = vmatprep.mubr.msk.f32.mxu1 %vm48938_vm3, %v54942_v52  ;;  %v17047_v0 = vpop.permute.xlu0 %17046  ;;  %vm17984_vm1 = vcmask 646144  }
 0x2e0   : > { %v51245_v47 = vadd.f32 %v7672_v46, %v51163_v17  ;;  %11675 = vmatmul.mubr.f32.vlgmr.msra.gmra.mrb[0].mxu0 %v50714_v7  ;;  %47251 = vmatprep.subr.mxu1 %v54942_v52  ;;  %v51256_v46 = vpop.permute.xlu1 %32953  ;;  %v12376_v7 = vsel %vm225_vm2, %v12370_v50, 0  ;;  %v16670_v17 = vand.u32 4294901760, %v16669_v16  ;;  %v17052_v16 = vsel %vm222_vm0, %v55111_v10, 0 }
 0x2e1   : > { %11684 = vmatpush1.msra.mxu0 %v51116_v57  ;;  %v8237_v43 = vpop.f32.mrb[96].mxu1  ;;  %11747 = vmatprep.mubr.f32.mxu0 %v54942_v52  ;;  %55108 = vst [vmem:[#allocation28_spill] sm:$0xff] %v51256_v46 }
 0x2e2   : > { %11760 = vmatprep.subr.mxu0 %v55107_v18  ;;  %v46985_v45 = vpop.f32.mrb[97].mxu1  ;;  %47249 = vmatmul.mubr.f32.vlgmr.msra.gmra.mrb[202].mxu1 %v51104_v25  ;;  %v51265_v18 = vand.u32 4294901760, %v12376_v7 }
 0x2e3   : > { %47252 = vmatpush3.msra.mxu1 %v51198_v42  ;;  %47253 = vmatprep.mubr.msk.f32.mxu1 %vm48938_vm3, %v54942_v52  ;;  %v17051_v45 = vsel %vm17048_vm13, %v55109_v3, %v17047_v0 }
 0x2e4   : > { %47256 = vmatprep.subr.mxu1 %v54942_v52  ;;  %v32952_v50 = vpop.permute.xlu1 %32951  ;;  %v51286_v10 = vsub.f32 %v12376_v7, %v51265_v18  ;;  %v51299_v7 = vand.u32 4294901760, %v12374_v5 }
 0x2e5   : > { %v8313_v60 = vpop.f32.mrb[98].mxu1  ;;  %v51277_v0 = vsel %vm32959_vm14, %v32952_v50, %v51256_v46 }
 0x2e6   : > { %v8314_v58 = vadd.f32 %v8313_v60, %v8237_v43  ;;  %v46990_v2 = vpop.f32.mrb[99].mxu1  ;;  %47254 = vmatmul.mubr.f32.vlgmr.msra.gmra.mrb[204].mxu1 %v51254_v14  ;;  %55112 = vst [vmem:[#allocation13_spill] sm:$0xff] %v51277_v0  ;;  %v55113_v60 = vand.u32 4294901760, %v51134_v27  ;;  %v51289_v43 = vand.u32 4294901760, %v17052_v16  ;;  %v54767_v50 = vand.u32 4294901760, %v51286_v10 }
 0x2e7   : > { %47257 = vmatpush3.msra.mxu1 %v16670_v17  ;;  %47258 = vmatprep.mubr.msk.f32.mxu1 %vm48938_vm3, %v54942_v52  ;;  %v17058_v2 = vsel %vm225_vm2, %v17051_v45, 0 }
 0x2e8   : > { %11751 = vmatmul.mubr.f32.vlgmr.msra.gmra.mrb[0].mxu0 %v50734_v6  ;;  %47261 = vmatprep.subr.mxu1 %v54942_v52  ;;  %55114 = vst [vmem:[#allocation26_spill] sm:$0xff] %v51289_v43  ;;  %v51296_v27 = vand.u32 4294901760, %v17058_v2  ;;  %v51302_v45 = vsub.f32 %v17052_v16, %v51289_v43  ;;  %v51315_v16 = vsub.f32 %v12374_v5, %v51299_v7 }
 0x2e9   : > { %11764 = vmatpush1.msra.mxu0 %v55113_v60  ;;  %v8387_v29 = vpop.f32.mrb[100].mxu1  ;;  %11827 = vmatprep.mubr.f32.mxu0 %v54942_v52 }
 0x2ea   : > { %v8388_v17 = vadd.f32 %v8387_v29, %v8314_v58  ;;  %11836 = vmatprep.subr.mxu0 %v51080_v53  ;;  %v46995_v6 = vpop.f32.mrb[101].mxu1  ;;  %47259 = vmatmul.mubr.f32.vlgmr.msra.gmra.mrb[206].mxu1 %v51191_v23  ;;  %55115 = vst [vmem:[#allocation32_spill] sm:$0xff] %v51302_v45  ;;  %v51310_v60 = vsub.f32 %v17058_v2, %v51296_v27 }
 0x2eb   : > { %47262 = vmatpush3.msra.mxu1 %v51211_v63  ;;  %47263 = vmatprep.mubr.msk.f32.mxu1 %vm48938_vm3, %v54942_v52  ;;  %v12461_v2 = vsub.f32 %v51286_v10, %v54767_v50 }
 0x2ec   : > { %47266 = vmatprep.subr.mxu1 %v54942_v52  ;;  %v54769_v5 = vand.u32 4294901760, %v51310_v60 }
 0x2ed   : > { %v8461_v15 = vpop.f32.mrb[102].mxu1 }
 0x2ee   : > { %v8462_v58 = vadd.f32 %v8461_v15, %v8388_v17  ;;  %v47000_v53 = vpop.f32.mrb[103].mxu1  ;;  %47264 = vmatmul.mubr.f32.vlgmr.msra.gmra.mrb[208].mxu1 %v51204_v1  ;;  %v51320_v17 = vand.u32 4294901760, %v51302_v45  ;;  %v17605_v33 = vsub.f32 %v51310_v60, %v54769_v5 }
 0x2ef   : > { %47267 = vmatpush3.msra.mxu1 %v51198_v42  ;;  %47268 = vmatprep.mubr.msk.f32.mxu1 %vm48938_vm3, %v54942_v52 }
 0x2f0   : > { %11829 = vmatmul.mubr.f32.vlgmr.msra.gmra.mrb[0].mxu0 %v50701_v26  ;;  %47271 = vmatprep.subr.mxu1 %v54942_v52  ;;  %55116 = vst [vmem:[#allocation30_spill] sm:$0xff] %v51320_v17 }
 0x2f1   : > { %11838 = vmatpush1.msra.mxu0 %v51116_v57  ;;  %v8535_v29 = vpop.f32.mrb[104].mxu1  ;;  %11901 = vmatprep.mubr.f32.mxu0 %v54942_v52  ;;  %v55117_v57 = vand.u32 4294901760, %v51211_v63  ;;  %v17130_v63 = vsub.f32 %v51302_v45, %v51320_v17 }
 0x2f2   : > { %v8536_v6 = vadd.f32 %v8535_v29, %v8462_v58  ;;  %v47005_v15 = vpop.f32.mrb[105].mxu1  ;;  %47269 = vmatmul.mubr.f32.vlgmr.msra.gmra.mrb[210].mxu1 %v51218_v19  ;;  %12381 = vmatprep.subr.mxu0 %v51265_v18  ;;  %v54768_v58 = vand.u32 4294901760, %v51315_v16 }
 0x2f3   : > { %47272 = vmatpush3.msra.mxu1 %v55117_v57  ;;  %47273 = vmatprep.mubr.msk.f32.mxu1 %vm48938_vm3, %v54942_v52  ;;  %v12462_v57 = vand.u32 4294901760, %v12461_v2  ;;  %v51358_v2 = vand.u32 4294901760, %v17130_v63 }
 0x2f4   : > { %47276 = vmatprep.subr.mxu1 %v54942_v52 }
 0x2f5   : > { %v8607_v53 = vpop.f32.mrb[106].mxu1 }
 0x2f6   : > { %v8608_v29 = vadd.f32 %v8607_v53, %v8536_v6  ;;  %v47010_v15 = vpop.f32.mrb[107].mxu1  ;;  %47274 = vmatmul.mubr.f32.vlgmr.msra.gmra.mrb[212].mxu1 %v51191_v23 }
 0x2f7   : > { %47277 = vmatpush3.msra.mxu1 %v51198_v42  ;;  %47278 = vmatprep.mubr.msk.f32.mxu1 %vm48938_vm3, %v54942_v52  ;;  %v12467_v42 = vsub.f32 %v51315_v16, %v54768_v58  ;;  %v55118_v15 = vld [vmem:[#allocation40_spill] sm:$0xff]  ;;  %v51370_v58 = vld [vmem:[%s49011_s23] sm:$0xff] }
 0x2f8   : > { %v51348_v50 = vadd.f32 %v8608_v29, %v51245_v47  ;;  %11903 = vmatmul.mubr.f32.vlgmr.msra.gmra.mrb[0].mxu0 %v50701_v26  ;;  %47281 = vmatprep.subr.mxu1 %v54942_v52  ;;  %v17606_v26 = vand.u32 4294901760, %v17605_v33  ;;  %v17987_v63 = vsel %vm17984_vm1, %v55118_v15, %v51044_v41 }
 0x2f9   : > { %12383 = vmatpush1.msra.mxu0 %v51299_v7  ;;  %12446 = vmatprep.mubr.f32.mxu0 %v54942_v52  ;;  %v9173_v6 = vpop.f32.mrb[108].mxu1  ;;  %v12468_v53 = vand.u32 4294901760, %v12467_v42  ;;  %v17994_v41 = vsel %vm225_vm2, %v17987_v63, 0 }
 0x2fa   : > { %47279 = vmatmul.mubr.f32.vlgmr.msra.gmra.mrb[214].mxu1 %v51191_v23  ;;  %12463 = vmatprep.subr.mxu0 %v12462_v57  ;;  %v47015_v47 = vpop.f32.mrb[109].mxu1 }
 0x2fb   : > { %47282 = vmatpush3.msra.mxu1 %v51296_v27  ;;  %47283 = vmatprep.mubr.msk.f32.mxu1 %vm48938_vm3, %v54942_v52  ;;  %v55119_v47 = vld [vmem:[#allocation38_spill] sm:$0xff] }
 0x2fc   : > { %47286 = vmatprep.subr.mxu1 %v54942_v52  ;;  %35759 = vrot.lane.b32.xlu1 %v51370_v58, %s48956_s30  ;;  %v17988_v5 = vsel %vm222_vm0, %v55119_v47, 0 }
 0x2fd   : > { %v9249_v29 = vpop.f32.mrb[110].mxu1  ;;  %v51383_v0 = vand.u32 4294901760, %v17988_v5 }
 0x2fe   : > { %47284 = vmatmul.mubr.f32.vlgmr.msra.gmra.mrb[216].mxu1 %v51358_v2  ;;  %v9250_v57 = vadd.f32 %v9249_v29, %v9173_v6  ;;  %v47020_v33 = vpop.f32.mrb[111].mxu1  ;;  %v51395_v29 = vpop.permute.xlu0 %32013 }
 0x2ff   : > { %47287 = vmatpush3.msra.mxu1 %v17606_v26  ;;  %47288 = vmatprep.mubr.msk.f32.mxu1 %vm48938_vm3, %v54942_v52  ;;  %55120 = vst [vmem:[#allocation15_spill] sm:$0xff] %v51395_v29  ;;  %v51400_v63 = vsub.f32 %v17988_v5, %v51383_v0 }
 0x300   : > { %12452 = vmatmul.mubr.f32.vlgmr.msra.gmra.mrb[0].mxu0 %v50861_v44  ;;  %47291 = vmatprep.subr.mxu1 %v54942_v52  ;;  %v51390_v44 = vand.u32 4294901760, %v17994_v41 }
 0x301   : > { %12469 = vmatpush1.msra.mxu0 %v12468_v53  ;;  %v9323_v42 = vpop.f32.mrb[112].mxu1  ;;  %12532 = vmatprep.mubr.f32.mxu0 %v54942_v52 }
 0x302   : > { %12542 = vmatprep.subr.mxu0 %v51286_v10  ;;  %47289 = vmatmul.mubr.f32.vlgmr.msra.gmra.mrb[218].mxu1 %v51289_v43  ;;  %v9324_v6 = vadd.f32 %v9323_v42, %v9250_v57  ;;  %v47025_v26 = vpop.f32.mrb[113].mxu1  ;;  %v51407_v47 = vsub.f32 %v17994_v41, %v51390_v44  ;;  %v51414_v42 = vand.u32 4294901760, %v51400_v63 }
 0x303   : > { %47292 = vmatpush3.msra.mxu1 %v51310_v60  ;;  %47293 = vmatprep.mubr.msk.f32.mxu1 %vm48938_vm3, %v54942_v52 }
 0x304   : > { %47296 = vmatprep.subr.mxu1 %v54942_v52  ;;  %27342 = vrot.lane.b32.xlu1 %v49368_v31, %s48947_s25  ;;  %v54773_v41 = vand.u32 4294901760, %v51407_v47  ;;  %s55265_s25 = smov 68  }
 0x305   : > { %v9397_v53 = vpop.f32.mrb[114].mxu1 }
 0x306   : > { %47294 = vmatmul.mubr.f32.vlgmr.msra.gmra.mrb[220].mxu1 %v51302_v45  ;;  %v9398_v57 = vadd.f32 %v9397_v53, %v9324_v6  ;;  %v47030_v33 = vpop.f32.mrb[115].mxu1  ;;  %v55121_v53 = vand.u32 4294901760, %v51310_v60  ;;  %v18541_v60 = vsub.f32 %v51407_v47, %v54773_v41 }
 0x307   : > { %47297 = vmatpush3.msra.mxu1 %v51296_v27  ;;  %47298 = vmatprep.mubr.msk.f32.mxu1 %vm48938_vm3, %v54942_v52  ;;  %v51423_v33 = vpop.permute.xlu0 %32019 }
 0x308   : > { %12534 = vmatmul.mubr.f32.vlgmr.msra.gmra.mrb[0].mxu0 %v50798_v39  ;;  %47301 = vmatprep.subr.mxu1 %v54942_v52  ;;  %55122 = vst [vmem:[#allocation36_spill] sm:$0xff] %v51423_v33  ;;  %v18542_v41 = vand.u32 4294901760, %v18541_v60 }
 0x309   : > { %12545 = vmatpush1.msra.mxu0 %v51315_v16  ;;  %v9471_v5 = vpop.f32.mrb[116].mxu1  ;;  %12608 = vmatprep.mubr.f32.mxu0 %v54942_v52 }
 0x30a   : > { %12618 = vmatprep.subr.mxu0 %v51265_v18  ;;  %47299 = vmatmul.mubr.f32.vlgmr.msra.gmra.mrb[222].mxu1 %v51320_v17  ;;  %v9472_v6 = vadd.f32 %v9471_v5, %v9398_v57  ;;  %v47035_v26 = vpop.f32.mrb[117].mxu1  ;;  %v18066_v57 = vsub.f32 %v51400_v63, %v51414_v42  ;;  %v51429_v5 = vpop.permute.xlu1 %21726  ;;  %v55126_v17 = vld [vmem:[#allocation21_spill] sm:$0xff] }
 0x30b   : > { %47302 = vmatpush3.msra.mxu1 %v55121_v53  ;;  %47303 = vmatprep.mubr.msk.f32.mxu1 %vm48938_vm3, %v54942_v52  ;;  %v55123_v26 = vld [vmem:[#allocation19_spill] sm:$0xff]  ;;  %v55124_v53 = vand.u32 4294901760, %v51286_v10 }
 0x30c   : > { %47306 = vmatprep.subr.mxu1 %v54942_v52  ;;  %v13305_v15 = vsel %vm13304_vm4, %v55126_v17, %v55123_v26  ;;  %36697 = vrot.lane.b32.xlu1 %v49023_v4, %s48957_s5 }
 0x30d   : > { %v9543_v46 = vpop.f32.mrb[118].mxu1 }
 0x30e   : > { %v9544_v29 = vadd.f32 %v9543_v46, %v9472_v6  ;;  %v47040_v45 = vpop.f32.mrb[119].mxu1  ;;  %47304 = vmatmul.mubr.f32.vlgmr.msra.gmra.mrb[224].mxu1 %v51289_v43  ;;  %v13306_v46 = vsel %vm13304_vm4, %v55123_v26, %v55076_v61  ;;  %v18919_v6 = vpop.permute.xlu0 %18918  ;;  %v51450_v61 = vand.u32 4294901760, %v18066_v57  ;;  %vm19856_vm4 = vcmask 506880  }
 0x30f   : > { %47307 = vmatpush3.msra.mxu1 %v51296_v27  ;;  %47308 = vmatprep.mubr.msk.f32.mxu1 %vm48938_vm3, %v54942_v52  ;;  %v18923_v10 = vsel %vm18920_vm8, %v49604_v59, %v18919_v6 }
 0x310   : > { %v51441_v45 = vadd.f32 %v9544_v29, %v51348_v50  ;;  %12611 = vmatmul.mubr.f32.vlgmr.msra.gmra.mrb[0].mxu0 %v50813_v62  ;;  %47311 = vmatprep.subr.mxu1 %v54942_v52  ;;  %v51452_v29 = vpop.permute.xlu1 %33889  ;;  %v13312_v62 = vsel %vm225_vm2, %v13306_v46, 0 }
 0x311   : > { %12620 = vmatpush1.msra.mxu0 %v51299_v7  ;;  %12683 = vmatprep.mubr.f32.mxu0 %v54942_v52  ;;  %v10109_v27 = vpop.f32.mrb[120].mxu1  ;;  %55125 = vst [vmem:[#allocation17_spill] sm:$0xff] %v51452_v29 }
 0x312   : > { %12696 = vmatprep.subr.mxu0 %v55124_v53  ;;  %47309 = vmatmul.mubr.f32.vlgmr.msra.gmra.mrb[226].mxu1 %v51289_v43  ;;  %v47045_v50 = vpop.f32.mrb[121].mxu1  ;;  %v51461_v53 = vand.u32 4294901760, %v13312_v62  ;;  %v55127_v43 = vld [vmem:[#allocation42_spill] sm:$0xff] }
 0x313   : > { %47312 = vmatpush3.msra.mxu1 %v51390_v44  ;;  %47313 = vmatprep.mubr.msk.f32.mxu1 %vm48938_vm3, %v54942_v52  ;;  %v18924_v60 = vsel %vm222_vm0, %v55127_v43, 0 }
 0x314   : > { %47316 = vmatprep.subr.mxu1 %v54942_v52  ;;  %v33888_v46 = vpop.permute.xlu1 %33887  ;;  %v51482_v43 = vsub.f32 %v13312_v62, %v51461_v53  ;;  %v51485_v26 = vand.u32 4294901760, %v18924_v60  ;;  %36695 = vrot.lane.b32.xlu1 %v51370_v58, %s48957_s5 }
 0x315   : > { %v10185_v33 = vpop.f32.mrb[122].mxu1  ;;  %v51473_v6 = vsel %vm54786_vm7, %v33888_v46, %v51452_v29  ;;  %vm54798_vm7 = vcmask 130048  }
 0x316   : > { %47314 = vmatmul.mubr.f32.vlgmr.msra.gmra.mrb[228].mxu1 %v51450_v61  ;;  %v10186_v57 = vadd.f32 %v10185_v33, %v10109_v27  ;;  %v47050_v50 = vpop.f32.mrb[123].mxu1  ;;  %55128 = vst [vmem:[#allocation34_spill] sm:$0xff] %v51473_v6  ;;  %v18930_v33 = vsel %vm225_vm2, %v18923_v10, 0  ;;  %v55129_v27 = vand.u32 4294901760, %v51315_v16  ;;  %55130 = vst [vmem:[#allocation38_spill] sm:$0xff] %v51485_v26  ;;  %v51498_v10 = vsub.f32 %v18924_v60, %v51485_v26 }
 0x317   : > { %47317 = vmatpush3.msra.mxu1 %v18542_v41  ;;  %47318 = vmatprep.mubr.msk.f32.mxu1 %vm48938_vm3, %v54942_v52  ;;  %v13310_v41 = vsel %vm225_vm2, %v13305_v15, 0  ;;  %v51492_v16 = vand.u32 4294901760, %v18930_v33  ;;  %v54779_v46 = vand.u32 4294901760, %v51482_v43 }
 0x318   : > { %12687 = vmatmul.mubr.f32.vlgmr.msra.gmra.mrb[0].mxu0 %v50827_v13  ;;  %47321 = vmatprep.subr.mxu1 %v54942_v52  ;;  %v51495_v62 = vand.u32 4294901760, %v13310_v41  ;;  %55131 = vst [vmem:[#allocation19_spill] sm:$0xff] %v51498_v10 }
 0x319   : > { %12700 = vmatpush1.msra.mxu0 %v55129_v27  ;;  %v10259_v17 = vpop.f32.mrb[124].mxu1  ;;  %12763 = vmatprep.mubr.f32.mxu0 %v54942_v52  ;;  %v51506_v27 = vsub.f32 %v18930_v33, %v51492_v16 }
 0x31a   : > { %12772 = vmatprep.subr.mxu0 %v51265_v18  ;;  %47319 = vmatmul.mubr.f32.vlgmr.msra.gmra.mrb[230].mxu1 %v51383_v0  ;;  %v10260_v13 = vadd.f32 %v10259_v17, %v10186_v57  ;;  %v47055_v50 = vpop.f32.mrb[125].mxu1  ;;  %v51511_v60 = vsub.f32 %v13310_v41, %v51495_v62 }
 0x31b   : > { %47322 = vmatpush3.msra.mxu1 %v51407_v47  ;;  %47323 = vmatprep.mubr.msk.f32.mxu1 %vm48938_vm3, %v54942_v52  ;;  %v54780_v41 = vand.u32 4294901760, %v51506_v27 }
 0x31c   : > { %47326 = vmatprep.subr.mxu1 %v54942_v52  ;;  %29214 = vrot.lane.b32.xlu1 %v49368_v31, %s48951_s14  ;;  %s55292_s14 = smov 64  }
 0x31d   : > { %v10333_v15 = vpop.f32.mrb[126].mxu1 }
 0x31e   : > { %47324 = vmatmul.mubr.f32.vlgmr.msra.gmra.mrb[232].mxu1 %v51400_v63  ;;  %v10334_v18 = vadd.f32 %v10333_v15, %v10260_v13  ;;  %v47060_v57 = vpop.f32.mrb[127].mxu1  ;;  %v51516_v13 = vand.u32 4294901760, %v51498_v10  ;;  %v13397_v15 = vsub.f32 %v51482_v43, %v54779_v46 }
 0x31f   : > { %47327 = vmatpush3.msra.mxu1 %v51390_v44  ;;  %47328 = vmatprep.mubr.msk.f32.mxu1 %vm48938_vm3, %v54942_v52  ;;  %v51530_v57 = vld [vmem:[%s49011_s23 + $0x8] sm:$0xff] }
 0x320   : > { %12765 = vmatmul.mubr.f32.vlgmr.msra.gmra.mrb[0].mxu0 %v50798_v39  ;;  %47331 = vmatprep.subr.mxu1 %v54942_v52  ;;  %55132 = vst [vmem:[#allocation21_spill] sm:$0xff] %v51516_v13 }
 0x321   : > { %12774 = vmatpush1.msra.mxu0 %v51299_v7  ;;  %v10407_v17 = vpop.f32.mrb[128].mxu1  ;;  %12837 = vmatprep.mubr.f32.mxu0 %v54942_v52  ;;  %v55133_v7 = vand.u32 4294901760, %v51407_v47  ;;  %v19002_v47 = vsub.f32 %v51498_v10, %v51516_v13 }
 0x322   : > { %47329 = vmatmul.mubr.f32.vlgmr.msra.gmra.mrb[234].mxu1 %v51414_v42  ;;  %v10408_v33 = vadd.f32 %v10407_v17, %v10334_v18  ;;  %v47065_v50 = vpop.f32.mrb[129].mxu1  ;;  %13317 = vmatprep.subr.mxu0 %v51461_v53  ;;  %v19477_v18 = vsub.f32 %v51506_v27, %v54780_v41 }
 0x323   : > { %47332 = vmatpush3.msra.mxu1 %v55133_v7  ;;  %47333 = vmatprep.mubr.msk.f32.mxu1 %vm48938_vm3, %v54942_v52  ;;  %v13398_v7 = vand.u32 4294901760, %v13397_v15  ;;  %v51557_v15 = vand.u32 4294901760, %v19002_v47  ;;  %v19859_v47 = vsel %vm19856_vm4, %v49614_v54, %v51233_v34 }
 0x324   : > { %47336 = vmatprep.subr.mxu1 %v54942_v52  ;;  %36699 = vrot.lane.b32.xlu0 %v51530_v57, %s48957_s5  ;;  %v19866_v34 = vsel %vm225_vm2, %v19859_v47, 0 }
 0x325   : > { %v10479_v17 = vpop.f32.mrb[130].mxu1  ;;  %37633 = vrot.lane.b32.xlu1 %v49023_v4, %s48958_s7 }
 0x326   : > { %v10480_v50 = vadd.f32 %v10479_v17, %v10408_v33  ;;  %47334 = vmatmul.mubr.f32.vlgmr.msra.gmra.mrb[236].mxu1 %v51383_v0  ;;  %v47070_v46 = vpop.f32.mrb[131].mxu1 }
 0x327   : > { %47337 = vmatpush3.msra.mxu1 %v51390_v44  ;;  %47338 = vmatprep.mubr.msk.f32.mxu1 %vm48938_vm3, %v54942_v52  ;;  %v55134_v44 = vand.u32 4294901760, %v51511_v60 }
 0x328   : > { %v51547_v6 = vadd.f32 %v10480_v50, %v51441_v45  ;;  %12839 = vmatmul.mubr.f32.vlgmr.msra.gmra.mrb[0].mxu0 %v50798_v39  ;;  %47341 = vmatprep.subr.mxu1 %v54942_v52  ;;  %v19478_v39 = vand.u32 4294901760, %v19477_v18 }
 0x329   : > { %13319 = vmatpush1.msra.mxu0 %v51495_v62  ;;  %13382 = vmatprep.mubr.f32.mxu0 %v54942_v52  ;;  %v13403_v46 = vsub.f32 %v51511_v60, %v55134_v44  ;;  %v11045_v33 = vpop.f32.mrb[132].mxu1 }
 0x32a   : > { %47339 = vmatmul.mubr.f32.vlgmr.msra.gmra.mrb[238].mxu1 %v51383_v0  ;;  %13399 = vmatprep.subr.mxu0 %v13398_v7  ;;  %v47075_v45 = vpop.f32.mrb[133].mxu1 }
 0x32b   : > { %47342 = vmatpush3.msra.mxu1 %v51492_v16  ;;  %47343 = vmatprep.mubr.msk.f32.mxu1 %vm48938_vm3, %v54942_v52  ;;  %v13404_v17 = vand.u32 4294901760, %v13403_v46  ;;  %v55135_v45 = vld [vmem:[#allocation45_spill] sm:$0xff] }
 0x32c   : > { %47346 = vmatprep.subr.mxu1 %v54942_v52  ;;  %28278 = vrot.lane.b32.xlu0 %v49368_v31, %s48949_s28  ;;  %v19860_v18 = vsel %vm222_vm0, %v55135_v45, 0  ;;  %s48960_s28 = smov 119  }
 0x32d   : > { %v11121_v50 = vpop.f32.mrb[134].mxu1  ;;  %v51579_v41 = vand.u32 4294901760, %v19860_v18  ;;  %37631 = vrot.lane.b32.xlu1 %v51370_v58, %s48958_s7 }
 0x32e   : > { %47344 = vmatmul.mubr.f32.vlgmr.msra.gmra.mrb[240].mxu1 %v51557_v15  ;;  %v11122_v7 = vadd.f32 %v11121_v50, %v11045_v33  ;;  %v47080_v44 = vpop.f32.mrb[135].mxu1  ;;  %v51591_v50 = vpop.permute.xlu0 %32949 }
 0x32f   : > { %47347 = vmatpush3.msra.mxu1 %v19478_v39  ;;  %47348 = vmatprep.mubr.msk.f32.mxu1 %vm48938_vm3, %v54942_v52  ;;  %55136 = vst [vmem:[#allocation42_spill] sm:$0xff] %v51591_v50  ;;  %v51596_v47 = vsub.f32 %v19860_v18, %v51579_v41 }
 0x330   : > { %13388 = vmatmul.mubr.f32.vlgmr.msra.gmra.mrb[0].mxu0 %v50970_v12  ;;  %47351 = vmatprep.subr.mxu1 %v54942_v52  ;;  %v51586_v12 = vand.u32 4294901760, %v19866_v34 }
 0x331   : > { %13405 = vmatpush1.msra.mxu0 %v13404_v17  ;;  %v11195_v46 = vpop.f32.mrb[136].mxu1  ;;  %13468 = vmatprep.mubr.f32.mxu0 %v54942_v52  ;;  %v51610_v18 = vand.u32 4294901760, %v51596_v47 }
 0x332   : > { %13478 = vmatprep.subr.mxu0 %v51482_v43  ;;  %47349 = vmatmul.mubr.f32.vlgmr.msra.gmra.mrb[242].mxu1 %v51485_v26  ;;  %v11196_v33 = vadd.f32 %v11195_v46, %v11122_v7  ;;  %v47085_v39 = vpop.f32.mrb[137].mxu1  ;;  %v51603_v45 = vsub.f32 %v19866_v34, %v51586_v12 }
 0x333   : > { %47352 = vmatpush3.msra.mxu1 %v51506_v27  ;;  %47353 = vmatprep.mubr.msk.f32.mxu1 %vm48938_vm3, %v54942_v52  ;;  %55138 = vst [vmem:[#allocation45_spill] sm:$0xff] %v51610_v18  ;;  %v55139_v39 = vand.u32 4294901760, %v51506_v27 }
 0x334   : > { %47356 = vmatprep.subr.mxu1 %v54942_v52  ;;  %37629 = vrot.lane.b32.xlu0 %v51006_v21, %s55137_s6  ;;  %v54783_v34 = vand.u32 4294901760, %v51603_v45 }
 0x335   : > { %v11269_v17 = vpop.f32.mrb[138].mxu1  ;;  %31085 = vrot.lane.b32.xlu1 %v49368_v31, %s48952_s13  ;;  %s48961_s13 = smov 118  }
 0x336   : > { %47354 = vmatmul.mubr.f32.vlgmr.msra.gmra.mrb[244].mxu1 %v51498_v10  ;;  %v11270_v7 = vadd.f32 %v11269_v17, %v11196_v33  ;;  %v47090_v44 = vpop.f32.mrb[139].mxu1  ;;  %v51619_v17 = vpop.permute.xlu0 %32955  ;;  %v20413_v27 = vsub.f32 %v51603_v45, %v54783_v34  ;;  %v55142_v34 = vand.u32 4294901760, %v51482_v43  ;;  %v55144_v43 = vld [vmem:[#allocation50_spill] sm:$0xff]  ;;  %v55145_v10 = vld [vmem:[#allocation25_spill] sm:$0xff] }
 0x337   : > { %47357 = vmatpush3.msra.mxu1 %v51492_v16  ;;  %47358 = vmatprep.mubr.msk.f32.mxu1 %vm48938_vm3, %v54942_v52  ;;  %55140 = vst [vmem:[#allocation103_spill] sm:$0xff] %v51619_v17 }
 0x338   : > { %13470 = vmatmul.mubr.f32.vlgmr.msra.gmra.mrb[0].mxu0 %v50897_v56  ;;  %47361 = vmatprep.subr.mxu1 %v54942_v52  ;;  %v20414_v50 = vand.u32 4294901760, %v20413_v27 }
 0x339   : > { %13481 = vmatpush1.msra.mxu0 %v51511_v60  ;;  %v11343_v21 = vpop.f32.mrb[140].mxu1  ;;  %13544 = vmatprep.mubr.f32.mxu0 %v54942_v52 }
 0x33a   : > { %13554 = vmatprep.subr.mxu0 %v51461_v53  ;;  %47359 = vmatmul.mubr.f32.vlgmr.msra.gmra.mrb[246].mxu1 %v51516_v13  ;;  %v11344_v46 = vadd.f32 %v11343_v21, %v11270_v7  ;;  %v47095_v33 = vpop.f32.mrb[141].mxu1  ;;  %v19938_v7 = vsub.f32 %v51596_v47, %v51610_v18 }
 0x33b   : > { %47362 = vmatpush3.msra.mxu1 %v55139_v39  ;;  %47363 = vmatprep.mubr.msk.f32.mxu1 %vm48938_vm3, %v54942_v52  ;;  %v51625_v33 = vpop.permute.xlu1 %23598  ;;  %v55141_v39 = vld [vmem:[#allocation23_spill] sm:$0xff] }
 0x33c   : > { %47366 = vmatprep.subr.mxu1 %v54942_v52  ;;  %v14241_v54 = vsel %vm14240_vm9, %v55145_v10, %v55141_v39  ;;  %37635 = vrot.lane.b32.xlu0 %v51530_v57, %s48958_s7 }
 0x33d   : > { %v11415_v44 = vpop.f32.mrb[142].mxu1  ;;  %38569 = vrot.lane.b32.xlu1 %v49023_v4, %s48946_s11 }
 0x33e   : > { %v11416_v29 = vadd.f32 %v11415_v44, %v11344_v46  ;;  %47364 = vmatmul.mubr.f32.vlgmr.msra.gmra.mrb[248].mxu1 %v51485_v26  ;;  %v47100_v21 = vpop.f32.mrb[143].mxu1  ;;  %v14242_v46 = vsel %vm14240_vm9, %v55141_v39, %v55087_v11  ;;  %v51646_v11 = vand.u32 4294901760, %v19938_v7  ;;  %vm54796_vm9 = vcmask 490496  }
 0x33f   : > { %47367 = vmatpush3.msra.mxu1 %v51492_v16  ;;  %47368 = vmatprep.mubr.msk.f32.mxu1 %vm48938_vm3, %v54942_v52  ;;  %v20791_v21 = vpop.permute.xlu0 %20790 }
 0x340   : > { %v51637_v44 = vadd.f32 %v11416_v29, %v51547_v6  ;;  %13547 = vmatmul.mubr.f32.vlgmr.msra.gmra.mrb[0].mxu0 %v50910_v32  ;;  %47371 = vmatprep.subr.mxu1 %v54942_v52  ;;  %v51648_v6 = vpop.permute.xlu1 %34825  ;;  %v14248_v32 = vsel %vm225_vm2, %v14242_v46, 0 }
 0x341   : > { %13556 = vmatpush1.msra.mxu0 %v51495_v62  ;;  %13619 = vmatprep.mubr.f32.mxu0 %v54942_v52  ;;  %v11981_v16 = vpop.f32.mrb[144].mxu1  ;;  %55143 = vst [vmem:[#allocation23_spill] sm:$0xff] %v51648_v6  ;;  %v51657_v13 = vand.u32 4294901760, %v14248_v32 }
 0x342   : > { %13632 = vmatprep.subr.mxu0 %v55142_v34  ;;  %47369 = vmatmul.mubr.f32.vlgmr.msra.gmra.mrb[250].mxu1 %v51485_v26  ;;  %v47105_v29 = vpop.f32.mrb[145].mxu1  ;;  %v20795_v34 = vsel %vm20792_vm6, %v55144_v43, %v20791_v21  ;;  %v55146_v26 = vld [vmem:[#allocation48_spill] sm:$0xff] }
 0x343   : > { %47372 = vmatpush3.msra.mxu1 %v51586_v12  ;;  %47373 = vmatprep.mubr.msk.f32.mxu1 %vm48938_vm3, %v54942_v52  ;;  %v20796_v27 = vsel %vm222_vm0, %v55146_v26, 0  ;;  %v51678_v26 = vsub.f32 %v14248_v32, %v51657_v13 }
 0x344   : > { %47376 = vmatprep.subr.mxu1 %v54942_v52  ;;  %v34824_v46 = vpop.permute.xlu1 %34823  ;;  %v51681_v39 = vand.u32 4294901760, %v20796_v27  ;;  %30148 = vrot.lane.b32.xlu0 %v49368_v31, %s48936_s27 }
 0x345   : > { %v12057_v17 = vpop.f32.mrb[146].mxu1  ;;  %v51669_v21 = vsel %vm54798_vm7, %v34824_v46, %v51648_v6  ;;  %v54791_v46 = vand.u32 4294901760, %v51678_v26  ;;  %38567 = vrot.lane.b32.xlu1 %v51370_v58, %s48946_s11  ;;  %vm35767_vm7 = vcmask 121856  }
 0x346   : > { %47374 = vmatmul.mubr.f32.vlgmr.msra.gmra.mrb[252].mxu1 %v51646_v11  ;;  %v12058_v7 = vadd.f32 %v12057_v17, %v11981_v16  ;;  %v47110_v29 = vpop.f32.mrb[147].mxu1  ;;  %55147 = vst [vmem:[#allocation50_spill] sm:$0xff] %v51669_v21  ;;  %v20802_v17 = vsel %vm225_vm2, %v20795_v34, 0  ;;  %v55148_v16 = vand.u32 4294901760, %v51511_v60  ;;  %55149 = vst [vmem:[#allocation25_spill] sm:$0xff] %v51681_v39  ;;  %v51694_v34 = vsub.f32 %v20796_v27, %v51681_v39 }
 0x347   : > { %47377 = vmatpush3.msra.mxu1 %v20414_v50  ;;  %47378 = vmatprep.mubr.msk.f32.mxu1 %vm48938_vm3, %v54942_v52  ;;  %v14246_v50 = vsel %vm225_vm2, %v14241_v54, 0  ;;  %v51688_v60 = vand.u32 4294901760, %v20802_v17 }
 0x348   : > { %13623 = vmatmul.mubr.f32.vlgmr.msra.gmra.mrb[0].mxu0 %v50930_v51  ;;  %47381 = vmatprep.subr.mxu1 %v54942_v52  ;;  %v51691_v32 = vand.u32 4294901760, %v14246_v50  ;;  %55150 = vst [vmem:[#allocation48_spill] sm:$0xff] %v51694_v34 }
 0x349   : > { %13636 = vmatpush1.msra.mxu0 %v55148_v16  ;;  %v12131_v10 = vpop.f32.mrb[148].mxu1  ;;  %13699 = vmatprep.mubr.f32.mxu0 %v54942_v52  ;;  %v51702_v16 = vsub.f32 %v20802_v17, %v51688_v60 }
 0x34a   : > { %13708 = vmatprep.subr.mxu0 %v51461_v53  ;;  %47379 = vmatmul.mubr.f32.vlgmr.msra.gmra.mrb[254].mxu1 %v51579_v41  ;;  %v12132_v51 = vadd.f32 %v12131_v10, %v12058_v7  ;;  %v47115_v29 = vpop.f32.mrb[149].mxu1  ;;  %v51707_v27 = vsub.f32 %v14246_v50, %v51691_v32 }
 0x34b   : > { %47382 = vmatpush3.msra.mxu1 %v51603_v45  ;;  %47383 = vmatprep.mubr.msk.f32.mxu1 %vm48938_vm3, %v54942_v52  ;;  %v54792_v50 = vand.u32 4294901760, %v51702_v16 }
 0x34c   : > { %47386 = vmatprep.subr.mxu1 %v54942_v52  ;;  %32957 = vrot.lane.b32.xlu1 %v49368_v31, %s48954_s10  ;;  %s48798_s10 = smul.u32 24, %s55495_s16 }
 0x34d   : > { %v12205_v54 = vpop.f32.mrb[150].mxu1 }
 0x34e   : > { %47384 = vmatmul.mubr.f32.vlgmr.msra.gmra.mrb[0].mxu1 %v51596_v47  ;;  %v12206_v53 = vadd.f32 %v12205_v54, %v12132_v51  ;;  %v47120_v7 = vpop.f32.mrb[151].mxu1  ;;  %v51712_v51 = vand.u32 4294901760, %v51694_v34  ;;  %v14333_v54 = vsub.f32 %v51678_v26, %v54791_v46  ;;  %v21349_v46 = vsub.f32 %v51702_v16, %v54792_v50  ;;  %v55156_v50 = vld [vmem:[#allocation52_spill] sm:$0xff]  ;;  %s54639_s6 = scalar_lea.vmem %s54651_s4, %s48798_s10 }
 0x34f   : > { %47387 = vmatpush3.msra.mxu1 %v51586_v12  ;;  %47388 = vmatprep.mubr.msk.f32.mxu1 %vm48938_vm3, %v54942_v52 }
 0x350   : > { %13701 = vmatmul.mubr.f32.vlgmr.msra.gmra.mrb[0].mxu0 %v50897_v56  ;;  %47391 = vmatprep.subr.mxu1 %v54942_v52  ;;  %55151 = vst [vmem:[#allocation104_spill] sm:$0xff] %v51712_v51 }
 0x351   : > { %13710 = vmatpush1.msra.mxu0 %v51495_v62  ;;  %v12279_v10 = vpop.f32.mrb[152].mxu1  ;;  %13773 = vmatprep.mubr.f32.mxu0 %v54942_v52  ;;  %v55152_v62 = vand.u32 4294901760, %v51603_v45 }
 0x352   : > { %47389 = vmatmul.mubr.f32.vlgmr.msra.gmra.mrb[2].mxu1 %v51610_v18  ;;  %v12280_v29 = vadd.f32 %v12279_v10, %v12206_v53  ;;  %v47125_v17 = vpop.f32.mrb[153].mxu1  ;;  %14253 = vmatprep.subr.mxu0 %v51657_v13  ;;  %v20874_v10 = vsub.f32 %v51694_v34, %v51712_v51  ;;  %v55166_v18 = vld [vmem:[#allocation57_spill] sm:$0xff] }
 0x353   : > { %47392 = vmatpush3.msra.mxu1 %v55152_v62  ;;  %47393 = vmatprep.mubr.msk.f32.mxu1 %vm48938_vm3, %v54942_v52  ;;  %v14334_v17 = vand.u32 4294901760, %v14333_v54 }
 0x354   : > { %47396 = vmatprep.subr.mxu1 %v54942_v52  ;;  %33893 = vrot.lane.b32.xlu1 %v49368_v31, %s48955_s18 }
 0x355   : > { %v12351_v7 = vpop.f32.mrb[154].mxu1 }
 0x356   : > { %v12352_v45 = vadd.f32 %v12351_v7, %v12280_v29  ;;  %47394 = vmatmul.mubr.f32.vlgmr.msra.gmra.mrb[4].mxu1 %v51579_v41  ;;  %v47130_v62 = vpop.f32.mrb[155].mxu1  ;;  %v51749_v7 = vand.u32 4294901760, %v20874_v10  ;;  %v55155_v10 = vld [vmem:[#allocation54_spill] sm:$0xff] }
 0x357   : > { %47397 = vmatpush3.msra.mxu1 %v51586_v12  ;;  %47398 = vmatprep.mubr.msk.f32.mxu1 %vm48938_vm3, %v54942_v52  ;;  %v55153_v12 = vand.u32 4294901760, %v51707_v27 }
 0x358   : > { %v51740_v53 = vadd.f32 %v12352_v45, %v51637_v44  ;;  %13775 = vmatmul.mubr.f32.vlgmr.msra.gmra.mrb[0].mxu0 %v50897_v56  ;;  %47401 = vmatprep.subr.mxu1 %v54942_v52  ;;  %55154 = vst [vmem:[#allocation105_spill] sm:$0xff] %v51749_v7  ;;  %v21350_v56 = vand.u32 4294901760, %v21349_v46  ;;  %v21732_v46 = vsel %vm222_vm0, %v55156_v50, 0 }
 0x359   : > { %14255 = vmatpush1.msra.mxu0 %v51691_v32  ;;  %14318 = vmatprep.mubr.f32.mxu0 %v54942_v52  ;;  %v14339_v29 = vsub.f32 %v51707_v27, %v55153_v12  ;;  %v12917_v54 = vpop.f32.mrb[156].mxu1  ;;  %v21731_v12 = vsel %vm54796_vm9, %v55155_v10, %v51429_v5  ;;  %v51772_v21 = vand.u32 4294901760, %v21732_v46  ;;  %vm54807_vm9 = vcmask 482304  }
 0x35a   : > { %47399 = vmatmul.mubr.f32.vlgmr.msra.gmra.mrb[6].mxu1 %v51579_v41  ;;  %14335 = vmatprep.subr.mxu0 %v14334_v17  ;;  %v47135_v44 = vpop.f32.mrb[157].mxu1  ;;  %v21738_v5 = vsel %vm225_vm2, %v21731_v12, 0 }
 0x35b   : > { %47402 = vmatpush3.msra.mxu1 %v51688_v60  ;;  %47403 = vmatprep.mubr.msk.f32.mxu1 %vm48938_vm3, %v54942_v52  ;;  %v14340_v45 = vand.u32 4294901760, %v14339_v29  ;;  %v51794_v12 = vsub.f32 %v21732_v46, %v51772_v21 }
 0x35c   : > { %47406 = vmatprep.subr.mxu1 %v54942_v52 }
 0x35d   : > { %v12993_v62 = vpop.f32.mrb[158].mxu1 }
 0x35e   : > { %47404 = vmatmul.mubr.f32.vlgmr.msra.gmra.mrb[8].mxu1 %v51749_v7  ;;  %v12994_v17 = vadd.f32 %v12993_v62, %v12917_v54  ;;  %v47140_v44 = vpop.f32.mrb[159].mxu1  ;;  %v51789_v62 = vld [vmem:[%s54648_s1 + $0x8] sm:$0xff] }
 0x35f   : > { %47407 = vmatpush3.msra.mxu1 %v21350_v56  ;;  %47408 = vmatprep.mubr.msk.f32.mxu1 %vm48938_vm3, %v54942_v52 }
 0x360   : > { %14324 = vmatmul.mubr.f32.vlgmr.msra.gmra.mrb[0].mxu0 %v51065_v24  ;;  %47411 = vmatprep.subr.mxu1 %v54942_v52  ;;  %v51779_v24 = vand.u32 4294901760, %v21738_v5 }
 0x361   : > { %14341 = vmatpush1.msra.mxu0 %v14340_v45  ;;  %v13067_v29 = vpop.f32.mrb[160].mxu1  ;;  %14404 = vmatprep.mubr.f32.mxu0 %v54942_v52  ;;  %v51784_v45 = vpop.permute.xlu0 %33885 }
 0x362   : > { %14414 = vmatprep.subr.mxu0 %v51678_v26  ;;  %47409 = vmatmul.mubr.f32.vlgmr.msra.gmra.mrb[10].mxu1 %v51681_v39  ;;  %v13068_v50 = vadd.f32 %v13067_v29, %v12994_v17  ;;  %v47145_v54 = vpop.f32.mrb[161].mxu1  ;;  %55157 = vst [vmem:[#allocation52_spill] sm:$0xff] %v51784_v45  ;;  %v51801_v29 = vsub.f32 %v21738_v5, %v51779_v24  ;;  %v22668_v45 = vsel %vm222_vm0, %v55166_v18, 0 }
 0x363   : > { %47412 = vmatpush3.msra.mxu1 %v51702_v16  ;;  %47413 = vmatprep.mubr.msk.f32.mxu1 %vm48938_vm3, %v54942_v52 }
 0x364   : > { %47416 = vmatprep.subr.mxu1 %v54942_v52  ;;  %38565 = vrot.lane.b32.xlu0 %v51789_v62, %s55158_s22  ;;  %v54797_v5 = vand.u32 4294901760, %v51801_v29 }
 0x365   : > { %v13141_v56 = vpop.f32.mrb[162].mxu1  ;;  %v51817_v6 = vpop.permute.xlu0 %33891  ;;  %40425 = vrot.lane.b32.xlu1 %v51789_v62, %s48915_s17  ;;  %s55177_s17 = smov 76  }
 0x366   : > { %47414 = vmatmul.mubr.f32.vlgmr.msra.gmra.mrb[12].mxu1 %v51694_v34  ;;  %v13142_v17 = vadd.f32 %v13141_v56, %v13068_v50  ;;  %v47150_v44 = vpop.f32.mrb[163].mxu1  ;;  %v51808_v50 = vand.u32 4294901760, %v51794_v12  ;;  %55160 = vst [vmem:[#allocation106_spill] sm:$0xff] %v51817_v6 }
 0x367   : > { %47417 = vmatpush3.msra.mxu1 %v51688_v60  ;;  %47418 = vmatprep.mubr.msk.f32.mxu1 %vm48938_vm3, %v54942_v52  ;;  %v55159_v44 = vand.u32 4294901760, %v51702_v16 }
 0x368   : > { %14406 = vmatmul.mubr.f32.vlgmr.msra.gmra.mrb[0].mxu0 %v50991_v8  ;;  %47421 = vmatprep.subr.mxu1 %v54942_v52 }
 0x369   : > { %14417 = vmatpush1.msra.mxu0 %v51707_v27  ;;  %v13215_v46 = vpop.f32.mrb[164].mxu1  ;;  %14480 = vmatprep.mubr.f32.mxu0 %v54942_v52 }
 0x36a   : > { %14490 = vmatprep.subr.mxu0 %v51657_v13  ;;  %47419 = vmatmul.mubr.f32.vlgmr.msra.gmra.mrb[14].mxu1 %v51712_v51  ;;  %v13216_v54 = vadd.f32 %v13215_v46, %v13142_v17  ;;  %v47155_v56 = vpop.f32.mrb[165].mxu1  ;;  %v21810_v17 = vsub.f32 %v51794_v12, %v51808_v50 }
 0x36b   : > { %47422 = vmatpush3.msra.mxu1 %v55159_v44  ;;  %47423 = vmatprep.mubr.msk.f32.mxu1 %vm48938_vm3, %v54942_v52  ;;  %v51827_v56 = vpop.permute.xlu1 %25470  ;;  %v55161_v44 = vld [vmem:[#allocation27_spill] sm:$0xff] }
 0x36c   : > { %47426 = vmatprep.subr.mxu1 %v54942_v52  ;;  %38571 = vrot.lane.b32.xlu0 %v51530_v57, %s48946_s11  ;;  %v22285_v57 = vsub.f32 %v51801_v29, %v54797_v5  ;;  %v15178_v51 = vsel %vm15176_vm10, %v55161_v44, %v55095_v20  ;;  %v55162_v5 = vand.u32 4294901760, %v51678_v26 }
 0x36d   : > { %v13287_v34 = vpop.f32.mrb[166].mxu1  ;;  %36701 = vrot.lane.b32.xlu1 %v49368_v31, %s48957_s5 }
 0x36e   : > { %v13288_v46 = vadd.f32 %v13287_v34, %v13216_v54  ;;  %47424 = vmatmul.mubr.f32.vlgmr.msra.gmra.mrb[16].mxu1 %v51681_v39  ;;  %v47160_v16 = vpop.f32.mrb[167].mxu1  ;;  %v22663_v54 = vpop.permute.xlu0 %22662 }
 0x36f   : > { %47427 = vmatpush3.msra.mxu1 %v51688_v60  ;;  %47428 = vmatprep.mubr.msk.f32.mxu1 %vm48938_vm3, %v54942_v52  ;;  %v51845_v16 = vand.u32 4294901760, %v21810_v17 }
 0x370   : > { %v51839_v34 = vadd.f32 %v13288_v46, %v51740_v53  ;;  %14483 = vmatmul.mubr.f32.vlgmr.msra.gmra.mrb[0].mxu0 %v51011_v40  ;;  %47431 = vmatprep.subr.mxu1 %v54942_v52  ;;  %v51850_v53 = vpop.permute.xlu1 %35761  ;;  %v15184_v40 = vsel %vm225_vm2, %v15178_v51, 0  ;;  %v22286_v46 = vand.u32 4294901760, %v22285_v57 }
 0x371   : > { %14492 = vmatpush1.msra.mxu0 %v51691_v32  ;;  %14555 = vmatprep.mubr.f32.mxu0 %v54942_v52  ;;  %v13853_v60 = vpop.f32.mrb[168].mxu1  ;;  %55163 = vst [vmem:[#allocation27_spill] sm:$0xff] %v51850_v53 }
 0x372   : > { %14568 = vmatprep.subr.mxu0 %v55162_v5  ;;  %47429 = vmatmul.mubr.f32.vlgmr.msra.gmra.mrb[18].mxu1 %v51681_v39  ;;  %v47165_v20 = vpop.f32.mrb[169].mxu1  ;;  %v55164_v5 = vld [vmem:[#allocation60_spill] sm:$0xff]  ;;  %v55165_v39 = vld [vmem:[#allocation29_spill] sm:$0xff] }
 0x373   : > { %47432 = vmatpush3.msra.mxu1 %v51779_v24  ;;  %47433 = vmatprep.mubr.msk.f32.mxu1 %vm48938_vm3, %v54942_v52  ;;  %v22667_v17 = vsel %vm54807_vm9, %v55164_v5, %v22663_v54  ;;  %v51863_v20 = vand.u32 4294901760, %v15184_v40  ;;  %v15177_v7 = vsel %vm15176_vm10, %v55165_v39, %v55161_v44  ;;  %v51887_v54 = vand.u32 4294901760, %v22668_v45 }
 0x374   : > { %47436 = vmatprep.subr.mxu1 %v54942_v52  ;;  %32021 = vrot.lane.b32.xlu0 %v49368_v31, %s48953_s21  ;;  %v35760_v57 = vpop.permute.xlu1 %35759  ;;  %v15182_v44 = vsel %vm225_vm2, %v15177_v7, 0  ;;  %vm54805_vm10 = vcmask 474112   ;;  %vm36703_vm9 = vcmask 113664  }
 0x375   : > { %v13929_v26 = vpop.f32.mrb[170].mxu1  ;;  %v51875_v58 = vsel %vm35767_vm7, %v35760_v57, %v51850_v53  ;;  %v51884_v18 = vsub.f32 %v15184_v40, %v51863_v20  ;;  %v51899_v7 = vand.u32 4294901760, %v15182_v44  ;;  %37637 = vrot.lane.b32.xlu1 %v49368_v31, %s48958_s7 }
 0x376   : > { %47434 = vmatmul.mubr.f32.vlgmr.msra.gmra.mrb[20].mxu1 %v51845_v16  ;;  %v13930_v51 = vadd.f32 %v13929_v26, %v13853_v60  ;;  %v47170_v10 = vpop.f32.mrb[171].mxu1  ;;  %55167 = vst [vmem:[#allocation60_spill] sm:$0xff] %v51875_v58  ;;  %v55168_v60 = vand.u32 4294901760, %v51707_v27 }
 0x377   : > { %47437 = vmatpush3.msra.mxu1 %v22286_v46  ;;  %47438 = vmatprep.mubr.msk.f32.mxu1 %vm48938_vm3, %v54942_v52  ;;  %v22674_v10 = vsel %vm225_vm2, %v22667_v17, 0 }
 0x378   : > { %14559 = vmatmul.mubr.f32.vlgmr.msra.gmra.mrb[0].mxu0 %v51025_v55  ;;  %47441 = vmatprep.subr.mxu1 %v54942_v52  ;;  %v51894_v27 = vand.u32 4294901760, %v22674_v10 }
 0x379   : > { %14572 = vmatpush1.msra.mxu0 %v55168_v60  ;;  %v14003_v39 = vpop.f32.mrb[172].mxu1  ;;  %14635 = vmatprep.mubr.f32.mxu0 %v54942_v52 }
 0x37a   : > { %14644 = vmatprep.subr.mxu0 %v51657_v13  ;;  %47439 = vmatmul.mubr.f32.vlgmr.msra.gmra.mrb[22].mxu1 %v51772_v21  ;;  %v14004_v55 = vadd.f32 %v14003_v39, %v13930_v51  ;;  %v47175_v46 = vpop.f32.mrb[173].mxu1  ;;  %v51904_v13 = vsub.f32 %v22668_v45, %v51887_v54  ;;  %v54803_v51 = vand.u32 4294901760, %v51884_v18  ;;  %v51912_v57 = vsub.f32 %v22674_v10, %v51894_v27 }
 0x37b   : > { %47442 = vmatpush3.msra.mxu1 %v51801_v29  ;;  %47443 = vmatprep.mubr.msk.f32.mxu1 %vm48938_vm3, %v54942_v52  ;;  %v51917_v45 = vsub.f32 %v15182_v44, %v51899_v7 }
 0x37c   : > { %47446 = vmatprep.subr.mxu1 %v54942_v52  ;;  %39501 = vrot.lane.b32.xlu0 %v51789_v62, %s55169_s29  ;;  %55170 = vst [vmem:[#allocation29_spill] sm:$0xff] %v51904_v13  ;;  %v51922_v39 = vand.u32 4294901760, %v51904_v13  ;;  %v15269_v46 = vsub.f32 %v51884_v18, %v54803_v51  ;;  %v23220_v44 = vand.u32 4294901760, %v51912_v57 }
 0x37d   : > { %v14077_v40 = vpop.f32.mrb[174].mxu1  ;;  %42271 = vrot.lane.b32.xlu1 %v51789_v62, %s55177_s17 }
 0x37e   : > { %47444 = vmatmul.mubr.f32.vlgmr.msra.gmra.mrb[24].mxu1 %v51794_v12  ;;  %v14078_v26 = vadd.f32 %v14077_v40, %v14004_v55  ;;  %v47180_v17 = vpop.f32.mrb[175].mxu1  ;;  %55171 = vst [vmem:[#allocation57_spill] sm:$0xff] %v51922_v39  ;;  %v54804_v40 = vand.u32 4294901760, %v51917_v45 }
 0x37f   : > { %47447 = vmatpush3.msra.mxu1 %v51779_v24  ;;  %47448 = vmatprep.mubr.msk.f32.mxu1 %vm48938_vm3, %v54942_v52  ;;  %v22746_v17 = vsub.f32 %v51904_v13, %v51922_v39 }
 0x380   : > { %14637 = vmatmul.mubr.f32.vlgmr.msra.gmra.mrb[0].mxu0 %v50991_v8  ;;  %47451 = vmatprep.subr.mxu1 %v54942_v52 }
 0x381   : > { %14646 = vmatpush1.msra.mxu0 %v51691_v32  ;;  %v14151_v60 = vpop.f32.mrb[176].mxu1  ;;  %14709 = vmatprep.mubr.f32.mxu0 %v54942_v52  ;;  %v55172_v32 = vand.u32 4294901760, %v51801_v29  ;;  %v15270_v29 = vand.u32 4294901760, %v15269_v46  ;;  %v51959_v46 = vand.u32 4294901760, %v22746_v17  ;;  %v23603_v17 = vsel %vm54805_vm10, %v49751_v49, %v51625_v33 }
 0x382   : > { %47449 = vmatmul.mubr.f32.vlgmr.msra.gmra.mrb[26].mxu1 %v51808_v50  ;;  %v14152_v55 = vadd.f32 %v14151_v60, %v14078_v26  ;;  %v47185_v10 = vpop.f32.mrb[177].mxu1  ;;  %15189 = vmatprep.subr.mxu0 %v51863_v20  ;;  %v23610_v33 = vsel %vm225_vm2, %v23603_v17, 0  ;;  %vm54817_vm10 = vcmask 465920  }
 0x383   : > { %47452 = vmatpush3.msra.mxu1 %v55172_v32  ;;  %47453 = vmatprep.mubr.msk.f32.mxu1 %vm48938_vm3, %v54942_v52  ;;  %v23221_v32 = vsub.f32 %v51912_v57, %v23220_v44 }
 0x384   : > { %47456 = vmatprep.subr.mxu1 %v54942_v52  ;;  %34829 = vrot.lane.b32.xlu0 %v49368_v31, %s48945_s9  ;;  %s48959_s9 = smov 121  }
 0x385   : > { %v14223_v26 = vpop.f32.mrb[178].mxu1  ;;  %42277 = vrot.lane.b32.xlu1 %v49368_v31, %s48959_s9 }
 0x386   : > { %v14224_v60 = vadd.f32 %v14223_v26, %v14152_v55  ;;  %47454 = vmatmul.mubr.f32.vlgmr.msra.gmra.mrb[28].mxu1 %v51772_v21  ;;  %v47190_v10 = vpop.f32.mrb[179].mxu1 }
 0x387   : > { %47457 = vmatpush3.msra.mxu1 %v51779_v24  ;;  %47458 = vmatprep.mubr.msk.f32.mxu1 %vm48938_vm3, %v54942_v52  ;;  %v15275_v24 = vsub.f32 %v51917_v45, %v54804_v40  ;;  %v55174_v40 = vld [vmem:[#allocation31_spill] sm:$0xff] }
 0x388   : > { %v51950_v51 = vadd.f32 %v14224_v60, %v51839_v34  ;;  %14711 = vmatmul.mubr.f32.vlgmr.msra.gmra.mrb[0].mxu0 %v50991_v8  ;;  %47461 = vmatprep.subr.mxu1 %v54942_v52  ;;  %v23222_v8 = vand.u32 4294901760, %v23221_v32  ;;  %v23604_v32 = vsel %vm222_vm0, %v49739_v38, 0  ;;  %v16114_v58 = vsel %vm16112_vm12, %v55174_v40, %v55101_v48 }
 0x389   : > { %15191 = vmatpush1.msra.mxu0 %v51899_v7  ;;  %15254 = vmatprep.mubr.f32.mxu0 %v54942_v52  ;;  %v14789_v55 = vpop.f32.mrb[180].mxu1  ;;  %v15276_v26 = vand.u32 4294901760, %v15275_v24 }
 0x38a   : > { %47459 = vmatmul.mubr.f32.vlgmr.msra.gmra.mrb[30].mxu1 %v51772_v21  ;;  %15271 = vmatprep.subr.mxu0 %v15270_v29  ;;  %v47195_v34 = vpop.f32.mrb[181].mxu1 }
 0x38b   : > { %47462 = vmatpush3.msra.mxu1 %v51894_v27  ;;  %47463 = vmatprep.mubr.msk.f32.mxu1 %vm48938_vm3, %v54942_v52  ;;  %v51982_v34 = vand.u32 4294901760, %v23604_v32 }
 0x38c   : > { %47466 = vmatprep.subr.mxu1 %v54942_v52  ;;  %35765 = vrot.lane.b32.xlu0 %v49368_v31, %s48956_s30 }
 0x38d   : > { %v14865_v60 = vpop.f32.mrb[182].mxu1 }
 0x38e   : > { %47464 = vmatmul.mubr.f32.vlgmr.msra.gmra.mrb[32].mxu1 %v51959_v46  ;;  %v14866_v29 = vadd.f32 %v14865_v60, %v14789_v55  ;;  %v47200_v10 = vpop.f32.mrb[183].mxu1  ;;  %v51999_v60 = vsub.f32 %v23604_v32, %v51982_v34 }
 0x38f   : > { %47467 = vmatpush3.msra.mxu1 %v23222_v8  ;;  %47468 = vmatprep.mubr.msk.f32.mxu1 %vm48938_vm3, %v54942_v52 }
 0x390   : > { %15260 = vmatmul.mubr.f32.vlgmr.msra.gmra.mrb[0].mxu0 %v51173_v37  ;;  %47471 = vmatprep.subr.mxu1 %v54942_v52  ;;  %v51989_v37 = vand.u32 4294901760, %v23610_v33 }
 0x391   : > { %15277 = vmatpush1.msra.mxu0 %v15276_v26  ;;  %v14939_v24 = vpop.f32.mrb[184].mxu1  ;;  %15340 = vmatprep.mubr.f32.mxu0 %v54942_v52  ;;  %v51994_v26 = vpop.permute.xlu0 %34821 }
 0x392   : > { %15350 = vmatprep.subr.mxu0 %v51884_v18  ;;  %47469 = vmatmul.mubr.f32.vlgmr.msra.gmra.mrb[34].mxu1 %v51887_v54  ;;  %v14940_v38 = vadd.f32 %v14939_v24, %v14866_v29  ;;  %v47205_v55 = vpop.f32.mrb[185].mxu1  ;;  %v52006_v10 = vsub.f32 %v23610_v33, %v51989_v37  ;;  %v52013_v24 = vand.u32 4294901760, %v51999_v60 }
 0x393   : > { %47472 = vmatpush3.msra.mxu1 %v51912_v57  ;;  %47473 = vmatprep.mubr.msk.f32.mxu1 %vm48938_vm3, %v54942_v52 }
 0x394   : > { %47476 = vmatprep.subr.mxu1 %v54942_v52  ;;  %41348 = vrot.lane.b32.xlu0 %v51789_v62, %s48917_s20  ;;  %v54806_v33 = vand.u32 4294901760, %v52006_v10 }
 0x395   : > { %v15013_v8 = vpop.f32.mrb[186].mxu1 }
 0x396   : > { %47474 = vmatmul.mubr.f32.vlgmr.msra.gmra.mrb[36].mxu1 %v51904_v13  ;;  %v15014_v17 = vadd.f32 %v15013_v8, %v14940_v38  ;;  %v47210_v29 = vpop.f32.mrb[187].mxu1  ;;  %v52022_v8 = vpop.permute.xlu0 %34827  ;;  %v24540_v13 = vsel %vm222_vm0, %v49912_v30, 0 }
 0x397   : > { %47477 = vmatpush3.msra.mxu1 %v51894_v27  ;;  %47478 = vmatprep.mubr.msk.f32.mxu1 %vm48938_vm3, %v54942_v52  ;;  %55173 = vst [vmem:[#allocation107_spill] sm:$0xff] %v52022_v8 }
 0x398   : > { %15342 = vmatmul.mubr.f32.vlgmr.msra.gmra.mrb[0].mxu0 %v51104_v25  ;;  %47481 = vmatprep.subr.mxu1 %v54942_v52 }
 0x399   : > { %15353 = vmatpush1.msra.mxu0 %v51917_v45  ;;  %v15087_v32 = vpop.f32.mrb[188].mxu1  ;;  %15416 = vmatprep.mubr.f32.mxu0 %v54942_v52 }
 0x39a   : > { %15426 = vmatprep.subr.mxu0 %v51863_v20  ;;  %47479 = vmatmul.mubr.f32.vlgmr.msra.gmra.mrb[38].mxu1 %v51922_v39  ;;  %v15088_v38 = vadd.f32 %v15087_v32, %v15014_v17  ;;  %v47215_v55 = vpop.f32.mrb[189].mxu1  ;;  %v23682_v17 = vsub.f32 %v51999_v60, %v52013_v24  ;;  %v55178_v39 = vld [vmem:[#allocation33_spill] sm:$0xff] }
 0x39b   : > { %47482 = vmatpush3.msra.mxu1 %v23220_v44  ;;  %47483 = vmatprep.mubr.msk.f32.mxu1 %vm48938_vm3, %v54942_v52  ;;  %v52032_v44 = vpop.permute.xlu1 %27342  ;;  %v24157_v55 = vsub.f32 %v52006_v10, %v54806_v33  ;;  %v55175_v33 = vand.u32 4294901760, %v51884_v18 }
 0x39c   : > { %47486 = vmatprep.subr.mxu1 %v54942_v52  ;;  %38573 = vrot.lane.b32.xlu0 %v49368_v31, %s48946_s11  ;;  %s55258_s11 = smov 122  }
 0x39d   : > { %v15159_v29 = vpop.f32.mrb[190].mxu1 }
 0x39e   : > { %v15160_v32 = vadd.f32 %v15159_v29, %v15088_v38  ;;  %47484 = vmatmul.mubr.f32.vlgmr.msra.gmra.mrb[40].mxu1 %v51887_v54  ;;  %v47220_v57 = vpop.f32.mrb[191].mxu1  ;;  %v24535_v29 = vpop.permute.xlu0 %24534 }
 0x39f   : > { %47487 = vmatpush3.msra.mxu1 %v51894_v27  ;;  %47488 = vmatprep.mubr.msk.f32.mxu1 %vm48938_vm3, %v54942_v52  ;;  %v52050_v57 = vand.u32 4294901760, %v23682_v17 }
 0x3a0   : > { %v52044_v38 = vadd.f32 %v15160_v32, %v51950_v51  ;;  %15419 = vmatmul.mubr.f32.vlgmr.msra.gmra.mrb[0].mxu0 %v51121_v22  ;;  %47491 = vmatprep.subr.mxu1 %v54942_v52  ;;  %v52055_v51 = vpop.permute.xlu1 %36697  ;;  %v16120_v22 = vsel %vm225_vm2, %v16114_v58, 0  ;;  %v24158_v32 = vand.u32 4294901760, %v24157_v55  ;;  %v16113_v55 = vsel %vm16112_vm12, %v55178_v39, %v55174_v40 }
 0x3a1   : > { %15428 = vmatpush1.msra.mxu0 %v51899_v7  ;;  %15491 = vmatprep.mubr.f32.mxu0 %v54942_v52  ;;  %v15725_v27 = vpop.f32.mrb[192].mxu1  ;;  %55176 = vst [vmem:[#allocation31_spill] sm:$0xff] %v52055_v51  ;;  %v52066_v17 = vand.u32 4294901760, %v16120_v22  ;;  %v16118_v40 = vsel %vm225_vm2, %v16113_v55, 0  ;;  %vm54813_vm12 = vcmask 457728  }
 0x3a2   : > { %15504 = vmatprep.subr.mxu0 %v55175_v33  ;;  %47489 = vmatmul.mubr.f32.vlgmr.msra.gmra.mrb[42].mxu1 %v51887_v54  ;;  %v47225_v48 = vpop.f32.mrb[193].mxu1  ;;  %v24539_v33 = vsel %vm54817_vm10, %v49927_v28, %v24535_v29  ;;  %v55180_v29 = vand.u32 4294901760, %v51917_v45  ;;  %vm54901_vm10 = vcmask 105472  }
 0x3a3   : > { %47492 = vmatpush3.msra.mxu1 %v51989_v37  ;;  %47493 = vmatprep.mubr.msk.f32.mxu1 %vm48938_vm3, %v54942_v52  ;;  %v52087_v39 = vsub.f32 %v16120_v22, %v52066_v17  ;;  %v52100_v22 = vand.u32 4294901760, %v16118_v40 }
 0x3a4   : > { %47496 = vmatprep.subr.mxu1 %v54942_v52  ;;  %v36696_v53 = vpop.permute.xlu1 %36695 }
 0x3a5   : > { %v15801_v18 = vpop.f32.mrb[194].mxu1  ;;  %v52078_v62 = vsel %vm36703_vm9, %v36696_v53, %v52055_v51  ;;  %v55193_v51 = vld [vmem:[#allocation96_spill] sm:$0xff] }
 0x3a6   : > { %47494 = vmatmul.mubr.f32.vlgmr.msra.gmra.mrb[44].mxu1 %v52050_v57  ;;  %v15802_v58 = vadd.f32 %v15801_v18, %v15725_v27  ;;  %v47230_v48 = vpop.f32.mrb[195].mxu1  ;;  %55179 = vst [vmem:[#allocation33_spill] sm:$0xff] %v52078_v62  ;;  %v24546_v27 = vsel %vm225_vm2, %v24539_v33, 0 }
 0x3a7   : > { %47497 = vmatpush3.msra.mxu1 %v24158_v32  ;;  %47498 = vmatprep.mubr.msk.f32.mxu1 %vm48938_vm3, %v54942_v52  ;;  %v52090_v32 = vand.u32 4294901760, %v24540_v13  ;;  %v52097_v45 = vand.u32 4294901760, %v24546_v27  ;;  %v54811_v48 = vand.u32 4294901760, %v52087_v39 }
 0x3a8   : > { %15495 = vmatmul.mubr.f32.vlgmr.msra.gmra.mrb[0].mxu0 %v51139_v36  ;;  %47501 = vmatprep.subr.mxu1 %v54942_v52 }
 0x3a9   : > { %15508 = vmatpush1.msra.mxu0 %v55180_v29  ;;  %15571 = vmatprep.mubr.f32.mxu0 %v54942_v52  ;;  %v15875_v30 = vpop.f32.mrb[196].mxu1  ;;  %55181 = vst [vmem:[#allocation108_spill] sm:$0xff] %v52090_v32  ;;  %v52103_v33 = vsub.f32 %v24540_v13, %v52090_v32  ;;  %v52111_v55 = vsub.f32 %v24546_v27, %v52097_v45 }
 0x3aa   : > { %15580 = vmatprep.subr.mxu0 %v51863_v20  ;;  %47499 = vmatmul.mubr.f32.vlgmr.msra.gmra.mrb[46].mxu1 %v51982_v34  ;;  %v15876_v36 = vadd.f32 %v15875_v30, %v15802_v58  ;;  %v47235_v53 = vpop.f32.mrb[197].mxu1  ;;  %v52116_v13 = vsub.f32 %v16118_v40, %v52100_v22 }
 0x3ab   : > { %47502 = vmatpush3.msra.mxu1 %v52006_v10  ;;  %47503 = vmatprep.mubr.msk.f32.mxu1 %vm48938_vm3, %v54942_v52  ;;  %55182 = vst [vmem:[#allocation109_spill] sm:$0xff] %v52103_v33  ;;  %v52121_v30 = vand.u32 4294901760, %v52103_v33  ;;  %v16205_v53 = vsub.f32 %v52087_v39, %v54811_v48  ;;  %v25092_v40 = vand.u32 4294901760, %v52111_v55 }
 0x3ac   : > { %47506 = vmatprep.subr.mxu1 %v54942_v52 }
 0x3ad   : > { %v15949_v18 = vpop.f32.mrb[198].mxu1  ;;  %55183 = vst [vmem:[#allocation110_spill] sm:$0xff] %v52121_v30 }
 0x3ae   : > { %47504 = vmatmul.mubr.f32.vlgmr.msra.gmra.mrb[48].mxu1 %v51999_v60  ;;  %v15950_v20 = vadd.f32 %v15949_v18, %v15876_v36  ;;  %v47240_v58 = vpop.f32.mrb[199].mxu1  ;;  %v54812_v18 = vand.u32 4294901760, %v52116_v13 }
 0x3af   : > { %47507 = vmatpush3.msra.mxu1 %v51989_v37  ;;  %47508 = vmatprep.mubr.msk.f32.mxu1 %vm48938_vm3, %v54942_v52  ;;  %v24618_v58 = vsub.f32 %v52103_v33, %v52121_v30 }
 0x3b0   : > { %15573 = vmatmul.mubr.f32.vlgmr.msra.gmra.mrb[0].mxu0 %v51104_v25  ;;  %47511 = vmatprep.subr.mxu1 %v54942_v52 }
 0x3b1   : > { %15582 = vmatpush1.msra.mxu0 %v51899_v7  ;;  %v16023_v29 = vpop.f32.mrb[200].mxu1  ;;  %15645 = vmatprep.mubr.f32.mxu0 %v54942_v52  ;;  %v55184_v7 = vand.u32 4294901760, %v52006_v10  ;;  %v25093_v10 = vsub.f32 %v52111_v55, %v25092_v40 }
 0x3b2   : > { %47509 = vmatmul.mubr.f32.vlgmr.msra.gmra.mrb[50].mxu1 %v52013_v24  ;;  %v16024_v36 = vadd.f32 %v16023_v29, %v15950_v20  ;;  %v47245_v27 = vpop.f32.mrb[201].mxu1  ;;  %16125 = vmatprep.subr.mxu0 %v52066_v17 }
 0x3b3   : > { %47512 = vmatpush3.msra.mxu1 %v55184_v7  ;;  %47513 = vmatprep.mubr.msk.f32.mxu1 %vm48938_vm3, %v54942_v52  ;;  %v16206_v27 = vand.u32 4294901760, %v16205_v53 }
 0x3b4   : > { %47516 = vmatprep.subr.mxu1 %v54942_v52 }
 0x3b5   : > { %v16095_v20 = vpop.f32.mrb[202].mxu1 }
 0x3b6   : > { %v16096_v29 = vadd.f32 %v16095_v20, %v16024_v36  ;;  %47514 = vmatmul.mubr.f32.vlgmr.msra.gmra.mrb[52].mxu1 %v51982_v34  ;;  %v47250_v48 = vpop.f32.mrb[203].mxu1  ;;  %v52154_v36 = vand.u32 4294901760, %v24618_v58  ;;  %v25475_v58 = vsel %vm54813_vm12, %v50112_v35, %v51827_v56  ;;  %vm54835_vm12 = vcmask 326656  }
 0x3b7   : > { %47517 = vmatpush3.msra.mxu1 %v51989_v37  ;;  %47518 = vmatprep.mubr.msk.f32.mxu1 %vm48938_vm3, %v54942_v52  ;;  %v16211_v37 = vsub.f32 %v52116_v13, %v54812_v18 }
 0x3b8   : > { %v52145_v7 = vadd.f32 %v16096_v29, %v52044_v38  ;;  %15647 = vmatmul.mubr.f32.vlgmr.msra.gmra.mrb[0].mxu0 %v51104_v25  ;;  %47521 = vmatprep.subr.mxu1 %v54942_v52  ;;  %v25094_v25 = vand.u32 4294901760, %v25093_v10  ;;  %v25482_v10 = vsel %vm225_vm2, %v25475_v58, 0 }
 0x3b9   : > { %16127 = vmatpush1.msra.mxu0 %v52100_v22  ;;  %16190 = vmatprep.mubr.f32.mxu0 %v54942_v52  ;;  %v16661_v48 = vpop.f32.mrb[204].mxu1  ;;  %v16212_v53 = vand.u32 4294901760, %v16211_v37 }
 0x3ba   : > { %47519 = vmatmul.mubr.f32.vlgmr.msra.gmra.mrb[54].mxu1 %v51982_v34  ;;  %16207 = vmatprep.subr.mxu0 %v16206_v27  ;;  %v47255_v38 = vpop.f32.mrb[205].mxu1  ;;  %v25476_v27 = vsel %vm222_vm0, %v50090_v9, 0 }
 0x3bb   : > { %47522 = vmatpush3.msra.mxu1 %v52097_v45  ;;  %47523 = vmatprep.mubr.msk.f32.mxu1 %vm48938_vm3, %v54942_v52  ;;  %v52173_v37 = vand.u32 4294901760, %v25476_v27  ;;  %v52183_v38 = vpop.permute.xlu0 %35757 }
 0x3bc   : > { %47526 = vmatprep.subr.mxu1 %v54942_v52 }
 0x3bd   : > { %v16737_v20 = vpop.f32.mrb[206].mxu1  ;;  %55185 = vst [vmem:[#allocation111_spill] sm:$0xff] %v52173_v37 }
 0x3be   : > { %47524 = vmatmul.mubr.f32.vlgmr.msra.gmra.mrb[56].mxu1 %v52154_v36  ;;  %v16738_v29 = vadd.f32 %v16737_v20, %v16661_v48  ;;  %v47260_v18 = vpop.f32.mrb[207].mxu1 }
 0x3bf   : > { %47527 = vmatpush3.msra.mxu1 %v25094_v25  ;;  %47528 = vmatprep.mubr.msk.f32.mxu1 %vm48938_vm3, %v54942_v52  ;;  %v52186_v25 = vsub.f32 %v25476_v27, %v52173_v37 }
 0x3c0   : > { %16196 = vmatmul.mubr.f32.vlgmr.msra.gmra.mrb[0].mxu0 %v51254_v14  ;;  %47531 = vmatprep.subr.mxu1 %v54942_v52  ;;  %v52180_v14 = vand.u32 4294901760, %v25482_v10 }
 0x3c1   : > { %16213 = vmatpush1.msra.mxu0 %v16212_v53  ;;  %16276 = vmatprep.mubr.f32.mxu0 %v54942_v52  ;;  %v16811_v56 = vpop.f32.mrb[208].mxu1  ;;  %55186 = vst [vmem:[#allocation112_spill] sm:$0xff] %v52186_v25  ;;  %v52200_v27 = vand.u32 4294901760, %v52186_v25 }
 0x3c2   : > { %16286 = vmatprep.subr.mxu0 %v52087_v39  ;;  %47529 = vmatmul.mubr.f32.vlgmr.msra.gmra.mrb[58].mxu1 %v52090_v32  ;;  %v16812_v9 = vadd.f32 %v16811_v56, %v16738_v29  ;;  %v47265_v18 = vpop.f32.mrb[209].mxu1  ;;  %v52193_v58 = vsub.f32 %v25482_v10, %v52180_v14 }
 0x3c3   : > { %47532 = vmatpush3.msra.mxu1 %v52111_v55  ;;  %47533 = vmatprep.mubr.msk.f32.mxu1 %vm48938_vm3, %v54942_v52  ;;  %55187 = vst [vmem:[#allocation113_spill] sm:$0xff] %v52200_v27  ;;  %v52209_v18 = vpop.permute.xlu0 %35763 }
 0x3c4   : > { %47536 = vmatprep.subr.mxu1 %v54942_v52  ;;  %v54814_v10 = vand.u32 4294901760, %v52193_v58  ;;  %55188 = vst [vmem:[#allocation114_spill] sm:$0xff] %v52209_v18 }
 0x3c5   : > { %v16885_v48 = vpop.f32.mrb[210].mxu1 }
 0x3c6   : > { %47534 = vmatmul.mubr.f32.vlgmr.msra.gmra.mrb[60].mxu1 %v52103_v33  ;;  %v16886_v53 = vadd.f32 %v16885_v48, %v16812_v9  ;;  %v47270_v20 = vpop.f32.mrb[211].mxu1  ;;  %v26029_v55 = vsub.f32 %v52193_v58, %v54814_v10  ;;  %v55191_v10 = vand.u32 4294901760, %v52087_v39  ;;  %v55194_v33 = vld [vmem:[#allocation37_spill] sm:$0xff] }
 0x3c7   : > { %47537 = vmatpush3.msra.mxu1 %v52097_v45  ;;  %47538 = vmatprep.mubr.msk.f32.mxu1 %vm48938_vm3, %v54942_v52  ;;  %v25554_v20 = vsub.f32 %v52186_v25, %v52200_v27 }
 0x3c8   : > { %16278 = vmatmul.mubr.f32.vlgmr.msra.gmra.mrb[0].mxu0 %v51191_v23  ;;  %47541 = vmatprep.subr.mxu1 %v54942_v52 }
 0x3c9   : > { %16289 = vmatpush1.msra.mxu0 %v52116_v13  ;;  %v16959_v29 = vpop.f32.mrb[212].mxu1  ;;  %16352 = vmatprep.mubr.f32.mxu0 %v54942_v52 }
 0x3ca   : > { %16362 = vmatprep.subr.mxu0 %v52066_v17  ;;  %47539 = vmatmul.mubr.f32.vlgmr.msra.gmra.mrb[62].mxu1 %v52121_v30  ;;  %v16960_v56 = vadd.f32 %v16959_v29, %v16886_v53  ;;  %v47275_v9 = vpop.f32.mrb[213].mxu1  ;;  %v52215_v29 = vpop.permute.xlu1 %29214 }
 0x3cb   : > { %47542 = vmatpush3.msra.mxu1 %v25092_v40  ;;  %47543 = vmatprep.mubr.msk.f32.mxu1 %vm48938_vm3, %v54942_v52  ;;  %v55189_v40 = vld [vmem:[#allocation35_spill] sm:$0xff] }
 0x3cc   : > { %47546 = vmatprep.subr.mxu1 %v54942_v52  ;;  %v17050_v9 = vsel %vm17048_vm13, %v55189_v40, %v55109_v3  ;;  %v17049_v35 = vsel %vm17048_vm13, %v55194_v33, %v55189_v40  ;;  %vm54830_vm13 = vcmask 318464  }
 0x3cd   : > { %v17031_v48 = vpop.f32.mrb[214].mxu1  ;;  %v17054_v40 = vsel %vm225_vm2, %v17049_v35, 0 }
 0x3ce   : > { %v17032_v62 = vadd.f32 %v17031_v48, %v16960_v56  ;;  %47544 = vmatmul.mubr.f32.vlgmr.msra.gmra.mrb[64].mxu1 %v52090_v32  ;;  %v47280_v53 = vpop.f32.mrb[215].mxu1  ;;  %v26407_v48 = vpop.permute.xlu0 %26406 }
 0x3cf   : > { %47547 = vmatpush3.msra.mxu1 %v52097_v45  ;;  %47548 = vmatprep.mubr.msk.f32.mxu1 %vm48938_vm3, %v54942_v52  ;;  %v52233_v53 = vand.u32 4294901760, %v25554_v20  ;;  %v26411_v39 = vsel %vm54835_vm12, %v55193_v51, %v26407_v48  ;;  %vm54897_vm12 = vcmask 97280   ;;  %v55214_v51 = vld [vmem:[#allocation41_spill] sm:$0xff] }
 0x3d0   : > { %v52227_v56 = vadd.f32 %v17032_v62, %v52145_v7  ;;  %16355 = vmatmul.mubr.f32.vlgmr.msra.gmra.mrb[0].mxu0 %v51204_v1  ;;  %47551 = vmatprep.subr.mxu1 %v54942_v52  ;;  %v52238_v62 = vpop.permute.xlu1 %37633  ;;  %v17056_v1 = vsel %vm225_vm2, %v17050_v9, 0  ;;  %v26030_v7 = vand.u32 4294901760, %v26029_v55 }
 0x3d1   : > { %16364 = vmatpush1.msra.mxu0 %v52100_v22  ;;  %16427 = vmatprep.mubr.f32.mxu0 %v54942_v52  ;;  %v17597_v45 = vpop.f32.mrb[216].mxu1  ;;  %55190 = vst [vmem:[#allocation35_spill] sm:$0xff] %v52233_v53  ;;  %55192 = vst [vmem:[#allocation115_spill] sm:$0xff] %v52238_v62 }
 0x3d2   : > { %16440 = vmatprep.subr.mxu0 %v55191_v10  ;;  %47549 = vmatmul.mubr.f32.vlgmr.msra.gmra.mrb[66].mxu1 %v52090_v32  ;;  %v47285_v3 = vpop.f32.mrb[217].mxu1  ;;  %v52247_v10 = vand.u32 4294901760, %v17056_v1  ;;  %v55195_v32 = vld [vmem:[#allocation95_spill] sm:$0xff] }
 0x3d3   : > { %47552 = vmatpush3.msra.mxu1 %v52180_v14  ;;  %47553 = vmatprep.mubr.msk.f32.mxu1 %vm48938_vm3, %v54942_v52  ;;  %v26412_v55 = vsel %vm222_vm0, %v55195_v32, 0 }
 0x3d4   : > { %47556 = vmatprep.subr.mxu1 %v54942_v52  ;;  %v37632_v9 = vpop.permute.xlu1 %37631  ;;  %v52268_v33 = vsub.f32 %v17056_v1, %v52247_v10  ;;  %v52281_v1 = vand.u32 4294901760, %v17054_v40 }
 0x3d5   : > { %v17673_v20 = vpop.f32.mrb[218].mxu1  ;;  %v52259_v48 = vsel %vm54901_vm10, %v37632_v9, %v52238_v62 }
 0x3d6   : > { %47554 = vmatmul.mubr.f32.vlgmr.msra.gmra.mrb[68].mxu1 %v52233_v53  ;;  %v17674_v3 = vadd.f32 %v17673_v20, %v17597_v45  ;;  %v47290_v30 = vpop.f32.mrb[219].mxu1  ;;  %55196 = vst [vmem:[#allocation37_spill] sm:$0xff] %v52259_v48  ;;  %v55197_v45 = vand.u32 4294901760, %v52116_v13  ;;  %v54822_v9 = vand.u32 4294901760, %v52268_v33  ;;  %v55215_v53 = vld [vmem:[#allocation3_spill] sm:$0xff] }
 0x3d7   : > { %47557 = vmatpush3.msra.mxu1 %v26030_v7  ;;  %47558 = vmatprep.mubr.msk.f32.mxu1 %vm48938_vm3, %v54942_v52  ;;  %v26418_v30 = vsel %vm225_vm2, %v26411_v39, 0  ;;  %v52271_v7 = vand.u32 4294901760, %v26412_v55 }
 0x3d8   : > { %16431 = vmatmul.mubr.f32.vlgmr.msra.gmra.mrb[0].mxu0 %v51218_v19  ;;  %47561 = vmatprep.subr.mxu1 %v54942_v52  ;;  %v52278_v13 = vand.u32 4294901760, %v26418_v30 }
 0x3d9   : > { %16444 = vmatpush1.msra.mxu0 %v55197_v45  ;;  %16507 = vmatprep.mubr.f32.mxu0 %v54942_v52  ;;  %v17747_v32 = vpop.f32.mrb[220].mxu1  ;;  %55198 = vst [vmem:[#allocation95_spill] sm:$0xff] %v52271_v7  ;;  %v52284_v39 = vsub.f32 %v26412_v55, %v52271_v7  ;;  %v52297_v55 = vsub.f32 %v17054_v40, %v52281_v1 }
 0x3da   : > { %16516 = vmatprep.subr.mxu0 %v52066_v17  ;;  %47559 = vmatmul.mubr.f32.vlgmr.msra.gmra.mrb[70].mxu1 %v52173_v37  ;;  %v17748_v19 = vadd.f32 %v17747_v32, %v17674_v3  ;;  %v47295_v20 = vpop.f32.mrb[221].mxu1  ;;  %v52292_v45 = vsub.f32 %v26418_v30, %v52278_v13 }
 0x3db   : > { %47562 = vmatpush3.msra.mxu1 %v52193_v58  ;;  %47563 = vmatprep.mubr.msk.f32.mxu1 %vm48938_vm3, %v54942_v52  ;;  %55199 = vst [vmem:[#allocation116_spill] sm:$0xff] %v52284_v39 }
 0x3dc   : > { %47566 = vmatprep.subr.mxu1 %v54942_v52  ;;  %v54824_v40 = vand.u32 4294901760, %v52292_v45 }
 0x3dd   : > { %v17821_v35 = vpop.f32.mrb[222].mxu1 }
 0x3de   : > { %47564 = vmatmul.mubr.f32.vlgmr.msra.gmra.mrb[72].mxu1 %v52186_v25  ;;  %v17822_v17 = vadd.f32 %v17821_v35, %v17748_v19  ;;  %v47300_v3 = vpop.f32.mrb[223].mxu1  ;;  %v52302_v19 = vand.u32 4294901760, %v52284_v39  ;;  %v17141_v35 = vsub.f32 %v52268_v33, %v54822_v9  ;;  %v55213_v25 = vld [vmem:[#allocation102_spill] sm:$0xff] }
 0x3df   : > { %47567 = vmatpush3.msra.mxu1 %v52180_v14  ;;  %47568 = vmatprep.mubr.msk.f32.mxu1 %vm48938_vm3, %v54942_v52  ;;  %v54823_v3 = vand.u32 4294901760, %v52297_v55 }
 0x3e0   : > { %16509 = vmatmul.mubr.f32.vlgmr.msra.gmra.mrb[0].mxu0 %v51191_v23  ;;  %47571 = vmatprep.subr.mxu1 %v54942_v52  ;;  %55200 = vst [vmem:[#allocation117_spill] sm:$0xff] %v52302_v19  ;;  %v17142_v9 = vand.u32 4294901760, %v17141_v35 }
 0x3e1   : > { %16518 = vmatpush1.msra.mxu0 %v52100_v22  ;;  %v17895_v32 = vpop.f32.mrb[224].mxu1  ;;  %16581 = vmatprep.mubr.f32.mxu0 %v54942_v52  ;;  %v55201_v22 = vand.u32 4294901760, %v52193_v58  ;;  %v26965_v58 = vsub.f32 %v52292_v45, %v54824_v40 }
 0x3e2   : > { %47569 = vmatmul.mubr.f32.vlgmr.msra.gmra.mrb[74].mxu1 %v52200_v27  ;;  %v17896_v20 = vadd.f32 %v17895_v32, %v17822_v17  ;;  %v47305_v30 = vpop.f32.mrb[225].mxu1  ;;  %17061 = vmatprep.subr.mxu0 %v52247_v10  ;;  %v26490_v32 = vsub.f32 %v52284_v39, %v52302_v19 }
 0x3e3   : > { %47572 = vmatpush3.msra.mxu1 %v55201_v22  ;;  %47573 = vmatprep.mubr.msk.f32.mxu1 %vm48938_vm3, %v54942_v52 }
 0x3e4   : > { %47576 = vmatprep.subr.mxu1 %v54942_v52 }
 0x3e5   : > { %v17967_v17 = vpop.f32.mrb[226].mxu1 }
 0x3e6   : > { %v17968_v30 = vadd.f32 %v17967_v17, %v17896_v20  ;;  %47574 = vmatmul.mubr.f32.vlgmr.msra.gmra.mrb[76].mxu1 %v52173_v37  ;;  %v47310_v48 = vpop.f32.mrb[227].mxu1  ;;  %v52335_v20 = vand.u32 4294901760, %v26490_v32 }
 0x3e7   : > { %47577 = vmatpush3.msra.mxu1 %v52180_v14  ;;  %47578 = vmatprep.mubr.msk.f32.mxu1 %vm48938_vm3, %v54942_v52  ;;  %v17147_v14 = vsub.f32 %v52297_v55, %v54823_v3 }
 0x3e8   : > { %v52326_v22 = vadd.f32 %v17968_v30, %v52227_v56  ;;  %16583 = vmatmul.mubr.f32.vlgmr.msra.gmra.mrb[0].mxu0 %v51191_v23  ;;  %47581 = vmatprep.subr.mxu1 %v54942_v52  ;;  %55202 = vst [vmem:[#allocation118_spill] sm:$0xff] %v52335_v20  ;;  %v26966_v23 = vand.u32 4294901760, %v26965_v58  ;;  %v55203_v30 = vld [vmem:[#allocation100_spill] sm:$0xff] }
 0x3e9   : > { %17063 = vmatpush1.msra.mxu0 %v52281_v1  ;;  %17126 = vmatprep.mubr.f32.mxu0 %v54942_v52  ;;  %v18533_v48 = vpop.f32.mrb[228].mxu1  ;;  %v17148_v35 = vand.u32 4294901760, %v17147_v14  ;;  %v27347_v32 = vsel %vm54830_vm13, %v55203_v30, %v52032_v44  ;;  %vm28280_vm13 = vcmask 310272  }
 0x3ea   : > { %47579 = vmatmul.mubr.f32.vlgmr.msra.gmra.mrb[78].mxu1 %v52173_v37  ;;  %17143 = vmatprep.subr.mxu0 %v17142_v9  ;;  %v47315_v56 = vpop.f32.mrb[229].mxu1  ;;  %v55204_v9 = vld [vmem:[#allocation99_spill] sm:$0xff]  ;;  %v27354_v58 = vsel %vm225_vm2, %v27347_v32, 0 }
 0x3eb   : > { %47582 = vmatpush3.msra.mxu1 %v52278_v13  ;;  %47583 = vmatprep.mubr.msk.f32.mxu1 %vm48938_vm3, %v54942_v52  ;;  %v27348_v56 = vsel %vm222_vm0, %v55204_v9, 0 }
 0x3ec   : > { %47586 = vmatprep.subr.mxu1 %v54942_v52  ;;  %v52354_v14 = vand.u32 4294901760, %v27348_v56 }
 0x3ed   : > { %v18609_v17 = vpop.f32.mrb[230].mxu1 }
 0x3ee   : > { %47584 = vmatmul.mubr.f32.vlgmr.msra.gmra.mrb[80].mxu1 %v52335_v20  ;;  %v18610_v3 = vadd.f32 %v18609_v17, %v18533_v48  ;;  %v47320_v40 = vpop.f32.mrb[231].mxu1  ;;  %v52367_v17 = vsub.f32 %v27348_v56, %v52354_v14 }
 0x3ef   : > { %47587 = vmatpush3.msra.mxu1 %v26966_v23  ;;  %47588 = vmatprep.mubr.msk.f32.mxu1 %vm48938_vm3, %v54942_v52 }
 0x3f0   : > { %17132 = vmatmul.mubr.f32.vlgmr.msra.gmra.mrb[0].mxu0 %v51358_v2  ;;  %47591 = vmatprep.subr.mxu1 %v54942_v52  ;;  %v52361_v2 = vand.u32 4294901760, %v27354_v58 }
 0x3f1   : > { %17149 = vmatpush1.msra.mxu0 %v17148_v35  ;;  %17212 = vmatprep.mubr.f32.mxu0 %v54942_v52  ;;  %v18683_v44 = vpop.f32.mrb[232].mxu1  ;;  %v52364_v35 = vpop.permute.xlu0 %36693 }
 0x3f2   : > { %17222 = vmatprep.subr.mxu0 %v52268_v33  ;;  %47589 = vmatmul.mubr.f32.vlgmr.msra.gmra.mrb[82].mxu1 %v52271_v7  ;;  %v18684_v40 = vadd.f32 %v18683_v44, %v18610_v3  ;;  %v47325_v48 = vpop.f32.mrb[233].mxu1  ;;  %v52374_v9 = vsub.f32 %v27354_v58, %v52361_v2  ;;  %v55205_v44 = vld [vmem:[#allocation26_spill] sm:$0xff] }
 0x3f3   : > { %47592 = vmatpush3.msra.mxu1 %v52292_v45  ;;  %47593 = vmatprep.mubr.msk.f32.mxu1 %vm48938_vm3, %v54942_v52 }
 0x3f4   : > { %47596 = vmatprep.subr.mxu1 %v54942_v52  ;;  %v54831_v58 = vand.u32 4294901760, %v52374_v9 }
 0x3f5   : > { %v18757_v23 = vpop.f32.mrb[234].mxu1  ;;  %v52390_v62 = vpop.permute.xlu0 %36699 }
 0x3f6   : > { %47594 = vmatmul.mubr.f32.vlgmr.msra.gmra.mrb[84].mxu1 %v52284_v39  ;;  %v18758_v32 = vadd.f32 %v18757_v23, %v18684_v40  ;;  %v47330_v3 = vpop.f32.mrb[235].mxu1  ;;  %v52381_v40 = vand.u32 4294901760, %v52367_v17 }
 0x3f7   : > { %47597 = vmatpush3.msra.mxu1 %v52278_v13  ;;  %47598 = vmatprep.mubr.msk.f32.mxu1 %vm48938_vm3, %v54942_v52  ;;  %v55207_v3 = vand.u32 4294901760, %v52292_v45  ;;  %v27901_v45 = vsub.f32 %v52374_v9, %v54831_v58  ;;  %v55211_v58 = vand.u32 4294901760, %v52268_v33 }
 0x3f8   : > { %17214 = vmatmul.mubr.f32.vlgmr.msra.gmra.mrb[0].mxu0 %v55205_v44  ;;  %47601 = vmatprep.subr.mxu1 %v54942_v52  ;;  %55206 = vst [vmem:[#allocation99_spill] sm:$0xff] %v52381_v40  ;;  %v27426_v30 = vsub.f32 %v52367_v17, %v52381_v40 }
 0x3f9   : > { %17225 = vmatpush1.msra.mxu0 %v52297_v55  ;;  %v18831_v56 = vpop.f32.mrb[236].mxu1  ;;  %17288 = vmatprep.mubr.f32.mxu0 %v54942_v52 }
 0x3fa   : > { %17298 = vmatprep.subr.mxu0 %v52247_v10  ;;  %47599 = vmatmul.mubr.f32.vlgmr.msra.gmra.mrb[86].mxu1 %v52302_v19  ;;  %v18832_v48 = vadd.f32 %v18831_v56, %v18758_v32  ;;  %v47335_v23 = vpop.f32.mrb[237].mxu1  ;;  %v52396_v56 = vpop.permute.xlu1 %31085  ;;  %v52414_v27 = vand.u32 4294901760, %v27426_v30 }
 0x3fb   : > { %47602 = vmatpush3.msra.mxu1 %v55207_v3  ;;  %47603 = vmatprep.mubr.msk.f32.mxu1 %vm48938_vm3, %v54942_v52  ;;  %v55208_v23 = vld [vmem:[#allocation40_spill] sm:$0xff]  ;;  %v55209_v3 = vld [vmem:[#allocation39_spill] sm:$0xff] }
 0x3fc   : > { %47606 = vmatprep.subr.mxu1 %v54942_v52  ;;  %v17986_v19 = vsel %vm17984_vm1, %v55209_v3, %v55208_v23  ;;  %v17985_v37 = vsel %vm17984_vm1, %v55214_v51, %v55209_v3  ;;  %vm29216_vm1 = vcmask 302080  }
 0x3fd   : > { %v18903_v39 = vpop.f32.mrb[238].mxu1  ;;  %v17992_v23 = vsel %vm225_vm2, %v17986_v19, 0  ;;  %v17990_v3 = vsel %vm225_vm2, %v17985_v37, 0 }
 0x3fe   : > { %v18904_v20 = vadd.f32 %v18903_v39, %v18832_v48  ;;  %47604 = vmatmul.mubr.f32.vlgmr.msra.gmra.mrb[88].mxu1 %v52271_v7  ;;  %v47340_v32 = vpop.f32.mrb[239].mxu1  ;;  %v55210_v48 = vld [vmem:[#allocation32_spill] sm:$0xff] }
 0x3ff   : > { %47607 = vmatpush3.msra.mxu1 %v52278_v13  ;;  %47608 = vmatprep.mubr.msk.f32.mxu1 %vm48938_vm3, %v54942_v52  ;;  %v28279_v32 = vpop.permute.xlu0 %28278 }
 0x400   : > { %v52408_v39 = vadd.f32 %v18904_v20, %v52326_v22  ;;  %17291 = vmatmul.mubr.f32.vlgmr.msra.gmra.mrb[0].mxu0 %v55210_v48  ;;  %47611 = vmatprep.subr.mxu1 %v54942_v52  ;;  %v52419_v20 = vpop.permute.xlu1 %38569  ;;  %v27902_v48 = vand.u32 4294901760, %v27901_v45  ;;  %v28283_v33 = vsel %vm28280_vm13, %v55213_v25, %v28279_v32  ;;  %v28284_v45 = vsel %vm222_vm0, %v55215_v53, 0  ;;  %v55217_v25 = vld [vmem:[#allocation30_spill] sm:$0xff] }
 0x401   : > { %17300 = vmatpush1.msra.mxu0 %v52281_v1  ;;  %17363 = vmatprep.mubr.f32.mxu0 %v54942_v52  ;;  %v19469_v13 = vpop.f32.mrb[240].mxu1  ;;  %55212 = vst [vmem:[#allocation26_spill] sm:$0xff] %v52419_v20 }
 0x402   : > { %17376 = vmatprep.subr.mxu0 %v55211_v58  ;;  %47609 = vmatmul.mubr.f32.vlgmr.msra.gmra.mrb[90].mxu1 %v52271_v7  ;;  %v47345_v22 = vpop.f32.mrb[241].mxu1  ;;  %v52428_v58 = vand.u32 4294901760, %v17992_v23 }
 0x403   : > { %47612 = vmatpush3.msra.mxu1 %v52361_v2  ;;  %47613 = vmatprep.mubr.msk.f32.mxu1 %vm48938_vm3, %v54942_v52 }
 0x404   : > { %47616 = vmatprep.subr.mxu1 %v54942_v52  ;;  %v38568_v19 = vpop.permute.xlu1 %38567  ;;  %v52449_v53 = vsub.f32 %v17992_v23, %v52428_v58  ;;  %v52462_v23 = vand.u32 4294901760, %v17990_v3 }
 0x405   : > { %v19545_v30 = vpop.f32.mrb[242].mxu1  ;;  %v52440_v32 = vsel %vm54897_vm12, %v38568_v19, %v52419_v20 }
 0x406   : > { %47614 = vmatmul.mubr.f32.vlgmr.msra.gmra.mrb[92].mxu1 %v52414_v27  ;;  %v19546_v22 = vadd.f32 %v19545_v30, %v19469_v13  ;;  %v47350_v7 = vpop.f32.mrb[243].mxu1  ;;  %55216 = vst [vmem:[#allocation40_spill] sm:$0xff] %v52440_v32  ;;  %v55218_v13 = vand.u32 4294901760, %v52297_v55  ;;  %v54839_v19 = vand.u32 4294901760, %v52449_v53 }
 0x407   : > { %47617 = vmatpush3.msra.mxu1 %v27902_v48  ;;  %47618 = vmatprep.mubr.msk.f32.mxu1 %vm48938_vm3, %v54942_v52  ;;  %v28290_v7 = vsel %vm225_vm2, %v28283_v33, 0  ;;  %v52452_v48 = vand.u32 4294901760, %v28284_v45 }
 0x408   : > { %17367 = vmatmul.mubr.f32.vlgmr.msra.gmra.mrb[0].mxu0 %v55217_v25  ;;  %47621 = vmatprep.subr.mxu1 %v54942_v52  ;;  %v52459_v55 = vand.u32 4294901760, %v28290_v7 }
 0x409   : > { %17380 = vmatpush1.msra.mxu0 %v55218_v13  ;;  %17443 = vmatprep.mubr.f32.mxu0 %v54942_v52  ;;  %v19619_v51 = vpop.f32.mrb[244].mxu1  ;;  %55219 = vst [vmem:[#allocation39_spill] sm:$0xff] %v52452_v48  ;;  %v52465_v33 = vsub.f32 %v28284_v45, %v52452_v48  ;;  %v52478_v45 = vsub.f32 %v17990_v3, %v52462_v23 }
 0x40a   : > { %17452 = vmatprep.subr.mxu0 %v52247_v10  ;;  %47619 = vmatmul.mubr.f32.vlgmr.msra.gmra.mrb[94].mxu1 %v52354_v14  ;;  %v19620_v25 = vadd.f32 %v19619_v51, %v19546_v22  ;;  %v47355_v30 = vpop.f32.mrb[245].mxu1  ;;  %v52473_v13 = vsub.f32 %v28290_v7, %v52459_v55 }
 0x40b   : > { %47622 = vmatpush3.msra.mxu1 %v52374_v9  ;;  %47623 = vmatprep.mubr.msk.f32.mxu1 %vm48938_vm3, %v54942_v52  ;;  %55220 = vst [vmem:[#allocation32_spill] sm:$0xff] %v52465_v33 }
 0x40c   : > { %47626 = vmatprep.subr.mxu1 %v54942_v52  ;;  %v54841_v3 = vand.u32 4294901760, %v52473_v13 }
 0x40d   : > { %v19693_v37 = vpop.f32.mrb[246].mxu1 }
 0x40e   : > { %47624 = vmatmul.mubr.f32.vlgmr.msra.gmra.mrb[96].mxu1 %v52367_v17  ;;  %v19694_v10 = vadd.f32 %v19693_v37, %v19620_v25  ;;  %v47360_v22 = vpop.f32.mrb[247].mxu1  ;;  %v52483_v25 = vand.u32 4294901760, %v52465_v33  ;;  %v18077_v37 = vsub.f32 %v52449_v53, %v54839_v19 }
 0x40f   : > { %47627 = vmatpush3.msra.mxu1 %v52361_v2  ;;  %47628 = vmatprep.mubr.msk.f32.mxu1 %vm48938_vm3, %v54942_v52  ;;  %v54840_v22 = vand.u32 4294901760, %v52478_v45 }
 0x410   : > { %17445 = vmatmul.mubr.f32.vlgmr.msra.gmra.mrb[0].mxu0 %v55205_v44  ;;  %47631 = vmatprep.subr.mxu1 %v54942_v52  ;;  %55221 = vst [vmem:[#allocation41_spill] sm:$0xff] %v52483_v25  ;;  %v18078_v19 = vand.u32 4294901760, %v18077_v37 }
 0x411   : > { %17454 = vmatpush1.msra.mxu0 %v52281_v1  ;;  %v19767_v51 = vpop.f32.mrb[248].mxu1  ;;  %17517 = vmatprep.mubr.f32.mxu0 %v54942_v52  ;;  %v55222_v1 = vand.u32 4294901760, %v52374_v9  ;;  %v28837_v9 = vsub.f32 %v52473_v13, %v54841_v3 }
 0x412   : > { %47629 = vmatmul.mubr.f32.vlgmr.msra.gmra.mrb[98].mxu1 %v52381_v40  ;;  %v19768_v30 = vadd.f32 %v19767_v51, %v19694_v10  ;;  %v47365_v7 = vpop.f32.mrb[249].mxu1  ;;  %17997 = vmatprep.subr.mxu0 %v52428_v58  ;;  %v28362_v51 = vsub.f32 %v52465_v33, %v52483_v25 }
 0x413   : > { %47632 = vmatpush3.msra.mxu1 %v55222_v1  ;;  %47633 = vmatprep.mubr.msk.f32.mxu1 %vm48938_vm3, %v54942_v52 }
 0x414   : > { %47636 = vmatprep.subr.mxu1 %v54942_v52 }
 0x415   : > { %v19839_v10 = vpop.f32.mrb[250].mxu1 }
 0x416   : > { %v19840_v7 = vadd.f32 %v19839_v10, %v19768_v30  ;;  %47634 = vmatmul.mubr.f32.vlgmr.msra.gmra.mrb[100].mxu1 %v52354_v14  ;;  %v47370_v32 = vpop.f32.mrb[251].mxu1  ;;  %v52516_v30 = vand.u32 4294901760, %v28362_v51 }
 0x417   : > { %47637 = vmatpush3.msra.mxu1 %v52361_v2  ;;  %47638 = vmatprep.mubr.msk.f32.mxu1 %vm48938_vm3, %v54942_v52  ;;  %v18083_v2 = vsub.f32 %v52478_v45, %v54840_v22 }
 0x418   : > { %v52507_v1 = vadd.f32 %v19840_v7, %v52408_v39  ;;  %17519 = vmatmul.mubr.f32.vlgmr.msra.gmra.mrb[0].mxu0 %v55205_v44  ;;  %47641 = vmatprep.subr.mxu1 %v54942_v52  ;;  %55223 = vst [vmem:[#allocation3_spill] sm:$0xff] %v52516_v30  ;;  %v28838_v44 = vand.u32 4294901760, %v28837_v9  ;;  %v55224_v7 = vld [vmem:[#allocation6_spill] sm:$0xff] }
 0x419   : > { %17999 = vmatpush1.msra.mxu0 %v52462_v23  ;;  %18062 = vmatprep.mubr.f32.mxu0 %v54942_v52  ;;  %v20405_v32 = vpop.f32.mrb[252].mxu1  ;;  %v18084_v37 = vand.u32 4294901760, %v18083_v2  ;;  %v29219_v51 = vsel %vm29216_vm1, %v55224_v7, %v52215_v29 }
 0x41a   : > { %47639 = vmatmul.mubr.f32.vlgmr.msra.gmra.mrb[102].mxu1 %v52354_v14  ;;  %18079 = vmatprep.subr.mxu0 %v18078_v19  ;;  %v47375_v39 = vpop.f32.mrb[253].mxu1  ;;  %v55225_v19 = vld [vmem:[#allocation8_spill] sm:$0xff]  ;;  %v29226_v9 = vsel %vm225_vm2, %v29219_v51, 0 }
 0x41b   : > { %47642 = vmatpush3.msra.mxu1 %v52459_v55  ;;  %47643 = vmatprep.mubr.msk.f32.mxu1 %vm48938_vm3, %v54942_v52  ;;  %v29220_v39 = vsel %vm222_vm0, %v55225_v19, 0  ;;  %v52549_v19 = vpop.permute.xlu0 %37629 }
 0x41c   : > { %47646 = vmatprep.subr.mxu1 %v54942_v52  ;;  %v52535_v2 = vand.u32 4294901760, %v29220_v39 }
 0x41d   : > { %v20481_v10 = vpop.f32.mrb[254].mxu1 }
 0x41e   : > { %47644 = vmatmul.mubr.f32.vlgmr.msra.gmra.mrb[104].mxu1 %v52516_v30  ;;  %v20482_v22 = vadd.f32 %v20481_v10, %v20405_v32  ;;  %v47380_v3 = vpop.f32.mrb[255].mxu1  ;;  %55226 = vst [vmem:[#allocation30_spill] sm:$0xff] %v52535_v2  ;;  %v55261_v30 = vld [vmem:[#allocation15_spill] sm:$0xff] }
 0x41f   : > { %47647 = vmatpush3.msra.mxu1 %v28838_v44  ;;  %47648 = vmatprep.mubr.msk.f32.mxu1 %vm48938_vm3, %v54942_v52  ;;  %v32027_v40 = vsel %vm222_vm0, %v55261_v30, 0 }
 0x420   : > { %18068 = vmatmul.mubr.f32.vlgmr.msra.gmra.mrb[0].mxu0 %v51450_v61  ;;  %47651 = vmatprep.subr.mxu1 %v54942_v52  ;;  %v52542_v61 = vand.u32 4294901760, %v29226_v9 }
 0x421   : > { %18085 = vmatpush1.msra.mxu0 %v18084_v37  ;;  %18148 = vmatprep.mubr.f32.mxu0 %v54942_v52  ;;  %v20555_v29 = vpop.f32.mrb[0].mxu1  ;;  %v52546_v37 = vsub.f32 %v29220_v39, %v52535_v2 }
 0x422   : > { %18158 = vmatprep.subr.mxu0 %v52449_v53  ;;  %47649 = vmatmul.mubr.f32.vlgmr.msra.gmra.mrb[106].mxu1 %v52452_v48  ;;  %v20556_v3 = vadd.f32 %v20555_v29, %v20482_v22  ;;  %v47385_v32 = vpop.f32.mrb[1].mxu1  ;;  %v52555_v22 = vsub.f32 %v29226_v9, %v52542_v61 }
 0x423   : > { %47652 = vmatpush3.msra.mxu1 %v52473_v13  ;;  %47653 = vmatprep.mubr.msk.f32.mxu1 %vm48938_vm3, %v54942_v52  ;;  %55227 = vst [vmem:[#allocation8_spill] sm:$0xff] %v52546_v37  ;;  %v52562_v29 = vand.u32 4294901760, %v52546_v37 }
 0x424   : > { %47656 = vmatprep.subr.mxu1 %v54942_v52  ;;  %v54844_v9 = vand.u32 4294901760, %v52555_v22 }
 0x425   : > { %v20629_v44 = vpop.f32.mrb[2].mxu1  ;;  %55228 = vst [vmem:[#allocation119_spill] sm:$0xff] %v52562_v29 }
 0x426   : > { %47654 = vmatmul.mubr.f32.vlgmr.msra.gmra.mrb[108].mxu1 %v52465_v33  ;;  %v20630_v10 = vadd.f32 %v20629_v44, %v20556_v3  ;;  %v47390_v51 = vpop.f32.mrb[3].mxu1  ;;  %v55229_v44 = vand.u32 4294901760, %v52473_v13  ;;  %v29298_v33 = vsub.f32 %v52546_v37, %v52562_v29  ;;  %v29773_v13 = vsub.f32 %v52555_v22, %v54844_v9 }
 0x427   : > { %47657 = vmatpush3.msra.mxu1 %v52459_v55  ;;  %47658 = vmatprep.mubr.msk.f32.mxu1 %vm48938_vm3, %v54942_v52  ;;  %v52572_v51 = vpop.permute.xlu0 %37635 }
 0x428   : > { %18150 = vmatmul.mubr.f32.vlgmr.msra.gmra.mrb[0].mxu0 %v51383_v0  ;;  %47661 = vmatprep.subr.mxu1 %v54942_v52 }
 0x429   : > { %18161 = vmatpush1.msra.mxu0 %v52478_v45  ;;  %v20703_v39 = vpop.f32.mrb[4].mxu1  ;;  %18224 = vmatprep.mubr.f32.mxu0 %v54942_v52 }
 0x42a   : > { %18234 = vmatprep.subr.mxu0 %v52428_v58  ;;  %47659 = vmatmul.mubr.f32.vlgmr.msra.gmra.mrb[110].mxu1 %v52483_v25  ;;  %v20704_v3 = vadd.f32 %v20703_v39, %v20630_v10  ;;  %v47395_v32 = vpop.f32.mrb[5].mxu1  ;;  %v55230_v39 = vld [vmem:[#allocation43_spill] sm:$0xff] }
 0x42b   : > { %47662 = vmatpush3.msra.mxu1 %v55229_v44  ;;  %47663 = vmatprep.mubr.msk.f32.mxu1 %vm48938_vm3, %v54942_v52  ;;  %v18922_v32 = vsel %vm18920_vm8, %v55230_v39, %v49604_v59 }
 0x42c   : > { %47666 = vmatprep.subr.mxu1 %v54942_v52 }
 0x42d   : > { %v20775_v20 = vpop.f32.mrb[6].mxu1 }
 0x42e   : > { %v20776_v7 = vadd.f32 %v20775_v20, %v20704_v3  ;;  %47664 = vmatmul.mubr.f32.vlgmr.msra.gmra.mrb[112].mxu1 %v52452_v48  ;;  %v47400_v10 = vpop.f32.mrb[7].mxu1  ;;  %v55232_v3 = vand.u32 4294901760, %v52449_v53 }
 0x42f   : > { %47667 = vmatpush3.msra.mxu1 %v52459_v55  ;;  %47668 = vmatprep.mubr.msk.f32.mxu1 %vm48938_vm3, %v54942_v52  ;;  %v52593_v55 = vand.u32 4294901760, %v29298_v33  ;;  %v30149_v10 = vpop.permute.xlu0 %30148  ;;  %v55233_v33 = vld [vmem:[#allocation9_spill] sm:$0xff] }
 0x430   : > { %v52587_v44 = vadd.f32 %v20776_v7, %v52507_v1  ;;  %18227 = vmatmul.mubr.f32.vlgmr.msra.gmra.mrb[0].mxu0 %v51400_v63  ;;  %47671 = vmatprep.subr.mxu1 %v54942_v52  ;;  %v18928_v1 = vsel %vm225_vm2, %v18922_v32, 0  ;;  %v29774_v63 = vand.u32 4294901760, %v29773_v13  ;;  %v30153_v9 = vsel %vm30150_vm15, %v55233_v33, %v30149_v10  ;;  %v55234_v32 = vld [vmem:[#allocation44_spill] sm:$0xff]  ;;  %v52616_v13 = vld [vmem:[%s54648_s1 + $0x8] sm:$0xff] }
 0x431   : > { %18236 = vmatpush1.msra.mxu0 %v52462_v23  ;;  %18299 = vmatprep.mubr.f32.mxu0 %v54942_v52  ;;  %v21341_v20 = vpop.f32.mrb[8].mxu1  ;;  %55231 = vst [vmem:[#allocation43_spill] sm:$0xff] %v52593_v55  ;;  %v52605_v53 = vand.u32 4294901760, %v18928_v1  ;;  %v18921_v25 = vsel %vm18920_vm8, %v55234_v32, %v55230_v39  ;;  %v30155_v10 = vsel %vm222_vm0, %v52616_v13, 0  ;;  %v55235_v39 = vand.u32 4294901760, %v52478_v45 }
 0x432   : > { %18312 = vmatprep.subr.mxu0 %v55232_v3  ;;  %47669 = vmatmul.mubr.f32.vlgmr.msra.gmra.mrb[114].mxu1 %v52452_v48  ;;  %v47405_v59 = vpop.f32.mrb[9].mxu1  ;;  %v52632_v33 = vand.u32 4294901760, %v30155_v10  ;;  %vm55279_vm8 = vcmask 138240  }
 0x433   : > { %47672 = vmatpush3.msra.mxu1 %v52542_v61  ;;  %47673 = vmatprep.mubr.msk.f32.mxu1 %vm48938_vm3, %v54942_v52 }
 0x434   : > { %47676 = vmatprep.subr.mxu1 %v54942_v52  ;;  %55236 = vst [vmem:[#allocation44_spill] sm:$0xff] %v52632_v33 }
 0x435   : > { %v21417_v7 = vpop.f32.mrb[10].mxu1 }
 0x436   : > { %47674 = vmatmul.mubr.f32.vlgmr.msra.gmra.mrb[116].mxu1 %v52593_v55  ;;  %v21418_v3 = vadd.f32 %v21417_v7, %v21341_v20  ;;  %v47410_v59 = vpop.f32.mrb[11].mxu1  ;;  %v30161_v20 = vsel %vm225_vm2, %v30153_v9, 0  ;;  %v52627_v7 = vsub.f32 %v18928_v1, %v52605_v53 }
 0x437   : > { %47677 = vmatpush3.msra.mxu1 %v29774_v63  ;;  %47678 = vmatprep.mubr.msk.f32.mxu1 %vm48938_vm3, %v54942_v52  ;;  %v18926_v59 = vsel %vm225_vm2, %v18921_v25, 0  ;;  %v52637_v45 = vand.u32 4294901760, %v30161_v20 }
 0x438   : > { %18303 = vmatmul.mubr.f32.vlgmr.msra.gmra.mrb[0].mxu0 %v51414_v42  ;;  %47681 = vmatprep.subr.mxu1 %v54942_v52  ;;  %v52640_v9 = vand.u32 4294901760, %v18926_v59 }
 0x439   : > { %18316 = vmatpush1.msra.mxu0 %v55235_v39  ;;  %18379 = vmatprep.mubr.f32.mxu0 %v54942_v52  ;;  %v21491_v63 = vpop.f32.mrb[12].mxu1  ;;  %v54846_v39 = vand.u32 4294901760, %v52627_v7 }
 0x43a   : > { %18388 = vmatprep.subr.mxu0 %v52428_v58  ;;  %47679 = vmatmul.mubr.f32.vlgmr.msra.gmra.mrb[118].mxu1 %v52535_v2  ;;  %v21492_v42 = vadd.f32 %v21491_v63, %v21418_v3  ;;  %v47415_v32 = vpop.f32.mrb[13].mxu1  ;;  %v52644_v3 = vsub.f32 %v30155_v10, %v52632_v33  ;;  %v52651_v63 = vsub.f32 %v30161_v20, %v52637_v45 }
 0x43b   : > { %47682 = vmatpush3.msra.mxu1 %v52555_v22  ;;  %47683 = vmatprep.mubr.msk.f32.mxu1 %vm48938_vm3, %v54942_v52 }
 0x43c   : > { %47686 = vmatprep.subr.mxu1 %v54942_v52  ;;  %55237 = vst [vmem:[#allocation120_spill] sm:$0xff] %v52644_v3  ;;  %v52663_v20 = vand.u32 4294901760, %v52644_v3 }
 0x43d   : > { %v21565_v25 = vpop.f32.mrb[14].mxu1 }
 0x43e   : > { %47684 = vmatmul.mubr.f32.vlgmr.msra.gmra.mrb[120].mxu1 %v52546_v37  ;;  %v21566_v58 = vadd.f32 %v21565_v25, %v21492_v42  ;;  %v47420_v1 = vpop.f32.mrb[15].mxu1  ;;  %v52656_v42 = vsub.f32 %v18926_v59, %v52640_v9  ;;  %55238 = vst [vmem:[#allocation121_spill] sm:$0xff] %v52663_v20  ;;  %v19013_v59 = vsub.f32 %v52627_v7, %v54846_v39 }
 0x43f   : > { %47687 = vmatpush3.msra.mxu1 %v52542_v61  ;;  %47688 = vmatprep.mubr.msk.f32.mxu1 %vm48938_vm3, %v54942_v52 }
 0x440   : > { %18381 = vmatmul.mubr.f32.vlgmr.msra.gmra.mrb[0].mxu0 %v51383_v0  ;;  %47691 = vmatprep.subr.mxu1 %v54942_v52  ;;  %v19014_v39 = vand.u32 4294901760, %v19013_v59 }
 0x441   : > { %18390 = vmatpush1.msra.mxu0 %v52462_v23  ;;  %v21639_v10 = vpop.f32.mrb[16].mxu1  ;;  %18453 = vmatprep.mubr.f32.mxu0 %v54942_v52  ;;  %v55239_v23 = vand.u32 4294901760, %v52555_v22 }
 0x442   : > { %47689 = vmatmul.mubr.f32.vlgmr.msra.gmra.mrb[122].mxu1 %v52562_v29  ;;  %v21640_v32 = vadd.f32 %v21639_v10, %v21566_v58  ;;  %v47425_v25 = vpop.f32.mrb[17].mxu1  ;;  %18933 = vmatprep.subr.mxu0 %v52605_v53  ;;  %v55240_v58 = vand.u32 4294901760, %v52651_v63 }
 0x443   : > { %47692 = vmatpush3.msra.mxu1 %v55239_v23  ;;  %47693 = vmatprep.mubr.msk.f32.mxu1 %vm48938_vm3, %v54942_v52  ;;  %v52678_v25 = vld [vmem:[%s49011_s23 + $0x8] sm:$0xff]  ;;  %v30233_v23 = vsub.f32 %v52644_v3, %v52663_v20 }
 0x444   : > { %47696 = vmatprep.subr.mxu1 %v54942_v52  ;;  %42275 = vrot.lane.b32.xlu0 %v52678_v25, %s48959_s9  ;;  %v30708_v29 = vsub.f32 %v52651_v63, %v55240_v58 }
 0x445   : > { %v21711_v10 = vpop.f32.mrb[18].mxu1  ;;  %v52705_v58 = vand.u32 4294901760, %v30233_v23 }
 0x446   : > { %v21712_v22 = vadd.f32 %v21711_v10, %v21640_v32  ;;  %47694 = vmatmul.mubr.f32.vlgmr.msra.gmra.mrb[124].mxu1 %v52535_v2  ;;  %v47430_v1 = vpop.f32.mrb[19].mxu1 }
 0x447   : > { %47697 = vmatpush3.msra.mxu1 %v52542_v61  ;;  %47698 = vmatprep.mubr.msk.f32.mxu1 %vm48938_vm3, %v54942_v52  ;;  %v55241_v61 = vand.u32 4294901760, %v52656_v42  ;;  %v52702_v1 = vld [vmem:[%s49011_s23 + $0x10] sm:$0xf]  ;;  %55242 = vst [vmem:[#allocation122_spill] sm:$0xff] %v52705_v58  ;;  %s55247_s23 = smov 72  }
 0x448   : > { %v52692_v37 = vadd.f32 %v21712_v22, %v52587_v44  ;;  %18455 = vmatmul.mubr.f32.vlgmr.msra.gmra.mrb[0].mxu0 %v51383_v0  ;;  %47701 = vmatprep.subr.mxu1 %v54942_v52  ;;  %v30709_v0 = vand.u32 4294901760, %v30708_v29 }
 0x449   : > { %18935 = vmatpush1.msra.mxu0 %v52640_v9  ;;  %18998 = vmatprep.mubr.f32.mxu0 %v54942_v52  ;;  %v19019_v32 = vsub.f32 %v52656_v42, %v55241_v61  ;;  %v22277_v59 = vpop.f32.mrb[20].mxu1  ;;  %v55243_v61 = vld [vmem:[#allocation11_spill] sm:$0xff] }
 0x44a   : > { %47699 = vmatmul.mubr.f32.vlgmr.msra.gmra.mrb[126].mxu1 %v52535_v2  ;;  %19015 = vmatprep.subr.mxu0 %v19014_v39  ;;  %v47435_v44 = vpop.f32.mrb[21].mxu1  ;;  %v31090_v23 = vsel %vm31087_vm5, %v55243_v61, %v52396_v56  ;;  %v55244_v2 = vld [vmem:[#allocation22_spill] sm:$0xff] }
 0x44b   : > { %47702 = vmatpush3.msra.mxu1 %v52637_v45  ;;  %47703 = vmatprep.mubr.msk.f32.mxu1 %vm48938_vm3, %v54942_v52  ;;  %v19020_v10 = vand.u32 4294901760, %v19019_v32  ;;  %v31091_v29 = vsel %vm222_vm0, %v55244_v2, 0  ;;  %v31097_v56 = vsel %vm225_vm2, %v31090_v23, 0 }
 0x44c   : > { %47706 = vmatprep.subr.mxu1 %v54942_v52  ;;  %39504 = vrot.lane.b32.xlu1 %v52702_v1, %s48896_s19  ;;  %v52727_v61 = vand.u32 4294901760, %v31091_v29  ;;  %s55246_s19 = smov 123  }
 0x44d   : > { %v22353_v22 = vpop.f32.mrb[22].mxu1  ;;  %42273 = vrot.lane.b32.xlu0 %v49023_v4, %s48959_s9 }
 0x44e   : > { %47704 = vmatmul.mubr.f32.vlgmr.msra.gmra.mrb[128].mxu1 %v52705_v58  ;;  %v22354_v39 = vadd.f32 %v22353_v22, %v22277_v59  ;;  %v47440_v44 = vpop.f32.mrb[23].mxu1  ;;  %55245 = vst [vmem:[#allocation22_spill] sm:$0xff] %v52727_v61 }
 0x44f   : > { %47707 = vmatpush3.msra.mxu1 %v30709_v0  ;;  %47708 = vmatprep.mubr.msk.f32.mxu1 %vm48938_vm3, %v54942_v52 }
 0x450   : > { %19004 = vmatmul.mubr.f32.vlgmr.msra.gmra.mrb[0].mxu0 %v51557_v15  ;;  %47711 = vmatprep.subr.mxu1 %v54942_v52  ;;  %v52734_v15 = vand.u32 4294901760, %v31097_v56 }
 0x451   : > { %19021 = vmatpush1.msra.mxu0 %v19020_v10  ;;  %19084 = vmatprep.mubr.f32.mxu0 %v54942_v52  ;;  %v22427_v32 = vpop.f32.mrb[24].mxu1  ;;  %v52742_v10 = vsub.f32 %v31091_v29, %v52727_v61 }
 0x452   : > { %19094 = vmatprep.subr.mxu0 %v52627_v7  ;;  %47709 = vmatmul.mubr.f32.vlgmr.msra.gmra.mrb[130].mxu1 %v52632_v33  ;;  %v22428_v2 = vadd.f32 %v22427_v32, %v22354_v39  ;;  %v47445_v59 = vpop.f32.mrb[25].mxu1  ;;  %v52745_v39 = vpop.permute.xlu0 %38565  ;;  %v52751_v44 = vsub.f32 %v31097_v56, %v52734_v15  ;;  %v55249_v32 = vld [vmem:[#allocation38_spill] sm:$0xff] }
 0x453   : > { %47712 = vmatpush3.msra.mxu1 %v52651_v63  ;;  %47713 = vmatprep.mubr.msk.f32.mxu1 %vm48938_vm3, %v54942_v52  ;;  %55248 = vst [vmem:[#allocation123_spill] sm:$0xff] %v52742_v10 }
 0x454   : > { %47716 = vmatprep.subr.mxu1 %v54942_v52  ;;  %40427 = vrot.lane.b32.xlu0 %v52702_v1, %s55246_s19  ;;  %v54857_v56 = vand.u32 4294901760, %v52751_v44 }
 0x455   : > { %v22501_v0 = vpop.f32.mrb[26].mxu1  ;;  %43207 = vrot.lane.b32.xlu1 %v52616_v13, %s55247_s23 }
 0x456   : > { %47714 = vmatmul.mubr.f32.vlgmr.msra.gmra.mrb[132].mxu1 %v52644_v3  ;;  %v22502_v22 = vadd.f32 %v22501_v0, %v22428_v2  ;;  %v47450_v23 = vpop.f32.mrb[27].mxu1  ;;  %v52758_v2 = vand.u32 4294901760, %v52742_v10  ;;  %v52768_v3 = vpop.permute.xlu0 %38571 }
 0x457   : > { %47717 = vmatpush3.msra.mxu1 %v52637_v45  ;;  %47718 = vmatprep.mubr.msk.f32.mxu1 %vm48938_vm3, %v54942_v52  ;;  %v55251_v23 = vand.u32 4294901760, %v52651_v63  ;;  %55252 = vst [vmem:[#allocation124_spill] sm:$0xff] %v52768_v3 }
 0x458   : > { %19086 = vmatmul.mubr.f32.vlgmr.msra.gmra.mrb[0].mxu0 %v55249_v32  ;;  %47721 = vmatprep.subr.mxu1 %v54942_v52  ;;  %55250 = vst [vmem:[#allocation38_spill] sm:$0xff] %v52758_v2 }
 0x459   : > { %19097 = vmatpush1.msra.mxu0 %v52656_v42  ;;  %v22575_v29 = vpop.f32.mrb[28].mxu1  ;;  %19160 = vmatprep.mubr.f32.mxu0 %v54942_v52 }
 0x45a   : > { %19170 = vmatprep.subr.mxu0 %v52605_v53  ;;  %47719 = vmatmul.mubr.f32.vlgmr.msra.gmra.mrb[134].mxu1 %v52663_v20  ;;  %v22576_v59 = vadd.f32 %v22575_v29, %v22502_v22  ;;  %v47455_v0 = vpop.f32.mrb[29].mxu1  ;;  %v31169_v22 = vsub.f32 %v52742_v10, %v52758_v2  ;;  %v55254_v20 = vld [vmem:[#allocation46_spill] sm:$0xff] }
 0x45b   : > { %47722 = vmatpush3.msra.mxu1 %v55251_v23  ;;  %47723 = vmatprep.mubr.msk.f32.mxu1 %vm48938_vm3, %v54942_v52  ;;  %v31644_v0 = vsub.f32 %v52751_v44, %v54857_v56  ;;  %v55253_v23 = vld [vmem:[#allocation47_spill] sm:$0xff]  ;;  %v32022_v56 = vpop.permute.xlu0 %32021 }
 0x45c   : > { %47726 = vmatprep.subr.mxu1 %v54942_v52  ;;  %43213 = vrot.lane.b32.xlu1 %v49368_v31, %s55033_s24  ;;  %v19858_v55 = vsel %vm19856_vm4, %v55254_v20, %v55253_v23 }
 0x45d   : > { %v22647_v58 = vpop.f32.mrb[30].mxu1  ;;  %43211 = vrot.lane.b32.xlu0 %v52678_v25, %s55033_s24 }
 0x45e   : > { %v22648_v29 = vadd.f32 %v22647_v58, %v22576_v59  ;;  %47724 = vmatmul.mubr.f32.vlgmr.msra.gmra.mrb[136].mxu1 %v52632_v33  ;;  %v47460_v63 = vpop.f32.mrb[31].mxu1  ;;  %v55255_v58 = vld [vmem:[#allocation19_spill] sm:$0xff]  ;;  %v52793_v59 = vand.u32 4294901760, %v31169_v22 }
 0x45f   : > { %47727 = vmatpush3.msra.mxu1 %v52637_v45  ;;  %47728 = vmatprep.mubr.msk.f32.mxu1 %vm48938_vm3, %v54942_v52  ;;  %v55257_v63 = vand.u32 4294901760, %v52627_v7  ;;  %v55259_v7 = vld [vmem:[#allocation36_spill] sm:$0xff] }
 0x460   : > { %v52787_v48 = vadd.f32 %v22648_v29, %v52692_v37  ;;  %19163 = vmatmul.mubr.f32.vlgmr.msra.gmra.mrb[0].mxu0 %v55255_v58  ;;  %47731 = vmatprep.subr.mxu1 %v54942_v52  ;;  %55256 = vst [vmem:[#allocation47_spill] sm:$0xff] %v52793_v59  ;;  %v19864_v37 = vsel %vm225_vm2, %v19858_v55, 0  ;;  %v31645_v29 = vand.u32 4294901760, %v31644_v0  ;;  %v32026_v58 = vsel %vm32023_vm11, %v55259_v7, %v32022_v56  ;;  %v55260_v0 = vld [vmem:[#allocation49_spill] sm:$0xff] }
 0x461   : > { %19172 = vmatpush1.msra.mxu0 %v52640_v9  ;;  %19235 = vmatprep.mubr.f32.mxu0 %v54942_v52  ;;  %v23213_v45 = vpop.f32.mrb[32].mxu1  ;;  %v55262_v56 = vld [vmem:[#allocation21_spill] sm:$0xff]  ;;  %v32033_v7 = vsel %vm225_vm2, %v32026_v58, 0 }
 0x462   : > { %19248 = vmatprep.subr.mxu0 %v55257_v63  ;;  %47729 = vmatmul.mubr.f32.vlgmr.msra.gmra.mrb[138].mxu1 %v52632_v33  ;;  %v47465_v23 = vpop.f32.mrb[33].mxu1  ;;  %v52809_v63 = vand.u32 4294901760, %v19864_v37  ;;  %v19857_v33 = vsel %vm19856_vm4, %v55260_v0, %v55254_v20  ;;  %vm55297_vm4 = vcmask 490496  }
 0x463   : > { %47732 = vmatpush3.msra.mxu1 %v52734_v15  ;;  %47733 = vmatprep.mubr.msk.f32.mxu1 %vm48938_vm3, %v54942_v52  ;;  %v19862_v30 = vsel %vm225_vm2, %v19857_v33, 0 }
 0x464   : > { %47736 = vmatprep.subr.mxu1 %v54942_v52  ;;  %41350 = vrot.lane.b32.xlu1 %v52702_v1, %s55258_s11  ;;  %v52826_v20 = vsub.f32 %v19864_v37, %v52809_v63  ;;  %v52841_v33 = vand.u32 4294901760, %v19862_v30 }
 0x465   : > { %v23289_v22 = vpop.f32.mrb[34].mxu1  ;;  %43209 = vrot.lane.b32.xlu0 %v49023_v4, %s55033_s24 }
 0x466   : > { %47734 = vmatmul.mubr.f32.vlgmr.msra.gmra.mrb[140].mxu1 %v52793_v59  ;;  %v23290_v55 = vadd.f32 %v23289_v22, %v23213_v45  ;;  %v47470_v23 = vpop.f32.mrb[35].mxu1  ;;  %v55263_v45 = vand.u32 4294901760, %v52656_v42  ;;  %v52836_v42 = vand.u32 4294901760, %v32033_v7  ;;  %v55301_v59 = vld [vmem:[#allocation61_spill] sm:$0xff] }
 0x467   : > { %47737 = vmatpush3.msra.mxu1 %v31645_v29  ;;  %47738 = vmatprep.mubr.msk.f32.mxu1 %vm48938_vm3, %v54942_v52  ;;  %v52829_v29 = vand.u32 4294901760, %v32027_v40 }
 0x468   : > { %19239 = vmatmul.mubr.f32.vlgmr.msra.gmra.mrb[0].mxu0 %v55262_v56  ;;  %47741 = vmatprep.subr.mxu1 %v54942_v52  ;;  %v54862_v56 = vand.u32 4294901760, %v52826_v20 }
 0x469   : > { %19252 = vmatpush1.msra.mxu0 %v55263_v45  ;;  %19315 = vmatprep.mubr.f32.mxu0 %v54942_v52  ;;  %v23363_v22 = vpop.f32.mrb[36].mxu1  ;;  %55264 = vst [vmem:[#allocation46_spill] sm:$0xff] %v52829_v29  ;;  %v52854_v45 = vsub.f32 %v32033_v7, %v52836_v42 }
 0x46a   : > { %19324 = vmatprep.subr.mxu0 %v52605_v53  ;;  %47739 = vmatmul.mubr.f32.vlgmr.msra.gmra.mrb[142].mxu1 %v52727_v61  ;;  %v23364_v23 = vadd.f32 %v23363_v22, %v23290_v55  ;;  %v47475_v0 = vpop.f32.mrb[37].mxu1  ;;  %v52846_v53 = vsub.f32 %v32027_v40, %v52829_v29  ;;  %v52859_v40 = vsub.f32 %v19862_v30, %v52841_v33 }
 0x46b   : > { %47742 = vmatpush3.msra.mxu1 %v52751_v44  ;;  %47743 = vmatprep.mubr.msk.f32.mxu1 %vm48938_vm3, %v54942_v52  ;;  %v54864_v30 = vand.u32 4294901760, %v52854_v45 }
 0x46c   : > { %47746 = vmatprep.subr.mxu1 %v54942_v52  ;;  %42279 = vrot.lane.b32.xlu0 %v52702_v1, %s48959_s9  ;;  %55266 = vst [vmem:[#allocation19_spill] sm:$0xff] %v52846_v53 }
 0x46d   : > { %v23437_v37 = vpop.f32.mrb[38].mxu1  ;;  %44143 = vrot.lane.b32.xlu1 %v52616_v13, %s55265_s25 }
 0x46e   : > { %47744 = vmatmul.mubr.f32.vlgmr.msra.gmra.mrb[144].mxu1 %v52742_v10  ;;  %v23438_v58 = vadd.f32 %v23437_v37, %v23364_v23  ;;  %v47480_v55 = vpop.f32.mrb[39].mxu1  ;;  %v52864_v23 = vand.u32 4294901760, %v52846_v53  ;;  %v19949_v37 = vsub.f32 %v52826_v20, %v54862_v56 }
 0x46f   : > { %47747 = vmatpush3.msra.mxu1 %v52734_v15  ;;  %47748 = vmatprep.mubr.msk.f32.mxu1 %vm48938_vm3, %v54942_v52  ;;  %v54865_v55 = vand.u32 4294901760, %v52859_v40 }
 0x470   : > { %19317 = vmatmul.mubr.f32.vlgmr.msra.gmra.mrb[0].mxu0 %v55249_v32  ;;  %47751 = vmatprep.subr.mxu1 %v54942_v52  ;;  %55267 = vst [vmem:[#allocation49_spill] sm:$0xff] %v52864_v23  ;;  %v19950_v56 = vand.u32 4294901760, %v19949_v37  ;;  %v32958_v37 = vpop.permute.xlu1 %32957 }
 0x471   : > { %19326 = vmatpush1.msra.mxu0 %v52640_v9  ;;  %v23511_v22 = vpop.f32.mrb[40].mxu1  ;;  %19389 = vmatprep.mubr.f32.mxu0 %v54942_v52  ;;  %v55268_v9 = vand.u32 4294901760, %v52751_v44  ;;  %v32580_v44 = vsub.f32 %v52854_v45, %v54864_v30  ;;  %v55270_v30 = vld [vmem:[#allocation103_spill] sm:$0xff] }
 0x472   : > { %47749 = vmatmul.mubr.f32.vlgmr.msra.gmra.mrb[146].mxu1 %v52758_v2  ;;  %v23512_v0 = vadd.f32 %v23511_v22, %v23438_v58  ;;  %v47485_v7 = vpop.f32.mrb[41].mxu1  ;;  %19869 = vmatprep.subr.mxu0 %v52809_v63  ;;  %v32105_v22 = vsub.f32 %v52846_v53, %v52864_v23 }
 0x473   : > { %47752 = vmatpush3.msra.mxu1 %v55268_v9  ;;  %47753 = vmatprep.mubr.msk.f32.mxu1 %vm48938_vm3, %v54942_v52 }
 0x474   : > { %47756 = vmatprep.subr.mxu1 %v54942_v52  ;;  %44149 = vrot.lane.b32.xlu1 %v49368_v31, %s48960_s28 }
 0x475   : > { %v23583_v58 = vpop.f32.mrb[42].mxu1  ;;  %44147 = vrot.lane.b32.xlu0 %v52678_v25, %s48960_s28 }
 0x476   : > { %v23584_v7 = vadd.f32 %v23583_v58, %v23512_v0  ;;  %47754 = vmatmul.mubr.f32.vlgmr.msra.gmra.mrb[148].mxu1 %v52727_v61  ;;  %v47490_v2 = vpop.f32.mrb[43].mxu1  ;;  %v52897_v0 = vand.u32 4294901760, %v32105_v22 }
 0x477   : > { %47757 = vmatpush3.msra.mxu1 %v52734_v15  ;;  %47758 = vmatprep.mubr.msk.f32.mxu1 %vm48938_vm3, %v54942_v52  ;;  %v19955_v15 = vsub.f32 %v52859_v40, %v54865_v55  ;;  %v32962_v55 = vsel %vm32959_vm14, %v55270_v30, %v32958_v37 }
 0x478   : > { %v52888_v9 = vadd.f32 %v23584_v7, %v52787_v48  ;;  %19391 = vmatmul.mubr.f32.vlgmr.msra.gmra.mrb[0].mxu0 %v55249_v32  ;;  %47761 = vmatprep.subr.mxu1 %v54942_v52  ;;  %55269 = vst [vmem:[#allocation15_spill] sm:$0xff] %v52897_v0  ;;  %v32581_v32 = vand.u32 4294901760, %v32580_v44  ;;  %v32969_v44 = vsel %vm225_vm2, %v32962_v55, 0 }
 0x479   : > { %19871 = vmatpush1.msra.mxu0 %v52841_v33  ;;  %19934 = vmatprep.mubr.f32.mxu0 %v54942_v52  ;;  %v24149_v2 = vpop.f32.mrb[44].mxu1  ;;  %v19956_v58 = vand.u32 4294901760, %v19955_v15 }
 0x47a   : > { %47759 = vmatmul.mubr.f32.vlgmr.msra.gmra.mrb[150].mxu1 %v52727_v61  ;;  %19951 = vmatprep.subr.mxu0 %v19950_v56  ;;  %v47495_v48 = vpop.f32.mrb[45].mxu1  ;;  %v55271_v56 = vld [vmem:[#allocation42_spill] sm:$0xff] }
 0x47b   : > { %47762 = vmatpush3.msra.mxu1 %v52836_v42  ;;  %47763 = vmatprep.mubr.msk.f32.mxu1 %vm48938_vm3, %v54942_v52  ;;  %v32963_v48 = vsel %vm222_vm0, %v55271_v56, 0 }
 0x47c   : > { %47766 = vmatprep.subr.mxu1 %v54942_v52  ;;  %v52915_v37 = vand.u32 4294901760, %v32963_v48  ;;  %43215 = vrot.lane.b32.xlu1 %v52702_v1, %s55033_s24 }
 0x47d   : > { %v24225_v7 = vpop.f32.mrb[46].mxu1  ;;  %44145 = vrot.lane.b32.xlu0 %v49023_v4, %s48960_s28 }
 0x47e   : > { %47764 = vmatmul.mubr.f32.vlgmr.msra.gmra.mrb[152].mxu1 %v52897_v0  ;;  %v24226_v22 = vadd.f32 %v24225_v7, %v24149_v2  ;;  %v47500_v10 = vpop.f32.mrb[47].mxu1  ;;  %55272 = vst [vmem:[#allocation21_spill] sm:$0xff] %v52915_v37 }
 0x47f   : > { %47767 = vmatpush3.msra.mxu1 %v32581_v32  ;;  %47768 = vmatprep.mubr.msk.f32.mxu1 %vm48938_vm3, %v54942_v52  ;;  %v52926_v32 = vsub.f32 %v32963_v48, %v52915_v37 }
 0x480   : > { %19940 = vmatmul.mubr.f32.vlgmr.msra.gmra.mrb[0].mxu0 %v51646_v11  ;;  %47771 = vmatprep.subr.mxu1 %v54942_v52  ;;  %v52922_v11 = vand.u32 4294901760, %v32969_v44 }
 0x481   : > { %19957 = vmatpush1.msra.mxu0 %v19956_v58  ;;  %20020 = vmatprep.mubr.f32.mxu0 %v54942_v52  ;;  %v24299_v15 = vpop.f32.mrb[48].mxu1  ;;  %55273 = vst [vmem:[#allocation42_spill] sm:$0xff] %v52926_v32  ;;  %v52940_v48 = vand.u32 4294901760, %v52926_v32 }
 0x482   : > { %20030 = vmatprep.subr.mxu0 %v52826_v20  ;;  %47769 = vmatmul.mubr.f32.vlgmr.msra.gmra.mrb[154].mxu1 %v52829_v29  ;;  %v24300_v10 = vadd.f32 %v24299_v15, %v24226_v22  ;;  %v47505_v2 = vpop.f32.mrb[49].mxu1  ;;  %v52933_v22 = vsub.f32 %v32969_v44, %v52922_v11 }
 0x483   : > { %47772 = vmatpush3.msra.mxu1 %v52854_v45  ;;  %47773 = vmatprep.mubr.msk.f32.mxu1 %vm48938_vm3, %v54942_v52  ;;  %55274 = vst [vmem:[#allocation125_spill] sm:$0xff] %v52940_v48  ;;  %v55275_v2 = vand.u32 4294901760, %v52854_v45 }
 0x484   : > { %47776 = vmatprep.subr.mxu1 %v54942_v52  ;;  %v54869_v44 = vand.u32 4294901760, %v52933_v22  ;;  %44151 = vrot.lane.b32.xlu0 %v52702_v1, %s48960_s28 }
 0x485   : > { %v24373_v55 = vpop.f32.mrb[50].mxu1  ;;  %45079 = vrot.lane.b32.xlu1 %v52616_v13, %s55292_s14 }
 0x486   : > { %47774 = vmatmul.mubr.f32.vlgmr.msra.gmra.mrb[156].mxu1 %v52846_v53  ;;  %v24374_v58 = vadd.f32 %v24373_v55, %v24300_v10  ;;  %v47510_v7 = vpop.f32.mrb[51].mxu1  ;;  %v33516_v45 = vsub.f32 %v52933_v22, %v54869_v44  ;;  %v55281_v44 = vld [vmem:[#allocation52_spill] sm:$0xff] }
 0x487   : > { %47777 = vmatpush3.msra.mxu1 %v52836_v42  ;;  %47778 = vmatprep.mubr.msk.f32.mxu1 %vm48938_vm3, %v54942_v52  ;;  %v33041_v7 = vsub.f32 %v52926_v32, %v52940_v48  ;;  %v33899_v30 = vsel %vm222_vm0, %v55281_v44, 0 }
 0x488   : > { %20022 = vmatmul.mubr.f32.vlgmr.msra.gmra.mrb[0].mxu0 %v51579_v41  ;;  %47781 = vmatprep.subr.mxu1 %v54942_v52 }
 0x489   : > { %20033 = vmatpush1.msra.mxu0 %v52859_v40  ;;  %v24447_v56 = vpop.f32.mrb[52].mxu1  ;;  %20096 = vmatprep.mubr.f32.mxu0 %v54942_v52 }
 0x48a   : > { %20106 = vmatprep.subr.mxu0 %v52809_v63  ;;  %47779 = vmatmul.mubr.f32.vlgmr.msra.gmra.mrb[158].mxu1 %v52864_v23  ;;  %v24448_v15 = vadd.f32 %v24447_v56, %v24374_v58  ;;  %v47515_v10 = vpop.f32.mrb[53].mxu1  ;;  %v55276_v58 = vld [vmem:[#allocation51_spill] sm:$0xff] }
 0x48b   : > { %47782 = vmatpush3.msra.mxu1 %v55275_v2  ;;  %47783 = vmatprep.mubr.msk.f32.mxu1 %vm48938_vm3, %v54942_v52  ;;  %v20794_v56 = vsel %vm20792_vm6, %v55276_v58, %v55144_v43  ;;  %v33894_v2 = vpop.permute.xlu1 %33893 }
 0x48c   : > { %47786 = vmatprep.subr.mxu1 %v54942_v52  ;;  %45085 = vrot.lane.b32.xlu1 %v49368_v31, %s48961_s13 }
 0x48d   : > { %v24519_v55 = vpop.f32.mrb[54].mxu1  ;;  %45083 = vrot.lane.b32.xlu0 %v52678_v25, %s48961_s13 }
 0x48e   : > { %v24520_v53 = vadd.f32 %v24519_v55, %v24448_v15  ;;  %47784 = vmatmul.mubr.f32.vlgmr.msra.gmra.mrb[160].mxu1 %v52829_v29  ;;  %v47520_v23 = vpop.f32.mrb[55].mxu1  ;;  %v55278_v15 = vand.u32 4294901760, %v52826_v20  ;;  %v33898_v55 = vsel %vm55279_vm8, %v51817_v6, %v33894_v2  ;;  %vm42281_vm8 = vcmask 990208  }
 0x48f   : > { %47787 = vmatpush3.msra.mxu1 %v52836_v42  ;;  %47788 = vmatprep.mubr.msk.f32.mxu1 %vm48938_vm3, %v54942_v52  ;;  %v52969_v23 = vand.u32 4294901760, %v33041_v7  ;;  %v33905_v2 = vsel %vm225_vm2, %v33898_v55, 0 }
 0x490   : > { %v52963_v10 = vadd.f32 %v24520_v53, %v52888_v9  ;;  %20099 = vmatmul.mubr.f32.vlgmr.msra.gmra.mrb[0].mxu0 %v51596_v47  ;;  %47791 = vmatprep.subr.mxu1 %v54942_v52  ;;  %v20800_v53 = vsel %vm225_vm2, %v20794_v56, 0  ;;  %v33517_v47 = vand.u32 4294901760, %v33516_v45  ;;  %v55280_v56 = vld [vmem:[#allocation55_spill] sm:$0xff]  ;;  %v55282_v45 = vld [vmem:[#allocation45_spill] sm:$0xff] }
 0x491   : > { %20108 = vmatpush1.msra.mxu0 %v52841_v33  ;;  %20171 = vmatprep.mubr.f32.mxu0 %v54942_v52  ;;  %v25085_v42 = vpop.f32.mrb[56].mxu1  ;;  %55277 = vst [vmem:[#allocation51_spill] sm:$0xff] %v52969_v23  ;;  %v52981_v20 = vand.u32 4294901760, %v20800_v53 }
 0x492   : > { %20184 = vmatprep.subr.mxu0 %v55278_v15  ;;  %47789 = vmatmul.mubr.f32.vlgmr.msra.gmra.mrb[162].mxu1 %v52829_v29  ;;  %v47525_v43 = vpop.f32.mrb[57].mxu1 }
 0x493   : > { %47792 = vmatpush3.msra.mxu1 %v52922_v11  ;;  %47793 = vmatprep.mubr.msk.f32.mxu1 %vm48938_vm3, %v54942_v52  ;;  %v20793_v43 = vsel %vm20792_vm6, %v55280_v56, %v55276_v58  ;;  %v52998_v58 = vsub.f32 %v20800_v53, %v52981_v20  ;;  %vm55290_vm6 = vcmask 130048  }
 0x494   : > { %47796 = vmatprep.subr.mxu1 %v54942_v52  ;;  %v20798_v44 = vsel %vm225_vm2, %v20793_v43, 0  ;;  %45087 = vrot.lane.b32.xlu1 %v52702_v1, %s48961_s13 }
 0x495   : > { %v25161_v9 = vpop.f32.mrb[58].mxu1  ;;  %v53011_v53 = vand.u32 4294901760, %v20798_v44  ;;  %45081 = vrot.lane.b32.xlu0 %v49023_v4, %s48961_s13 }
 0x496   : > { %47794 = vmatmul.mubr.f32.vlgmr.msra.gmra.mrb[164].mxu1 %v52969_v23  ;;  %v25162_v7 = vadd.f32 %v25161_v9, %v25085_v42  ;;  %v47530_v15 = vpop.f32.mrb[59].mxu1  ;;  %v55283_v42 = vand.u32 4294901760, %v52859_v40  ;;  %v53008_v40 = vand.u32 4294901760, %v33905_v2 }
 0x497   : > { %47797 = vmatpush3.msra.mxu1 %v33517_v47  ;;  %47798 = vmatprep.mubr.msk.f32.mxu1 %vm48938_vm3, %v54942_v52  ;;  %v53001_v47 = vand.u32 4294901760, %v33899_v30 }
 0x498   : > { %20175 = vmatmul.mubr.f32.vlgmr.msra.gmra.mrb[0].mxu0 %v55282_v45  ;;  %47801 = vmatprep.subr.mxu1 %v54942_v52  ;;  %v54870_v45 = vand.u32 4294901760, %v52998_v58 }
 0x499   : > { %20188 = vmatpush1.msra.mxu0 %v55283_v42  ;;  %20251 = vmatprep.mubr.f32.mxu0 %v54942_v52  ;;  %v25235_v9 = vpop.f32.mrb[60].mxu1  ;;  %55284 = vst [vmem:[#allocation55_spill] sm:$0xff] %v53001_v47  ;;  %v53014_v43 = vsub.f32 %v33899_v30, %v53001_v47  ;;  %v53022_v42 = vsub.f32 %v33905_v2, %v53008_v40 }
 0x49a   : > { %20260 = vmatprep.subr.mxu0 %v52809_v63  ;;  %47799 = vmatmul.mubr.f32.vlgmr.msra.gmra.mrb[166].mxu1 %v52915_v37  ;;  %v25236_v15 = vadd.f32 %v25235_v9, %v25162_v7  ;;  %v47535_v56 = vpop.f32.mrb[61].mxu1  ;;  %v53027_v30 = vsub.f32 %v20798_v44, %v53011_v53 }
 0x49b   : > { %47802 = vmatpush3.msra.mxu1 %v52933_v22  ;;  %47803 = vmatprep.mubr.msk.f32.mxu1 %vm48938_vm3, %v54942_v52  ;;  %55285 = vst [vmem:[#allocation52_spill] sm:$0xff] %v53014_v43  ;;  %v54872_v44 = vand.u32 4294901760, %v53022_v42 }
 0x49c   : > { %47806 = vmatprep.subr.mxu1 %v54942_v52 }
 0x49d   : > { %v25309_v55 = vpop.f32.mrb[62].mxu1 }
 0x49e   : > { %47804 = vmatmul.mubr.f32.vlgmr.msra.gmra.mrb[168].mxu1 %v52926_v32  ;;  %v25310_v63 = vadd.f32 %v25309_v55, %v25236_v15  ;;  %v47540_v7 = vpop.f32.mrb[63].mxu1  ;;  %v53032_v15 = vand.u32 4294901760, %v53014_v43  ;;  %v20885_v55 = vsub.f32 %v52998_v58, %v54870_v45  ;;  %v55293_v32 = vld [vmem:[#allocation25_spill] sm:$0xff] }
 0x49f   : > { %47807 = vmatpush3.msra.mxu1 %v52922_v11  ;;  %47808 = vmatprep.mubr.msk.f32.mxu1 %vm48938_vm3, %v54942_v52  ;;  %v53045_v7 = vpop.permute.xlu0 %39501 }
 0x4a0   : > { %20253 = vmatmul.mubr.f32.vlgmr.msra.gmra.mrb[0].mxu0 %v51579_v41  ;;  %47811 = vmatprep.subr.mxu1 %v54942_v52  ;;  %55286 = vst [vmem:[#allocation45_spill] sm:$0xff] %v53032_v15 }
 0x4a1   : > { %20262 = vmatpush1.msra.mxu0 %v52841_v33  ;;  %v25383_v9 = vpop.f32.mrb[64].mxu1  ;;  %20325 = vmatprep.mubr.f32.mxu0 %v54942_v52  ;;  %v55287_v33 = vand.u32 4294901760, %v52933_v22  ;;  %v33977_v22 = vsub.f32 %v53014_v43, %v53032_v15 }
 0x4a2   : > { %47809 = vmatmul.mubr.f32.vlgmr.msra.gmra.mrb[170].mxu1 %v52940_v48  ;;  %v25384_v56 = vadd.f32 %v25383_v9, %v25310_v63  ;;  %v47545_v2 = vpop.f32.mrb[65].mxu1  ;;  %20805 = vmatprep.subr.mxu0 %v52981_v20  ;;  %v34452_v63 = vsub.f32 %v53022_v42, %v54872_v44  ;;  %v53082_v44 = vpop.permute.xlu1 %40425 }
 0x4a3   : > { %47812 = vmatpush3.msra.mxu1 %v55287_v33  ;;  %47813 = vmatprep.mubr.msk.f32.mxu1 %vm48938_vm3, %v54942_v52  ;;  %v20886_v33 = vand.u32 4294901760, %v20885_v55  ;;  %v53071_v55 = vand.u32 4294901760, %v33977_v22 }
 0x4a4   : > { %47816 = vmatprep.subr.mxu1 %v54942_v52 }
 0x4a5   : > { %v25455_v9 = vpop.f32.mrb[66].mxu1  ;;  %55289 = vst [vmem:[#allocation126_spill] sm:$0xff] %v53071_v55 }
 0x4a6   : > { %v25456_v2 = vadd.f32 %v25455_v9, %v25384_v56  ;;  %47814 = vmatmul.mubr.f32.vlgmr.msra.gmra.mrb[172].mxu1 %v52915_v37  ;;  %v47550_v45 = vpop.f32.mrb[67].mxu1  ;;  %v34830_v9 = vpop.permute.xlu0 %34829 }
 0x4a7   : > { %47817 = vmatpush3.msra.mxu1 %v52922_v11  ;;  %47818 = vmatprep.mubr.msk.f32.mxu1 %vm48938_vm3, %v54942_v52  ;;  %v55288_v11 = vand.u32 4294901760, %v53027_v30  ;;  %v34834_v22 = vsel %vm55290_vm6, %v52022_v8, %v34830_v9  ;;  %vm55302_vm6 = vmmov %vm55297_vm4 }
 0x4a8   : > { %20327 = vmatmul.mubr.f32.vlgmr.msra.gmra.mrb[0].mxu0 %v51579_v41  ;;  %47821 = vmatprep.subr.mxu1 %v54942_v52  ;;  %v53064_v48 = vadd.f32 %v25456_v2, %v52963_v10  ;;  %v34453_v10 = vand.u32 4294901760, %v34452_v63  ;;  %v34835_v63 = vsel %vm222_vm0, %v51994_v26, 0  ;;  %v34841_v9 = vsel %vm225_vm2, %v34834_v22, 0 }
 0x4a9   : > { %20807 = vmatpush1.msra.mxu0 %v53011_v53  ;;  %20870 = vmatprep.mubr.f32.mxu0 %v54942_v52  ;;  %v20891_v45 = vsub.f32 %v53027_v30, %v55288_v11  ;;  %v26021_v56 = vpop.f32.mrb[68].mxu1 }
 0x4aa   : > { %47819 = vmatmul.mubr.f32.vlgmr.msra.gmra.mrb[174].mxu1 %v52915_v37  ;;  %20887 = vmatprep.subr.mxu0 %v20886_v33  ;;  %v47555_v41 = vpop.f32.mrb[69].mxu1 }
 0x4ab   : > { %47822 = vmatpush3.msra.mxu1 %v53008_v40  ;;  %47823 = vmatprep.mubr.msk.f32.mxu1 %vm48938_vm3, %v54942_v52  ;;  %v20892_v2 = vand.u32 4294901760, %v20891_v45  ;;  %v55291_v45 = vld [vmem:[#allocation105_spill] sm:$0xff] }
 0x4ac   : > { %47826 = vmatprep.subr.mxu1 %v54942_v52 }
 0x4ad   : > { %v26097_v11 = vpop.f32.mrb[70].mxu1 }
 0x4ae   : > { %47824 = vmatmul.mubr.f32.vlgmr.msra.gmra.mrb[176].mxu1 %v53071_v55  ;;  %v26098_v33 = vadd.f32 %v26097_v11, %v26021_v56  ;;  %v47560_v41 = vpop.f32.mrb[71].mxu1  ;;  %v53095_v55 = vand.u32 4294901760, %v34835_v63  ;;  %v53104_v11 = vpop.permute.xlu1 %36701 }
 0x4af   : > { %47827 = vmatpush3.msra.mxu1 %v34453_v10  ;;  %47828 = vmatprep.mubr.msk.f32.mxu1 %vm48938_vm3, %v54942_v52  ;;  %v53102_v10 = vand.u32 4294901760, %v34841_v9 }
 0x4b0   : > { %20876 = vmatmul.mubr.f32.vlgmr.msra.gmra.mrb[0].mxu0 %v55291_v45  ;;  %47831 = vmatprep.subr.mxu1 %v54942_v52 }
 0x4b1   : > { %20893 = vmatpush1.msra.mxu0 %v20892_v2  ;;  %20956 = vmatprep.mubr.f32.mxu0 %v54942_v52  ;;  %v26171_v8 = vpop.f32.mrb[72].mxu1  ;;  %v35766_v2 = vpop.permute.xlu0 %35765  ;;  %v53119_v45 = vsub.f32 %v34841_v9, %v53102_v10 }
 0x4b2   : > { %20966 = vmatprep.subr.mxu0 %v52998_v58  ;;  %47829 = vmatmul.mubr.f32.vlgmr.msra.gmra.mrb[178].mxu1 %v53001_v47  ;;  %v26172_v26 = vadd.f32 %v26171_v8, %v26098_v33  ;;  %v47565_v56 = vpop.f32.mrb[73].mxu1  ;;  %v53112_v8 = vsub.f32 %v34835_v63, %v53095_v55 }
 0x4b3   : > { %47832 = vmatpush3.msra.mxu1 %v53022_v42  ;;  %47833 = vmatprep.mubr.msk.f32.mxu1 %vm48938_vm3, %v54942_v52  ;;  %v53121_v56 = vpop.permute.xlu1 %37637 }
 0x4b4   : > { %47836 = vmatprep.subr.mxu1 %v54942_v52 }
 0x4b5   : > { %v26245_v22 = vpop.f32.mrb[74].mxu1  ;;  %v53125_v13 = vpop.permute.xlu0 %41348 }
 0x4b6   : > { %47834 = vmatmul.mubr.f32.vlgmr.msra.gmra.mrb[180].mxu1 %v53014_v43  ;;  %v47570_v33 = vpop.f32.mrb[75].mxu1  ;;  %v26246_v41 = vadd.f32 %v26245_v22, %v26172_v26  ;;  %v53130_v26 = vand.u32 4294901760, %v53112_v8  ;;  %v55294_v43 = vand.u32 4294901760, %v53022_v42  ;;  %v55295_v42 = vld [vmem:[#allocation54_spill] sm:$0xff] }
 0x4b7   : > { %47837 = vmatpush3.msra.mxu1 %v53008_v40  ;;  %47838 = vmatprep.mubr.msk.f32.mxu1 %vm48938_vm3, %v54942_v52  ;;  %v54885_v33 = vand.u32 4294901760, %v53119_v45  ;;  %v53139_v6 = vpop.permute.xlu1 %42271 }
 0x4b8   : > { %20958 = vmatmul.mubr.f32.vlgmr.msra.gmra.mrb[0].mxu0 %v55293_v32  ;;  %47841 = vmatprep.subr.mxu1 %v54942_v52  ;;  %v34913_v23 = vsub.f32 %v53112_v8, %v53130_v26 }
 0x4b9   : > { %20969 = vmatpush1.msra.mxu0 %v53027_v30  ;;  %v26319_v63 = vpop.f32.mrb[76].mxu1  ;;  %21032 = vmatprep.mubr.f32.mxu0 %v54942_v52 }
 0x4ba   : > { %21042 = vmatprep.subr.mxu0 %v52981_v20  ;;  %47839 = vmatmul.mubr.f32.vlgmr.msra.gmra.mrb[182].mxu1 %v53032_v15  ;;  %v26320_v9 = vadd.f32 %v26319_v63, %v26246_v41  ;;  %v47575_v22 = vpop.f32.mrb[77].mxu1  ;;  %v53145_v63 = vpop.permute.xlu0 %38573  ;;  %v53165_v0 = vand.u32 4294901760, %v34913_v23 }
 0x4bb   : > { %47842 = vmatpush3.msra.mxu1 %v55294_v43  ;;  %47843 = vmatprep.mubr.msk.f32.mxu1 %vm48938_vm3, %v54942_v52  ;;  %v35388_v43 = vsub.f32 %v53119_v45, %v54885_v33  ;;  %v55296_v22 = vld [vmem:[#allocation59_spill] sm:$0xff]  ;;  %v55299_v33 = vand.u32 4294901760, %v52998_v58 }
 0x4bc   : > { %47846 = vmatprep.subr.mxu1 %v54942_v52  ;;  %v21730_v15 = vsel %vm55297_vm4, %v55296_v22, %v55295_v42  ;;  %vm55308_vm4 = vcmask 482304  }
 0x4bd   : > { %v26391_v37 = vpop.f32.mrb[78].mxu1  ;;  %v21736_v42 = vsel %vm225_vm2, %v21730_v15, 0 }
 0x4be   : > { %v26392_v29 = vadd.f32 %v26391_v37, %v26320_v9  ;;  %47844 = vmatmul.mubr.f32.vlgmr.msra.gmra.mrb[184].mxu1 %v53001_v47  ;;  %v47580_v41 = vpop.f32.mrb[79].mxu1  ;;  %v55298_v9 = vld [vmem:[#allocation48_spill] sm:$0xff] }
 0x4bf   : > { %47847 = vmatpush3.msra.mxu1 %v53008_v40  ;;  %47848 = vmatprep.mubr.msk.f32.mxu1 %vm48938_vm3, %v54942_v52  ;;  %v53163_v41 = vpop.permute.xlu1 %42277 }
 0x4c0   : > { %v53157_v37 = vadd.f32 %v26392_v29, %v53064_v48  ;;  %21035 = vmatmul.mubr.f32.vlgmr.msra.gmra.mrb[0].mxu0 %v55298_v9  ;;  %47851 = vmatprep.subr.mxu1 %v54942_v52  ;;  %v42276_v48 = vpop.permute.xlu0 %42275  ;;  %v35389_v9 = vand.u32 4294901760, %v35388_v43  ;;  %v21729_v43 = vsel %vm55302_vm6, %v55301_v59, %v55296_v22  ;;  %vm43217_vm6 = vcmask 982016  }
 0x4c1   : > { %21044 = vmatpush1.msra.mxu0 %v53011_v53  ;;  %21107 = vmatprep.mubr.f32.mxu0 %v54942_v52  ;;  %v26957_v40 = vpop.f32.mrb[80].mxu1  ;;  %v53176_v23 = vsel %vm42281_vm8, %v42276_v48, %v53163_v41  ;;  %v21734_v22 = vsel %vm225_vm2, %v21729_v43, 0 }
 0x4c2   : > { %21120 = vmatprep.subr.mxu0 %v55299_v33  ;;  %47849 = vmatmul.mubr.f32.vlgmr.msra.gmra.mrb[186].mxu1 %v53001_v47  ;;  %v47585_v29 = vpop.f32.mrb[81].mxu1  ;;  %55300 = vst [vmem:[#allocation105_spill] sm:$0xff] %v53176_v23  ;;  %v35770_v33 = vsel %vm35767_vm7, %v52209_v18, %v35766_v2  ;;  %v35771_v23 = vsel %vm222_vm0, %v52183_v38, 0  ;;  %v55304_v18 = vld [vmem:[#allocation104_spill] sm:$0xff] }
 0x4c3   : > { %47852 = vmatpush3.msra.mxu1 %v53102_v10  ;;  %47853 = vmatprep.mubr.msk.f32.mxu1 %vm48938_vm3, %v54942_v52  ;;  %v53181_v29 = vand.u32 4294901760, %v21736_v42 }
 0x4c4   : > { %47856 = vmatprep.subr.mxu1 %v54942_v52  ;;  %v42274_v61 = vpop.permute.xlu0 %42273 }
 0x4c5   : > { %v27033_v58 = vpop.f32.mrb[82].mxu1  ;;  %v53192_v2 = vsel %vm42281_vm8, %v42274_v61, %v42276_v48  ;;  %v53201_v38 = vsub.f32 %v21736_v42, %v53181_v29  ;;  %v53214_v48 = vand.u32 4294901760, %v21734_v22 }
 0x4c6   : > { %47854 = vmatmul.mubr.f32.vlgmr.msra.gmra.mrb[188].mxu1 %v53165_v0  ;;  %v27034_v15 = vadd.f32 %v27033_v58, %v26957_v40  ;;  %v47590_v47 = vpop.f32.mrb[83].mxu1  ;;  %55303 = vst [vmem:[#allocation25_spill] sm:$0xff] %v53192_v2  ;;  %v55305_v40 = vand.u32 4294901760, %v53027_v30 }
 0x4c7   : > { %47857 = vmatpush3.msra.mxu1 %v35389_v9  ;;  %47858 = vmatprep.mubr.msk.f32.mxu1 %vm48938_vm3, %v54942_v52  ;;  %v35777_v47 = vsel %vm225_vm2, %v35770_v33, 0  ;;  %v53204_v9 = vand.u32 4294901760, %v35771_v23 }
 0x4c8   : > { %21111 = vmatmul.mubr.f32.vlgmr.msra.gmra.mrb[0].mxu0 %v55304_v18  ;;  %47861 = vmatprep.subr.mxu1 %v54942_v52  ;;  %v53211_v30 = vand.u32 4294901760, %v35777_v47 }
 0x4c9   : > { %21124 = vmatpush1.msra.mxu0 %v55305_v40  ;;  %21187 = vmatprep.mubr.f32.mxu0 %v54942_v52  ;;  %v27107_v59 = vpop.f32.mrb[84].mxu1  ;;  %v53217_v58 = vsub.f32 %v35771_v23, %v53204_v9  ;;  %v53230_v23 = vsub.f32 %v21734_v22, %v53214_v48 }
 0x4ca   : > { %21196 = vmatprep.subr.mxu0 %v52981_v20  ;;  %47859 = vmatmul.mubr.f32.vlgmr.msra.gmra.mrb[190].mxu1 %v53095_v55  ;;  %v27108_v18 = vadd.f32 %v27107_v59, %v27034_v15  ;;  %v47595_v61 = vpop.f32.mrb[85].mxu1  ;;  %v21820_v15 = vand.u32 4294901760, %v53201_v38  ;;  %v53225_v43 = vsub.f32 %v35777_v47, %v53211_v30 }
 0x4cb   : > { %47862 = vmatpush3.msra.mxu1 %v53119_v45  ;;  %47863 = vmatprep.mubr.msk.f32.mxu1 %vm48938_vm3, %v54942_v52  ;;  %v53235_v59 = vand.u32 4294901760, %v53217_v58 }
 0x4cc   : > { %47866 = vmatprep.subr.mxu1 %v54942_v52  ;;  %v21821_v61 = vsub.f32 %v53201_v38, %v21820_v15  ;;  %v36323_v22 = vand.u32 4294901760, %v53225_v43 }
 0x4cd   : > { %v27181_v42 = vpop.f32.mrb[86].mxu1 }
 0x4ce   : > { %47864 = vmatmul.mubr.f32.vlgmr.msra.gmra.mrb[192].mxu1 %v53112_v8  ;;  %v27182_v20 = vadd.f32 %v27181_v42, %v27108_v18  ;;  %v47600_v33 = vpop.f32.mrb[87].mxu1  ;;  %v54893_v42 = vand.u32 4294901760, %v53230_v23  ;;  %v36324_v31 = vsub.f32 %v53225_v43, %v36323_v22 }
 0x4cf   : > { %47867 = vmatpush3.msra.mxu1 %v53102_v10  ;;  %47868 = vmatprep.mubr.msk.f32.mxu1 %vm48938_vm3, %v54942_v52  ;;  %v35849_v33 = vsub.f32 %v53217_v58, %v53235_v59 }
 0x4d0   : > { %21189 = vmatmul.mubr.f32.vlgmr.msra.gmra.mrb[0].mxu0 %v55293_v32  ;;  %47871 = vmatprep.subr.mxu1 %v54942_v52  ;;  %v21827_v25 = vsub.f32 %v53230_v23, %v54893_v42 }
 0x4d1   : > { %21198 = vmatpush1.msra.mxu0 %v53011_v53  ;;  %v27255_v40 = vpop.f32.mrb[88].mxu1  ;;  %21261 = vmatprep.mubr.f32.mxu0 %v54942_v52  ;;  %v55306_v53 = vand.u32 4294901760, %v53119_v45 }
 0x4d2   : > { %47869 = vmatmul.mubr.f32.vlgmr.msra.gmra.mrb[194].mxu1 %v53130_v26  ;;  %v27256_v18 = vadd.f32 %v27255_v40, %v27182_v20  ;;  %v47605_v47 = vpop.f32.mrb[89].mxu1  ;;  %21741 = vmatprep.subr.mxu0 %v53181_v29  ;;  %v21822_v40 = vand.u32 4294901760, %v21821_v61  ;;  %v21828_v61 = vand.u32 4294901760, %v21827_v25 }
 0x4d3   : > { %47872 = vmatpush3.msra.mxu1 %v55306_v53  ;;  %47873 = vmatprep.mubr.msk.f32.mxu1 %vm48938_vm3, %v54942_v52 }
 0x4d4   : > { %47876 = vmatprep.subr.mxu1 %v54942_v52 }
 0x4d5   : > { %v27327_v20 = vpop.f32.mrb[90].mxu1 }
 0x4d6   : > { %v27328_v45 = vadd.f32 %v27327_v20, %v27256_v18  ;;  %47874 = vmatmul.mubr.f32.vlgmr.msra.gmra.mrb[196].mxu1 %v53095_v55  ;;  %v47610_v47 = vpop.f32.mrb[91].mxu1  ;;  %v53272_v18 = vand.u32 4294901760, %v35849_v33  ;;  %v36706_v33 = vsel %vm36703_vm9, %v52390_v62, %v53104_v11 }
 0x4d7   : > { %47877 = vmatpush3.msra.mxu1 %v53102_v10  ;;  %47878 = vmatprep.mubr.msk.f32.mxu1 %vm48938_vm3, %v54942_v52  ;;  %v36707_v47 = vsel %vm222_vm0, %v52364_v35, 0  ;;  %v36713_v1 = vsel %vm225_vm2, %v36706_v33, 0 }
 0x4d8   : > { %v53263_v53 = vadd.f32 %v27328_v45, %v53157_v37  ;;  %21263 = vmatmul.mubr.f32.vlgmr.msra.gmra.mrb[0].mxu0 %v55293_v32  ;;  %47881 = vmatprep.subr.mxu1 %v54942_v52  ;;  %v36325_v32 = vand.u32 4294901760, %v36324_v31  ;;  %v53295_v11 = vand.u32 4294901760, %v36707_v47 }
 0x4d9   : > { %21743 = vmatpush1.msra.mxu0 %v53214_v48  ;;  %21806 = vmatprep.mubr.f32.mxu0 %v54942_v52  ;;  %v27893_v10 = vpop.f32.mrb[92].mxu1 }
 0x4da   : > { %47879 = vmatmul.mubr.f32.vlgmr.msra.gmra.mrb[198].mxu1 %v53095_v55  ;;  %21823 = vmatprep.subr.mxu0 %v21822_v40  ;;  %v47615_v37 = vpop.f32.mrb[93].mxu1 }
 0x4db   : > { %47882 = vmatpush3.msra.mxu1 %v53211_v30  ;;  %47883 = vmatprep.mubr.msk.f32.mxu1 %vm48938_vm3, %v54942_v52 }
 0x4dc   : > { %47886 = vmatprep.subr.mxu1 %v54942_v52 }
 0x4dd   : > { %v27969_v20 = vpop.f32.mrb[94].mxu1 }
 0x4de   : > { %47884 = vmatmul.mubr.f32.vlgmr.msra.gmra.mrb[200].mxu1 %v53272_v18  ;;  %v27970_v45 = vadd.f32 %v27969_v20, %v27893_v10  ;;  %v47620_v40 = vpop.f32.mrb[95].mxu1  ;;  %v53306_v10 = vsub.f32 %v36707_v47, %v53295_v11  ;;  %v53315_v20 = vpop.permute.xlu1 %39504 }
 0x4df   : > { %47887 = vmatpush3.msra.mxu1 %v36325_v32  ;;  %47888 = vmatprep.mubr.msk.f32.mxu1 %vm48938_vm3, %v54942_v52 }
 0x4e0   : > { %21812 = vmatmul.mubr.f32.vlgmr.msra.gmra.mrb[0].mxu0 %v51845_v16  ;;  %47891 = vmatprep.subr.mxu1 %v54942_v52  ;;  %v53302_v16 = vand.u32 4294901760, %v36713_v1 }
 0x4e1   : > { %21829 = vmatpush1.msra.mxu0 %v21828_v61  ;;  %21892 = vmatprep.mubr.f32.mxu0 %v54942_v52  ;;  %v28043_v4 = vpop.f32.mrb[96].mxu1 }
 0x4e2   : > { %21902 = vmatprep.subr.mxu0 %v53201_v38  ;;  %47889 = vmatmul.mubr.f32.vlgmr.msra.gmra.mrb[202].mxu1 %v53204_v9  ;;  %v28044_v35 = vadd.f32 %v28043_v4, %v27970_v45  ;;  %v47625_v31 = vpop.f32.mrb[97].mxu1  ;;  %v53313_v61 = vsub.f32 %v36713_v1, %v53302_v16  ;;  %v53322_v45 = vand.u32 4294901760, %v53306_v10  ;;  %v53331_v4 = vpop.permute.xlu1 %43207 }
 0x4e3   : > { %47892 = vmatpush3.msra.mxu1 %v53225_v43  ;;  %47893 = vmatprep.mubr.msk.f32.mxu1 %vm48938_vm3, %v54942_v52 }
 0x4e4   : > { %47896 = vmatprep.subr.mxu1 %v54942_v52  ;;  %v54892_v1 = vand.u32 4294901760, %v53313_v61  ;;  %v36785_v31 = vsub.f32 %v53306_v10, %v53322_v45 }
 0x4e5   : > { %v28117_v25 = vpop.f32.mrb[98].mxu1 }
 0x4e6   : > { %47894 = vmatmul.mubr.f32.vlgmr.msra.gmra.mrb[204].mxu1 %v53217_v58  ;;  %v28118_v37 = vadd.f32 %v28117_v25, %v28044_v35  ;;  %v47630_v32 = vpop.f32.mrb[99].mxu1  ;;  %v37260_v43 = vsub.f32 %v53313_v61, %v54892_v1 }
 0x4e7   : > { %47897 = vmatpush3.msra.mxu1 %v53211_v30  ;;  %47898 = vmatprep.mubr.msk.f32.mxu1 %vm48938_vm3, %v54942_v52  ;;  %v53337_v32 = vpop.permute.xlu0 %40427 }
 0x4e8   : > { %21894 = vmatmul.mubr.f32.vlgmr.msra.gmra.mrb[0].mxu0 %v51772_v21  ;;  %47901 = vmatprep.subr.mxu1 %v54942_v52 }
 0x4e9   : > { %21905 = vmatpush1.msra.mxu0 %v53230_v23  ;;  %v28191_v33 = vpop.f32.mrb[100].mxu1  ;;  %21968 = vmatprep.mubr.f32.mxu0 %v54942_v52 }
 0x4ea   : > { %21978 = vmatprep.subr.mxu0 %v53181_v29  ;;  %47899 = vmatmul.mubr.f32.vlgmr.msra.gmra.mrb[206].mxu1 %v53235_v59  ;;  %v28192_v40 = vadd.f32 %v28191_v33, %v28118_v37  ;;  %v47635_v47 = vpop.f32.mrb[101].mxu1 }
 0x4eb   : > { %47902 = vmatpush3.msra.mxu1 %v36323_v22  ;;  %47903 = vmatprep.mubr.msk.f32.mxu1 %vm48938_vm3, %v54942_v52  ;;  %v55307_v22 = vld [vmem:[#allocation63_spill] sm:$0xff]  ;;  %v53355_v47 = vpop.permute.xlu1 %43213 }
 0x4ec   : > { %47906 = vmatprep.subr.mxu1 %v54942_v52  ;;  %v22666_v33 = vsel %vm55308_vm4, %v55307_v22, %v55164_v5 }
 0x4ed   : > { %v28263_v35 = vpop.f32.mrb[102].mxu1 }
 0x4ee   : > { %v28264_v25 = vadd.f32 %v28263_v35, %v28192_v40  ;;  %47904 = vmatmul.mubr.f32.vlgmr.msra.gmra.mrb[208].mxu1 %v53204_v9  ;;  %v47640_v37 = vpop.f32.mrb[103].mxu1  ;;  %v53357_v35 = vand.u32 4294901760, %v36785_v31 }
 0x4ef   : > { %47907 = vmatpush3.msra.mxu1 %v53211_v30  ;;  %47908 = vmatprep.mubr.msk.f32.mxu1 %vm48938_vm3, %v54942_v52 }
 0x4f0   : > { %v53349_v40 = vadd.f32 %v28264_v25, %v53263_v53  ;;  %21971 = vmatmul.mubr.f32.vlgmr.msra.gmra.mrb[0].mxu0 %v51794_v12  ;;  %47911 = vmatprep.subr.mxu1 %v54942_v52  ;;  %v43212_v53 = vpop.permute.xlu0 %43211  ;;  %v22672_v12 = vsel %vm225_vm2, %v22666_v33, 0  ;;  %v37261_v25 = vand.u32 4294901760, %v37260_v43  ;;  %v55310_v43 = vld [vmem:[#allocation64_spill] sm:$0xff] }
 0x4f1   : > { %21980 = vmatpush1.msra.mxu0 %v53214_v48  ;;  %22043 = vmatprep.mubr.f32.mxu0 %v54942_v52  ;;  %v28829_v30 = vpop.f32.mrb[104].mxu1  ;;  %v53368_v31 = vsel %vm43217_vm6, %v43212_v53, %v53355_v47  ;;  %v53374_v37 = vand.u32 4294901760, %v22672_v12  ;;  %v22665_v42 = vsel %vm55308_vm4, %v55310_v43, %v55307_v22  ;;  %vm55318_vm4 = vcmask 474112  }
 0x4f2   : > { %22056 = vmatprep.subr.mxu0 %v21820_v15  ;;  %47909 = vmatmul.mubr.f32.vlgmr.msra.gmra.mrb[210].mxu1 %v53204_v9  ;;  %v47645_v5 = vpop.f32.mrb[105].mxu1  ;;  %55309 = vst [vmem:[#allocation54_spill] sm:$0xff] %v53368_v31  ;;  %v37642_v15 = vsel %vm54901_vm10, %v52572_v51, %v53121_v56  ;;  %v37643_v31 = vsel %vm222_vm0, %v52549_v19, 0  ;;  %vm55325_vm10 = vcmask 474112  }
 0x4f3   : > { %47912 = vmatpush3.msra.mxu1 %v53302_v16  ;;  %47913 = vmatprep.mubr.msk.f32.mxu1 %vm48938_vm3, %v54942_v52  ;;  %v53394_v19 = vsub.f32 %v22672_v12, %v53374_v37 }
 0x4f4   : > { %47916 = vmatprep.subr.mxu1 %v54942_v52  ;;  %v43210_v1 = vpop.permute.xlu0 %43209 }
 0x4f5   : > { %v28905_v38 = vpop.f32.mrb[106].mxu1  ;;  %v53385_v56 = vsel %vm43217_vm6, %v43210_v1, %v43212_v53 }
 0x4f6   : > { %47914 = vmatmul.mubr.f32.vlgmr.msra.gmra.mrb[212].mxu1 %v53357_v35  ;;  %v28906_v33 = vadd.f32 %v28905_v38, %v28829_v30  ;;  %v47650_v5 = vpop.f32.mrb[107].mxu1  ;;  %55311 = vst [vmem:[#allocation59_spill] sm:$0xff] %v53385_v56  ;;  %v37649_v30 = vsel %vm225_vm2, %v37642_v15, 0  ;;  %v55312_v38 = vand.u32 4294901760, %v53230_v23 }
 0x4f7   : > { %47917 = vmatpush3.msra.mxu1 %v37261_v25  ;;  %47918 = vmatprep.mubr.msk.f32.mxu1 %vm48938_vm3, %v54942_v52  ;;  %v22670_v25 = vsel %vm225_vm2, %v22665_v42, 0  ;;  %v53397_v5 = vand.u32 4294901760, %v37643_v31  ;;  %v53404_v23 = vand.u32 4294901760, %v37649_v30 }
 0x4f8   : > { %22047 = vmatmul.mubr.f32.vlgmr.msra.gmra.mrb[0].mxu0 %v51808_v50  ;;  %47921 = vmatprep.subr.mxu1 %v54942_v52  ;;  %v53407_v53 = vand.u32 4294901760, %v22670_v25 }
 0x4f9   : > { %22060 = vmatpush1.msra.mxu0 %v55312_v38  ;;  %22123 = vmatprep.mubr.f32.mxu0 %v54942_v52  ;;  %v28979_v22 = vpop.f32.mrb[108].mxu1  ;;  %55313 = vst [vmem:[#allocation48_spill] sm:$0xff] %v53397_v5  ;;  %v53410_v12 = vsub.f32 %v37643_v31, %v53397_v5  ;;  %v53418_v43 = vsub.f32 %v37649_v30, %v53404_v23 }
 0x4fa   : > { %22132 = vmatprep.subr.mxu0 %v53181_v29  ;;  %47919 = vmatmul.mubr.f32.vlgmr.msra.gmra.mrb[214].mxu1 %v53295_v11  ;;  %v28980_v50 = vadd.f32 %v28979_v22, %v28906_v33  ;;  %v47655_v1 = vpop.f32.mrb[109].mxu1  ;;  %v54894_v33 = vand.u32 4294901760, %v53394_v19  ;;  %v53423_v31 = vsub.f32 %v22670_v25, %v53407_v53 }
 0x4fb   : > { %47922 = vmatpush3.msra.mxu1 %v53313_v61  ;;  %47923 = vmatprep.mubr.msk.f32.mxu1 %vm48938_vm3, %v54942_v52  ;;  %55314 = vst [vmem:[#allocation61_spill] sm:$0xff] %v53410_v12  ;;  %v53428_v22 = vand.u32 4294901760, %v53410_v12  ;;  %v38195_v25 = vand.u32 4294901760, %v53418_v43 }
 0x4fc   : > { %47926 = vmatprep.subr.mxu1 %v54942_v52  ;;  %v22757_v1 = vsub.f32 %v53394_v19, %v54894_v33 }
 0x4fd   : > { %v29053_v42 = vpop.f32.mrb[110].mxu1  ;;  %55315 = vst [vmem:[#allocation104_spill] sm:$0xff] %v53428_v22 }
 0x4fe   : > { %47924 = vmatmul.mubr.f32.vlgmr.msra.gmra.mrb[216].mxu1 %v53306_v10  ;;  %v29054_v29 = vadd.f32 %v29053_v42, %v28980_v50  ;;  %v47660_v15 = vpop.f32.mrb[111].mxu1  ;;  %v54895_v42 = vand.u32 4294901760, %v53423_v31 }
 0x4ff   : > { %47927 = vmatpush3.msra.mxu1 %v53302_v16  ;;  %47928 = vmatprep.mubr.msk.f32.mxu1 %vm48938_vm3, %v54942_v52  ;;  %v37721_v15 = vsub.f32 %v53410_v12, %v53428_v22 }
 0x500   : > { %22125 = vmatmul.mubr.f32.vlgmr.msra.gmra.mrb[0].mxu0 %v51772_v21  ;;  %47931 = vmatprep.subr.mxu1 %v54942_v52 }
 0x501   : > { %22134 = vmatpush1.msra.mxu0 %v53214_v48  ;;  %v29127_v38 = vpop.f32.mrb[112].mxu1  ;;  %22197 = vmatprep.mubr.f32.mxu0 %v54942_v52  ;;  %v55316_v48 = vand.u32 4294901760, %v53313_v61  ;;  %v38196_v61 = vsub.f32 %v53418_v43, %v38195_v25 }
 0x502   : > { %47929 = vmatmul.mubr.f32.vlgmr.msra.gmra.mrb[218].mxu1 %v53322_v45  ;;  %v29128_v50 = vadd.f32 %v29127_v38, %v29054_v29  ;;  %v47665_v30 = vpop.f32.mrb[113].mxu1  ;;  %22677 = vmatprep.subr.mxu0 %v53374_v37 }
 0x503   : > { %47932 = vmatpush3.msra.mxu1 %v55316_v48  ;;  %47933 = vmatprep.mubr.msk.f32.mxu1 %vm48938_vm3, %v54942_v52  ;;  %v22758_v30 = vand.u32 4294901760, %v22757_v1 }
 0x504   : > { %47936 = vmatprep.subr.mxu1 %v54942_v52 }
 0x505   : > { %v29199_v29 = vpop.f32.mrb[114].mxu1 }
 0x506   : > { %v29200_v38 = vadd.f32 %v29199_v29, %v29128_v50  ;;  %47934 = vmatmul.mubr.f32.vlgmr.msra.gmra.mrb[220].mxu1 %v53295_v11  ;;  %v47670_v33 = vpop.f32.mrb[115].mxu1  ;;  %v53461_v50 = vand.u32 4294901760, %v37721_v15 }
 0x507   : > { %47937 = vmatpush3.msra.mxu1 %v53302_v16  ;;  %47938 = vmatprep.mubr.msk.f32.mxu1 %vm48938_vm3, %v54942_v52  ;;  %v22763_v16 = vsub.f32 %v53423_v31, %v54895_v42 }
 0x508   : > { %v53452_v48 = vadd.f32 %v29200_v38, %v53349_v40  ;;  %22199 = vmatmul.mubr.f32.vlgmr.msra.gmra.mrb[0].mxu0 %v51772_v21  ;;  %47941 = vmatprep.subr.mxu1 %v54942_v52  ;;  %v38197_v21 = vand.u32 4294901760, %v38196_v61  ;;  %v38578_v38 = vsel %vm54897_vm12, %v52768_v3, %v53145_v63  ;;  %vm55323_vm12 = vcmask 1014784  }
 0x509   : > { %22679 = vmatpush1.msra.mxu0 %v53407_v53  ;;  %22742 = vmatprep.mubr.f32.mxu0 %v54942_v52  ;;  %v29765_v33 = vpop.f32.mrb[116].mxu1  ;;  %v22764_v1 = vand.u32 4294901760, %v22763_v16  ;;  %v38585_v61 = vsel %vm225_vm2, %v38578_v38, 0  ;;  %v53500_v38 = vpop.permute.xlu1 %41350 }
 0x50a   : > { %47939 = vmatmul.mubr.f32.vlgmr.msra.gmra.mrb[222].mxu1 %v53295_v11  ;;  %22759 = vmatprep.subr.mxu0 %v22758_v30  ;;  %v47675_v40 = vpop.f32.mrb[117].mxu1  ;;  %v38579_v30 = vsel %vm222_vm0, %v52745_v39, 0 }
 0x50b   : > { %47942 = vmatpush3.msra.mxu1 %v53404_v23  ;;  %47943 = vmatprep.mubr.msk.f32.mxu1 %vm48938_vm3, %v54942_v52  ;;  %v53480_v16 = vand.u32 4294901760, %v38579_v30 }
 0x50c   : > { %47946 = vmatprep.subr.mxu1 %v54942_v52 }
 0x50d   : > { %v29841_v29 = vpop.f32.mrb[118].mxu1  ;;  %v53491_v40 = vsub.f32 %v38579_v30, %v53480_v16 }
 0x50e   : > { %47944 = vmatmul.mubr.f32.vlgmr.msra.gmra.mrb[224].mxu1 %v53461_v50  ;;  %v29842_v15 = vadd.f32 %v29841_v29, %v29765_v33  ;;  %v47680_v42 = vpop.f32.mrb[119].mxu1 }
 0x50f   : > { %47947 = vmatpush3.msra.mxu1 %v38197_v21  ;;  %47948 = vmatprep.mubr.msk.f32.mxu1 %vm48938_vm3, %v54942_v52  ;;  %v53507_v30 = vand.u32 4294901760, %v53491_v40 }
 0x510   : > { %22748 = vmatmul.mubr.f32.vlgmr.msra.gmra.mrb[0].mxu0 %v51959_v46  ;;  %47951 = vmatprep.subr.mxu1 %v54942_v52  ;;  %v53487_v46 = vand.u32 4294901760, %v38585_v61 }
 0x511   : > { %22765 = vmatpush1.msra.mxu0 %v22764_v1  ;;  %22828 = vmatprep.mubr.f32.mxu0 %v54942_v52  ;;  %v29915_v63 = vpop.f32.mrb[120].mxu1 }
 0x512   : > { %22838 = vmatprep.subr.mxu0 %v53394_v19  ;;  %47949 = vmatmul.mubr.f32.vlgmr.msra.gmra.mrb[226].mxu1 %v53397_v5  ;;  %v29916_v39 = vadd.f32 %v29915_v63, %v29842_v15  ;;  %v47685_v42 = vpop.f32.mrb[121].mxu1  ;;  %v53498_v29 = vsub.f32 %v38585_v61, %v53487_v46 }
 0x513   : > { %47952 = vmatpush3.msra.mxu1 %v53418_v43  ;;  %47953 = vmatprep.mubr.msk.f32.mxu1 %vm48938_vm3, %v54942_v52  ;;  %v53516_v42 = vpop.permute.xlu1 %44143 }
 0x514   : > { %47956 = vmatprep.subr.mxu1 %v54942_v52 }
 0x515   : > { %v29989_v33 = vpop.f32.mrb[122].mxu1 }
 0x516   : > { %47954 = vmatmul.mubr.f32.vlgmr.msra.gmra.mrb[228].mxu1 %v53410_v12  ;;  %v29990_v21 = vadd.f32 %v29989_v33, %v29916_v39  ;;  %v47690_v1 = vpop.f32.mrb[123].mxu1  ;;  %v54896_v39 = vand.u32 4294901760, %v53498_v29 }
 0x517   : > { %47957 = vmatpush3.msra.mxu1 %v53404_v23  ;;  %47958 = vmatprep.mubr.msk.f32.mxu1 %vm48938_vm3, %v54942_v52  ;;  %v38657_v1 = vsub.f32 %v53491_v40, %v53507_v30 }
 0x518   : > { %22830 = vmatmul.mubr.f32.vlgmr.msra.gmra.mrb[0].mxu0 %v51887_v54  ;;  %47961 = vmatprep.subr.mxu1 %v54942_v52  ;;  %v39132_v43 = vsub.f32 %v53498_v29, %v54896_v39  ;;  %v55320_v39 = vand.u32 4294901760, %v53394_v19 }
 0x519   : > { %22841 = vmatpush1.msra.mxu0 %v53423_v31  ;;  %v30063_v15 = vpop.f32.mrb[124].mxu1  ;;  %22904 = vmatprep.mubr.f32.mxu0 %v54942_v52  ;;  %v53542_v2 = vand.u32 4294901760, %v38657_v1 }
 0x51a   : > { %22914 = vmatprep.subr.mxu0 %v53374_v37  ;;  %47959 = vmatmul.mubr.f32.vlgmr.msra.gmra.mrb[230].mxu1 %v53428_v22  ;;  %v30064_v61 = vadd.f32 %v30063_v15, %v29990_v21  ;;  %v47695_v63 = vpop.f32.mrb[125].mxu1  ;;  %v53522_v15 = vpop.permute.xlu0 %42279 }
 0x51b   : > { %47962 = vmatpush3.msra.mxu1 %v38195_v25  ;;  %47963 = vmatprep.mubr.msk.f32.mxu1 %vm48938_vm3, %v54942_v52  ;;  %v55317_v25 = vld [vmem:[#allocation68_spill] sm:$0xff] }
 0x51c   : > { %47966 = vmatprep.subr.mxu1 %v54942_v52  ;;  %v23602_v63 = vsel %vm55318_vm4, %v55317_v25, %v49751_v49  ;;  %vm44153_vm4 = vcmask 973824  }
 0x51d   : > { %v30135_v33 = vpop.f32.mrb[126].mxu1 }
 0x51e   : > { %v30136_v56 = vadd.f32 %v30135_v33, %v30064_v61  ;;  %47964 = vmatmul.mubr.f32.vlgmr.msra.gmra.mrb[232].mxu1 %v53397_v5  ;;  %v47700_v21 = vpop.f32.mrb[127].mxu1  ;;  %v55319_v33 = vld [vmem:[#allocation29_spill] sm:$0xff] }
 0x51f   : > { %47967 = vmatpush3.msra.mxu1 %v53404_v23  ;;  %47968 = vmatprep.mubr.msk.f32.mxu1 %vm48938_vm3, %v54942_v52  ;;  %v53540_v21 = vpop.permute.xlu1 %44149 }
 0x520   : > { %v53534_v61 = vadd.f32 %v30136_v56, %v53452_v48  ;;  %22907 = vmatmul.mubr.f32.vlgmr.msra.gmra.mrb[0].mxu0 %v55319_v33  ;;  %47971 = vmatprep.subr.mxu1 %v54942_v52  ;;  %v44148_v56 = vpop.permute.xlu0 %44147  ;;  %v23608_v48 = vsel %vm225_vm2, %v23602_v63, 0  ;;  %v39133_v33 = vand.u32 4294901760, %v39132_v43  ;;  %v55324_v43 = vld [vmem:[#allocation69_spill] sm:$0xff] }
 0x521   : > { %22916 = vmatpush1.msra.mxu0 %v53407_v53  ;;  %22979 = vmatprep.mubr.f32.mxu0 %v54942_v52  ;;  %v30700_v23 = vpop.f32.mrb[128].mxu1  ;;  %v53553_v1 = vsel %vm44153_vm4, %v44148_v56, %v53540_v21  ;;  %v53559_v22 = vand.u32 4294901760, %v23608_v48 }
 0x522   : > { %22992 = vmatprep.subr.mxu0 %v55320_v39  ;;  %47969 = vmatmul.mubr.f32.vlgmr.msra.gmra.mrb[234].mxu1 %v53397_v5  ;;  %v47705_v49 = vpop.f32.mrb[129].mxu1  ;;  %55321 = vst [vmem:[#allocation63_spill] sm:$0xff] %v53553_v1  ;;  %v55322_v39 = vld [vmem:[#allocation71_spill] sm:$0xff]  ;;  %v23601_v5 = vsel %vm55325_vm10, %v55324_v43, %v55317_v25  ;;  %v39507_v1 = vsel %vm222_vm0, %v53045_v7, 0  ;;  %vm55331_vm10 = vcmask 1006592  }
 0x523   : > { %47972 = vmatpush3.msra.mxu1 %v53487_v46  ;;  %47973 = vmatprep.mubr.msk.f32.mxu1 %vm48938_vm3, %v54942_v52  ;;  %v39506_v49 = vsel %vm55323_vm12, %v55322_v39, %v53315_v20  ;;  %v55327_v39 = vld [vmem:[#allocation57_spill] sm:$0xff]  ;;  %v53579_v7 = vsub.f32 %v23608_v48, %v53559_v22  ;;  %vm55334_vm12 = vcmask 465920  }
 0x524   : > { %47976 = vmatprep.subr.mxu1 %v54942_v52  ;;  %v44146_v3 = vpop.permute.xlu0 %44145 }
 0x525   : > { %v30776_v19 = vpop.f32.mrb[130].mxu1  ;;  %v53570_v20 = vsel %vm44153_vm4, %v44146_v3, %v44148_v56  ;;  %v54904_v43 = vand.u32 4294901760, %v53579_v7 }
 0x526   : > { %47974 = vmatmul.mubr.f32.vlgmr.msra.gmra.mrb[236].mxu1 %v53542_v2  ;;  %v30777_v63 = vadd.f32 %v30776_v19, %v30700_v23  ;;  %v47710_v12 = vpop.f32.mrb[131].mxu1  ;;  %55326 = vst [vmem:[#allocation64_spill] sm:$0xff] %v53570_v20  ;;  %v55328_v23 = vand.u32 4294901760, %v53423_v31  ;;  %v53582_v19 = vand.u32 4294901760, %v39507_v1  ;;  %v43221_v20 = vsel %vm222_vm0, %v53331_v4, 0 }
 0x527   : > { %47977 = vmatpush3.msra.mxu1 %v39133_v33  ;;  %47978 = vmatprep.mubr.msk.f32.mxu1 %vm48938_vm3, %v54942_v52  ;;  %v39509_v12 = vsel %vm225_vm2, %v39506_v49, 0  ;;  %v23606_v33 = vsel %vm225_vm2, %v23601_v5, 0 }
 0x528   : > { %22983 = vmatmul.mubr.f32.vlgmr.msra.gmra.mrb[0].mxu0 %v55327_v39  ;;  %47981 = vmatprep.subr.mxu1 %v54942_v52  ;;  %v53589_v31 = vand.u32 4294901760, %v39509_v12  ;;  %v53592_v48 = vand.u32 4294901760, %v23606_v33  ;;  %v53595_v49 = vsub.f32 %v39507_v1, %v53582_v19 }
 0x529   : > { %22996 = vmatpush1.msra.mxu0 %v55328_v23  ;;  %23059 = vmatprep.mubr.f32.mxu0 %v54942_v52  ;;  %v30850_v25 = vpop.f32.mrb[132].mxu1 }
 0x52a   : > { %23068 = vmatprep.subr.mxu0 %v53374_v37  ;;  %47979 = vmatmul.mubr.f32.vlgmr.msra.gmra.mrb[238].mxu1 %v53480_v16  ;;  %v30851_v3 = vadd.f32 %v30850_v25, %v30777_v63  ;;  %v47715_v56 = vpop.f32.mrb[133].mxu1  ;;  %v53603_v39 = vsub.f32 %v39509_v12, %v53589_v31  ;;  %v53608_v1 = vsub.f32 %v23606_v33, %v53592_v48  ;;  %v53613_v25 = vand.u32 4294901760, %v53595_v49 }
 0x52b   : > { %47982 = vmatpush3.msra.mxu1 %v53498_v29  ;;  %47983 = vmatprep.mubr.msk.f32.mxu1 %vm48938_vm3, %v54942_v52  ;;  %v23693_v56 = vsub.f32 %v53579_v7, %v54904_v43 }
 0x52c   : > { %47986 = vmatprep.subr.mxu1 %v54942_v52  ;;  %v54906_v33 = vand.u32 4294901760, %v53603_v39 }
 0x52d   : > { %v30924_v5 = vpop.f32.mrb[134].mxu1 }
 0x52e   : > { %47984 = vmatmul.mubr.f32.vlgmr.msra.gmra.mrb[240].mxu1 %v53491_v40  ;;  %v30925_v37 = vadd.f32 %v30924_v5, %v30851_v3  ;;  %v47720_v63 = vpop.f32.mrb[135].mxu1  ;;  %v54905_v5 = vand.u32 4294901760, %v53608_v1 }
 0x52f   : > { %47987 = vmatpush3.msra.mxu1 %v53487_v46  ;;  %47988 = vmatprep.mubr.msk.f32.mxu1 %vm48938_vm3, %v54942_v52  ;;  %v39581_v63 = vsub.f32 %v53595_v49, %v53613_v25 }
 0x530   : > { %23061 = vmatmul.mubr.f32.vlgmr.msra.gmra.mrb[0].mxu0 %v51887_v54  ;;  %47991 = vmatprep.subr.mxu1 %v54942_v52 }
 0x531   : > { %23070 = vmatpush1.msra.mxu0 %v53407_v53  ;;  %v30998_v23 = vpop.f32.mrb[136].mxu1  ;;  %23133 = vmatprep.mubr.f32.mxu0 %v54942_v52  ;;  %v55329_v53 = vand.u32 4294901760, %v53498_v29  ;;  %v40056_v29 = vsub.f32 %v53603_v39, %v54906_v33 }
 0x532   : > { %47989 = vmatmul.mubr.f32.vlgmr.msra.gmra.mrb[242].mxu1 %v53507_v30  ;;  %v30999_v3 = vadd.f32 %v30998_v23, %v30925_v37  ;;  %v47725_v12 = vpop.f32.mrb[137].mxu1  ;;  %23613 = vmatprep.subr.mxu0 %v53559_v22 }
 0x533   : > { %47992 = vmatpush3.msra.mxu1 %v55329_v53  ;;  %47993 = vmatprep.mubr.msk.f32.mxu1 %vm48938_vm3, %v54942_v52  ;;  %v23694_v12 = vand.u32 4294901760, %v23693_v56 }
 0x534   : > { %47996 = vmatprep.subr.mxu1 %v54942_v52 }
 0x535   : > { %v31070_v37 = vpop.f32.mrb[138].mxu1 }
 0x536   : > { %v31071_v23 = vadd.f32 %v31070_v37, %v30999_v3  ;;  %47994 = vmatmul.mubr.f32.vlgmr.msra.gmra.mrb[244].mxu1 %v53480_v16  ;;  %v47730_v43 = vpop.f32.mrb[139].mxu1  ;;  %v53646_v3 = vand.u32 4294901760, %v39581_v63 }
 0x537   : > { %47997 = vmatpush3.msra.mxu1 %v53487_v46  ;;  %47998 = vmatprep.mubr.msk.f32.mxu1 %vm48938_vm3, %v54942_v52  ;;  %v23699_v46 = vsub.f32 %v53608_v1, %v54905_v5 }
 0x538   : > { %v53637_v53 = vadd.f32 %v31071_v23, %v53534_v61  ;;  %23135 = vmatmul.mubr.f32.vlgmr.msra.gmra.mrb[0].mxu0 %v51887_v54  ;;  %48001 = vmatprep.subr.mxu1 %v54942_v52  ;;  %v40057_v54 = vand.u32 4294901760, %v40056_v29  ;;  %v55330_v23 = vld [vmem:[#allocation81_spill] sm:$0xff] }
 0x539   : > { %23615 = vmatpush1.msra.mxu0 %v53592_v48  ;;  %23678 = vmatprep.mubr.f32.mxu0 %v54942_v52  ;;  %v31636_v43 = vpop.f32.mrb[140].mxu1  ;;  %v23700_v56 = vand.u32 4294901760, %v23699_v46  ;;  %v40429_v5 = vsel %vm55331_vm10, %v55330_v23, %v53337_v32  ;;  %vm55337_vm10 = vcmask 998400  }
 0x53a   : > { %47999 = vmatmul.mubr.f32.vlgmr.msra.gmra.mrb[246].mxu1 %v53480_v16  ;;  %23695 = vmatprep.subr.mxu0 %v23694_v12  ;;  %v47735_v61 = vpop.f32.mrb[141].mxu1  ;;  %v40430_v12 = vsel %vm222_vm0, %v53082_v44, 0  ;;  %v40432_v29 = vsel %vm225_vm2, %v40429_v5, 0 }
 0x53b   : > { %48002 = vmatpush3.msra.mxu1 %v53589_v31  ;;  %48003 = vmatprep.mubr.msk.f32.mxu1 %vm48938_vm3, %v54942_v52  ;;  %v53665_v46 = vand.u32 4294901760, %v40430_v12 }
 0x53c   : > { %48006 = vmatprep.subr.mxu1 %v54942_v52 }
 0x53d   : > { %v31712_v37 = vpop.f32.mrb[142].mxu1 }
 0x53e   : > { %48004 = vmatmul.mubr.f32.vlgmr.msra.gmra.mrb[248].mxu1 %v53646_v3  ;;  %v31713_v63 = vadd.f32 %v31712_v37, %v31636_v43  ;;  %v47740_v33 = vpop.f32.mrb[143].mxu1  ;;  %v53676_v43 = vsub.f32 %v40430_v12, %v53665_v46 }
 0x53f   : > { %48007 = vmatpush3.msra.mxu1 %v40057_v54  ;;  %48008 = vmatprep.mubr.msk.f32.mxu1 %vm48938_vm3, %v54942_v52 }
 0x540   : > { %23684 = vmatmul.mubr.f32.vlgmr.msra.gmra.mrb[0].mxu0 %v52050_v57  ;;  %48011 = vmatprep.subr.mxu1 %v54942_v52  ;;  %v53672_v57 = vand.u32 4294901760, %v40432_v29  ;;  %v53690_v23 = vand.u32 4294901760, %v53676_v43 }
 0x541   : > { %23701 = vmatpush1.msra.mxu0 %v23700_v56  ;;  %23764 = vmatprep.mubr.f32.mxu0 %v54942_v52  ;;  %v31786_v32 = vpop.f32.mrb[144].mxu1 }
 0x542   : > { %23774 = vmatprep.subr.mxu0 %v53579_v7  ;;  %48009 = vmatmul.mubr.f32.vlgmr.msra.gmra.mrb[250].mxu1 %v53582_v19  ;;  %v31787_v44 = vadd.f32 %v31786_v32, %v31713_v63  ;;  %v47745_v33 = vpop.f32.mrb[145].mxu1  ;;  %v53683_v56 = vsub.f32 %v40432_v29, %v53672_v57  ;;  %v55332_v32 = vand.u32 4294901760, %v53603_v39 }
 0x543   : > { %48012 = vmatpush3.msra.mxu1 %v53603_v39  ;;  %48013 = vmatprep.mubr.msk.f32.mxu1 %vm48938_vm3, %v54942_v52  ;;  %v40504_v33 = vsub.f32 %v53676_v43, %v53690_v23 }
 0x544   : > { %48016 = vmatprep.subr.mxu1 %v54942_v52  ;;  %v40978_v29 = vand.u32 4294901760, %v53683_v56 }
 0x545   : > { %v31860_v5 = vpop.f32.mrb[146].mxu1 }
 0x546   : > { %48014 = vmatmul.mubr.f32.vlgmr.msra.gmra.mrb[252].mxu1 %v53595_v49  ;;  %v31861_v61 = vadd.f32 %v31860_v5, %v31787_v44  ;;  %v47750_v54 = vpop.f32.mrb[147].mxu1  ;;  %v40979_v39 = vsub.f32 %v53683_v56, %v40978_v29 }
 0x547   : > { %48017 = vmatpush3.msra.mxu1 %v53589_v31  ;;  %48018 = vmatprep.mubr.msk.f32.mxu1 %vm48938_vm3, %v54942_v52 }
 0x548   : > { %23766 = vmatmul.mubr.f32.vlgmr.msra.gmra.mrb[0].mxu0 %v51982_v34  ;;  %48021 = vmatprep.subr.mxu1 %v54942_v52 }
 0x549   : > { %23777 = vmatpush1.msra.mxu0 %v53608_v1  ;;  %v31934_v37 = vpop.f32.mrb[148].mxu1  ;;  %23840 = vmatprep.mubr.f32.mxu0 %v54942_v52 }
 0x54a   : > { %23850 = vmatprep.subr.mxu0 %v53559_v22  ;;  %48019 = vmatmul.mubr.f32.vlgmr.msra.gmra.mrb[254].mxu1 %v53613_v25  ;;  %v31935_v63 = vadd.f32 %v31934_v37, %v31861_v61  ;;  %v47755_v12 = vpop.f32.mrb[149].mxu1  ;;  %v55333_v61 = vld [vmem:[#allocation76_spill] sm:$0xff] }
 0x54b   : > { %48022 = vmatpush3.msra.mxu1 %v55332_v32  ;;  %48023 = vmatprep.mubr.msk.f32.mxu1 %vm48938_vm3, %v54942_v52  ;;  %v24538_v37 = vsel %vm55334_vm12, %v55333_v61, %v49927_v28  ;;  %v55335_v32 = vand.u32 4294901760, %v53579_v7 }
 0x54c   : > { %48026 = vmatprep.subr.mxu1 %v54942_v52 }
 0x54d   : > { %v32006_v44 = vpop.f32.mrb[150].mxu1 }
 0x54e   : > { %v32007_v5 = vadd.f32 %v32006_v44, %v31935_v63  ;;  %48024 = vmatmul.mubr.f32.vlgmr.msra.gmra.mrb[0].mxu1 %v53582_v19  ;;  %v47760_v54 = vpop.f32.mrb[151].mxu1  ;;  %v53719_v63 = vand.u32 4294901760, %v40504_v33  ;;  %v55336_v33 = vld [vmem:[#allocation87_spill] sm:$0xff] }
 0x54f   : > { %48027 = vmatpush3.msra.mxu1 %v53589_v31  ;;  %48028 = vmatprep.mubr.msk.f32.mxu1 %vm48938_vm3, %v54942_v52 }
 0x550   : > { %v53713_v12 = vadd.f32 %v32007_v5, %v53637_v53  ;;  %23843 = vmatmul.mubr.f32.vlgmr.msra.gmra.mrb[0].mxu0 %v51999_v60  ;;  %48031 = vmatprep.subr.mxu1 %v54942_v52  ;;  %v24544_v53 = vsel %vm225_vm2, %v24538_v37, 0  ;;  %v40980_v60 = vand.u32 4294901760, %v40979_v39  ;;  %v41352_v5 = vsel %vm55337_vm10, %v55336_v33, %v53500_v38  ;;  %v55338_v37 = vld [vmem:[#allocation79_spill] sm:$0xff] }
 0x551   : > { %23852 = vmatpush1.msra.mxu0 %v53592_v48  ;;  %23915 = vmatprep.mubr.f32.mxu0 %v54942_v52  ;;  %v32572_v31 = vpop.f32.mrb[152].mxu1  ;;  %v53732_v7 = vand.u32 4294901760, %v24544_v53  ;;  %v41353_v39 = vsel %vm222_vm0, %v53125_v13, 0  ;;  %v41355_v38 = vsel %vm225_vm2, %v41352_v5, 0 }
 0x552   : > { %23928 = vmatprep.subr.mxu0 %v55335_v32  ;;  %48029 = vmatmul.mubr.f32.vlgmr.msra.gmra.mrb[2].mxu1 %v53582_v19  ;;  %v47765_v28 = vpop.f32.mrb[153].mxu1 }
 0x553   : > { %48032 = vmatpush3.msra.mxu1 %v53672_v57  ;;  %48033 = vmatprep.mubr.msk.f32.mxu1 %vm48938_vm3, %v54942_v52  ;;  %v24537_v28 = vsel %vm55334_vm12, %v55338_v37, %v55333_v61  ;;  %v53749_v61 = vsub.f32 %v24544_v53, %v53732_v7 }
 0x554   : > { %48036 = vmatprep.subr.mxu1 %v54942_v52  ;;  %v24542_v13 = vsel %vm225_vm2, %v24537_v28, 0 }
 0x555   : > { %v32648_v44 = vpop.f32.mrb[154].mxu1  ;;  %v53762_v53 = vand.u32 4294901760, %v24542_v13  ;;  %v24628_v37 = vand.u32 4294901760, %v53749_v61 }
 0x556   : > { %48034 = vmatmul.mubr.f32.vlgmr.msra.gmra.mrb[4].mxu1 %v53719_v63  ;;  %v32649_v54 = vadd.f32 %v32648_v44, %v32572_v31  ;;  %v47770_v32 = vpop.f32.mrb[155].mxu1  ;;  %v55339_v31 = vand.u32 4294901760, %v53608_v1  ;;  %v53759_v1 = vand.u32 4294901760, %v41355_v38 }
 0x557   : > { %48037 = vmatpush3.msra.mxu1 %v40980_v60  ;;  %48038 = vmatprep.mubr.msk.f32.mxu1 %vm48938_vm3, %v54942_v52  ;;  %v53752_v60 = vand.u32 4294901760, %v41353_v39 }
 0x558   : > { %23919 = vmatmul.mubr.f32.vlgmr.msra.gmra.mrb[0].mxu0 %v52013_v24  ;;  %48041 = vmatprep.subr.mxu1 %v54942_v52  ;;  %v53773_v28 = vsub.f32 %v41355_v38, %v53759_v1 }
 0x559   : > { %23932 = vmatpush1.msra.mxu0 %v55339_v31  ;;  %23995 = vmatprep.mubr.f32.mxu0 %v54942_v52  ;;  %v32722_v44 = vpop.f32.mrb[156].mxu1  ;;  %v53765_v32 = vsub.f32 %v41353_v39, %v53752_v60  ;;  %v53778_v39 = vsub.f32 %v24542_v13, %v53762_v53 }
 0x55a   : > { %24004 = vmatprep.subr.mxu0 %v53559_v22  ;;  %48039 = vmatmul.mubr.f32.vlgmr.msra.gmra.mrb[6].mxu1 %v53665_v46  ;;  %v32723_v24 = vadd.f32 %v32722_v44, %v32649_v54  ;;  %v47775_v33 = vpop.f32.mrb[157].mxu1  ;;  %v41901_v13 = vand.u32 4294901760, %v53773_v28 }
 0x55b   : > { %48042 = vmatpush3.msra.mxu1 %v53683_v56  ;;  %48043 = vmatprep.mubr.msk.f32.mxu1 %vm48938_vm3, %v54942_v52  ;;  %v53783_v44 = vand.u32 4294901760, %v53765_v32  ;;  %v24629_v33 = vsub.f32 %v53749_v61, %v24628_v37 }
 0x55c   : > { %48046 = vmatprep.subr.mxu1 %v54942_v52  ;;  %v41902_v56 = vsub.f32 %v53773_v28, %v41901_v13 }
 0x55d   : > { %v32796_v5 = vpop.f32.mrb[158].mxu1 }
 0x55e   : > { %48044 = vmatmul.mubr.f32.vlgmr.msra.gmra.mrb[8].mxu1 %v53676_v43  ;;  %v32797_v22 = vadd.f32 %v32796_v5, %v32723_v24  ;;  %v47780_v54 = vpop.f32.mrb[159].mxu1 }
 0x55f   : > { %48047 = vmatpush3.msra.mxu1 %v53672_v57  ;;  %48048 = vmatprep.mubr.msk.f32.mxu1 %vm48938_vm3, %v54942_v52 }
 0x560   : > { %23997 = vmatmul.mubr.f32.vlgmr.msra.gmra.mrb[0].mxu0 %v51982_v34  ;;  %48051 = vmatprep.subr.mxu1 %v54942_v52 }
 0x561   : > { %24006 = vmatpush1.msra.mxu0 %v53592_v48  ;;  %v32870_v31 = vpop.f32.mrb[160].mxu1  ;;  %24069 = vmatprep.mubr.f32.mxu0 %v54942_v52  ;;  %v54907_v48 = vand.u32 4294901760, %v53778_v39 }
 0x562   : > { %48049 = vmatmul.mubr.f32.vlgmr.msra.gmra.mrb[10].mxu1 %v53690_v23  ;;  %v32871_v24 = vadd.f32 %v32870_v31, %v32797_v22  ;;  %v47785_v38 = vpop.f32.mrb[161].mxu1  ;;  %24549 = vmatprep.subr.mxu0 %v53732_v7  ;;  %v41427_v22 = vsub.f32 %v53765_v32, %v53783_v44  ;;  %v24630_v31 = vand.u32 4294901760, %v24629_v33 }
 0x563   : > { %48052 = vmatpush3.msra.mxu1 %v40978_v29  ;;  %48053 = vmatprep.mubr.msk.f32.mxu1 %vm48938_vm3, %v54942_v52 }
 0x564   : > { %48056 = vmatprep.subr.mxu1 %v54942_v52  ;;  %v53816_v33 = vand.u32 4294901760, %v41427_v22 }
 0x565   : > { %v32942_v5 = vpop.f32.mrb[162].mxu1 }
 0x566   : > { %v32943_v54 = vadd.f32 %v32942_v5, %v32871_v24  ;;  %48054 = vmatmul.mubr.f32.vlgmr.msra.gmra.mrb[12].mxu1 %v53665_v46  ;;  %v47790_v38 = vpop.f32.mrb[163].mxu1 }
 0x567   : > { %48057 = vmatpush3.msra.mxu1 %v53672_v57  ;;  %48058 = vmatprep.mubr.msk.f32.mxu1 %vm48938_vm3, %v54942_v52  ;;  %v24635_v57 = vsub.f32 %v53778_v39, %v54907_v48  ;;  %v42284_v38 = vsel %vm42281_vm8, %v53163_v41, %v53522_v15  ;;  %vm55345_vm8 = vcmask 457728  }
 0x568   : > { %v53807_v29 = vadd.f32 %v32943_v54, %v53713_v12  ;;  %24071 = vmatmul.mubr.f32.vlgmr.msra.gmra.mrb[0].mxu0 %v51982_v34  ;;  %48061 = vmatprep.subr.mxu1 %v54942_v52  ;;  %v41903_v34 = vand.u32 4294901760, %v41902_v56  ;;  %v42291_v56 = vsel %vm225_vm2, %v42284_v38, 0  ;;  %vm55348_vm10 = vmmov %vm55345_vm8 }
 0x569   : > { %24551 = vmatpush1.msra.mxu0 %v53762_v53  ;;  %24614 = vmatprep.mubr.f32.mxu0 %v54942_v52  ;;  %v33508_v24 = vpop.f32.mrb[164].mxu1  ;;  %v24636_v5 = vand.u32 4294901760, %v24635_v57 }
 0x56a   : > { %48059 = vmatmul.mubr.f32.vlgmr.msra.gmra.mrb[14].mxu1 %v53665_v46  ;;  %24631 = vmatprep.subr.mxu0 %v24630_v31  ;;  %v47795_v12 = vpop.f32.mrb[165].mxu1  ;;  %v42285_v31 = vsel %vm222_vm0, %v53139_v6, 0 }
 0x56b   : > { %48062 = vmatpush3.msra.mxu1 %v53759_v1  ;;  %48063 = vmatprep.mubr.msk.f32.mxu1 %vm48938_vm3, %v54942_v52  ;;  %v53835_v15 = vand.u32 4294901760, %v42285_v31 }
 0x56c   : > { %48066 = vmatprep.subr.mxu1 %v54942_v52 }
 0x56d   : > { %v33584_v54 = vpop.f32.mrb[166].mxu1 }
 0x56e   : > { %48064 = vmatmul.mubr.f32.vlgmr.msra.gmra.mrb[16].mxu1 %v53816_v33  ;;  %v33585_v22 = vadd.f32 %v33584_v54, %v33508_v24  ;;  %v47800_v48 = vpop.f32.mrb[167].mxu1  ;;  %v53846_v24 = vsub.f32 %v42285_v31, %v53835_v15  ;;  %v55341_v54 = vld [vmem:[#allocation108_spill] sm:$0xff] }
 0x56f   : > { %48067 = vmatpush3.msra.mxu1 %v41903_v34  ;;  %48068 = vmatprep.mubr.msk.f32.mxu1 %vm48938_vm3, %v54942_v52 }
 0x570   : > { %24620 = vmatmul.mubr.f32.vlgmr.msra.gmra.mrb[0].mxu0 %v52154_v36  ;;  %48071 = vmatprep.subr.mxu1 %v54942_v52  ;;  %v53842_v36 = vand.u32 4294901760, %v42291_v56  ;;  %55340 = vst [vmem:[#allocation68_spill] sm:$0xff] %v53846_v24 }
 0x571   : > { %24637 = vmatpush1.msra.mxu0 %v24636_v5  ;;  %24700 = vmatprep.mubr.f32.mxu0 %v54942_v52  ;;  %v33658_v41 = vpop.f32.mrb[168].mxu1 }
 0x572   : > { %24710 = vmatprep.subr.mxu0 %v53749_v61  ;;  %48069 = vmatmul.mubr.f32.vlgmr.msra.gmra.mrb[18].mxu1 %v53752_v60  ;;  %v33659_v6 = vadd.f32 %v33658_v41, %v33585_v22  ;;  %v47805_v48 = vpop.f32.mrb[169].mxu1  ;;  %v53853_v5 = vsub.f32 %v42291_v56, %v53842_v36  ;;  %v53860_v22 = vand.u32 4294901760, %v53846_v24 }
 0x573   : > { %48072 = vmatpush3.msra.mxu1 %v53773_v28  ;;  %48073 = vmatprep.mubr.msk.f32.mxu1 %vm48938_vm3, %v54942_v52 }
 0x574   : > { %48076 = vmatprep.subr.mxu1 %v54942_v52  ;;  %55342 = vst [vmem:[#allocation29_spill] sm:$0xff] %v53860_v22  ;;  %v54908_v56 = vand.u32 4294901760, %v53853_v5  ;;  %v42363_v48 = vsub.f32 %v53846_v24, %v53860_v22 }
 0x575   : > { %v33732_v57 = vpop.f32.mrb[170].mxu1 }
 0x576   : > { %48074 = vmatmul.mubr.f32.vlgmr.msra.gmra.mrb[20].mxu1 %v53765_v32  ;;  %v33733_v12 = vadd.f32 %v33732_v57, %v33659_v6  ;;  %v47810_v34 = vpop.f32.mrb[171].mxu1  ;;  %v42838_v28 = vsub.f32 %v53853_v5, %v54908_v56 }
 0x577   : > { %48077 = vmatpush3.msra.mxu1 %v53759_v1  ;;  %48078 = vmatprep.mubr.msk.f32.mxu1 %vm48938_vm3, %v54942_v52 }
 0x578   : > { %24702 = vmatmul.mubr.f32.vlgmr.msra.gmra.mrb[0].mxu0 %v55341_v54  ;;  %48081 = vmatprep.subr.mxu1 %v54942_v52 }
 0x579   : > { %24713 = vmatpush1.msra.mxu0 %v53778_v39  ;;  %v33806_v38 = vpop.f32.mrb[172].mxu1  ;;  %24776 = vmatprep.mubr.f32.mxu0 %v54942_v52 }
 0x57a   : > { %24786 = vmatprep.subr.mxu0 %v53732_v7  ;;  %48079 = vmatmul.mubr.f32.vlgmr.msra.gmra.mrb[22].mxu1 %v53783_v44  ;;  %v33807_v31 = vadd.f32 %v33806_v38, %v33733_v12  ;;  %v47815_v41 = vpop.f32.mrb[173].mxu1  ;;  %v55344_v12 = vld [vmem:[#allocation90_spill] sm:$0xff] }
 0x57b   : > { %48082 = vmatpush3.msra.mxu1 %v41901_v13  ;;  %48083 = vmatprep.mubr.msk.f32.mxu1 %vm48938_vm3, %v54942_v52  ;;  %v55343_v13 = vld [vmem:[#allocation86_spill] sm:$0xff] }
 0x57c   : > { %48086 = vmatprep.subr.mxu1 %v54942_v52  ;;  %v25474_v38 = vsel %vm55345_vm8, %v55344_v12, %v55343_v13  ;;  %v43216_v13 = vpop.permute.xlu1 %43215 }
 0x57d   : > { %v33878_v6 = vpop.f32.mrb[174].mxu1 }
 0x57e   : > { %v33879_v57 = vadd.f32 %v33878_v6, %v33807_v31  ;;  %48084 = vmatmul.mubr.f32.vlgmr.msra.gmra.mrb[24].mxu1 %v53752_v60  ;;  %v47820_v34 = vpop.f32.mrb[175].mxu1  ;;  %v55346_v31 = vld [vmem:[#allocation109_spill] sm:$0xff]  ;;  %v53889_v6 = vand.u32 4294901760, %v42363_v48  ;;  %v43220_v48 = vsel %vm43217_vm6, %v53355_v47, %v43216_v13  ;;  %vm55362_vm6 = vcmask 326656  }
 0x57f   : > { %48087 = vmatpush3.msra.mxu1 %v53759_v1  ;;  %48088 = vmatprep.mubr.msk.f32.mxu1 %vm48938_vm3, %v54942_v52  ;;  %v43227_v47 = vsel %vm225_vm2, %v43220_v48, 0  ;;  %vm55366_vm12 = vmmov %vm55362_vm6 }
 0x580   : > { %v53883_v41 = vadd.f32 %v33879_v57, %v53807_v29  ;;  %24779 = vmatmul.mubr.f32.vlgmr.msra.gmra.mrb[0].mxu0 %v55346_v31  ;;  %48091 = vmatprep.subr.mxu1 %v54942_v52  ;;  %v25480_v29 = vsel %vm225_vm2, %v25474_v38, 0  ;;  %v42839_v57 = vand.u32 4294901760, %v42838_v28  ;;  %v55347_v38 = vld [vmem:[#allocation93_spill] sm:$0xff]  ;;  %v55349_v28 = vld [vmem:[#allocation110_spill] sm:$0xff] }
 0x581   : > { %24788 = vmatpush1.msra.mxu0 %v53762_v53  ;;  %24851 = vmatprep.mubr.f32.mxu0 %v54942_v52  ;;  %v34444_v1 = vpop.f32.mrb[176].mxu1  ;;  %v53901_v61 = vand.u32 4294901760, %v25480_v29  ;;  %v25473_v56 = vsel %vm55348_vm10, %v55347_v38, %v55344_v12 }
 0x582   : > { %24864 = vmatprep.subr.mxu0 %v24628_v37  ;;  %48089 = vmatmul.mubr.f32.vlgmr.msra.gmra.mrb[26].mxu1 %v53752_v60  ;;  %v47825_v34 = vpop.f32.mrb[177].mxu1  ;;  %v25478_v4 = vsel %vm225_vm2, %v25473_v56, 0 }
 0x583   : > { %48092 = vmatpush3.msra.mxu1 %v53842_v36  ;;  %48093 = vmatprep.mubr.msk.f32.mxu1 %vm48938_vm3, %v54942_v52  ;;  %v53918_v12 = vsub.f32 %v25480_v29, %v53901_v61  ;;  %v53931_v29 = vand.u32 4294901760, %v25478_v4 }
 0x584   : > { %48096 = vmatprep.subr.mxu1 %v54942_v52 }
 0x585   : > { %v34520_v31 = vpop.f32.mrb[178].mxu1  ;;  %v54909_v38 = vand.u32 4294901760, %v53918_v12 }
 0x586   : > { %48094 = vmatmul.mubr.f32.vlgmr.msra.gmra.mrb[28].mxu1 %v53889_v6  ;;  %v34521_v37 = vadd.f32 %v34520_v31, %v34444_v1  ;;  %v47830_v34 = vpop.f32.mrb[179].mxu1  ;;  %v55350_v1 = vand.u32 4294901760, %v53778_v39  ;;  %v53928_v39 = vand.u32 4294901760, %v43227_v47 }
 0x587   : > { %48097 = vmatpush3.msra.mxu1 %v42839_v57  ;;  %48098 = vmatprep.mubr.msk.f32.mxu1 %vm48938_vm3, %v54942_v52  ;;  %v53921_v57 = vand.u32 4294901760, %v43221_v20 }
 0x588   : > { %24855 = vmatmul.mubr.f32.vlgmr.msra.gmra.mrb[0].mxu0 %v55349_v28  ;;  %48101 = vmatprep.subr.mxu1 %v54942_v52  ;;  %v53942_v28 = vsub.f32 %v43227_v47, %v53928_v39 }
 0x589   : > { %24868 = vmatpush1.msra.mxu0 %v55350_v1  ;;  %24931 = vmatprep.mubr.f32.mxu0 %v54942_v52  ;;  %v34594_v13 = vpop.f32.mrb[180].mxu1  ;;  %55351 = vst [vmem:[#allocation71_spill] sm:$0xff] %v53921_v57  ;;  %v53934_v48 = vsub.f32 %v43221_v20, %v53921_v57  ;;  %v53947_v20 = vsub.f32 %v25478_v4, %v53931_v29 }
 0x58a   : > { %24940 = vmatprep.subr.mxu0 %v53732_v7  ;;  %48099 = vmatmul.mubr.f32.vlgmr.msra.gmra.mrb[30].mxu1 %v53835_v15  ;;  %v34595_v31 = vadd.f32 %v34594_v13, %v34521_v37  ;;  %v47835_v34 = vpop.f32.mrb[181].mxu1  ;;  %v54911_v4 = vand.u32 4294901760, %v53942_v28 }
 0x58b   : > { %48102 = vmatpush3.msra.mxu1 %v53853_v5  ;;  %48103 = vmatprep.mubr.msk.f32.mxu1 %vm48938_vm3, %v54942_v52  ;;  %55352 = vst [vmem:[#allocation69_spill] sm:$0xff] %v53934_v48  ;;  %v53952_v13 = vand.u32 4294901760, %v53934_v48  ;;  %v25565_v34 = vsub.f32 %v53918_v12, %v54909_v38 }
 0x58c   : > { %48106 = vmatprep.subr.mxu1 %v54942_v52 }
 0x58d   : > { %v34668_v56 = vpop.f32.mrb[182].mxu1  ;;  %55353 = vst [vmem:[#allocation57_spill] sm:$0xff] %v53952_v13 }
 0x58e   : > { %48104 = vmatmul.mubr.f32.vlgmr.msra.gmra.mrb[32].mxu1 %v53846_v24  ;;  %v34669_v7 = vadd.f32 %v34668_v56, %v34595_v31  ;;  %v47840_v37 = vpop.f32.mrb[183].mxu1  ;;  %v54910_v56 = vand.u32 4294901760, %v53947_v20  ;;  %v55367_v24 = vld [vmem:[#allocation113_spill] sm:$0xff] }
 0x58f   : > { %48107 = vmatpush3.msra.mxu1 %v53842_v36  ;;  %48108 = vmatprep.mubr.msk.f32.mxu1 %vm48938_vm3, %v54942_v52  ;;  %v43299_v37 = vsub.f32 %v53934_v48, %v53952_v13 }
 0x590   : > { %24933 = vmatmul.mubr.f32.vlgmr.msra.gmra.mrb[0].mxu0 %v55341_v54  ;;  %48111 = vmatprep.subr.mxu1 %v54942_v52 }
 0x591   : > { %24942 = vmatpush1.msra.mxu0 %v53762_v53  ;;  %v34742_v1 = vpop.f32.mrb[184].mxu1  ;;  %25005 = vmatprep.mubr.f32.mxu0 %v54942_v52  ;;  %v55354_v53 = vand.u32 4294901760, %v53853_v5  ;;  %v43774_v5 = vsub.f32 %v53942_v28, %v54911_v4 }
 0x592   : > { %48109 = vmatmul.mubr.f32.vlgmr.msra.gmra.mrb[34].mxu1 %v53860_v22  ;;  %v34743_v31 = vadd.f32 %v34742_v1, %v34669_v7  ;;  %v47845_v47 = vpop.f32.mrb[185].mxu1  ;;  %25485 = vmatprep.subr.mxu0 %v53901_v61 }
 0x593   : > { %48112 = vmatpush3.msra.mxu1 %v55354_v53  ;;  %48113 = vmatprep.mubr.msk.f32.mxu1 %vm48938_vm3, %v54942_v52  ;;  %v25566_v47 = vand.u32 4294901760, %v25565_v34  ;;  %v44152_v34 = vpop.permute.xlu0 %44151 }
 0x594   : > { %48116 = vmatprep.subr.mxu1 %v54942_v52 }
 0x595   : > { %v34814_v7 = vpop.f32.mrb[186].mxu1 }
 0x596   : > { %v34815_v1 = vadd.f32 %v34814_v7, %v34743_v31  ;;  %48114 = vmatmul.mubr.f32.vlgmr.msra.gmra.mrb[36].mxu1 %v53835_v15  ;;  %v47850_v38 = vpop.f32.mrb[187].mxu1  ;;  %v53985_v31 = vand.u32 4294901760, %v43299_v37 }
 0x597   : > { %48117 = vmatpush3.msra.mxu1 %v53842_v36  ;;  %48118 = vmatprep.mubr.msk.f32.mxu1 %vm48938_vm3, %v54942_v52  ;;  %v25571_v36 = vsub.f32 %v53947_v20, %v54910_v56  ;;  %v44156_v56 = vsel %vm44153_vm4, %v53540_v21, %v44152_v34  ;;  %vm45089_vm4 = vcmask 965632  }
 0x598   : > { %v53976_v53 = vadd.f32 %v34815_v1, %v53883_v41  ;;  %25007 = vmatmul.mubr.f32.vlgmr.msra.gmra.mrb[0].mxu0 %v55341_v54  ;;  %48121 = vmatprep.subr.mxu1 %v54942_v52  ;;  %55355 = vst [vmem:[#allocation81_spill] sm:$0xff] %v53985_v31  ;;  %v43775_v54 = vand.u32 4294901760, %v43774_v5  ;;  %v44163_v5 = vsel %vm225_vm2, %v44156_v56, 0 }
 0x599   : > { %25487 = vmatpush1.msra.mxu0 %v53931_v29  ;;  %25550 = vmatprep.mubr.f32.mxu0 %v54942_v52  ;;  %v35380_v38 = vpop.f32.mrb[188].mxu1  ;;  %v25572_v7 = vand.u32 4294901760, %v25571_v36 }
 0x59a   : > { %48119 = vmatmul.mubr.f32.vlgmr.msra.gmra.mrb[38].mxu1 %v53835_v15  ;;  %25567 = vmatprep.subr.mxu0 %v25566_v47  ;;  %v47855_v41 = vpop.f32.mrb[189].mxu1  ;;  %v44157_v47 = vsel %vm222_vm0, %v53516_v42, 0 }
 0x59b   : > { %48122 = vmatpush3.msra.mxu1 %v53928_v39  ;;  %48123 = vmatprep.mubr.msk.f32.mxu1 %vm48938_vm3, %v54942_v52  ;;  %v55356_v41 = vld [vmem:[#allocation35_spill] sm:$0xff]  ;;  %v54003_v36 = vand.u32 4294901760, %v44157_v47 }
 0x59c   : > { %48126 = vmatprep.subr.mxu1 %v54942_v52 }
 0x59d   : > { %v35456_v1 = vpop.f32.mrb[190].mxu1  ;;  %v54014_v34 = vsub.f32 %v44157_v47, %v54003_v36 }
 0x59e   : > { %48124 = vmatmul.mubr.f32.vlgmr.msra.gmra.mrb[40].mxu1 %v53985_v31  ;;  %v35457_v37 = vadd.f32 %v35456_v1, %v35380_v38  ;;  %v47860_v4 = vpop.f32.mrb[191].mxu1  ;;  %v54010_v38 = vand.u32 4294901760, %v44163_v5  ;;  %v45080_v1 = vpop.permute.xlu1 %45079 }
 0x59f   : > { %48127 = vmatpush3.msra.mxu1 %v43775_v54  ;;  %48128 = vmatprep.mubr.msk.f32.mxu1 %vm48938_vm3, %v54942_v52 }
 0x5a0   : > { %25556 = vmatmul.mubr.f32.vlgmr.msra.gmra.mrb[0].mxu0 %v55356_v41  ;;  %48131 = vmatprep.subr.mxu1 %v54942_v52  ;;  %v55357_v41 = vld [vmem:[#allocation111_spill] sm:$0xff] }
 0x5a1   : > { %25573 = vmatpush1.msra.mxu0 %v25572_v7  ;;  %25636 = vmatprep.mubr.f32.mxu0 %v54942_v52  ;;  %v35530_v21 = vpop.f32.mrb[192].mxu1 }
 0x5a2   : > { %25646 = vmatprep.subr.mxu0 %v53918_v12  ;;  %48129 = vmatmul.mubr.f32.vlgmr.msra.gmra.mrb[42].mxu1 %v53921_v57  ;;  %v35531_v42 = vadd.f32 %v35530_v21, %v35457_v37  ;;  %v47865_v4 = vpop.f32.mrb[193].mxu1  ;;  %v54021_v37 = vsub.f32 %v44163_v5, %v54010_v38  ;;  %v54028_v21 = vand.u32 4294901760, %v54014_v34 }
 0x5a3   : > { %48132 = vmatpush3.msra.mxu1 %v53942_v28  ;;  %48133 = vmatprep.mubr.msk.f32.mxu1 %vm48938_vm3, %v54942_v52 }
 0x5a4   : > { %48136 = vmatprep.subr.mxu1 %v54942_v52  ;;  %v54916_v5 = vand.u32 4294901760, %v54021_v37  ;;  %v44235_v31 = vsub.f32 %v54014_v34, %v54028_v21 }
 0x5a5   : > { %v35604_v56 = vpop.f32.mrb[194].mxu1 }
 0x5a6   : > { %48134 = vmatmul.mubr.f32.vlgmr.msra.gmra.mrb[44].mxu1 %v53934_v48  ;;  %v35605_v54 = vadd.f32 %v35604_v56, %v35531_v42  ;;  %v47870_v7 = vpop.f32.mrb[195].mxu1  ;;  %v55358_v56 = vand.u32 4294901760, %v53942_v28  ;;  %v44710_v28 = vsub.f32 %v54021_v37, %v54916_v5 }
 0x5a7   : > { %48137 = vmatpush3.msra.mxu1 %v53928_v39  ;;  %48138 = vmatprep.mubr.msk.f32.mxu1 %vm48938_vm3, %v54942_v52  ;;  %v54038_v7 = vpop.permute.xlu1 %45085 }
 0x5a8   : > { %25638 = vmatmul.mubr.f32.vlgmr.msra.gmra.mrb[0].mxu0 %v55357_v41  ;;  %48141 = vmatprep.subr.mxu1 %v54942_v52  ;;  %55359 = vst [vmem:[#allocation76_spill] sm:$0xff] %v54038_v7 }
 0x5a9   : > { %25649 = vmatpush1.msra.mxu0 %v53947_v20  ;;  %v35678_v47 = vpop.f32.mrb[196].mxu1  ;;  %25712 = vmatprep.mubr.f32.mxu0 %v54942_v52 }
 0x5aa   : > { %25722 = vmatprep.subr.mxu0 %v53901_v61  ;;  %48139 = vmatmul.mubr.f32.vlgmr.msra.gmra.mrb[46].mxu1 %v53952_v13  ;;  %v35679_v42 = vadd.f32 %v35678_v47, %v35605_v54  ;;  %v47875_v4 = vpop.f32.mrb[197].mxu1  ;;  %v55360_v47 = vld [vmem:[#allocation96_spill] sm:$0xff] }
 0x5ab   : > { %48142 = vmatpush3.msra.mxu1 %v55358_v56  ;;  %48143 = vmatprep.mubr.msk.f32.mxu1 %vm48938_vm3, %v54942_v52  ;;  %v55361_v4 = vld [vmem:[#allocation97_spill] sm:$0xff] }
 0x5ac   : > { %48146 = vmatprep.subr.mxu1 %v54942_v52  ;;  %v26410_v56 = vsel %vm55362_vm6, %v55361_v4, %v55360_v47 }
 0x5ad   : > { %v35750_v48 = vpop.f32.mrb[198].mxu1 }
 0x5ae   : > { %v35751_v22 = vadd.f32 %v35750_v48, %v35679_v42  ;;  %48144 = vmatmul.mubr.f32.vlgmr.msra.gmra.mrb[48].mxu1 %v53921_v57  ;;  %v47880_v54 = vpop.f32.mrb[199].mxu1  ;;  %v55363_v48 = vld [vmem:[#allocation112_spill] sm:$0xff]  ;;  %v54059_v42 = vand.u32 4294901760, %v44235_v31 }
 0x5af   : > { %48147 = vmatpush3.msra.mxu1 %v53928_v39  ;;  %48148 = vmatprep.mubr.msk.f32.mxu1 %vm48938_vm3, %v54942_v52  ;;  %v55364_v54 = vand.u32 4294901760, %v53918_v12 }
 0x5b0   : > { %v54053_v13 = vadd.f32 %v35751_v22, %v53976_v53  ;;  %25715 = vmatmul.mubr.f32.vlgmr.msra.gmra.mrb[0].mxu0 %v55363_v48  ;;  %48151 = vmatprep.subr.mxu1 %v54942_v52  ;;  %v45088_v22 = vpop.permute.xlu1 %45087  ;;  %v26416_v53 = vsel %vm225_vm2, %v26410_v56, 0  ;;  %v44711_v48 = vand.u32 4294901760, %v44710_v28  ;;  %v55365_v56 = vld [vmem:[#allocation98_spill] sm:$0xff]  ;;  %v45093_v28 = vsel %vm222_vm0, %v45080_v1, 0 }
 0x5b1   : > { %25724 = vmatpush1.msra.mxu0 %v53931_v29  ;;  %25787 = vmatprep.mubr.f32.mxu0 %v54942_v52  ;;  %v36316_v39 = vpop.f32.mrb[200].mxu1  ;;  %v45092_v12 = vsel %vm45089_vm4, %v54038_v7, %v45088_v22  ;;  %v55368_v7 = vand.u32 4294901760, %v53947_v20  ;;  %v46015_v20 = vld [vmem:[%s54649_s2] sm:$0xff]  ;;  %vm55377_vm0 = vcmask 318464  }
 0x5b2   : > { %25800 = vmatprep.subr.mxu0 %v55364_v54  ;;  %48149 = vmatmul.mubr.f32.vlgmr.msra.gmra.mrb[50].mxu1 %v53921_v57  ;;  %v47885_v47 = vpop.f32.mrb[201].mxu1  ;;  %v54071_v54 = vand.u32 4294901760, %v26416_v53  ;;  %v26409_v57 = vsel %vm55366_vm12, %v55365_v56, %v55361_v4  ;;  %v45099_v22 = vsel %vm225_vm2, %v45092_v12, 0 }
 0x5b3   : > { %48152 = vmatpush3.msra.mxu1 %v54010_v38  ;;  %48153 = vmatprep.mubr.msk.f32.mxu1 %vm48938_vm3, %v54942_v52 }
 0x5b4   : > { %48156 = vmatprep.subr.mxu1 %v54942_v52  ;;  %v54087_v4 = vsub.f32 %v26416_v53, %v54071_v54 }
 0x5b5   : > { %v36392_v31 = vpop.f32.mrb[202].mxu1 }
 0x5b6   : > { %48154 = vmatmul.mubr.f32.vlgmr.msra.gmra.mrb[52].mxu1 %v54059_v42  ;;  %v36393_v47 = vadd.f32 %v36392_v31, %v36316_v39  ;;  %v47890_v5 = vpop.f32.mrb[203].mxu1  ;;  %v26414_v39 = vsel %vm225_vm2, %v26409_v57, 0  ;;  %v54921_v56 = vand.u32 4294901760, %v54087_v4 }
 0x5b7   : > { %48157 = vmatpush3.msra.mxu1 %v44711_v48  ;;  %48158 = vmatprep.mubr.msk.f32.mxu1 %vm48938_vm3, %v54942_v52  ;;  %v54103_v57 = vand.u32 4294901760, %v26414_v39 }
 0x5b8   : > { %25791 = vmatmul.mubr.f32.vlgmr.msra.gmra.mrb[0].mxu0 %v55367_v24  ;;  %48161 = vmatprep.subr.mxu1 %v54942_v52  ;;  %v54092_v24 = vand.u32 4294901760, %v45093_v28 }
 0x5b9   : > { %25804 = vmatpush1.msra.mxu0 %v55368_v7  ;;  %25867 = vmatprep.mubr.f32.mxu0 %v54942_v52  ;;  %v36466_v5 = vpop.f32.mrb[204].mxu1  ;;  %v54100_v7 = vand.u32 4294901760, %v45099_v22 }
 0x5ba   : > { %25876 = vmatprep.subr.mxu0 %v53901_v61  ;;  %48159 = vmatmul.mubr.f32.vlgmr.msra.gmra.mrb[54].mxu1 %v54003_v36  ;;  %55369 = vst [vmem:[#allocation87_spill] sm:$0xff] %v54092_v24  ;;  %v36467_v1 = vadd.f32 %v36466_v5, %v36393_v47  ;;  %v47895_v48 = vpop.f32.mrb[205].mxu1  ;;  %v48962_v61 = vmov 0   ;;  %v54106_v31 = vsub.f32 %v45093_v28, %v54092_v24 }
 0x5bb   : > { %48162 = vmatpush3.msra.mxu1 %v54021_v37  ;;  %48163 = vmatprep.mubr.msk.f32.mxu1 %vm48938_vm3, %v54942_v52  ;;  %v54114_v5 = vsub.f32 %v45099_v22, %v54100_v7  ;;  %v54119_v28 = vsub.f32 %v26414_v39, %v54103_v57 }
 0x5bc   : > { %48166 = vmatprep.subr.mxu1 %v54942_v52  ;;  %48874 = vset.pattern.permute.xlu0 %v48962_v61  ;;  %55370 = vst [vmem:[#allocation79_spill] sm:$0xff] %v54106_v31  ;;  %v54124_v48 = vand.u32 4294901760, %v54106_v31  ;;  %v26501_v61 = vsub.f32 %v54087_v4, %v54921_v56 }
 0x5bd   : > { %v36540_v53 = vpop.f32.mrb[206].mxu1  ;;  %46018 = vperm.xlu0 %48874, %v46015_v20   ;;  %v45645_v39 = vand.u32 4294901760, %v54114_v5 }
 0x5be   : > { %48164 = vmatmul.mubr.f32.vlgmr.msra.gmra.mrb[56].mxu1 %v54014_v34  ;;  %v36541_v12 = vadd.f32 %v36540_v53, %v36467_v1  ;;  %v47900_v47 = vpop.f32.mrb[207].mxu1  ;;  %55371 = vst [vmem:[#allocation108_spill] sm:$0xff] %v54124_v48  ;;  %v54922_v53 = vand.u32 4294901760, %v54119_v28 }
 0x5bf   : > { %48167 = vmatpush3.msra.mxu1 %v54010_v38  ;;  %48168 = vmatprep.mubr.msk.f32.mxu1 %vm48938_vm3, %v54942_v52  ;;  %v45171_v47 = vsub.f32 %v54106_v31, %v54124_v48 }
 0x5c0   : > { %25869 = vmatmul.mubr.f32.vlgmr.msra.gmra.mrb[0].mxu0 %v55357_v41  ;;  %48171 = vmatprep.subr.mxu1 %v54942_v52 }
 0x5c1   : > { %25878 = vmatpush1.msra.mxu0 %v53931_v29  ;;  %v36614_v1 = vpop.f32.mrb[208].mxu1  ;;  %25941 = vmatprep.mubr.f32.mxu0 %v54942_v52  ;;  %v55372_v29 = vand.u32 4294901760, %v54021_v37  ;;  %v45646_v37 = vsub.f32 %v54114_v5, %v45645_v39 }
 0x5c2   : > { %48169 = vmatmul.mubr.f32.vlgmr.msra.gmra.mrb[58].mxu1 %v54028_v21  ;;  %v36615_v20 = vadd.f32 %v36614_v1, %v36541_v12  ;;  %v47905_v22 = vpop.f32.mrb[209].mxu1  ;;  %26421 = vmatprep.subr.mxu0 %v54071_v54 }
 0x5c3   : > { %48172 = vmatpush3.msra.mxu1 %v55372_v29  ;;  %48173 = vmatprep.mubr.msk.f32.mxu1 %vm48938_vm3, %v54942_v52  ;;  %v26502_v22 = vand.u32 4294901760, %v26501_v61 }
 0x5c4   : > { %48176 = vmatprep.subr.mxu1 %v54942_v52 }
 0x5c5   : > { %v36686_v12 = vpop.f32.mrb[210].mxu1 }
 0x5c6   : > { %v36687_v1 = vadd.f32 %v36686_v12, %v36615_v20  ;;  %48174 = vmatmul.mubr.f32.vlgmr.msra.gmra.mrb[60].mxu1 %v54003_v36  ;;  %v47910_v56 = vpop.f32.mrb[211].mxu1  ;;  %v54153_v20 = vand.u32 4294901760, %v45171_v47  ;;  %v55373_v47 = vld [vmem:[#allocation118_spill] sm:$0xff] }
 0x5c7   : > { %48177 = vmatpush3.msra.mxu1 %v54010_v38  ;;  %48178 = vmatprep.mubr.msk.f32.mxu1 %vm48938_vm3, %v54942_v52  ;;  %v26507_v56 = vsub.f32 %v54119_v28, %v54922_v53 }
 0x5c8   : > { %v36692_v29 = vadd.f32 %v36687_v1, %v54053_v13  ;;  %25943 = vmatmul.mubr.f32.vlgmr.msra.gmra.mrb[0].mxu0 %v55357_v41  ;;  %48181 = vmatprep.subr.mxu1 %v54942_v52  ;;  %v45647_v13 = vand.u32 4294901760, %v45646_v37 }
 0x5c9   : > { %26423 = vmatpush1.msra.mxu0 %v54103_v57  ;;  %26486 = vmatprep.mubr.f32.mxu0 %v54942_v52  ;;  %v37252_v38 = vpop.f32.mrb[212].mxu1  ;;  %v26508_v41 = vand.u32 4294901760, %v26507_v56 }
 0x5ca   : > { %48179 = vmatmul.mubr.f32.vlgmr.msra.gmra.mrb[62].mxu1 %v54003_v36  ;;  %26503 = vmatprep.subr.mxu0 %v26502_v22  ;;  %v47915_v61 = vpop.f32.mrb[213].mxu1 }
 0x5cb   : > { %48182 = vmatpush3.msra.mxu1 %v54100_v7  ;;  %48183 = vmatprep.mubr.msk.f32.mxu1 %vm48938_vm3, %v54942_v52 }
 0x5cc   : > { %48186 = vmatprep.subr.mxu1 %v54942_v52 }
 0x5cd   : > { %v37328_v12 = vpop.f32.mrb[214].mxu1 }
 0x5ce   : > { %48184 = vmatmul.mubr.f32.vlgmr.msra.gmra.mrb[64].mxu1 %v54153_v20  ;;  %v37329_v1 = vadd.f32 %v37328_v12, %v37252_v38  ;;  %v47920_v53 = vpop.f32.mrb[215].mxu1 }
 0x5cf   : > { %48187 = vmatpush3.msra.mxu1 %v45647_v13  ;;  %48188 = vmatprep.mubr.msk.f32.mxu1 %vm48938_vm3, %v54942_v52  ;;  %v55374_v13 = vld [vmem:[#allocation95_spill] sm:$0xff] }
 0x5d0   : > { %26492 = vmatmul.mubr.f32.vlgmr.msra.gmra.mrb[0].mxu0 %v55373_v47  ;;  %48191 = vmatprep.subr.mxu1 %v54942_v52 }
 0x5d1   : > { %26509 = vmatpush1.msra.mxu0 %v26508_v41  ;;  %26572 = vmatprep.mubr.f32.mxu0 %v54942_v52  ;;  %v37402_v22 = vpop.f32.mrb[216].mxu1 }
 0x5d2   : > { %26582 = vmatprep.subr.mxu0 %v54087_v4  ;;  %48189 = vmatmul.mubr.f32.vlgmr.msra.gmra.mrb[66].mxu1 %v54092_v24  ;;  %v37403_v37 = vadd.f32 %v37402_v22, %v37329_v1  ;;  %v47925_v56 = vpop.f32.mrb[217].mxu1 }
 0x5d3   : > { %48192 = vmatpush3.msra.mxu1 %v54114_v5  ;;  %48193 = vmatprep.mubr.msk.f32.mxu1 %vm48938_vm3, %v54942_v52  ;;  %v55376_v56 = vld [vmem:[#allocation2_spill] sm:$0xff] }
 0x5d4   : > { %48196 = vmatprep.subr.mxu1 %v54942_v52 }
 0x5d5   : > { %v37476_v53 = vpop.f32.mrb[218].mxu1 }
 0x5d6   : > { %48194 = vmatmul.mubr.f32.vlgmr.msra.gmra.mrb[68].mxu1 %v54106_v31  ;;  %v37477_v38 = vadd.f32 %v37476_v53, %v37403_v37  ;;  %v47930_v61 = vpop.f32.mrb[219].mxu1  ;;  %v55375_v37 = vld [vmem:[#allocation100_spill] sm:$0xff] }
 0x5d7   : > { %48197 = vmatpush3.msra.mxu1 %v54100_v7  ;;  %48198 = vmatprep.mubr.msk.f32.mxu1 %vm48938_vm3, %v54942_v52  ;;  %v27346_v53 = vsel %vm55377_vm0, %v55376_v56, %v55375_v37 }
 0x5d8   : > { %26574 = vmatmul.mubr.f32.vlgmr.msra.gmra.mrb[0].mxu0 %v55374_v13  ;;  %48201 = vmatprep.subr.mxu1 %v54942_v52 }
 0x5d9   : > { %26585 = vmatpush1.msra.mxu0 %v54119_v28  ;;  %v37550_v5 = vpop.f32.mrb[220].mxu1  ;;  %26648 = vmatprep.mubr.f32.mxu0 %v54942_v52 }
 0x5da   : > { %26658 = vmatprep.subr.mxu0 %v54071_v54  ;;  %48199 = vmatmul.mubr.f32.vlgmr.msra.gmra.mrb[70].mxu1 %v54124_v48  ;;  %v37551_v41 = vadd.f32 %v37550_v5, %v37477_v38  ;;  %v47935_v12 = vpop.f32.mrb[221].mxu1  ;;  %v55378_v38 = vld [vmem:[#allocation116_spill] sm:$0xff]  ;;  %v55379_v5 = vand.u32 4294901760, %v54087_v4  ;;  %v55383_v48 = vand.u32 4294901760, %v54119_v28 }
 0x5db   : > { %48202 = vmatpush3.msra.mxu1 %v45645_v39  ;;  %48203 = vmatprep.mubr.msk.f32.mxu1 %vm48938_vm3, %v54942_v52 }
 0x5dc   : > { %48206 = vmatprep.subr.mxu1 %v54942_v52 }
 0x5dd   : > { %v37622_v1 = vpop.f32.mrb[222].mxu1 }
 0x5de   : > { %v37623_v47 = vadd.f32 %v37622_v1, %v37551_v41  ;;  %48204 = vmatmul.mubr.f32.vlgmr.msra.gmra.mrb[72].mxu1 %v54092_v24  ;;  %v47940_v22 = vpop.f32.mrb[223].mxu1  ;;  %v27352_v41 = vsel %vm225_vm2, %v27346_v53, 0 }
 0x5df   : > { %48207 = vmatpush3.msra.mxu1 %v54100_v7  ;;  %48208 = vmatprep.mubr.msk.f32.mxu1 %vm48938_vm3, %v54942_v52  ;;  %v54199_v1 = vand.u32 4294901760, %v27352_v41  ;;  %vm55381_vm3 = vmmov %vm55377_vm0 }
 0x5e0   : > { %v37628_v39 = vadd.f32 %v37623_v47, %v36692_v29  ;;  %26651 = vmatmul.mubr.f32.vlgmr.msra.gmra.mrb[0].mxu0 %v55378_v38  ;;  %v55380_v47 = vld [vmem:[#allocation101_spill] sm:$0xff] }
 0x5e1   : > { %26660 = vmatpush1.msra.mxu0 %v54103_v57  ;;  %26723 = vmatprep.mubr.f32.mxu0 %v54942_v52  ;;  %v38188_v61 = vpop.f32.mrb[224].mxu1  ;;  %v27345_v37 = vsel %vm55381_vm3, %v55380_v47, %v55376_v56  ;;  %v55382_v38 = vld [vmem:[#allocation117_spill] sm:$0xff] }
 0x5e2   : > { %26736 = vmatprep.subr.mxu0 %v55379_v5  ;;  %48209 = vmatmul.mubr.f32.vlgmr.msra.gmra.mrb[74].mxu1 %v54092_v24  ;;  %v47945_v7 = vpop.f32.mrb[225].mxu1  ;;  %v27435_v5 = vsub.f32 %v27352_v41, %v54199_v1  ;;  %v27350_v53 = vsel %vm225_vm2, %v27345_v37, 0 }
 0x5e5   : > { %v38264_v12 = vpop.f32.mrb[226].mxu1 }
 0x5e6   : > { %v38265_v22 = vadd.f32 %v38264_v12, %v38188_v61  ;;  %v47950_v29 = vpop.f32.mrb[227].mxu1  ;;  %v54211_v12 = vand.u32 4294901760, %v27350_v53 }
 0x5e8   : > { %26727 = vmatmul.mubr.f32.vlgmr.msra.gmra.mrb[0].mxu0 %v55382_v38  ;;  %v27436_v38 = vand.u32 4294901760, %v27435_v5  ;;  %v27441_v28 = vsub.f32 %v27350_v53, %v54211_v12 }
 0x5e9   : > { %26740 = vmatpush1.msra.mxu0 %v55383_v48  ;;  %26803 = vmatprep.mubr.f32.mxu0 %v54942_v52  ;;  %v38338_v4 = vpop.f32.mrb[228].mxu1 }
 0x5ea   : > { %26812 = vmatprep.subr.mxu0 %v54071_v54  ;;  %v38339_v61 = vadd.f32 %v38338_v4, %v38265_v22  ;;  %v47955_v7 = vpop.f32.mrb[229].mxu1  ;;  %v27437_v54 = vsub.f32 %v27435_v5, %v27436_v38  ;;  %v27442_v22 = vand.u32 4294901760, %v27441_v28 }
 0x5ed   : > { %v38412_v29 = vpop.f32.mrb[230].mxu1 }
 0x5ee   : > { %v38413_v56 = vadd.f32 %v38412_v29, %v38339_v61  ;;  %v47960_v47 = vpop.f32.mrb[231].mxu1  ;;  %v27438_v61 = vand.u32 4294901760, %v27437_v54 }
 0x5f0   : > { %26805 = vmatmul.mubr.f32.vlgmr.msra.gmra.mrb[0].mxu0 %v55374_v13 }
 0x5f1   : > { %26814 = vmatpush1.msra.mxu0 %v54103_v57  ;;  %v38486_v48 = vpop.f32.mrb[232].mxu1  ;;  %26877 = vmatprep.mubr.f32.mxu0 %v54942_v52  ;;  %v27443_v57 = vsub.f32 %v27441_v28, %v27442_v22 }
 0x5f2   : > { %v38487_v41 = vadd.f32 %v38486_v48, %v38413_v56  ;;  %v47965_v37 = vpop.f32.mrb[233].mxu1  ;;  %27357 = vmatprep.subr.mxu0 %v54199_v1 }
 0x5f3   : > { %v27444_v48 = vand.u32 4294901760, %v27443_v57 }
 0x5f5   : > { %v38558_v4 = vpop.f32.mrb[234].mxu1 }
 0x5f6   : > { %v38559_v7 = vadd.f32 %v38558_v4, %v38487_v41  ;;  %v47970_v29 = vpop.f32.mrb[235].mxu1 }
 0x5f8   : > { %v38564_v47 = vadd.f32 %v38559_v7, %v37628_v39  ;;  %26879 = vmatmul.mubr.f32.vlgmr.msra.gmra.mrb[0].mxu0 %v55374_v13 }
 0x5f9   : > { %27359 = vmatpush1.msra.mxu0 %v54211_v12  ;;  %27422 = vmatprep.mubr.f32.mxu0 %v54942_v52  ;;  %v39124_v53 = vpop.f32.mrb[236].mxu1 }
 0x5fa   : > { %27439 = vmatprep.subr.mxu0 %v27438_v61  ;;  %v47975_v56 = vpop.f32.mrb[237].mxu1 }
 0x5fb   : > { %v55384_v56 = vld [vmem:[#allocation102_spill] sm:$0xff] }
 0x5fd   : > { %v39200_v37 = vpop.f32.mrb[238].mxu1 }
 0x5fe   : > { %v39201_v31 = vadd.f32 %v39200_v37, %v39124_v53  ;;  %v47980_v24 = vpop.f32.mrb[239].mxu1 }
 0x600   : > { %27428 = vmatmul.mubr.f32.vlgmr.msra.gmra.mrb[0].mxu0 %v52414_v27 }
 0x601   : > { %27445 = vmatpush1.msra.mxu0 %v27444_v48  ;;  %27508 = vmatprep.mubr.f32.mxu0 %v54942_v52  ;;  %v39274_v39 = vpop.f32.mrb[240].mxu1 }
 0x602   : > { %27518 = vmatprep.subr.mxu0 %v27435_v5  ;;  %v39275_v13 = vadd.f32 %v39274_v39, %v39201_v31  ;;  %v47985_v41 = vpop.f32.mrb[241].mxu1  ;;  %v55385_v5 = vld [vmem:[#allocation5_spill] sm:$0xff] }
 0x603   : > { %v28282_v31 = vsel %vm28280_vm13, %v55385_v5, %v55384_v56 }
 0x604   : > { %v28288_v39 = vsel %vm225_vm2, %v28282_v31, 0 }
 0x605   : > { %v39348_v54 = vpop.f32.mrb[242].mxu1  ;;  %v54233_v41 = vand.u32 4294901760, %v28288_v39 }
 0x606   : > { %v39349_v4 = vadd.f32 %v39348_v54, %v39275_v13  ;;  %v47990_v7 = vpop.f32.mrb[243].mxu1 }
 0x607   : > { %v55386_v7 = vld [vmem:[#allocation10_spill] sm:$0xff] }
 0x608   : > { %27510 = vmatmul.mubr.f32.vlgmr.msra.gmra.mrb[0].mxu0 %v52354_v14 }
 0x609   : > { %27521 = vmatpush1.msra.mxu0 %v27441_v28  ;;  %v39422_v61 = vpop.f32.mrb[244].mxu1  ;;  %27584 = vmatprep.mubr.f32.mxu0 %v54942_v52 }
 0x60a   : > { %27594 = vmatprep.subr.mxu0 %v54199_v1  ;;  %v39423_v24 = vadd.f32 %v39422_v61, %v39349_v4  ;;  %v47995_v27 = vpop.f32.mrb[245].mxu1  ;;  %v55387_v61 = vld [vmem:[#allocation99_spill] sm:$0xff] }
 0x60d   : > { %v39494_v29 = vpop.f32.mrb[246].mxu1 }
 0x60e   : > { %v39495_v57 = vadd.f32 %v39494_v29, %v39423_v24  ;;  %v48000_v53 = vpop.f32.mrb[247].mxu1 }
 0x610   : > { %v39500_v48 = vadd.f32 %v39495_v57, %v38564_v47  ;;  %27587 = vmatmul.mubr.f32.vlgmr.msra.gmra.mrb[0].mxu0 %v52367_v17  ;;  %v28281_v47 = vsel %vm28280_vm13, %v55386_v7, %v55385_v5 }
 0x611   : > { %27596 = vmatpush1.msra.mxu0 %v54211_v12  ;;  %27659 = vmatprep.mubr.f32.mxu0 %v54942_v52  ;;  %v40048_v28 = vpop.f32.mrb[248].mxu1  ;;  %v28286_v24 = vsel %vm225_vm2, %v28281_v47, 0 }
 0x612   : > { %27672 = vmatprep.subr.mxu0 %v27436_v38  ;;  %v48005_v37 = vpop.f32.mrb[249].mxu1  ;;  %v28371_v38 = vsub.f32 %v28288_v39, %v54233_v41  ;;  %v54243_v57 = vand.u32 4294901760, %v28286_v24 }
 0x614   : > { %v28372_v5 = vand.u32 4294901760, %v28371_v38 }
 0x615   : > { %v40124_v13 = vpop.f32.mrb[250].mxu1 }
 0x616   : > { %v40125_v54 = vadd.f32 %v40124_v13, %v40048_v28  ;;  %v48010_v4 = vpop.f32.mrb[251].mxu1 }
 0x618   : > { %27663 = vmatmul.mubr.f32.vlgmr.msra.gmra.mrb[0].mxu0 %v55387_v61 }
 0x619   : > { %27676 = vmatpush1.msra.mxu0 %v27442_v22  ;;  %27739 = vmatprep.mubr.f32.mxu0 %v54942_v52  ;;  %v40198_v17 = vpop.f32.mrb[252].mxu1  ;;  %v28377_v22 = vsub.f32 %v28286_v24, %v54243_v57 }
 0x61a   : > { %27748 = vmatprep.subr.mxu0 %v54199_v1  ;;  %v40199_v27 = vadd.f32 %v40198_v17, %v40125_v54  ;;  %v48015_v29 = vpop.f32.mrb[253].mxu1  ;;  %v28373_v1 = vsub.f32 %v28371_v38, %v28372_v5 }
 0x61b   : > { %v28378_v13 = vand.u32 4294901760, %v28377_v22 }
 0x61c   : > { %v28374_v7 = vand.u32 4294901760, %v28373_v1 }
 0x61d   : > { %v40272_v53 = vpop.f32.mrb[254].mxu1 }
 0x61e   : > { %v40273_v56 = vadd.f32 %v40272_v53, %v40199_v27  ;;  %v48020_v31 = vpop.f32.mrb[255].mxu1 }
 0x61f   : > { %v55388_v31 = vld [vmem:[#allocation3_spill] sm:$0xff] }
 0x620   : > { %27741 = vmatmul.mubr.f32.vlgmr.msra.gmra.mrb[0].mxu0 %v52354_v14 }
 0x621   : > { %27750 = vmatpush1.msra.mxu0 %v54211_v12  ;;  %v40346_v28 = vpop.f32.mrb[0].mxu1  ;;  %27813 = vmatprep.mubr.f32.mxu0 %v54942_v52  ;;  %v28379_v12 = vsub.f32 %v28377_v22, %v28378_v13 }
 0x622   : > { %v40347_v37 = vadd.f32 %v40346_v28, %v40273_v56  ;;  %v48025_v39 = vpop.f32.mrb[1].mxu1  ;;  %28293 = vmatprep.subr.mxu0 %v54233_v41 }
 0x623   : > { %v28380_v27 = vand.u32 4294901760, %v28379_v12 }
 0x625   : > { %v40418_v54 = vpop.f32.mrb[2].mxu1 }
 0x626   : > { %v40419_v4 = vadd.f32 %v40418_v54, %v40347_v37  ;;  %v48030_v47 = vpop.f32.mrb[3].mxu1  ;;  %v55389_v54 = vld [vmem:[#allocation39_spill] sm:$0xff] }
 0x628   : > { %v40424_v61 = vadd.f32 %v40419_v4, %v39500_v48  ;;  %27815 = vmatmul.mubr.f32.vlgmr.msra.gmra.mrb[0].mxu0 %v52354_v14 }
 0x629   : > { %28295 = vmatpush1.msra.mxu0 %v54243_v57  ;;  %28358 = vmatprep.mubr.f32.mxu0 %v54942_v52  ;;  %v40971_v17 = vpop.f32.mrb[4].mxu1 }
 0x62a   : > { %28375 = vmatprep.subr.mxu0 %v28374_v7  ;;  %v48035_v24 = vpop.f32.mrb[5].mxu1 }
 0x62d   : > { %v41047_v29 = vpop.f32.mrb[6].mxu1 }
 0x62e   : > { %v41048_v53 = vadd.f32 %v41047_v29, %v40971_v17  ;;  %v48040_v56 = vpop.f32.mrb[7].mxu1 }
 0x62f   : > { %v55392_v56 = vld [vmem:[#allocation32_spill] sm:$0xff] }
 0x630   : > { %28364 = vmatmul.mubr.f32.vlgmr.msra.gmra.mrb[0].mxu0 %v55388_v31 }
 0x631   : > { %28381 = vmatpush1.msra.mxu0 %v28380_v27  ;;  %28444 = vmatprep.mubr.f32.mxu0 %v54942_v52  ;;  %v41121_v48 = vpop.f32.mrb[8].mxu1  ;;  %v55390_v27 = vld [vmem:[#allocation6_spill] sm:$0xff] }
 0x632   : > { %28454 = vmatprep.subr.mxu0 %v28371_v38  ;;  %v41122_v14 = vadd.f32 %v41121_v48, %v41048_v53  ;;  %v48045_v28 = vpop.f32.mrb[9].mxu1  ;;  %v55391_v38 = vld [vmem:[#allocation7_spill] sm:$0xff] }
 0x633   : > { %v29218_v29 = vsel %vm29216_vm1, %v55391_v38, %v55390_v27 }
 0x634   : > { %v29224_v48 = vsel %vm225_vm2, %v29218_v29, 0 }
 0x635   : > { %v41195_v37 = vpop.f32.mrb[10].mxu1  ;;  %v54265_v28 = vand.u32 4294901760, %v29224_v48 }
 0x636   : > { %v41196_v39 = vadd.f32 %v41195_v37, %v41122_v14  ;;  %v48050_v1 = vpop.f32.mrb[11].mxu1 }
 0x637   : > { %v55393_v1 = vld [vmem:[#allocation20_spill] sm:$0xff] }
 0x638   : > { %28446 = vmatmul.mubr.f32.vlgmr.msra.gmra.mrb[0].mxu0 %v55389_v54 }
 0x639   : > { %28457 = vmatpush1.msra.mxu0 %v28377_v22  ;;  %v41269_v4 = vpop.f32.mrb[12].mxu1  ;;  %28520 = vmatprep.mubr.f32.mxu0 %v54942_v52 }
 0x63a   : > { %28530 = vmatprep.subr.mxu0 %v54233_v41  ;;  %v41270_v7 = vadd.f32 %v41269_v4, %v41196_v39  ;;  %v48055_v47 = vpop.f32.mrb[13].mxu1  ;;  %v55394_v4 = vld [vmem:[#allocation41_spill] sm:$0xff] }
 0x63d   : > { %v41341_v12 = vpop.f32.mrb[14].mxu1 }
 0x63e   : > { %v41342_v17 = vadd.f32 %v41341_v12, %v41270_v7  ;;  %v48060_v24 = vpop.f32.mrb[15].mxu1 }
 0x640   : > { %v41347_v53 = vadd.f32 %v41342_v17, %v40424_v61  ;;  %28523 = vmatmul.mubr.f32.vlgmr.msra.gmra.mrb[0].mxu0 %v55392_v56  ;;  %v29217_v61 = vsel %vm29216_vm1, %v55393_v1, %v55391_v38 }
 0x641   : > { %28532 = vmatpush1.msra.mxu0 %v54243_v57  ;;  %28595 = vmatprep.mubr.f32.mxu0 %v54942_v52  ;;  %v41894_v22 = vpop.f32.mrb[16].mxu1  ;;  %v29222_v47 = vsel %vm225_vm2, %v29217_v61, 0 }
 0x642   : > { %28608 = vmatprep.subr.mxu0 %v28372_v5  ;;  %v48065_v31 = vpop.f32.mrb[17].mxu1  ;;  %v29307_v5 = vsub.f32 %v29224_v48, %v54265_v28  ;;  %v54275_v24 = vand.u32 4294901760, %v29222_v47 }
 0x644   : > { %v29308_v38 = vand.u32 4294901760, %v29307_v5 }
 0x645   : > { %v41970_v14 = vpop.f32.mrb[18].mxu1 }
 0x646   : > { %v41971_v37 = vadd.f32 %v41970_v14, %v41894_v22  ;;  %v48070_v39 = vpop.f32.mrb[19].mxu1 }
 0x648   : > { %28599 = vmatmul.mubr.f32.vlgmr.msra.gmra.mrb[0].mxu0 %v55394_v4 }
 0x649   : > { %28612 = vmatpush1.msra.mxu0 %v28378_v13  ;;  %28675 = vmatprep.mubr.f32.mxu0 %v54942_v52  ;;  %v42044_v7 = vpop.f32.mrb[20].mxu1  ;;  %v29313_v13 = vsub.f32 %v29222_v47, %v54275_v24 }
 0x64a   : > { %28684 = vmatprep.subr.mxu0 %v54233_v41  ;;  %v42045_v12 = vadd.f32 %v42044_v7, %v41971_v37  ;;  %v48075_v17 = vpop.f32.mrb[21].mxu1  ;;  %v29309_v41 = vsub.f32 %v29307_v5, %v29308_v38 }
 0x64b   : > { %v29314_v14 = vand.u32 4294901760, %v29313_v13 }
 0x64c   : > { %v29310_v1 = vand.u32 4294901760, %v29309_v41 }
 0x64d   : > { %v42118_v27 = vpop.f32.mrb[22].mxu1 }
 0x64e   : > { %v42119_v29 = vadd.f32 %v42118_v27, %v42045_v12  ;;  %v48080_v56 = vpop.f32.mrb[23].mxu1 }
 0x64f   : > { %v55395_v56 = vld [vmem:[#allocation43_spill] sm:$0xff] }
 0x650   : > { %28677 = vmatmul.mubr.f32.vlgmr.msra.gmra.mrb[0].mxu0 %v55389_v54 }
 0x651   : > { %28686 = vmatpush1.msra.mxu0 %v54243_v57  ;;  %v42192_v22 = vpop.f32.mrb[24].mxu1  ;;  %28749 = vmatprep.mubr.f32.mxu0 %v54942_v52  ;;  %v29315_v57 = vsub.f32 %v29313_v13, %v29314_v14 }
 0x652   : > { %v42193_v31 = vadd.f32 %v42192_v22, %v42119_v29  ;;  %v48085_v48 = vpop.f32.mrb[25].mxu1  ;;  %29229 = vmatprep.subr.mxu0 %v54265_v28 }
 0x653   : > { %v29316_v12 = vand.u32 4294901760, %v29315_v57 }
 0x655   : > { %v42264_v37 = vpop.f32.mrb[26].mxu1 }
 0x656   : > { %v42265_v39 = vadd.f32 %v42264_v37, %v42193_v31  ;;  %v48090_v61 = vpop.f32.mrb[27].mxu1  ;;  %v55396_v37 = vld [vmem:[#allocation30_spill] sm:$0xff] }
 0x658   : > { %v42270_v4 = vadd.f32 %v42265_v39, %v41347_v53  ;;  %28751 = vmatmul.mubr.f32.vlgmr.msra.gmra.mrb[0].mxu0 %v55389_v54 }
 0x659   : > { %29231 = vmatpush1.msra.mxu0 %v54275_v24  ;;  %29294 = vmatprep.mubr.f32.mxu0 %v54942_v52  ;;  %v42830_v7 = vpop.f32.mrb[28].mxu1 }
 0x65a   : > { %29311 = vmatprep.subr.mxu0 %v29310_v1  ;;  %v48095_v47 = vpop.f32.mrb[29].mxu1 }
 0x65d   : > { %v42906_v17 = vpop.f32.mrb[30].mxu1 }
 0x65e   : > { %v42907_v27 = vadd.f32 %v42906_v17, %v42830_v7  ;;  %v48100_v29 = vpop.f32.mrb[31].mxu1 }
 0x65f   : > { %v55399_v29 = vld [vmem:[#allocation8_spill] sm:$0xff] }
 0x660   : > { %29300 = vmatmul.mubr.f32.vlgmr.msra.gmra.mrb[0].mxu0 %v55395_v56 }
 0x661   : > { %29317 = vmatpush1.msra.mxu0 %v29316_v12  ;;  %29380 = vmatprep.mubr.f32.mxu0 %v54942_v52  ;;  %v42980_v53 = vpop.f32.mrb[32].mxu1  ;;  %v55397_v12 = vld [vmem:[#allocation9_spill] sm:$0xff] }
 0x662   : > { %29390 = vmatprep.subr.mxu0 %v29307_v5  ;;  %v42981_v54 = vadd.f32 %v42980_v53, %v42907_v27  ;;  %v48105_v22 = vpop.f32.mrb[33].mxu1  ;;  %v55398_v5 = vld [vmem:[#allocation4_spill] sm:$0xff] }
 0x663   : > { %v30152_v17 = vsel %vm30150_vm15, %v55398_v5, %v55397_v12  ;;  %vm55427_vm15 = vcmask 138240  }
 0x664   : > { %v30159_v53 = vsel %vm225_vm2, %v30152_v17, 0 }
 0x665   : > { %v43054_v31 = vpop.f32.mrb[34].mxu1  ;;  %v54297_v22 = vand.u32 4294901760, %v30159_v53 }
 0x666   : > { %v43055_v48 = vadd.f32 %v43054_v31, %v42981_v54  ;;  %v48110_v41 = vpop.f32.mrb[35].mxu1 }
 0x667   : > { %v55400_v41 = vld [vmem:[#allocation119_spill] sm:$0xff] }
 0x668   : > { %29382 = vmatmul.mubr.f32.vlgmr.msra.gmra.mrb[0].mxu0 %v55396_v37 }
 0x669   : > { %29393 = vmatpush1.msra.mxu0 %v29313_v13  ;;  %v43128_v39 = vpop.f32.mrb[36].mxu1  ;;  %29456 = vmatprep.mubr.f32.mxu0 %v54942_v52 }
 0x66a   : > { %29466 = vmatprep.subr.mxu0 %v54265_v28  ;;  %v43129_v1 = vadd.f32 %v43128_v39, %v43055_v48  ;;  %v48115_v61 = vpop.f32.mrb[37].mxu1  ;;  %v30242_v39 = vsub.f32 %v30159_v53, %v54297_v22 }
 0x66c   : > { %v30243_v17 = vand.u32 4294901760, %v30242_v39 }
 0x66d   : > { %v43200_v57 = vpop.f32.mrb[38].mxu1 }
 0x66e   : > { %v43201_v7 = vadd.f32 %v43200_v57, %v43129_v1  ;;  %v48120_v47 = vpop.f32.mrb[39].mxu1  ;;  %v55401_v1 = vld [vmem:[#allocation12_spill] sm:$0xff] }
 0x66f   : > { %v30157_v61 = vsel %vm225_vm2, %v55401_v1, 0 }
 0x670   : > { %v43206_v27 = vadd.f32 %v43201_v7, %v42270_v4  ;;  %29459 = vmatmul.mubr.f32.vlgmr.msra.gmra.mrb[0].mxu0 %v55399_v29  ;;  %v54305_v7 = vand.u32 4294901760, %v30157_v61 }
 0x671   : > { %29468 = vmatpush1.msra.mxu0 %v54275_v24  ;;  %29531 = vmatprep.mubr.f32.mxu0 %v54942_v52  ;;  %v43766_v13 = vpop.f32.mrb[40].mxu1 }
 0x672   : > { %29544 = vmatprep.subr.mxu0 %v29308_v38  ;;  %v48125_v56 = vpop.f32.mrb[41].mxu1 }
 0x675   : > { %v43842_v54 = vpop.f32.mrb[42].mxu1 }
 0x676   : > { %v43843_v31 = vadd.f32 %v43842_v54, %v43766_v13  ;;  %v48130_v48 = vpop.f32.mrb[43].mxu1 }
 0x678   : > { %29535 = vmatmul.mubr.f32.vlgmr.msra.gmra.mrb[0].mxu0 %v55400_v41 }
 0x679   : > { %29548 = vmatpush1.msra.mxu0 %v29314_v14  ;;  %29611 = vmatprep.mubr.f32.mxu0 %v54942_v52  ;;  %v43916_v4 = vpop.f32.mrb[44].mxu1  ;;  %v30248_v14 = vsub.f32 %v30157_v61, %v54305_v7 }
 0x67a   : > { %29620 = vmatprep.subr.mxu0 %v54265_v28  ;;  %v43917_v38 = vadd.f32 %v43916_v4, %v43843_v31  ;;  %v48135_v57 = vpop.f32.mrb[45].mxu1  ;;  %v30244_v28 = vsub.f32 %v30242_v39, %v30243_v17 }
 0x67b   : > { %v30249_v53 = vand.u32 4294901760, %v30248_v14 }
 0x67c   : > { %v30245_v48 = vand.u32 4294901760, %v30244_v28 }
 0x67d   : > { %v43990_v47 = vpop.f32.mrb[46].mxu1 }
 0x67e   : > { %v43991_v12 = vadd.f32 %v43990_v47, %v43917_v38  ;;  %v48140_v5 = vpop.f32.mrb[47].mxu1 }
 0x67f   : > { %v55402_v5 = vld [vmem:[#allocation122_spill] sm:$0xff] }
 0x680   : > { %29613 = vmatmul.mubr.f32.vlgmr.msra.gmra.mrb[0].mxu0 %v55396_v37 }
 0x681   : > { %29622 = vmatpush1.msra.mxu0 %v54275_v24  ;;  %v44064_v29 = vpop.f32.mrb[48].mxu1  ;;  %29685 = vmatprep.mubr.f32.mxu0 %v54942_v52  ;;  %v30250_v24 = vsub.f32 %v30248_v14, %v30249_v53 }
 0x682   : > { %v44065_v13 = vadd.f32 %v44064_v29, %v43991_v12  ;;  %v48145_v56 = vpop.f32.mrb[49].mxu1  ;;  %30164 = vmatprep.subr.mxu0 %v54297_v22 }
 0x683   : > { %v30251_v38 = vand.u32 4294901760, %v30250_v24 }
 0x685   : > { %v44136_v54 = vpop.f32.mrb[50].mxu1 }
 0x686   : > { %v44137_v31 = vadd.f32 %v44136_v54, %v44065_v13  ;;  %v48150_v41 = vpop.f32.mrb[51].mxu1  ;;  %v55403_v54 = vld [vmem:[#allocation44_spill] sm:$0xff] }
 0x688   : > { %v44142_v4 = vadd.f32 %v44137_v31, %v43206_v27  ;;  %29687 = vmatmul.mubr.f32.vlgmr.msra.gmra.mrb[0].mxu0 %v55396_v37 }
 0x689   : > { %30166 = vmatpush1.msra.mxu0 %v54305_v7  ;;  %30229 = vmatprep.mubr.f32.mxu0 %v54942_v52  ;;  %v44702_v1 = vpop.f32.mrb[52].mxu1 }
 0x68a   : > { %30246 = vmatprep.subr.mxu0 %v30245_v48  ;;  %v48155_v61 = vpop.f32.mrb[53].mxu1 }
 0x68d   : > { %v44778_v57 = vpop.f32.mrb[54].mxu1 }
 0x68e   : > { %v44779_v47 = vadd.f32 %v44778_v57, %v44702_v1  ;;  %v48160_v12 = vpop.f32.mrb[55].mxu1 }
 0x68f   : > { %v55406_v12 = vld [vmem:[#allocation120_spill] sm:$0xff] }
 0x690   : > { %30235 = vmatmul.mubr.f32.vlgmr.msra.gmra.mrb[0].mxu0 %v55402_v5 }
 0x691   : > { %30252 = vmatpush1.msra.mxu0 %v30251_v38  ;;  %30315 = vmatprep.mubr.f32.mxu0 %v54942_v52  ;;  %v44852_v27 = vpop.f32.mrb[56].mxu1  ;;  %v55404_v38 = vld [vmem:[#allocation11_spill] sm:$0xff] }
 0x692   : > { %30325 = vmatprep.subr.mxu0 %v30242_v39  ;;  %v44853_v37 = vadd.f32 %v44852_v27, %v44779_v47  ;;  %v48165_v29 = vpop.f32.mrb[57].mxu1  ;;  %v55405_v39 = vld [vmem:[#allocation16_spill] sm:$0xff] }
 0x693   : > { %v31089_v57 = vsel %vm31087_vm5, %v55405_v39, %v55404_v38  ;;  %vm55435_vm5 = vcmask 130048  }
 0x694   : > { %v31095_v27 = vsel %vm225_vm2, %v31089_v57, 0 }
 0x695   : > { %v44926_v13 = vpop.f32.mrb[58].mxu1  ;;  %v31099_v29 = vand.u32 4294901760, %v31095_v27 }
 0x696   : > { %v44927_v56 = vadd.f32 %v44926_v13, %v44853_v37  ;;  %v48170_v28 = vpop.f32.mrb[59].mxu1 }
 0x697   : > { %v55407_v28 = vld [vmem:[#allocation121_spill] sm:$0xff] }
 0x698   : > { %30317 = vmatmul.mubr.f32.vlgmr.msra.gmra.mrb[0].mxu0 %v55403_v54 }
 0x699   : > { %30328 = vmatpush1.msra.mxu0 %v30248_v14  ;;  %v45000_v31 = vpop.f32.mrb[60].mxu1  ;;  %30391 = vmatprep.mubr.f32.mxu0 %v54942_v52 }
 0x69a   : > { %30401 = vmatprep.subr.mxu0 %v54297_v22  ;;  %v45001_v48 = vadd.f32 %v45000_v31, %v44927_v56  ;;  %v48175_v41 = vpop.f32.mrb[61].mxu1  ;;  %v31178_v31 = vsub.f32 %v31095_v27, %v31099_v29 }
 0x69c   : > { %v31179_v57 = vand.u32 4294901760, %v31178_v31 }
 0x69d   : > { %v45072_v24 = vpop.f32.mrb[62].mxu1 }
 0x69e   : > { %v45073_v1 = vadd.f32 %v45072_v24, %v45001_v48  ;;  %v48180_v61 = vpop.f32.mrb[63].mxu1  ;;  %v55408_v48 = vld [vmem:[#allocation14_spill] sm:$0xff]  ;;  %v31180_v27 = vsub.f32 %v31178_v31, %v31179_v57 }
 0x69f   : > { %v31093_v41 = vsel %vm225_vm2, %v55408_v48, 0 }
 0x6a0   : > { %v45078_v47 = vadd.f32 %v45073_v1, %v44142_v4  ;;  %30394 = vmatmul.mubr.f32.vlgmr.msra.gmra.mrb[0].mxu0 %v55406_v12  ;;  %v31101_v1 = vand.u32 4294901760, %v31093_v41 }
 0x6a1   : > { %30403 = vmatpush1.msra.mxu0 %v54305_v7  ;;  %30466 = vmatprep.mubr.f32.mxu0 %v54942_v52  ;;  %v45638_v14 = vpop.f32.mrb[64].mxu1 }
 0x6a2   : > { %30479 = vmatprep.subr.mxu0 %v30243_v17  ;;  %v48185_v5 = vpop.f32.mrb[65].mxu1  ;;  %v31184_v12 = vsub.f32 %v31093_v41, %v31101_v1  ;;  %v55409_v41 = vld [vmem:[#allocation47_spill] sm:$0xff] }
 0x6a5   : > { %v45714_v37 = vpop.f32.mrb[66].mxu1 }
 0x6a6   : > { %v45715_v13 = vadd.f32 %v45714_v37, %v45638_v14  ;;  %v48190_v56 = vpop.f32.mrb[67].mxu1 }
 0x6a7   : > { %v31181_v56 = vand.u32 4294901760, %v31180_v27 }
 0x6a8   : > { %30470 = vmatmul.mubr.f32.vlgmr.msra.gmra.mrb[0].mxu0 %v55407_v28 }
 0x6a9   : > { %30483 = vmatpush1.msra.mxu0 %v30249_v53  ;;  %30546 = vmatprep.mubr.f32.mxu0 %v54942_v52  ;;  %v45788_v4 = vpop.f32.mrb[68].mxu1 }
 0x6aa   : > { %30555 = vmatprep.subr.mxu0 %v54297_v22  ;;  %v45789_v17 = vadd.f32 %v45788_v4, %v45715_v13  ;;  %v48195_v24 = vpop.f32.mrb[69].mxu1  ;;  %v31185_v22 = vand.u32 4294901760, %v31184_v12 }
 0x6ad   : > { %v45862_v61 = vpop.f32.mrb[70].mxu1 }
 0x6ae   : > { %v45863_v38 = vadd.f32 %v45862_v61, %v45789_v17  ;;  %v48200_v39 = vpop.f32.mrb[71].mxu1  ;;  %v55410_v17 = vld [vmem:[#allocation22_spill] sm:$0xff]  ;;  %v55413_v61 = vld [vmem:[#allocation123_spill] sm:$0xff] }
 0x6b0   : > { %30548 = vmatmul.mubr.f32.vlgmr.msra.gmra.mrb[0].mxu0 %v55403_v54 }
 0x6b1   : > { %30557 = vmatpush1.msra.mxu0 %v54305_v7  ;;  %v45936_v53 = vpop.f32.mrb[72].mxu1  ;;  %30620 = vmatprep.mubr.f32.mxu0 %v54942_v52  ;;  %v31186_v7 = vsub.f32 %v31184_v12, %v31185_v22 }
 0x6b2   : > { %v45937_v14 = vadd.f32 %v45936_v53, %v45863_v38  ;;  %v48205_v5 = vpop.f32.mrb[73].mxu1  ;;  %31100 = vmatprep.subr.mxu0 %v31099_v29  ;;  %v55415_v53 = vld [vmem:[#allocation24_spill] sm:$0xff] }
 0x6b3   : > { %v31187_v48 = vand.u32 4294901760, %v31186_v7  ;;  %v55418_v7 = vld [vmem:[#allocation103_spill] sm:$0xff] }
 0x6b5   : > { %v46008_v37 = vpop.f32.mrb[74].mxu1 }
 0x6b6   : > { %v46009_v13 = vadd.f32 %v46008_v37, %v45937_v14  ;;  %v48210_v28 = vpop.f32.mrb[75].mxu1  ;;  %v32029_v14 = vsel %vm225_vm2, %v55415_v53, 0 }
 0x6b7   : > { %v32037_v5 = vand.u32 4294901760, %v32029_v14  ;;  %v55416_v28 = vld [vmem:[#allocation15_spill] sm:$0xff] }
 0x6b8   : > { %v54335_v4 = vadd.f32 %v46009_v13, %v45078_v47  ;;  %30622 = vmatmul.mubr.f32.vlgmr.msra.gmra.mrb[0].mxu0 %v55403_v54  ;;  %v55411_v47 = vld [vmem:[#allocation36_spill] sm:$0xff]  ;;  %v55412_v54 = vld [vmem:[#allocation18_spill] sm:$0xff] }
 0x6b9   : > { %31102 = vmatpush1.msra.mxu0 %v31101_v1  ;;  %31165 = vmatprep.mubr.f32.mxu0 %v54942_v52  ;;  %v32025_v24 = vsel %vm32023_vm11, %v55412_v54, %v55411_v47  ;;  %v32120_v37 = vsub.f32 %v32029_v14, %v32037_v5  ;;  %vm55450_vm11 = vcmask 97280  }
 0x6ba   : > { %31182 = vmatprep.subr.mxu0 %v31181_v56  ;;  %v32031_v38 = vsel %vm225_vm2, %v32025_v24, 0  ;;  %v55421_v24 = vld [vmem:[#allocation49_spill] sm:$0xff] }
 0x6bb   : > { %v32035_v39 = vand.u32 4294901760, %v32031_v38  ;;  %v32121_v13 = vand.u32 4294901760, %v32120_v37 }
 0x6c0   : > { %31171 = vmatmul.mubr.f32.vlgmr.msra.gmra.mrb[0].mxu0 %v55409_v41 }
 0x6c1   : > { %31188 = vmatpush1.msra.mxu0 %v31187_v48  ;;  %31251 = vmatprep.mubr.f32.mxu0 %v54942_v52  ;;  %v55419_v48 = vld [vmem:[#allocation28_spill] sm:$0xff] }
 0x6c2   : > { %31261 = vmatprep.subr.mxu0 %v31178_v31  ;;  %v55414_v31 = vld [vmem:[#allocation38_spill] sm:$0xff]  ;;  %v32961_v41 = vsel %vm32959_vm14, %v55419_v48, %v55418_v7 }
 0x6c3   : > { %v32967_v47 = vsel %vm225_vm2, %v32961_v41, 0  ;;  %v55429_v41 = vld [vmem:[#allocation125_spill] sm:$0xff] }
 0x6c4   : > { %v32971_v54 = vand.u32 4294901760, %v32967_v47 }
 0x6c8   : > { %31253 = vmatmul.mubr.f32.vlgmr.msra.gmra.mrb[0].mxu0 %v55410_v17 }
 0x6c9   : > { %31264 = vmatpush1.msra.mxu0 %v31184_v12  ;;  %31327 = vmatprep.mubr.f32.mxu0 %v54942_v52  ;;  %v32114_v12 = vsub.f32 %v32031_v38, %v32035_v39  ;;  %v55422_v38 = vld [vmem:[#allocation13_spill] sm:$0xff] }
 0x6ca   : > { %31337 = vmatprep.subr.mxu0 %v31099_v29 }
 0x6cb   : > { %v32115_v27 = vand.u32 4294901760, %v32114_v12 }
 0x6d0   : > { %31330 = vmatmul.mubr.f32.vlgmr.msra.gmra.mrb[0].mxu0 %v55413_v61  ;;  %v33050_v61 = vsub.f32 %v32967_v47, %v32971_v54  ;;  %v55430_v47 = vld [vmem:[#allocation34_spill] sm:$0xff] }
 0x6d1   : > { %31339 = vmatpush1.msra.mxu0 %v31101_v1  ;;  %31402 = vmatprep.mubr.f32.mxu0 %v54942_v52 }
 0x6d2   : > { %31415 = vmatprep.subr.mxu0 %v31179_v57  ;;  %v32116_v57 = vsub.f32 %v32114_v12, %v32115_v27  ;;  %v33051_v53 = vand.u32 4294901760, %v33050_v61 }
 0x6d4   : > { %v32117_v56 = vand.u32 4294901760, %v32116_v57 }
 0x6d8   : > { %31406 = vmatmul.mubr.f32.vlgmr.msra.gmra.mrb[0].mxu0 %v55414_v31  ;;  %v32965_v31 = vsel %vm225_vm2, %v55422_v38, 0 }
 0x6d9   : > { %31419 = vmatpush1.msra.mxu0 %v31185_v22  ;;  %31482 = vmatprep.mubr.f32.mxu0 %v54942_v52  ;;  %v32122_v22 = vsub.f32 %v32120_v37, %v32121_v13 }
 0x6da   : > { %31491 = vmatprep.subr.mxu0 %v31099_v29 }
 0x6db   : > { %v32123_v29 = vand.u32 4294901760, %v32122_v22  ;;  %v55425_v22 = vld [vmem:[#allocation106_spill] sm:$0xff] }
 0x6e0   : > { %31484 = vmatmul.mubr.f32.vlgmr.msra.gmra.mrb[0].mxu0 %v55410_v17 }
 0x6e1   : > { %31493 = vmatpush1.msra.mxu0 %v31101_v1  ;;  %31556 = vmatprep.mubr.f32.mxu0 %v54942_v52  ;;  %v55417_v1 = vld [vmem:[#allocation46_spill] sm:$0xff] }
 0x6e2   : > { %32036 = vmatprep.subr.mxu0 %v32035_v39 }
 0x6e8   : > { %31558 = vmatmul.mubr.f32.vlgmr.msra.gmra.mrb[0].mxu0 %v55410_v17  ;;  %v55420_v17 = vld [vmem:[#allocation19_spill] sm:$0xff] }
 0x6e9   : > { %32038 = vmatpush1.msra.mxu0 %v32037_v5  ;;  %32101 = vmatprep.mubr.f32.mxu0 %v54942_v52 }
 0x6ea   : > { %32118 = vmatprep.subr.mxu0 %v32117_v56  ;;  %v55423_v56 = vld [vmem:[#allocation51_spill] sm:$0xff] }
 0x6f0   : > { %32107 = vmatmul.mubr.f32.vlgmr.msra.gmra.mrb[0].mxu0 %v55416_v28 }
 0x6f1   : > { %32124 = vmatpush1.msra.mxu0 %v32123_v29  ;;  %32187 = vmatprep.mubr.f32.mxu0 %v54942_v52  ;;  %v55426_v29 = vld [vmem:[#allocation17_spill] sm:$0xff] }
 0x6f2   : > { %32197 = vmatprep.subr.mxu0 %v32114_v12  ;;  %v32973_v12 = vand.u32 4294901760, %v32965_v31  ;;  %v33897_v28 = vsel %vm55427_vm15, %v55426_v29, %v55425_v22 }
 0x6f3   : > { %v33903_v7 = vsel %vm225_vm2, %v33897_v28, 0  ;;  %v55437_v28 = vld [vmem:[#allocation45_spill] sm:$0xff] }
 0x6f4   : > { %v33056_v14 = vsub.f32 %v32965_v31, %v32973_v12  ;;  %v33907_v48 = vand.u32 4294901760, %v33903_v7 }
 0x6f8   : > { %32189 = vmatmul.mubr.f32.vlgmr.msra.gmra.mrb[0].mxu0 %v55417_v1 }
 0x6f9   : > { %32200 = vmatpush1.msra.mxu0 %v32120_v37  ;;  %32263 = vmatprep.mubr.f32.mxu0 %v54942_v52  ;;  %v33057_v37 = vand.u32 4294901760, %v33056_v14 }
 0x6fa   : > { %32273 = vmatprep.subr.mxu0 %v32035_v39 }
 0x700   : > { %32266 = vmatmul.mubr.f32.vlgmr.msra.gmra.mrb[0].mxu0 %v55420_v17  ;;  %v33986_v17 = vsub.f32 %v33903_v7, %v33907_v48  ;;  %v55438_v7 = vld [vmem:[#allocation50_spill] sm:$0xff] }
 0x701   : > { %32275 = vmatpush1.msra.mxu0 %v32037_v5  ;;  %32338 = vmatprep.mubr.f32.mxu0 %v54942_v52 }
 0x702   : > { %32351 = vmatprep.subr.mxu0 %v32115_v27  ;;  %v33052_v27 = vsub.f32 %v33050_v61, %v33051_v53  ;;  %v33987_v38 = vand.u32 4294901760, %v33986_v17 }
 0x704   : > { %v33053_v57 = vand.u32 4294901760, %v33052_v27 }
 0x708   : > { %32342 = vmatmul.mubr.f32.vlgmr.msra.gmra.mrb[0].mxu0 %v55421_v24  ;;  %v33901_v24 = vsel %vm225_vm2, %v55430_v47, 0 }
 0x709   : > { %32355 = vmatpush1.msra.mxu0 %v32121_v13  ;;  %32418 = vmatprep.mubr.f32.mxu0 %v54942_v52  ;;  %v33058_v13 = vsub.f32 %v33056_v14, %v33057_v37 }
 0x70a   : > { %32427 = vmatprep.subr.mxu0 %v32035_v39 }
 0x70b   : > { %v33059_v39 = vand.u32 4294901760, %v33058_v13  ;;  %v55433_v13 = vld [vmem:[#allocation107_spill] sm:$0xff] }
 0x710   : > { %32420 = vmatmul.mubr.f32.vlgmr.msra.gmra.mrb[0].mxu0 %v55417_v1 }
 0x711   : > { %32429 = vmatpush1.msra.mxu0 %v32037_v5  ;;  %32492 = vmatprep.mubr.f32.mxu0 %v54942_v52  ;;  %v55424_v5 = vld [vmem:[#allocation21_spill] sm:$0xff] }
 0x712   : > { %32972 = vmatprep.subr.mxu0 %v32971_v54 }
 0x718   : > { %32494 = vmatmul.mubr.f32.vlgmr.msra.gmra.mrb[0].mxu0 %v55417_v1  ;;  %v55428_v1 = vld [vmem:[#allocation42_spill] sm:$0xff] }
 0x719   : > { %32974 = vmatpush1.msra.mxu0 %v32973_v12  ;;  %33037 = vmatprep.mubr.f32.mxu0 %v54942_v52 }
 0x71a   : > { %33054 = vmatprep.subr.mxu0 %v33053_v57  ;;  %v55431_v57 = vld [vmem:[#allocation126_spill] sm:$0xff] }
 0x720   : > { %33043 = vmatmul.mubr.f32.vlgmr.msra.gmra.mrb[0].mxu0 %v55423_v56 }
 0x721   : > { %33060 = vmatpush1.msra.mxu0 %v33059_v39  ;;  %33123 = vmatprep.mubr.f32.mxu0 %v54942_v52  ;;  %v55434_v39 = vld [vmem:[#allocation23_spill] sm:$0xff] }
 0x722   : > { %33133 = vmatprep.subr.mxu0 %v33050_v61  ;;  %v33909_v61 = vand.u32 4294901760, %v33901_v24  ;;  %v34833_v56 = vsel %vm55435_vm5, %v55434_v39, %v55433_v13 }
 0x723   : > { %v34839_v22 = vsel %vm225_vm2, %v34833_v56, 0 }
 0x724   : > { %v33992_v31 = vsub.f32 %v33901_v24, %v33909_v61  ;;  %v34843_v29 = vand.u32 4294901760, %v34839_v22 }
 0x728   : > { %33125 = vmatmul.mubr.f32.vlgmr.msra.gmra.mrb[0].mxu0 %v55424_v5 }
 0x729   : > { %33136 = vmatpush1.msra.mxu0 %v33056_v14  ;;  %33199 = vmatprep.mubr.f32.mxu0 %v54942_v52  ;;  %v33993_v14 = vand.u32 4294901760, %v33992_v31 }
 0x72a   : > { %33209 = vmatprep.subr.mxu0 %v32971_v54 }
 0x730   : > { %33202 = vmatmul.mubr.f32.vlgmr.msra.gmra.mrb[0].mxu0 %v55428_v1  ;;  %v34922_v1 = vsub.f32 %v34839_v22, %v34843_v29 }
 0x731   : > { %33211 = vmatpush1.msra.mxu0 %v32973_v12  ;;  %33274 = vmatprep.mubr.f32.mxu0 %v54942_v52 }
 0x732   : > { %33287 = vmatprep.subr.mxu0 %v33051_v53  ;;  %v33988_v53 = vsub.f32 %v33986_v17, %v33987_v38  ;;  %v34923_v47 = vand.u32 4294901760, %v34922_v1 }
 0x734   : > { %v33989_v27 = vand.u32 4294901760, %v33988_v53 }
 0x738   : > { %33278 = vmatmul.mubr.f32.vlgmr.msra.gmra.mrb[0].mxu0 %v55429_v41  ;;  %v34837_v41 = vsel %vm225_vm2, %v55438_v7, 0 }
 0x739   : > { %33291 = vmatpush1.msra.mxu0 %v33057_v37  ;;  %33354 = vmatprep.mubr.f32.mxu0 %v54942_v52  ;;  %v33994_v37 = vsub.f32 %v33992_v31, %v33993_v14 }
 0x73a   : > { %33363 = vmatprep.subr.mxu0 %v32971_v54 }
 0x73b   : > { %v33995_v54 = vand.u32 4294901760, %v33994_v37 }
 0x740   : > { %33356 = vmatmul.mubr.f32.vlgmr.msra.gmra.mrb[0].mxu0 %v55424_v5 }
 0x741   : > { %33365 = vmatpush1.msra.mxu0 %v32973_v12  ;;  %33428 = vmatprep.mubr.f32.mxu0 %v54942_v52  ;;  %v55432_v12 = vld [vmem:[#allocation55_spill] sm:$0xff] }
 0x742   : > { %33908 = vmatprep.subr.mxu0 %v33907_v48 }
 0x748   : > { %33430 = vmatmul.mubr.f32.vlgmr.msra.gmra.mrb[0].mxu0 %v55424_v5  ;;  %v55436_v5 = vld [vmem:[#allocation52_spill] sm:$0xff] }
 0x749   : > { %33910 = vmatpush1.msra.mxu0 %v33909_v61  ;;  %33973 = vmatprep.mubr.f32.mxu0 %v54942_v52 }
 0x74a   : > { %33990 = vmatprep.subr.mxu0 %v33989_v27  ;;  %v55440_v27 = vld [vmem:[#allocation27_spill] sm:$0xff] }
 0x750   : > { %33979 = vmatmul.mubr.f32.vlgmr.msra.gmra.mrb[0].mxu0 %v55431_v57 }
 0x751   : > { %33996 = vmatpush1.msra.mxu0 %v33995_v54  ;;  %34059 = vmatprep.mubr.f32.mxu0 %v54942_v52 }
 0x752   : > { %34069 = vmatprep.subr.mxu0 %v33986_v17  ;;  %v34845_v17 = vand.u32 4294901760, %v34837_v41 }
 0x754   : > { %v34928_v24 = vsub.f32 %v34837_v41, %v34845_v17 }
 0x758   : > { %34061 = vmatmul.mubr.f32.vlgmr.msra.gmra.mrb[0].mxu0 %v55432_v12 }
 0x759   : > { %34072 = vmatpush1.msra.mxu0 %v33992_v31  ;;  %34135 = vmatprep.mubr.f32.mxu0 %v54942_v52  ;;  %v34929_v31 = vand.u32 4294901760, %v34928_v24 }
 0x75a   : > { %34145 = vmatprep.subr.mxu0 %v33907_v48 }
 0x760   : > { %34138 = vmatmul.mubr.f32.vlgmr.msra.gmra.mrb[0].mxu0 %v55436_v5 }
 0x761   : > { %34147 = vmatpush1.msra.mxu0 %v33909_v61  ;;  %34210 = vmatprep.mubr.f32.mxu0 %v54942_v52 }
 0x762   : > { %34223 = vmatprep.subr.mxu0 %v33987_v38  ;;  %v34924_v38 = vsub.f32 %v34922_v1, %v34923_v47 }
 0x764   : > { %v34925_v53 = vand.u32 4294901760, %v34924_v38 }
 0x768   : > { %34214 = vmatmul.mubr.f32.vlgmr.msra.gmra.mrb[0].mxu0 %v55437_v28 }
 0x769   : > { %34227 = vmatpush1.msra.mxu0 %v33993_v14  ;;  %34290 = vmatprep.mubr.f32.mxu0 %v54942_v52  ;;  %v34930_v14 = vsub.f32 %v34928_v24, %v34929_v31 }
 0x76a   : > { %34299 = vmatprep.subr.mxu0 %v33907_v48 }
 0x76b   : > { %v34931_v48 = vand.u32 4294901760, %v34930_v14 }
 0x770   : > { %34292 = vmatmul.mubr.f32.vlgmr.msra.gmra.mrb[0].mxu0 %v55432_v12 }
 0x771   : > { %34301 = vmatpush1.msra.mxu0 %v33909_v61  ;;  %34364 = vmatprep.mubr.f32.mxu0 %v54942_v52  ;;  %v55439_v61 = vld [vmem:[#allocation114_spill] sm:$0xff] }
 0x772   : > { %34844 = vmatprep.subr.mxu0 %v34843_v29  ;;  %v35769_v37 = vsel %vm35767_vm7, %v55440_v27, %v55439_v61  ;;  %vm55445_vm7 = vcmask 105472  }
 0x778   : > { %34366 = vmatmul.mubr.f32.vlgmr.msra.gmra.mrb[0].mxu0 %v55432_v12  ;;  %v55441_v12 = vld [vmem:[#allocation60_spill] sm:$0xff] }
 0x779   : > { %34846 = vmatpush1.msra.mxu0 %v34845_v17  ;;  %34909 = vmatprep.mubr.f32.mxu0 %v54942_v52  ;;  %v35773_v13 = vsel %vm225_vm2, %v55441_v12, 0 }
 0x77a   : > { %34926 = vmatprep.subr.mxu0 %v34925_v53  ;;  %v35781_v39 = vand.u32 4294901760, %v35773_v13 }
 0x780   : > { %34915 = vmatmul.mubr.f32.vlgmr.msra.gmra.mrb[0].mxu0 %v53165_v0  ;;  %v35775_v0 = vsel %vm225_vm2, %v35769_v37, 0  ;;  %v55446_v37 = vld [vmem:[#allocation37_spill] sm:$0xff] }
 0x781   : > { %34932 = vmatpush1.msra.mxu0 %v34931_v48  ;;  %34995 = vmatprep.mubr.f32.mxu0 %v54942_v52  ;;  %v35779_v54 = vand.u32 4294901760, %v35775_v0 }
 0x782   : > { %35005 = vmatprep.subr.mxu0 %v34922_v1 }
 0x783   : > { %v35858_v57 = vsub.f32 %v35775_v0, %v35779_v54  ;;  %v37645_v0 = vsel %vm225_vm2, %v55446_v37, 0  ;;  %v55475_v37 = vld [vmem:[#allocation73_spill] sm:$0xff] }
 0x785   : > { %v35859_v56 = vand.u32 4294901760, %v35858_v57 }
 0x787   : > { %v35860_v5 = vsub.f32 %v35858_v57, %v35859_v56 }
 0x788   : > { %34997 = vmatmul.mubr.f32.vlgmr.msra.gmra.mrb[0].mxu0 %v53095_v55 }
 0x789   : > { %35008 = vmatpush1.msra.mxu0 %v34928_v24  ;;  %35071 = vmatprep.mubr.f32.mxu0 %v54942_v52 }
 0x78a   : > { %35081 = vmatprep.subr.mxu0 %v34843_v29 }
 0x790   : > { %35074 = vmatmul.mubr.f32.vlgmr.msra.gmra.mrb[0].mxu0 %v53112_v8  ;;  %v35864_v8 = vsub.f32 %v35773_v13, %v35781_v39 }
 0x791   : > { %35083 = vmatpush1.msra.mxu0 %v34845_v17  ;;  %35146 = vmatprep.mubr.f32.mxu0 %v54942_v52 }
 0x792   : > { %35159 = vmatprep.subr.mxu0 %v34923_v47  ;;  %v35865_v22 = vand.u32 4294901760, %v35864_v8 }
 0x794   : > { %v35866_v28 = vsub.f32 %v35864_v8, %v35865_v22 }
 0x798   : > { %35150 = vmatmul.mubr.f32.vlgmr.msra.gmra.mrb[0].mxu0 %v53130_v26  ;;  %v35861_v26 = vand.u32 4294901760, %v35860_v5 }
 0x799   : > { %35163 = vmatpush1.msra.mxu0 %v34929_v31  ;;  %35226 = vmatprep.mubr.f32.mxu0 %v54942_v52 }
 0x79a   : > { %35235 = vmatprep.subr.mxu0 %v34843_v29  ;;  %v35867_v29 = vand.u32 4294901760, %v35866_v28  ;;  %v55452_v28 = vld [vmem:[#allocation104_spill] sm:$0xff] }
 0x7a0   : > { %35228 = vmatmul.mubr.f32.vlgmr.msra.gmra.mrb[0].mxu0 %v53095_v55 }
 0x7a1   : > { %35237 = vmatpush1.msra.mxu0 %v34845_v17  ;;  %35300 = vmatprep.mubr.f32.mxu0 %v54942_v52  ;;  %v55443_v17 = vld [vmem:[#allocation33_spill] sm:$0xff] }
 0x7a2   : > { %35780 = vmatprep.subr.mxu0 %v35779_v54  ;;  %v36709_v47 = vsel %vm225_vm2, %v55443_v17, 0 }
 0x7a8   : > { %35302 = vmatmul.mubr.f32.vlgmr.msra.gmra.mrb[0].mxu0 %v53095_v55  ;;  %v55442_v55 = vld [vmem:[#allocation31_spill] sm:$0xff] }
 0x7a9   : > { %35782 = vmatpush1.msra.mxu0 %v35781_v39  ;;  %35845 = vmatprep.mubr.f32.mxu0 %v54942_v52  ;;  %v36705_v1 = vsel %vm36703_vm9, %v55442_v55, %v52390_v62  ;;  %v36717_v62 = vand.u32 4294901760, %v36709_v47  ;;  %v55453_v55 = vld [vmem:[#allocation40_spill] sm:$0xff] }
 0x7aa   : > { %35862 = vmatprep.subr.mxu0 %v35861_v26 }
 0x7b0   : > { %35851 = vmatmul.mubr.f32.vlgmr.msra.gmra.mrb[0].mxu0 %v53272_v18  ;;  %v36711_v18 = vsel %vm225_vm2, %v36705_v1, 0  ;;  %v38581_v1 = vsel %vm225_vm2, %v55453_v55, 0 }
 0x7b1   : > { %35868 = vmatpush1.msra.mxu0 %v35867_v29  ;;  %35931 = vmatprep.mubr.f32.mxu0 %v54942_v52  ;;  %v36715_v7 = vand.u32 4294901760, %v36711_v18 }
 0x7b2   : > { %35941 = vmatprep.subr.mxu0 %v35858_v57 }
 0x7b3   : > { %v36794_v41 = vsub.f32 %v36711_v18, %v36715_v7  ;;  %v38589_v18 = vand.u32 4294901760, %v38581_v1 }
 0x7b5   : > { %v36795_v24 = vand.u32 4294901760, %v36794_v41 }
 0x7b7   : > { %v36796_v38 = vsub.f32 %v36794_v41, %v36795_v24 }
 0x7b8   : > { %35933 = vmatmul.mubr.f32.vlgmr.msra.gmra.mrb[0].mxu0 %v53204_v9 }
 0x7b9   : > { %35944 = vmatpush1.msra.mxu0 %v35864_v8  ;;  %36007 = vmatprep.mubr.f32.mxu0 %v54942_v52  ;;  %v55448_v8 = vld [vmem:[#allocation124_spill] sm:$0xff] }
 0x7ba   : > { %36017 = vmatprep.subr.mxu0 %v35779_v54 }
 0x7c0   : > { %36010 = vmatmul.mubr.f32.vlgmr.msra.gmra.mrb[0].mxu0 %v53217_v58  ;;  %v36800_v58 = vsub.f32 %v36709_v47, %v36717_v62 }
 0x7c1   : > { %36019 = vmatpush1.msra.mxu0 %v35781_v39  ;;  %36082 = vmatprep.mubr.f32.mxu0 %v54942_v52 }
 0x7c2   : > { %36095 = vmatprep.subr.mxu0 %v35859_v56  ;;  %v36801_v31 = vand.u32 4294901760, %v36800_v58  ;;  %v55447_v56 = vld [vmem:[#allocation48_spill] sm:$0xff] }
 0x7c4   : > { %v36802_v53 = vsub.f32 %v36800_v58, %v36801_v31 }
 0x7c6   : > { %v36803_v14 = vand.u32 4294901760, %v36802_v53  ;;  %v55463_v53 = vld [vmem:[#allocation65_spill] sm:$0xff] }
 0x7c8   : > { %36086 = vmatmul.mubr.f32.vlgmr.msra.gmra.mrb[0].mxu0 %v53235_v59  ;;  %v36797_v59 = vand.u32 4294901760, %v36796_v38  ;;  %v55456_v38 = vld [vmem:[#allocation82_spill] sm:$0xff] }
 0x7c9   : > { %36099 = vmatpush1.msra.mxu0 %v35865_v22  ;;  %36162 = vmatprep.mubr.f32.mxu0 %v54942_v52  ;;  %v55451_v22 = vld [vmem:[#allocation61_spill] sm:$0xff] }
 0x7ca   : > { %36171 = vmatprep.subr.mxu0 %v35779_v54 }
 0x7d0   : > { %36164 = vmatmul.mubr.f32.vlgmr.msra.gmra.mrb[0].mxu0 %v53204_v9 }
 0x7d1   : > { %36173 = vmatpush1.msra.mxu0 %v35781_v39  ;;  %36236 = vmatprep.mubr.f32.mxu0 %v54942_v52 }
 0x7d2   : > { %36716 = vmatprep.subr.mxu0 %v36715_v7 }
 0x7d8   : > { %36238 = vmatmul.mubr.f32.vlgmr.msra.gmra.mrb[0].mxu0 %v53204_v9  ;;  %v55444_v9 = vld [vmem:[#allocation115_spill] sm:$0xff] }
 0x7d9   : > { %36718 = vmatpush1.msra.mxu0 %v36717_v62  ;;  %36781 = vmatprep.mubr.f32.mxu0 %v54942_v52  ;;  %v37641_v48 = vsel %vm55445_vm7, %v55444_v9, %v52572_v51  ;;  %v37653_v51 = vand.u32 4294901760, %v37645_v0  ;;  %v55466_v9 = vld [vmem:[#allocation84_spill] sm:$0xff] }
 0x7da   : > { %36798 = vmatprep.subr.mxu0 %v36797_v59  ;;  %v55459_v59 = vld [vmem:[#allocation56_spill] sm:$0xff] }
 0x7e0   : > { %36787 = vmatmul.mubr.f32.vlgmr.msra.gmra.mrb[0].mxu0 %v53357_v35  ;;  %v37647_v35 = vsel %vm225_vm2, %v37641_v48, 0  ;;  %v55467_v48 = vld [vmem:[#allocation66_spill] sm:$0xff] }
 0x7e1   : > { %36804 = vmatpush1.msra.mxu0 %v36803_v14  ;;  %36867 = vmatprep.mubr.f32.mxu0 %v54942_v52  ;;  %v37651_v61 = vand.u32 4294901760, %v37647_v35  ;;  %v55465_v14 = vld [vmem:[#allocation70_spill] sm:$0xff] }
 0x7e2   : > { %36877 = vmatprep.subr.mxu0 %v36794_v41  ;;  %v38672_v41 = vsub.f32 %v38581_v1, %v38589_v18 }
 0x7e3   : > { %v37730_v27 = vsub.f32 %v37647_v35, %v37651_v61  ;;  %v55471_v35 = vld [vmem:[#allocation72_spill] sm:$0xff] }
 0x7e4   : > { %v38673_v47 = vand.u32 4294901760, %v38672_v41 }
 0x7e5   : > { %v37731_v54 = vand.u32 4294901760, %v37730_v27 }
 0x7e7   : > { %v37732_v57 = vsub.f32 %v37730_v27, %v37731_v54 }
 0x7e8   : > { %36869 = vmatmul.mubr.f32.vlgmr.msra.gmra.mrb[0].mxu0 %v53295_v11 }
 0x7e9   : > { %36880 = vmatpush1.msra.mxu0 %v36800_v58  ;;  %36943 = vmatprep.mubr.f32.mxu0 %v54942_v52 }
 0x7ea   : > { %36953 = vmatprep.subr.mxu0 %v36715_v7 }
 0x7f0   : > { %36946 = vmatmul.mubr.f32.vlgmr.msra.gmra.mrb[0].mxu0 %v53306_v10  ;;  %v37736_v10 = vsub.f32 %v37645_v0, %v37653_v51 }
 0x7f1   : > { %36955 = vmatpush1.msra.mxu0 %v36717_v62  ;;  %37018 = vmatprep.mubr.f32.mxu0 %v54942_v52 }
 0x7f2   : > { %37031 = vmatprep.subr.mxu0 %v36795_v24  ;;  %v37737_v12 = vand.u32 4294901760, %v37736_v10  ;;  %v38674_v24 = vsub.f32 %v38672_v41, %v38673_v47 }
 0x7f4   : > { %v37738_v13 = vsub.f32 %v37736_v10, %v37737_v12  ;;  %v38675_v58 = vand.u32 4294901760, %v38674_v24  ;;  %v55484_v24 = vld [vmem:[#allocation81_spill] sm:$0xff] }
 0x7f6   : > { %v37739_v39 = vand.u32 4294901760, %v37738_v13 }
 0x7f8   : > { %37022 = vmatmul.mubr.f32.vlgmr.msra.gmra.mrb[0].mxu0 %v53322_v45  ;;  %v37733_v45 = vand.u32 4294901760, %v37732_v57  ;;  %v55479_v57 = vld [vmem:[#allocation25_spill] sm:$0xff] }
 0x7f9   : > { %37035 = vmatpush1.msra.mxu0 %v36801_v31  ;;  %37098 = vmatprep.mubr.f32.mxu0 %v54942_v52  ;;  %v55458_v31 = vld [vmem:[#allocation77_spill] sm:$0xff] }
 0x7fa   : > { %37107 = vmatprep.subr.mxu0 %v36715_v7 }
 0x800   : > { %37100 = vmatmul.mubr.f32.vlgmr.msra.gmra.mrb[0].mxu0 %v53295_v11 }
 0x801   : > { %37109 = vmatpush1.msra.mxu0 %v36717_v62  ;;  %37172 = vmatprep.mubr.f32.mxu0 %v54942_v52 }
 0x802   : > { %37652 = vmatprep.subr.mxu0 %v37651_v61 }
 0x808   : > { %37174 = vmatmul.mubr.f32.vlgmr.msra.gmra.mrb[0].mxu0 %v53295_v11  ;;  %v55449_v11 = vld [vmem:[#allocation26_spill] sm:$0xff] }
 0x809   : > { %37654 = vmatpush1.msra.mxu0 %v37653_v51  ;;  %37717 = vmatprep.mubr.f32.mxu0 %v54942_v52  ;;  %v38577_v5 = vsel %vm55450_vm11, %v55449_v11, %v55448_v8 }
 0x80a   : > { %37734 = vmatprep.subr.mxu0 %v37733_v45 }
 0x810   : > { %37723 = vmatmul.mubr.f32.vlgmr.msra.gmra.mrb[0].mxu0 %v53461_v50  ;;  %v38583_v50 = vsel %vm225_vm2, %v38577_v5, 0  ;;  %v55480_v5 = vld [vmem:[#allocation68_spill] sm:$0xff] }
 0x811   : > { %37740 = vmatpush1.msra.mxu0 %v37739_v39  ;;  %37803 = vmatprep.mubr.f32.mxu0 %v54942_v52  ;;  %v38587_v26 = vand.u32 4294901760, %v38583_v50 }
 0x812   : > { %37813 = vmatprep.subr.mxu0 %v37730_v27  ;;  %v55474_v27 = vld [vmem:[#allocation91_spill] sm:$0xff] }
 0x813   : > { %v38666_v29 = vsub.f32 %v38583_v50, %v38587_v26  ;;  %v55482_v50 = vld [vmem:[#allocation29_spill] sm:$0xff] }
 0x815   : > { %v38667_v7 = vand.u32 4294901760, %v38666_v29 }
 0x817   : > { %v38668_v17 = vsub.f32 %v38666_v29, %v38667_v7 }
 0x818   : > { %37805 = vmatmul.mubr.f32.vlgmr.msra.gmra.mrb[0].mxu0 %v55447_v56 }
 0x819   : > { %37816 = vmatpush1.msra.mxu0 %v37736_v10  ;;  %37879 = vmatprep.mubr.f32.mxu0 %v54942_v52  ;;  %v38669_v62 = vand.u32 4294901760, %v38668_v17 }
 0x81a   : > { %37889 = vmatprep.subr.mxu0 %v37651_v61 }
 0x820   : > { %37882 = vmatmul.mubr.f32.vlgmr.msra.gmra.mrb[0].mxu0 %v55451_v22 }
 0x821   : > { %37891 = vmatpush1.msra.mxu0 %v37653_v51  ;;  %37954 = vmatprep.mubr.f32.mxu0 %v54942_v52 }
 0x822   : > { %37967 = vmatprep.subr.mxu0 %v37731_v54  ;;  %v55478_v54 = vld [vmem:[#allocation75_spill] sm:$0xff] }
 0x828   : > { %37958 = vmatmul.mubr.f32.vlgmr.msra.gmra.mrb[0].mxu0 %v55452_v28  ;;  %v55483_v28 = vld [vmem:[#allocation59_spill] sm:$0xff] }
 0x829   : > { %37971 = vmatpush1.msra.mxu0 %v37737_v12  ;;  %38034 = vmatprep.mubr.f32.mxu0 %v54942_v52 }
 0x82a   : > { %38043 = vmatprep.subr.mxu0 %v37651_v61  ;;  %v55473_v61 = vld [vmem:[#allocation80_spill] sm:$0xff] }
 0x830   : > { %38036 = vmatmul.mubr.f32.vlgmr.msra.gmra.mrb[0].mxu0 %v55447_v56 }
 0x831   : > { %38045 = vmatpush1.msra.mxu0 %v37653_v51  ;;  %38108 = vmatprep.mubr.f32.mxu0 %v54942_v52 }
 0x832   : > { %38588 = vmatprep.subr.mxu0 %v38587_v26 }
 0x838   : > { %38110 = vmatmul.mubr.f32.vlgmr.msra.gmra.mrb[0].mxu0 %v55447_v56 }
 0x839   : > { %38590 = vmatpush1.msra.mxu0 %v38589_v18  ;;  %38653 = vmatprep.mubr.f32.mxu0 %v54942_v52 }
 0x83a   : > { %38670 = vmatprep.subr.mxu0 %v38669_v62 }
 0x840   : > { %38659 = vmatmul.mubr.f32.vlgmr.msra.gmra.mrb[0].mxu0 %v53542_v2  ;;  %v55454_v2 = vld [vmem:[#allocation74_spill] sm:$0xff] }
 0x841   : > { %38676 = vmatpush1.msra.mxu0 %v38675_v58  ;;  %38739 = vmatprep.mubr.f32.mxu0 %v54942_v52  ;;  %v55485_v58 = vld [vmem:[#allocation71_spill] sm:$0xff] }
 0x842   : > { %38749 = vmatprep.subr.mxu0 %v38666_v29  ;;  %v43223_v29 = vsel %vm225_vm2, %v55483_v28, 0 }
 0x843   : > { %v43231_v55 = vand.u32 4294901760, %v43223_v29 }
 0x848   : > { %38741 = vmatmul.mubr.f32.vlgmr.msra.gmra.mrb[0].mxu0 %v53480_v16 }
 0x849   : > { %38752 = vmatpush1.msra.mxu0 %v38672_v41  ;;  %38815 = vmatprep.mubr.f32.mxu0 %v54942_v52 }
 0x84a   : > { %38825 = vmatprep.subr.mxu0 %v38587_v26 }
 0x850   : > { %38818 = vmatmul.mubr.f32.vlgmr.msra.gmra.mrb[0].mxu0 %v53491_v40  ;;  %v55455_v40 = vld [vmem:[#allocation53_spill] sm:$0xff] }
 0x851   : > { %38827 = vmatpush1.msra.mxu0 %v38589_v18  ;;  %38890 = vmatprep.mubr.f32.mxu0 %v54942_v52 }
 0x852   : > { %38903 = vmatprep.subr.mxu0 %v38667_v7 }
 0x858   : > { %38894 = vmatmul.mubr.f32.vlgmr.msra.gmra.mrb[0].mxu0 %v53507_v30  ;;  %v55457_v30 = vld [vmem:[#allocation62_spill] sm:$0xff] }
 0x859   : > { %38907 = vmatpush1.msra.mxu0 %v38673_v47  ;;  %38970 = vmatprep.mubr.f32.mxu0 %v54942_v52 }
 0x85a   : > { %38979 = vmatprep.subr.mxu0 %v38587_v26 }
 0x860   : > { %38972 = vmatmul.mubr.f32.vlgmr.msra.gmra.mrb[0].mxu0 %v53480_v16 }
 0x861   : > { %38981 = vmatpush1.msra.mxu0 %v38589_v18  ;;  %39044 = vmatprep.mubr.f32.mxu0 %v54942_v52  ;;  %v43314_v18 = vsub.f32 %v43223_v29, %v43231_v55 }
 0x862   : > { %39512 = vmatprep.subr.mxu0 %v55454_v2 }
 0x863   : > { %v43315_v41 = vand.u32 4294901760, %v43314_v18 }
 0x865   : > { %v43316_v47 = vsub.f32 %v43314_v18, %v43315_v41 }
 0x867   : > { %v43317_v62 = vand.u32 4294901760, %v43316_v47 }
 0x868   : > { %39046 = vmatmul.mubr.f32.vlgmr.msra.gmra.mrb[0].mxu0 %v53480_v16  ;;  %v55460_v16 = vld [vmem:[#allocation78_spill] sm:$0xff] }
 0x869   : > { %39514 = vmatpush1.msra.mxu0 %v55455_v40  ;;  %39577 = vmatprep.mubr.f32.mxu0 %v54942_v52 }
 0x86a   : > { %39594 = vmatprep.subr.mxu0 %v55456_v38 }
 0x870   : > { %39583 = vmatmul.mubr.f32.vlgmr.msra.gmra.mrb[0].mxu0 %v53646_v3  ;;  %v55461_v3 = vld [vmem:[#allocation58_spill] sm:$0xff] }
 0x871   : > { %39600 = vmatpush1.msra.mxu0 %v55457_v30  ;;  %39663 = vmatprep.mubr.f32.mxu0 %v54942_v52  ;;  %v55488_v30 = vld [vmem:[#allocation57_spill] sm:$0xff] }
 0x872   : > { %39673 = vmatprep.subr.mxu0 %v55458_v31 }
 0x878   : > { %39665 = vmatmul.mubr.f32.vlgmr.msra.gmra.mrb[0].mxu0 %v53582_v19 }
 0x879   : > { %39676 = vmatpush1.msra.mxu0 %v55459_v59  ;;  %39739 = vmatprep.mubr.f32.mxu0 %v54942_v52  ;;  %v55489_v59 = vld [vmem:[#allocation64_spill] sm:$0xff] }
 0x87a   : > { %39749 = vmatprep.subr.mxu0 %v55454_v2 }
 0x880   : > { %39742 = vmatmul.mubr.f32.vlgmr.msra.gmra.mrb[0].mxu0 %v53595_v49  ;;  %v55462_v49 = vld [vmem:[#allocation83_spill] sm:$0xff] }
 0x881   : > { %39751 = vmatpush1.msra.mxu0 %v55455_v40  ;;  %39814 = vmatprep.mubr.f32.mxu0 %v54942_v52 }
 0x882   : > { %39827 = vmatprep.subr.mxu0 %v55460_v16  ;;  %v44159_v16 = vsel %vm225_vm2, %v55489_v59, 0 }
 0x888   : > { %39818 = vmatmul.mubr.f32.vlgmr.msra.gmra.mrb[0].mxu0 %v53613_v25  ;;  %v55464_v25 = vld [vmem:[#allocation88_spill] sm:$0xff] }
 0x889   : > { %39831 = vmatpush1.msra.mxu0 %v55461_v3  ;;  %39894 = vmatprep.mubr.f32.mxu0 %v54942_v52  ;;  %v44167_v3 = vand.u32 4294901760, %v44159_v16 }
 0x88a   : > { %39903 = vmatprep.subr.mxu0 %v55454_v2  ;;  %v55486_v2 = vld [vmem:[#allocation69_spill] sm:$0xff] }
 0x890   : > { %39896 = vmatmul.mubr.f32.vlgmr.msra.gmra.mrb[0].mxu0 %v53582_v19 }
 0x891   : > { %39905 = vmatpush1.msra.mxu0 %v55455_v40  ;;  %39968 = vmatprep.mubr.f32.mxu0 %v54942_v52 }
 0x892   : > { %40435 = vmatprep.subr.mxu0 %v55462_v49 }
 0x898   : > { %39970 = vmatmul.mubr.f32.vlgmr.msra.gmra.mrb[0].mxu0 %v53582_v19  ;;  %v55468_v19 = vld [vmem:[#allocation85_spill] sm:$0xff] }
 0x899   : > { %40437 = vmatpush1.msra.mxu0 %v55463_v53  ;;  %40500 = vmatprep.mubr.f32.mxu0 %v54942_v52 }
 0x89a   : > { %40517 = vmatprep.subr.mxu0 %v55464_v25 }
 0x8a0   : > { %40506 = vmatmul.mubr.f32.vlgmr.msra.gmra.mrb[0].mxu0 %v53719_v63  ;;  %v55469_v63 = vld [vmem:[#allocation67_spill] sm:$0xff] }
 0x8a1   : > { %40523 = vmatpush1.msra.mxu0 %v55465_v14  ;;  %40586 = vmatprep.mubr.f32.mxu0 %v54942_v52 }
 0x8a2   : > { %40596 = vmatprep.subr.mxu0 %v55466_v9 }
 0x8a8   : > { %40588 = vmatmul.mubr.f32.vlgmr.msra.gmra.mrb[0].mxu0 %v53665_v46 }
 0x8a9   : > { %40599 = vmatpush1.msra.mxu0 %v55467_v48  ;;  %40662 = vmatprep.mubr.f32.mxu0 %v54942_v52 }
 0x8aa   : > { %40672 = vmatprep.subr.mxu0 %v55462_v49 }
 0x8b0   : > { %40665 = vmatmul.mubr.f32.vlgmr.msra.gmra.mrb[0].mxu0 %v53676_v43  ;;  %v55470_v43 = vld [vmem:[#allocation89_spill] sm:$0xff] }
 0x8b1   : > { %40674 = vmatpush1.msra.mxu0 %v55463_v53  ;;  %40737 = vmatprep.mubr.f32.mxu0 %v54942_v52 }
 0x8b2   : > { %40750 = vmatprep.subr.mxu0 %v55468_v19 }
 0x8b8   : > { %40741 = vmatmul.mubr.f32.vlgmr.msra.gmra.mrb[0].mxu0 %v53690_v23  ;;  %v55472_v23 = vld [vmem:[#allocation94_spill] sm:$0xff] }
 0x8b9   : > { %40754 = vmatpush1.msra.mxu0 %v55469_v63  ;;  %40817 = vmatprep.mubr.f32.mxu0 %v54942_v52  ;;  %v45084_v63 = vpop.permute.xlu0 %45083 }
 0x8ba   : > { %40826 = vmatprep.subr.mxu0 %v55462_v49 }
 0x8c0   : > { %40819 = vmatmul.mubr.f32.vlgmr.msra.gmra.mrb[0].mxu0 %v53665_v46 }
 0x8c1   : > { %40828 = vmatpush1.msra.mxu0 %v55463_v53  ;;  %40891 = vmatprep.mubr.f32.mxu0 %v54942_v52  ;;  %v44250_v53 = vsub.f32 %v44159_v16, %v44167_v3 }
 0x8c2   : > { %41358 = vmatprep.subr.mxu0 %v55470_v43 }
 0x8c3   : > { %v44251_v14 = vand.u32 4294901760, %v44250_v53 }
 0x8c5   : > { %v44252_v48 = vsub.f32 %v44250_v53, %v44251_v14 }
 0x8c7   : > { %v44253_v19 = vand.u32 4294901760, %v44252_v48 }
 0x8c8   : > { %40893 = vmatmul.mubr.f32.vlgmr.msra.gmra.mrb[0].mxu0 %v53665_v46  ;;  %v55476_v46 = vld [vmem:[#allocation92_spill] sm:$0xff] }
 0x8c9   : > { %41360 = vmatpush1.msra.mxu0 %v55471_v35  ;;  %41423 = vmatprep.mubr.f32.mxu0 %v54942_v52 }
 0x8ca   : > { %41440 = vmatprep.subr.mxu0 %v55472_v23 }
 0x8d0   : > { %41429 = vmatmul.mubr.f32.vlgmr.msra.gmra.mrb[0].mxu0 %v53816_v33  ;;  %v55477_v33 = vld [vmem:[#allocation105_spill] sm:$0xff] }
 0x8d1   : > { %41446 = vmatpush1.msra.mxu0 %v55473_v61  ;;  %41509 = vmatprep.mubr.f32.mxu0 %v54942_v52  ;;  %v42289_v0 = vsel %vm225_vm2, %v55477_v33, 0  ;;  %v45082_v61 = vpop.permute.xlu0 %45081 }
 0x8d2   : > { %41519 = vmatprep.subr.mxu0 %v55474_v27  ;;  %v42293_v51 = vand.u32 4294901760, %v42289_v0  ;;  %v45090_v27 = vsel %vm45089_vm4, %v45082_v61, %v45084_v63 }
 0x8d4   : > { %v42372_v10 = vsub.f32 %v42289_v0, %v42293_v51 }
 0x8d6   : > { %v42373_v45 = vand.u32 4294901760, %v42372_v10 }
 0x8d8   : > { %41511 = vmatmul.mubr.f32.vlgmr.msra.gmra.mrb[0].mxu0 %v53752_v60 }
 0x8d9   : > { %41522 = vmatpush1.msra.mxu0 %v55475_v37  ;;  %41585 = vmatprep.mubr.f32.mxu0 %v54942_v52 }
 0x8da   : > { %41595 = vmatprep.subr.mxu0 %v55470_v43 }
 0x8e0   : > { %41588 = vmatmul.mubr.f32.vlgmr.msra.gmra.mrb[0].mxu0 %v53765_v32  ;;  %v42287_v32 = vsel %vm225_vm2, %v55479_v57, 0 }
 0x8e1   : > { %41597 = vmatpush1.msra.mxu0 %v55471_v35  ;;  %41660 = vmatprep.mubr.f32.mxu0 %v54942_v52  ;;  %v42295_v12 = vand.u32 4294901760, %v42287_v32 }
 0x8e2   : > { %41673 = vmatprep.subr.mxu0 %v55476_v46  ;;  %v45095_v46 = vsel %vm225_vm2, %v45090_v27, 0 }
 0x8e3   : > { %v42378_v13 = vsub.f32 %v42287_v32, %v42295_v12  ;;  %v55491_v32 = vld [vmem:[#allocation87_spill] sm:$0xff] }
 0x8e5   : > { %v42379_v39 = vand.u32 4294901760, %v42378_v13 }
 0x8e7   : > { %v42380_v8 = vsub.f32 %v42378_v13, %v42379_v39 }
 0x8e8   : > { %41664 = vmatmul.mubr.f32.vlgmr.msra.gmra.mrb[0].mxu0 %v53783_v44  ;;  %v42374_v44 = vsub.f32 %v42372_v10, %v42373_v45 }
 0x8e9   : > { %41677 = vmatpush1.msra.mxu0 %v55478_v54  ;;  %41740 = vmatprep.mubr.f32.mxu0 %v54942_v52  ;;  %v42381_v11 = vand.u32 4294901760, %v42380_v8 }
 0x8ea   : > { %41749 = vmatprep.subr.mxu0 %v55470_v43  ;;  %v42375_v56 = vand.u32 4294901760, %v42374_v44  ;;  %v55490_v43 = vld [vmem:[#allocation76_spill] sm:$0xff] }
 0x8f0   : > { %41742 = vmatmul.mubr.f32.vlgmr.msra.gmra.mrb[0].mxu0 %v53752_v60 }
 0x8f1   : > { %41751 = vmatpush1.msra.mxu0 %v55471_v35  ;;  %41814 = vmatprep.mubr.f32.mxu0 %v54942_v52  ;;  %v45091_v35 = vsel %vm45089_vm4, %v45084_v63, %v55490_v43 }
 0x8f2   : > { %42294 = vmatprep.subr.mxu0 %v42293_v51 }
 0x8f8   : > { %41816 = vmatmul.mubr.f32.vlgmr.msra.gmra.mrb[0].mxu0 %v53752_v60  ;;  %v55481_v60 = vld [vmem:[#allocation54_spill] sm:$0xff] }
 0x8f9   : > { %42296 = vmatpush1.msra.mxu0 %v42295_v12  ;;  %42359 = vmatprep.mubr.f32.mxu0 %v54942_v52  ;;  %v43225_v22 = vsel %vm225_vm2, %v55481_v60, 0 }
 0x8fa   : > { %42376 = vmatprep.subr.mxu0 %v42375_v56  ;;  %v46024_v56 = vld [vmem:[%s54650_s3] sm:$0x7] }
 0x900   : > { %42365 = vmatmul.mubr.f32.vlgmr.msra.gmra.mrb[0].mxu0 %v53889_v6  ;;  %v43229_v6 = vand.u32 4294901760, %v43225_v22 }
 0x901   : > { %42382 = vmatpush1.msra.mxu0 %v42381_v11  ;;  %42445 = vmatprep.mubr.f32.mxu0 %v54942_v52 }
 0x902   : > { %42455 = vmatprep.subr.mxu0 %v42372_v10  ;;  %v43308_v26 = vsub.f32 %v43225_v22, %v43229_v6 }
 0x904   : > { %v43309_v1 = vand.u32 4294901760, %v43308_v26 }
 0x906   : > { %v43310_v7 = vsub.f32 %v43308_v26, %v43309_v1 }
 0x908   : > { %42447 = vmatmul.mubr.f32.vlgmr.msra.gmra.mrb[0].mxu0 %v53835_v15  ;;  %v43311_v17 = vand.u32 4294901760, %v43310_v7 }
 0x909   : > { %42458 = vmatpush1.msra.mxu0 %v42378_v13  ;;  %42521 = vmatprep.mubr.f32.mxu0 %v54942_v52 }
 0x90a   : > { %42531 = vmatprep.subr.mxu0 %v42293_v51 }
 0x910   : > { %42524 = vmatmul.mubr.f32.vlgmr.msra.gmra.mrb[0].mxu0 %v55480_v5 }
 0x911   : > { %42533 = vmatpush1.msra.mxu0 %v42295_v12  ;;  %42596 = vmatprep.mubr.f32.mxu0 %v54942_v52 }
 0x912   : > { %42609 = vmatprep.subr.mxu0 %v42373_v45 }
 0x918   : > { %42600 = vmatmul.mubr.f32.vlgmr.msra.gmra.mrb[0].mxu0 %v55482_v50 }
 0x919   : > { %42613 = vmatpush1.msra.mxu0 %v42379_v39  ;;  %42676 = vmatprep.mubr.f32.mxu0 %v54942_v52  ;;  %v46019_v39 = vpop.permute.xlu0 %46018 }
 0x91a   : > { %42685 = vmatprep.subr.mxu0 %v42293_v51  ;;  %v46023_v5 = vadd.f32 %v46019_v39, %v54335_v4 }
 0x91c   : > { %v46050_v4 = vmul.f32 %v46023_v5, %v46023_v5 }
 0x920   : > { %42678 = vmatmul.mubr.f32.vlgmr.msra.gmra.mrb[0].mxu0 %v53835_v15 }
 0x921   : > { %42687 = vmatpush1.msra.mxu0 %v42295_v12  ;;  %42750 = vmatprep.mubr.f32.mxu0 %v54942_v52  ;;  %v55492_v12 = vld [vmem:[#allocation79_spill] sm:$0xff] }
 0x922   : > { %43230 = vmatprep.subr.mxu0 %v43229_v6 }
 0x928   : > { %42752 = vmatmul.mubr.f32.vlgmr.msra.gmra.mrb[0].mxu0 %v53835_v15  ;;  %v55487_v15 = vld [vmem:[#allocation63_spill] sm:$0xff] }
 0x929   : > { %43232 = vmatpush1.msra.mxu0 %v43231_v55  ;;  %43295 = vmatprep.mubr.f32.mxu0 %v54942_v52  ;;  %v44161_v40 = vsel %vm225_vm2, %v55487_v15, 0 }
 0x92a   : > { %43312 = vmatprep.subr.mxu0 %v43311_v17  ;;  %v44165_v38 = vand.u32 4294901760, %v44161_v40 }
 0x92c   : > { %v44244_v31 = vsub.f32 %v44161_v40, %v44165_v38 }
 0x92e   : > { %v44245_v49 = vand.u32 4294901760, %v44244_v31 }
 0x930   : > { %43301 = vmatmul.mubr.f32.vlgmr.msra.gmra.mrb[0].mxu0 %v55484_v24  ;;  %v44246_v25 = vsub.f32 %v44244_v31, %v44245_v49 }
 0x931   : > { %43318 = vmatpush1.msra.mxu0 %v43317_v62  ;;  %43381 = vmatprep.mubr.f32.mxu0 %v54942_v52 }
 0x932   : > { %43391 = vmatprep.subr.mxu0 %v43308_v26  ;;  %v44247_v9 = vand.u32 4294901760, %v44246_v25 }
 0x938   : > { %43383 = vmatmul.mubr.f32.vlgmr.msra.gmra.mrb[0].mxu0 %v55485_v58 }
 0x939   : > { %43394 = vmatpush1.msra.mxu0 %v43314_v18  ;;  %43457 = vmatprep.mubr.f32.mxu0 %v54942_v52 }
 0x93a   : > { %43467 = vmatprep.subr.mxu0 %v43229_v6 }
 0x940   : > { %43460 = vmatmul.mubr.f32.vlgmr.msra.gmra.mrb[0].mxu0 %v55486_v2 }
 0x941   : > { %43469 = vmatpush1.msra.mxu0 %v43231_v55  ;;  %43532 = vmatprep.mubr.f32.mxu0 %v54942_v52 }
 0x942   : > { %43545 = vmatprep.subr.mxu0 %v43309_v1 }
 0x948   : > { %43536 = vmatmul.mubr.f32.vlgmr.msra.gmra.mrb[0].mxu0 %v55488_v30 }
 0x949   : > { %43549 = vmatpush1.msra.mxu0 %v43315_v41  ;;  %43612 = vmatprep.mubr.f32.mxu0 %v54942_v52 }
 0x94a   : > { %43621 = vmatprep.subr.mxu0 %v43229_v6 }
 0x950   : > { %43614 = vmatmul.mubr.f32.vlgmr.msra.gmra.mrb[0].mxu0 %v55485_v58 }
 0x951   : > { %43623 = vmatpush1.msra.mxu0 %v43231_v55  ;;  %43686 = vmatprep.mubr.f32.mxu0 %v54942_v52 }
 0x952   : > { %44166 = vmatprep.subr.mxu0 %v44165_v38 }
 0x958   : > { %43688 = vmatmul.mubr.f32.vlgmr.msra.gmra.mrb[0].mxu0 %v55485_v58 }
 0x959   : > { %44168 = vmatpush1.msra.mxu0 %v44167_v3  ;;  %44231 = vmatprep.mubr.f32.mxu0 %v54942_v52 }
 0x95a   : > { %44248 = vmatprep.subr.mxu0 %v44247_v9 }
 0x960   : > { %44237 = vmatmul.mubr.f32.vlgmr.msra.gmra.mrb[0].mxu0 %v54059_v42  ;;  %v45097_v42 = vsel %vm225_vm2, %v45091_v35, 0 }
 0x961   : > { %44254 = vmatpush1.msra.mxu0 %v44253_v19  ;;  %44317 = vmatprep.mubr.f32.mxu0 %v54942_v52  ;;  %v45101_v23 = vand.u32 4294901760, %v45097_v42 }
 0x962   : > { %44327 = vmatprep.subr.mxu0 %v44244_v31 }
 0x963   : > { %v45180_v37 = vsub.f32 %v45097_v42, %v45101_v23 }
 0x965   : > { %v45181_v33 = vand.u32 4294901760, %v45180_v37 }
 0x967   : > { %v45182_v51 = vsub.f32 %v45180_v37, %v45181_v33 }
 0x968   : > { %44319 = vmatmul.mubr.f32.vlgmr.msra.gmra.mrb[0].mxu0 %v54003_v36 }
 0x969   : > { %44330 = vmatpush1.msra.mxu0 %v44250_v53  ;;  %44393 = vmatprep.mubr.f32.mxu0 %v54942_v52  ;;  %v45183_v10 = vand.u32 4294901760, %v45182_v51 }
 0x96a   : > { %44403 = vmatprep.subr.mxu0 %v44165_v38 }
 0x970   : > { %44396 = vmatmul.mubr.f32.vlgmr.msra.gmra.mrb[0].mxu0 %v54014_v34  ;;  %v45103_v34 = vand.u32 4294901760, %v45095_v46 }
 0x971   : > { %44405 = vmatpush1.msra.mxu0 %v44167_v3  ;;  %44468 = vmatprep.mubr.f32.mxu0 %v54942_v52 }
 0x972   : > { %44481 = vmatprep.subr.mxu0 %v44245_v49  ;;  %v45186_v0 = vsub.f32 %v45095_v46, %v45103_v34 }
 0x974   : > { %v45187_v54 = vand.u32 4294901760, %v45186_v0 }
 0x978   : > { %44472 = vmatmul.mubr.f32.vlgmr.msra.gmra.mrb[0].mxu0 %v54028_v21  ;;  %v45188_v21 = vsub.f32 %v45186_v0, %v45187_v54 }
 0x979   : > { %44485 = vmatpush1.msra.mxu0 %v44251_v14  ;;  %44548 = vmatprep.mubr.f32.mxu0 %v54942_v52 }
 0x97a   : > { %44557 = vmatprep.subr.mxu0 %v44165_v38  ;;  %v45189_v57 = vand.u32 4294901760, %v45188_v21 }
 0x980   : > { %44550 = vmatmul.mubr.f32.vlgmr.msra.gmra.mrb[0].mxu0 %v54003_v36 }
 0x981   : > { %44559 = vmatpush1.msra.mxu0 %v44167_v3  ;;  %44622 = vmatprep.mubr.f32.mxu0 %v54942_v52 }
 0x982   : > { %45102 = vmatprep.subr.mxu0 %v45101_v23 }
 0x988   : > { %44624 = vmatmul.mubr.f32.vlgmr.msra.gmra.mrb[0].mxu0 %v54003_v36  ;;  %v55493_v36 = vld [vmem:[#allocation108_spill] sm:$0xff] }
 0x989   : > { %45104 = vmatpush1.msra.mxu0 %v45103_v34  ;;  %45167 = vmatprep.mubr.f32.mxu0 %v54942_v52 }
 0x98a   : > { %45184 = vmatprep.subr.mxu0 %v45183_v10 }
 0x990   : > { %45173 = vmatmul.mubr.f32.vlgmr.msra.gmra.mrb[0].mxu0 %v54153_v20  ;;  %v46026_v20 = vlaneseq }
 0x991   : > { %45190 = vmatpush1.msra.mxu0 %v45189_v57  ;;  %45253 = vmatprep.mubr.f32.mxu0 %v54942_v52 }
 0x992   : > { %45263 = vmatprep.subr.mxu0 %v45180_v37  ;;  %v46027_v45 = vshrl.u32 %v46026_v20, 7  ;;  %v46059_v2 = vand.u32 127, %v46026_v20 }
 0x994   : > { %v46028_v13 = vsub.s32 0, %v46027_v45  ;;  %v46032_v44 = vsub.s32 1, %v46027_v45  ;;  %v46036_v8 = vsub.s32 2, %v46027_v45  ;;  %v46061_v15 = vadd.s32 256, %v46059_v2 }
 0x996   : > { %v46029_v11 = vrot.slane %v46024_v56, %v46028_v13  ;;  %v46033_v60 = vrot.slane %v46024_v56, %v46032_v44  ;;  %v46037_v26 = vrot.slane %v46024_v56, %v46036_v8  ;;  %vm46067_vm2 = vcmp.eq.s32.totalorder %v46061_v15, 383 }
 0x997   : > { %vm46064_vm14 = vcmp.eq.s32.totalorder %v46061_v15, 382 }
 0x998   : > { %45255 = vmatmul.mubr.f32.vlgmr.msra.gmra.mrb[0].mxu0 %v55491_v32  ;;  %v46043_v41 = vmul.f32 %v46037_v26, %v46023_v5  ;;  %v46053_v62 = vmul.f32 %v46050_v4, %v46037_v26 }
 0x999   : > { %45266 = vmatpush1.msra.mxu0 %v45186_v0  ;;  %45329 = vmatprep.mubr.f32.mxu0 %v54942_v52 }
 0x99a   : > { %45339 = vmatprep.subr.mxu0 %v45101_v23 }
 0x9a0   : > { %45332 = vmatmul.mubr.f32.vlgmr.msra.gmra.mrb[0].mxu0 %v55492_v12 }
 0x9a1   : > { %45341 = vmatpush1.msra.mxu0 %v45103_v34  ;;  %45404 = vmatprep.mubr.f32.mxu0 %v54942_v52 }
 0x9a2   : > { %45417 = vmatprep.subr.mxu0 %v45181_v33 }
 0x9a8   : > { %45408 = vmatmul.mubr.f32.vlgmr.msra.gmra.mrb[0].mxu0 %v55493_v36 }
 0x9a9   : > { %45421 = vmatpush1.msra.mxu0 %v45187_v54  ;;  %45484 = vmatprep.mubr.f32.mxu0 %v54942_v52 }
 0x9aa   : > { %45493 = vmatprep.subr.mxu0 %v45101_v23 }
 0x9b0   : > { %45486 = vmatmul.mubr.f32.vlgmr.msra.gmra.mrb[0].mxu0 %v55491_v32 }
 0x9b1   : > { %45495 = vmatpush1.msra.mxu0 %v45103_v34  ;;  %45558 = vmatprep.mubr.f32.mxu0 %v54942_v52 }
 0x9b8   : > { %45560 = vmatmul.mubr.f32.vlgmr.msra.gmra.mrb[0].mxu0 %v55491_v32 }
 0xa8b   : > { %v45561_v52 = vpop.f32.mrb[0].mxu0 }
 0xa8c   : > { %v46021_v22 = vadd.f32 %v46019_v39, %v45561_v52  ;;  %v45563_v6 = vpop.f32.mrb[1].mxu0 }
 0xa8d   : > { %v46022_v50 = vadd.f32 %v46019_v39, %v45563_v6 }
 0xa8e   : > { %v46041_v28 = vmul.f32 %v46029_v11, %v46021_v22  ;;  %v46048_v29 = vmul.f32 %v46021_v22, %v46021_v22  ;;  %46086 = vst [vmem:[%s54639_s6] sm:$0xff] %v46021_v22 }
 0xa8f   : > { %v46042_v55 = vmul.f32 %v46033_v60, %v46022_v50  ;;  %v46049_v1 = vmul.f32 %v46022_v50, %v46022_v50  ;;  %46087 = vst [vmem:[%s54639_s6 + $0x8] sm:$0xff] %v46022_v50 }
 0xa90   : > { %v46051_v18 = vmul.f32 %v46048_v29, %v46029_v11 }
 0xa91   : > { %v46052_v7 = vmul.f32 %v46049_v1, %v46033_v60  ;;  %v46044_v17 = vadd.f32 %v46042_v55, %v46041_v28 }
 0xa93   : > { %v46045_v47 = vadd.f32 %v46044_v17, %v46043_v41  ;;  %v46054_v24 = vadd.f32 %v46052_v7, %v46051_v18 }
 0xa95   : > { %46046 = vadd.xlane.f32.xlu0 %v46045_v47  ;;  %v46055_v58 = vadd.f32 %v46054_v24, %v46053_v62 }
 0xa97   : > { %46056 = vadd.xlane.f32.xlu1 %v46055_v58 }
 0xb22   : > { %v46047_v38 = vpop.xlane.xlu0 %46046 }
 0xb24   : > { %v46057_v40 = vpop.xlane.xlu1 %46056 }
 0xb25   : > { %v46076_v30 = vsel %vm46067_vm2, %v46057_v40, %v46023_v5 }
 0xb26   : > { %v46085_v31 = vsel %vm46064_vm14, %v46047_v38, %v46076_v30 }
 0xb27   : > { %46088 = vst [vmem:[%s54639_s6 + $0x10] sm:$0xff] %v46085_v31 }
 0xb28 PF: > { %s14_s15 = sadd.s32 1, %s48894_s15  }
 0xb29   : > { %p11_p4 = scmp.ge.s32.totalorder %s14_s15, 4  }
 0xb2b   :  { %13 = sbr.rel (!%p11_p4) target bundleno = 1 (0x1), region = 66 }

</bundles_post_ra>
